<compile_context>
chip_gen: v7x
topology: tpu7x:2x2x1
jax: 0.10.0
libtpu: 0.0.40
codegen_flags: <defaults>
</compile_context>

<pallas_src>
import jax
import jax.numpy as jnp
from jax.experimental import pallas as pl
from jax.experimental.pallas import tpu as pltpu


_LN_EPS = 1e-5   # nn.Transformer layer_norm_eps default


# --------------------------- shared forward math ----------------------------
# Pure jnp functions: used unchanged both inside the Pallas kernel (on values
# loaded from VMEM refs) and as the plain-JAX reference.

def _dot(x, w):
    return jnp.dot(x, w, preferred_element_type=jnp.float32)


def _layer_norm(x, g, b):
    # x: (N, D); g, b: (1, D)
    mu = jnp.mean(x, axis=-1, keepdims=True)
    xc = x - mu
    var = jnp.mean(xc * xc, axis=-1, keepdims=True)
    return xc * jax.lax.rsqrt(var + _LN_EPS) * g + b


def _softmax(s):
    s = s - jnp.max(s, axis=-1, keepdims=True)
    e = jnp.exp(s)
    return e / jnp.sum(e, axis=-1, keepdims=True)


def _mha_core(q, k, v, wo, bo, nhead):
    """Scaled-dot-product MHA core, no mask (nn.Transformer called w/o masks).

    q: (B, Tq, D), k/v: (B, Tk, D). The 1/sqrt(hd) scale is already folded
    into the Q projection at init. Heads are statically unrolled; each head's
    context is folded straight into the out-projection matmul (no lane concat).
    """
    B, Tq, D = q.shape
    hd = D // nhead
    out = jnp.zeros((B * Tq, D), jnp.float32)
    for h in range(nhead):                       # static unroll over heads
        sl = slice(h * hd, (h + 1) * hd)
        s = jnp.einsum("bqd,bkd->bqk", q[:, :, sl], k[:, :, sl],
                       preferred_element_type=jnp.float32)
        p = _softmax(s)
        oh = jnp.einsum("bqk,bkd->bqd", p, v[:, :, sl],
                        preferred_element_type=jnp.float32)
        out = out + _dot(oh.reshape(B * Tq, hd), wo[sl, :])
    return (out + bo).reshape(B, Tq, D)


def _self_attention(x, a, nhead):
    B, T, D = x.shape
    qkv = _dot(x.reshape(B * T, D), a["wqkv"]) + a["bqkv"]   # one fused matmul
    q = qkv[:, 0 * D:1 * D].reshape(B, T, D)
    k = qkv[:, 1 * D:2 * D].reshape(B, T, D)
    v = qkv[:, 2 * D:3 * D].reshape(B, T, D)
    return _mha_core(q, k, v, a["wo"], a["bo"], nhead)


def _cross_attention(y, mem, a, nhead):
    B, T, D = y.shape
    S = mem.shape[1]
    q = (_dot(y.reshape(B * T, D), a["wq"]) + a["bq"]).reshape(B, T, D)
    kv = _dot(mem.reshape(B * S, D), a["wkv"]) + a["bkv"]    # fused K,V matmul
    k = kv[:, 0 * D:1 * D].reshape(B, S, D)
    v = kv[:, 1 * D:2 * D].reshape(B, S, D)
    return _mha_core(q, k, v, a["wo"], a["bo"], nhead)


def _ffn(x2d, lp):
    h = jnp.maximum(_dot(x2d, lp["ff1"][0]) + lp["ff1"][1], 0.0)   # ReLU
    return _dot(h, lp["ff2"][0]) + lp["ff2"][1]


def _encoder_layer(x, lp, nhead):
    # Post-norm (norm_first=False); dropout == identity in eval mode.
    B, S, D = x.shape
    sa = _self_attention(x, lp["sa"], nhead)
    h = _layer_norm((x + sa).reshape(B * S, D), *lp["norm1"])
    h = _layer_norm(h + _ffn(h, lp), *lp["norm2"])
    return h.reshape(B, S, D)


def _decoder_layer(y, mem, lp, nhead):
    B, T, D = y.shape
    sa = _self_attention(y, lp["sa"], nhead)
    h = _layer_norm((y + sa).reshape(B * T, D), *lp["norm1"]).reshape(B, T, D)
    ca = _cross_attention(h, mem, lp["ca"], nhead)
    h2 = _layer_norm((h + ca).reshape(B * T, D), *lp["norm2"])
    h3 = _layer_norm(h2 + _ffn(h2, lp), *lp["norm3"])
    return h3.reshape(B, T, D)


def _forward_math(src, tgt, p, nhead):
    B, S, _ = src.shape
    T = tgt.shape[1]
    D = p["embed_in"][0].shape[1]
    out_size = p["embed_out"][0].shape[1]

    x = (_dot(src.reshape(B * S, -1), p["embed_in"][0])
         + p["embed_in"][1]).reshape(B, S, D)
    y = (_dot(tgt.reshape(B * T, -1), p["embed_tgt"][0])
         + p["embed_tgt"][1]).reshape(B, T, D)

    for lp in p["enc"]:
        x = _encoder_layer(x, lp, nhead)
    mem = _layer_norm(x.reshape(B * S, D), *p["enc_norm"]).reshape(B, S, D)

    for lp in p["dec"]:
        y = _decoder_layer(y, mem, lp, nhead)
    y2 = _layer_norm(y.reshape(B * T, D), *p["dec_norm"])

    out = _dot(y2, p["embed_out"][0]) + p["embed_out"][1]
    return out.reshape(B, T, out_size)


# ------------------------------ Pallas kernel --------------------------------

def _make_fused_kernel(treedef, nhead):
    def kernel(*refs):
        # refs = (src_ref, tgt_ref, *param_refs, out_ref); no scratch.
        src_ref, tgt_ref = refs[0], refs[1]
        out_ref = refs[-1]
        params = jax.tree_util.tree_unflatten(
            treedef, [r[...] for r in refs[2:-1]])
        out = _forward_math(src_ref[...], tgt_ref[...], params, nhead)
        out_ref[...] = out.astype(out_ref.dtype)
    return kernel


def transformer2_forward(src, tgt, params, num_heads):
    """src: (B, S, input_size), tgt: (B, T, output_size) -> (B, T, output_size)."""
    B, T = tgt.shape[0], tgt.shape[1]
    out_size = params["embed_out"][0].shape[1]
    flat, treedef = jax.tree_util.tree_flatten(params)
    vmem = pl.BlockSpec(memory_space=pltpu.MemorySpace.VMEM)
    return pl.pallas_call(
        _make_fused_kernel(treedef, num_heads),
        out_shape=jax.ShapeDtypeStruct((B, T, out_size), src.dtype),
        in_specs=[vmem] * (2 + len(flat)),
        out_specs=vmem,
    )(src, tgt, *flat)


# ------------------------------ parameter init -------------------------------

def init_transformer2_params(key, input_size, hidden_size, output_size,
                             num_layers, num_heads):
    D, F = hidden_size, hidden_size * 2
    hd = D // num_heads
    scale = 1.0 / (hd ** 0.5)        # folded into the Q projection at init
    key_box = [key]

    def nk():
        key_box[0], sub = jax.random.split(key_box[0])
        return sub

    def linear_p(fin, fout, s=0.1):
        # PyTorch Linear weight layout is (fout, fin); transpose once at init
        # so the kernel computes x @ W with no runtime transposes.
        w_pt = jax.random.normal(nk(), (fout, fin), jnp.float32) * s
        b = jax.random.normal(nk(), (1, fout), jnp.float32) * s
        return jnp.transpose(w_pt), b

    def norm_p():
        # nn.LayerNorm defaults: weight = 1, bias = 0
        return (jnp.ones((1, D), jnp.float32), jnp.zeros((1, D), jnp.float32))

    def self_attn_p():
        wq, bq = linear_p(D, D)
        wk, bk = linear_p(D, D)
        wv, bv = linear_p(D, D)
        wo, bo = linear_p(D, D)
        # Fuse Q/K/V into one (D, 3D) matmul; fold the attention scale into Q.
        wqkv = jnp.concatenate([wq * scale, wk, wv], axis=1)
        bqkv = jnp.concatenate([bq * scale, bk, bv], axis=1)
        return {"wqkv": wqkv, "bqkv": bqkv, "wo": wo, "bo": bo}

    def cross_attn_p():
        wq, bq = linear_p(D, D)
        wk, bk = linear_p(D, D)
        wv, bv = linear_p(D, D)
        wo, bo = linear_p(D, D)
        # Q comes from the decoder stream, K/V from encoder memory: fuse K/V.
        wkv = jnp.concatenate([wk, wv], axis=1)
        bkv = jnp.concatenate([bk, bv], axis=1)
        return {"wq": wq * scale, "bq": bq * scale,
                "wkv": wkv, "bkv": bkv, "wo": wo, "bo": bo}

    def enc_layer_p():
        return {"sa": self_attn_p(), "norm1": norm_p(),
                "ff1": linear_p(D, F), "ff2": linear_p(F, D),
                "norm2": norm_p()}

    def dec_layer_p():
        return {"sa": self_attn_p(), "norm1": norm_p(),
                "ca": cross_attn_p(), "norm2": norm_p(),
                "ff1": linear_p(D, F), "ff2": linear_p(F, D),
                "norm3": norm_p()}

    return {
        "embed_in": linear_p(input_size, D),
        "embed_tgt": linear_p(output_size, D),
        "enc": [enc_layer_p() for _ in range(num_layers)],
        "enc_norm": norm_p(),
        "dec": [dec_layer_p() for _ in range(num_layers)],
        "dec_norm": norm_p(),
        "embed_out": linear_p(D, output_size),
    }


# ----------------------------------- main ------------------------------------

if __name__ == "__main__":
    input_size, hidden_size, output_size = 16, 32, 8
    num_layers, num_heads = 2, 4
    batch, src_len, tgt_len = 2, 8, 8

    key = jax.random.PRNGKey(0)
    key, ks, kt = jax.random.split(key, 3)
    src = jax.random.normal(ks, (batch, src_len, input_size), jnp.float32)
    tgt = jax.random.normal(kt, (batch, tgt_len, output_size), jnp.float32)

    params = init_transformer2_params(key, input_size, hidden_size,
                                      output_size, num_layers, num_heads)

    out = transformer2_forward(src, tgt, params, num_heads)
    out = jax.block_until_ready(out)

    # Plain-JAX reference (same math, full f32 matmul precision).
    with jax.default_matmul_precision("float32"):
        ref = _forward_math(src, tgt, params, num_heads)
    ref = jax.block_until_ready(ref)

    assert out.shape == (batch, tgt_len, output_size)
    assert jnp.allclose(out, ref, atol=5e-4, rtol=5e-4), "mismatch vs reference"

    print("KERNEL_OK")
</pallas_src>

<mosaic_0001>
module attributes {stable_mosaic.version = 11 : i64} {
  func.func @kernel(%arg0: memref<2x8x16xf32, #tpu.memory_space<vmem>>, %arg1: memref<2x8x8xf32, #tpu.memory_space<vmem>>, %arg2: memref<1x64xf32, #tpu.memory_space<vmem>>, %arg3: memref<1x32xf32, #tpu.memory_space<vmem>>, %arg4: memref<1x32xf32, #tpu.memory_space<vmem>>, %arg5: memref<32x64xf32, #tpu.memory_space<vmem>>, %arg6: memref<32x32xf32, #tpu.memory_space<vmem>>, %arg7: memref<32x32xf32, #tpu.memory_space<vmem>>, %arg8: memref<32x64xf32, #tpu.memory_space<vmem>>, %arg9: memref<1x64xf32, #tpu.memory_space<vmem>>, %arg10: memref<64x32xf32, #tpu.memory_space<vmem>>, %arg11: memref<1x32xf32, #tpu.memory_space<vmem>>, %arg12: memref<1x32xf32, #tpu.memory_space<vmem>>, %arg13: memref<1x32xf32, #tpu.memory_space<vmem>>, %arg14: memref<1x32xf32, #tpu.memory_space<vmem>>, %arg15: memref<1x32xf32, #tpu.memory_space<vmem>>, %arg16: memref<1x32xf32, #tpu.memory_space<vmem>>, %arg17: memref<1x32xf32, #tpu.memory_space<vmem>>, %arg18: memref<1x32xf32, #tpu.memory_space<vmem>>, %arg19: memref<1x96xf32, #tpu.memory_space<vmem>>, %arg20: memref<32x32xf32, #tpu.memory_space<vmem>>, %arg21: memref<32x96xf32, #tpu.memory_space<vmem>>, %arg22: memref<1x64xf32, #tpu.memory_space<vmem>>, %arg23: memref<1x32xf32, #tpu.memory_space<vmem>>, %arg24: memref<1x32xf32, #tpu.memory_space<vmem>>, %arg25: memref<32x64xf32, #tpu.memory_space<vmem>>, %arg26: memref<32x32xf32, #tpu.memory_space<vmem>>, %arg27: memref<32x32xf32, #tpu.memory_space<vmem>>, %arg28: memref<32x64xf32, #tpu.memory_space<vmem>>, %arg29: memref<1x64xf32, #tpu.memory_space<vmem>>, %arg30: memref<64x32xf32, #tpu.memory_space<vmem>>, %arg31: memref<1x32xf32, #tpu.memory_space<vmem>>, %arg32: memref<1x32xf32, #tpu.memory_space<vmem>>, %arg33: memref<1x32xf32, #tpu.memory_space<vmem>>, %arg34: memref<1x32xf32, #tpu.memory_space<vmem>>, %arg35: memref<1x32xf32, #tpu.memory_space<vmem>>, %arg36: memref<1x32xf32, #tpu.memory_space<vmem>>, %arg37: memref<1x32xf32, #tpu.memory_space<vmem>>, %arg38: memref<1x32xf32, #tpu.memory_space<vmem>>, %arg39: memref<1x96xf32, #tpu.memory_space<vmem>>, %arg40: memref<32x32xf32, #tpu.memory_space<vmem>>, %arg41: memref<32x96xf32, #tpu.memory_space<vmem>>, %arg42: memref<1x32xf32, #tpu.memory_space<vmem>>, %arg43: memref<1x32xf32, #tpu.memory_space<vmem>>, %arg44: memref<16x32xf32, #tpu.memory_space<vmem>>, %arg45: memref<1x32xf32, #tpu.memory_space<vmem>>, %arg46: memref<32x8xf32, #tpu.memory_space<vmem>>, %arg47: memref<1x8xf32, #tpu.memory_space<vmem>>, %arg48: memref<8x32xf32, #tpu.memory_space<vmem>>, %arg49: memref<1x32xf32, #tpu.memory_space<vmem>>, %arg50: memref<32x64xf32, #tpu.memory_space<vmem>>, %arg51: memref<1x64xf32, #tpu.memory_space<vmem>>, %arg52: memref<64x32xf32, #tpu.memory_space<vmem>>, %arg53: memref<1x32xf32, #tpu.memory_space<vmem>>, %arg54: memref<1x32xf32, #tpu.memory_space<vmem>>, %arg55: memref<1x32xf32, #tpu.memory_space<vmem>>, %arg56: memref<1x32xf32, #tpu.memory_space<vmem>>, %arg57: memref<1x32xf32, #tpu.memory_space<vmem>>, %arg58: memref<1x32xf32, #tpu.memory_space<vmem>>, %arg59: memref<1x96xf32, #tpu.memory_space<vmem>>, %arg60: memref<32x32xf32, #tpu.memory_space<vmem>>, %arg61: memref<32x96xf32, #tpu.memory_space<vmem>>, %arg62: memref<32x64xf32, #tpu.memory_space<vmem>>, %arg63: memref<1x64xf32, #tpu.memory_space<vmem>>, %arg64: memref<64x32xf32, #tpu.memory_space<vmem>>, %arg65: memref<1x32xf32, #tpu.memory_space<vmem>>, %arg66: memref<1x32xf32, #tpu.memory_space<vmem>>, %arg67: memref<1x32xf32, #tpu.memory_space<vmem>>, %arg68: memref<1x32xf32, #tpu.memory_space<vmem>>, %arg69: memref<1x32xf32, #tpu.memory_space<vmem>>, %arg70: memref<1x32xf32, #tpu.memory_space<vmem>>, %arg71: memref<1x96xf32, #tpu.memory_space<vmem>>, %arg72: memref<32x32xf32, #tpu.memory_space<vmem>>, %arg73: memref<32x96xf32, #tpu.memory_space<vmem>>, %arg74: memref<1x32xf32, #tpu.memory_space<vmem>>, %arg75: memref<1x32xf32, #tpu.memory_space<vmem>>, %arg76: memref<2x8x8xf32, #tpu.memory_space<vmem>>) attributes {dimension_semantics = [], scalar_prefetch = 0 : i64, scratch_operands = 0 : i64, tpu.core_type = #tpu.core_type<tc>} {
    %c0 = arith.constant 0 : index
    %c0_0 = arith.constant 0 : index
    %0 = vector.load %arg2[%c0, %c0_0] : memref<1x64xf32, #tpu.memory_space<vmem>>, vector<1x64xf32>
    %c0_1 = arith.constant 0 : index
    %c0_2 = arith.constant 0 : index
    %1 = vector.load %arg3[%c0_1, %c0_2] : memref<1x32xf32, #tpu.memory_space<vmem>>, vector<1x32xf32>
    %c0_3 = arith.constant 0 : index
    %c0_4 = arith.constant 0 : index
    %2 = vector.load %arg4[%c0_3, %c0_4] : memref<1x32xf32, #tpu.memory_space<vmem>>, vector<1x32xf32>
    %c0_5 = arith.constant 0 : index
    %c0_6 = arith.constant 0 : index
    %3 = vector.load %arg5[%c0_5, %c0_6] : memref<32x64xf32, #tpu.memory_space<vmem>>, vector<32x64xf32>
    %c0_7 = arith.constant 0 : index
    %c0_8 = arith.constant 0 : index
    %4 = vector.load %arg6[%c0_7, %c0_8] : memref<32x32xf32, #tpu.memory_space<vmem>>, vector<32x32xf32>
    %c0_9 = arith.constant 0 : index
    %c0_10 = arith.constant 0 : index
    %5 = vector.load %arg7[%c0_9, %c0_10] : memref<32x32xf32, #tpu.memory_space<vmem>>, vector<32x32xf32>
    %c0_11 = arith.constant 0 : index
    %c0_12 = arith.constant 0 : index
    %6 = vector.load %arg8[%c0_11, %c0_12] : memref<32x64xf32, #tpu.memory_space<vmem>>, vector<32x64xf32>
    %c0_13 = arith.constant 0 : index
    %c0_14 = arith.constant 0 : index
    %7 = vector.load %arg9[%c0_13, %c0_14] : memref<1x64xf32, #tpu.memory_space<vmem>>, vector<1x64xf32>
    %c0_15 = arith.constant 0 : index
    %c0_16 = arith.constant 0 : index
    %8 = vector.load %arg10[%c0_15, %c0_16] : memref<64x32xf32, #tpu.memory_space<vmem>>, vector<64x32xf32>
    %c0_17 = arith.constant 0 : index
    %c0_18 = arith.constant 0 : index
    %9 = vector.load %arg11[%c0_17, %c0_18] : memref<1x32xf32, #tpu.memory_space<vmem>>, vector<1x32xf32>
    %c0_19 = arith.constant 0 : index
    %c0_20 = arith.constant 0 : index
    %10 = vector.load %arg12[%c0_19, %c0_20] : memref<1x32xf32, #tpu.memory_space<vmem>>, vector<1x32xf32>
    %c0_21 = arith.constant 0 : index
    %c0_22 = arith.constant 0 : index
    %11 = vector.load %arg13[%c0_21, %c0_22] : memref<1x32xf32, #tpu.memory_space<vmem>>, vector<1x32xf32>
    %c0_23 = arith.constant 0 : index
    %c0_24 = arith.constant 0 : index
    %12 = vector.load %arg14[%c0_23, %c0_24] : memref<1x32xf32, #tpu.memory_space<vmem>>, vector<1x32xf32>
    %c0_25 = arith.constant 0 : index
    %c0_26 = arith.constant 0 : index
    %13 = vector.load %arg15[%c0_25, %c0_26] : memref<1x32xf32, #tpu.memory_space<vmem>>, vector<1x32xf32>
    %c0_27 = arith.constant 0 : index
    %c0_28 = arith.constant 0 : index
    %14 = vector.load %arg16[%c0_27, %c0_28] : memref<1x32xf32, #tpu.memory_space<vmem>>, vector<1x32xf32>
    %c0_29 = arith.constant 0 : index
    %c0_30 = arith.constant 0 : index
    %15 = vector.load %arg17[%c0_29, %c0_30] : memref<1x32xf32, #tpu.memory_space<vmem>>, vector<1x32xf32>
    %c0_31 = arith.constant 0 : index
    %c0_32 = arith.constant 0 : index
    %16 = vector.load %arg18[%c0_31, %c0_32] : memref<1x32xf32, #tpu.memory_space<vmem>>, vector<1x32xf32>
    %c0_33 = arith.constant 0 : index
    %c0_34 = arith.constant 0 : index
    %17 = vector.load %arg19[%c0_33, %c0_34] : memref<1x96xf32, #tpu.memory_space<vmem>>, vector<1x96xf32>
    %c0_35 = arith.constant 0 : index
    %c0_36 = arith.constant 0 : index
    %18 = vector.load %arg20[%c0_35, %c0_36] : memref<32x32xf32, #tpu.memory_space<vmem>>, vector<32x32xf32>
    %c0_37 = arith.constant 0 : index
    %c0_38 = arith.constant 0 : index
    %19 = vector.load %arg21[%c0_37, %c0_38] : memref<32x96xf32, #tpu.memory_space<vmem>>, vector<32x96xf32>
    %c0_39 = arith.constant 0 : index
    %c0_40 = arith.constant 0 : index
    %20 = vector.load %arg22[%c0_39, %c0_40] : memref<1x64xf32, #tpu.memory_space<vmem>>, vector<1x64xf32>
    %c0_41 = arith.constant 0 : index
    %c0_42 = arith.constant 0 : index
    %21 = vector.load %arg23[%c0_41, %c0_42] : memref<1x32xf32, #tpu.memory_space<vmem>>, vector<1x32xf32>
    %c0_43 = arith.constant 0 : index
    %c0_44 = arith.constant 0 : index
    %22 = vector.load %arg24[%c0_43, %c0_44] : memref<1x32xf32, #tpu.memory_space<vmem>>, vector<1x32xf32>
    %c0_45 = arith.constant 0 : index
    %c0_46 = arith.constant 0 : index
    %23 = vector.load %arg25[%c0_45, %c0_46] : memref<32x64xf32, #tpu.memory_space<vmem>>, vector<32x64xf32>
    %c0_47 = arith.constant 0 : index
    %c0_48 = arith.constant 0 : index
    %24 = vector.load %arg26[%c0_47, %c0_48] : memref<32x32xf32, #tpu.memory_space<vmem>>, vector<32x32xf32>
    %c0_49 = arith.constant 0 : index
    %c0_50 = arith.constant 0 : index
    %25 = vector.load %arg27[%c0_49, %c0_50] : memref<32x32xf32, #tpu.memory_space<vmem>>, vector<32x32xf32>
    %c0_51 = arith.constant 0 : index
    %c0_52 = arith.constant 0 : index
    %26 = vector.load %arg28[%c0_51, %c0_52] : memref<32x64xf32, #tpu.memory_space<vmem>>, vector<32x64xf32>
    %c0_53 = arith.constant 0 : index
    %c0_54 = arith.constant 0 : index
    %27 = vector.load %arg29[%c0_53, %c0_54] : memref<1x64xf32, #tpu.memory_space<vmem>>, vector<1x64xf32>
    %c0_55 = arith.constant 0 : index
    %c0_56 = arith.constant 0 : index
    %28 = vector.load %arg30[%c0_55, %c0_56] : memref<64x32xf32, #tpu.memory_space<vmem>>, vector<64x32xf32>
    %c0_57 = arith.constant 0 : index
    %c0_58 = arith.constant 0 : index
    %29 = vector.load %arg31[%c0_57, %c0_58] : memref<1x32xf32, #tpu.memory_space<vmem>>, vector<1x32xf32>
    %c0_59 = arith.constant 0 : index
    %c0_60 = arith.constant 0 : index
    %30 = vector.load %arg32[%c0_59, %c0_60] : memref<1x32xf32, #tpu.memory_space<vmem>>, vector<1x32xf32>
    %c0_61 = arith.constant 0 : index
    %c0_62 = arith.constant 0 : index
    %31 = vector.load %arg33[%c0_61, %c0_62] : memref<1x32xf32, #tpu.memory_space<vmem>>, vector<1x32xf32>
    %c0_63 = arith.constant 0 : index
    %c0_64 = arith.constant 0 : index
    %32 = vector.load %arg34[%c0_63, %c0_64] : memref<1x32xf32, #tpu.memory_space<vmem>>, vector<1x32xf32>
    %c0_65 = arith.constant 0 : index
    %c0_66 = arith.constant 0 : index
    %33 = vector.load %arg35[%c0_65, %c0_66] : memref<1x32xf32, #tpu.memory_space<vmem>>, vector<1x32xf32>
    %c0_67 = arith.constant 0 : index
    %c0_68 = arith.constant 0 : index
    %34 = vector.load %arg36[%c0_67, %c0_68] : memref<1x32xf32, #tpu.memory_space<vmem>>, vector<1x32xf32>
    %c0_69 = arith.constant 0 : index
    %c0_70 = arith.constant 0 : index
    %35 = vector.load %arg37[%c0_69, %c0_70] : memref<1x32xf32, #tpu.memory_space<vmem>>, vector<1x32xf32>
    %c0_71 = arith.constant 0 : index
    %c0_72 = arith.constant 0 : index
    %36 = vector.load %arg38[%c0_71, %c0_72] : memref<1x32xf32, #tpu.memory_space<vmem>>, vector<1x32xf32>
    %c0_73 = arith.constant 0 : index
    %c0_74 = arith.constant 0 : index
    %37 = vector.load %arg39[%c0_73, %c0_74] : memref<1x96xf32, #tpu.memory_space<vmem>>, vector<1x96xf32>
    %c0_75 = arith.constant 0 : index
    %c0_76 = arith.constant 0 : index
    %38 = vector.load %arg40[%c0_75, %c0_76] : memref<32x32xf32, #tpu.memory_space<vmem>>, vector<32x32xf32>
    %c0_77 = arith.constant 0 : index
    %c0_78 = arith.constant 0 : index
    %39 = vector.load %arg41[%c0_77, %c0_78] : memref<32x96xf32, #tpu.memory_space<vmem>>, vector<32x96xf32>
    %c0_79 = arith.constant 0 : index
    %c0_80 = arith.constant 0 : index
    %40 = vector.load %arg42[%c0_79, %c0_80] : memref<1x32xf32, #tpu.memory_space<vmem>>, vector<1x32xf32>
    %c0_81 = arith.constant 0 : index
    %c0_82 = arith.constant 0 : index
    %41 = vector.load %arg43[%c0_81, %c0_82] : memref<1x32xf32, #tpu.memory_space<vmem>>, vector<1x32xf32>
    %c0_83 = arith.constant 0 : index
    %c0_84 = arith.constant 0 : index
    %42 = vector.load %arg44[%c0_83, %c0_84] : memref<16x32xf32, #tpu.memory_space<vmem>>, vector<16x32xf32>
    %c0_85 = arith.constant 0 : index
    %c0_86 = arith.constant 0 : index
    %43 = vector.load %arg45[%c0_85, %c0_86] : memref<1x32xf32, #tpu.memory_space<vmem>>, vector<1x32xf32>
    %c0_87 = arith.constant 0 : index
    %c0_88 = arith.constant 0 : index
    %44 = vector.load %arg46[%c0_87, %c0_88] : memref<32x8xf32, #tpu.memory_space<vmem>>, vector<32x8xf32>
    %c0_89 = arith.constant 0 : index
    %c0_90 = arith.constant 0 : index
    %45 = vector.load %arg47[%c0_89, %c0_90] : memref<1x8xf32, #tpu.memory_space<vmem>>, vector<1x8xf32>
    %c0_91 = arith.constant 0 : index
    %c0_92 = arith.constant 0 : index
    %46 = vector.load %arg48[%c0_91, %c0_92] : memref<8x32xf32, #tpu.memory_space<vmem>>, vector<8x32xf32>
    %c0_93 = arith.constant 0 : index
    %c0_94 = arith.constant 0 : index
    %47 = vector.load %arg49[%c0_93, %c0_94] : memref<1x32xf32, #tpu.memory_space<vmem>>, vector<1x32xf32>
    %c0_95 = arith.constant 0 : index
    %c0_96 = arith.constant 0 : index
    %48 = vector.load %arg50[%c0_95, %c0_96] : memref<32x64xf32, #tpu.memory_space<vmem>>, vector<32x64xf32>
    %c0_97 = arith.constant 0 : index
    %c0_98 = arith.constant 0 : index
    %49 = vector.load %arg51[%c0_97, %c0_98] : memref<1x64xf32, #tpu.memory_space<vmem>>, vector<1x64xf32>
    %c0_99 = arith.constant 0 : index
    %c0_100 = arith.constant 0 : index
    %50 = vector.load %arg52[%c0_99, %c0_100] : memref<64x32xf32, #tpu.memory_space<vmem>>, vector<64x32xf32>
    %c0_101 = arith.constant 0 : index
    %c0_102 = arith.constant 0 : index
    %51 = vector.load %arg53[%c0_101, %c0_102] : memref<1x32xf32, #tpu.memory_space<vmem>>, vector<1x32xf32>
    %c0_103 = arith.constant 0 : index
    %c0_104 = arith.constant 0 : index
    %52 = vector.load %arg54[%c0_103, %c0_104] : memref<1x32xf32, #tpu.memory_space<vmem>>, vector<1x32xf32>
    %c0_105 = arith.constant 0 : index
    %c0_106 = arith.constant 0 : index
    %53 = vector.load %arg55[%c0_105, %c0_106] : memref<1x32xf32, #tpu.memory_space<vmem>>, vector<1x32xf32>
    %c0_107 = arith.constant 0 : index
    %c0_108 = arith.constant 0 : index
    %54 = vector.load %arg56[%c0_107, %c0_108] : memref<1x32xf32, #tpu.memory_space<vmem>>, vector<1x32xf32>
    %c0_109 = arith.constant 0 : index
    %c0_110 = arith.constant 0 : index
    %55 = vector.load %arg57[%c0_109, %c0_110] : memref<1x32xf32, #tpu.memory_space<vmem>>, vector<1x32xf32>
    %c0_111 = arith.constant 0 : index
    %c0_112 = arith.constant 0 : index
    %56 = vector.load %arg58[%c0_111, %c0_112] : memref<1x32xf32, #tpu.memory_space<vmem>>, vector<1x32xf32>
    %c0_113 = arith.constant 0 : index
    %c0_114 = arith.constant 0 : index
    %57 = vector.load %arg59[%c0_113, %c0_114] : memref<1x96xf32, #tpu.memory_space<vmem>>, vector<1x96xf32>
    %c0_115 = arith.constant 0 : index
    %c0_116 = arith.constant 0 : index
    %58 = vector.load %arg60[%c0_115, %c0_116] : memref<32x32xf32, #tpu.memory_space<vmem>>, vector<32x32xf32>
    %c0_117 = arith.constant 0 : index
    %c0_118 = arith.constant 0 : index
    %59 = vector.load %arg61[%c0_117, %c0_118] : memref<32x96xf32, #tpu.memory_space<vmem>>, vector<32x96xf32>
    %c0_119 = arith.constant 0 : index
    %c0_120 = arith.constant 0 : index
    %60 = vector.load %arg62[%c0_119, %c0_120] : memref<32x64xf32, #tpu.memory_space<vmem>>, vector<32x64xf32>
    %c0_121 = arith.constant 0 : index
    %c0_122 = arith.constant 0 : index
    %61 = vector.load %arg63[%c0_121, %c0_122] : memref<1x64xf32, #tpu.memory_space<vmem>>, vector<1x64xf32>
    %c0_123 = arith.constant 0 : index
    %c0_124 = arith.constant 0 : index
    %62 = vector.load %arg64[%c0_123, %c0_124] : memref<64x32xf32, #tpu.memory_space<vmem>>, vector<64x32xf32>
    %c0_125 = arith.constant 0 : index
    %c0_126 = arith.constant 0 : index
    %63 = vector.load %arg65[%c0_125, %c0_126] : memref<1x32xf32, #tpu.memory_space<vmem>>, vector<1x32xf32>
    %c0_127 = arith.constant 0 : index
    %c0_128 = arith.constant 0 : index
    %64 = vector.load %arg66[%c0_127, %c0_128] : memref<1x32xf32, #tpu.memory_space<vmem>>, vector<1x32xf32>
    %c0_129 = arith.constant 0 : index
    %c0_130 = arith.constant 0 : index
    %65 = vector.load %arg67[%c0_129, %c0_130] : memref<1x32xf32, #tpu.memory_space<vmem>>, vector<1x32xf32>
    %c0_131 = arith.constant 0 : index
    %c0_132 = arith.constant 0 : index
    %66 = vector.load %arg68[%c0_131, %c0_132] : memref<1x32xf32, #tpu.memory_space<vmem>>, vector<1x32xf32>
    %c0_133 = arith.constant 0 : index
    %c0_134 = arith.constant 0 : index
    %67 = vector.load %arg69[%c0_133, %c0_134] : memref<1x32xf32, #tpu.memory_space<vmem>>, vector<1x32xf32>
    %c0_135 = arith.constant 0 : index
    %c0_136 = arith.constant 0 : index
    %68 = vector.load %arg70[%c0_135, %c0_136] : memref<1x32xf32, #tpu.memory_space<vmem>>, vector<1x32xf32>
    %c0_137 = arith.constant 0 : index
    %c0_138 = arith.constant 0 : index
    %69 = vector.load %arg71[%c0_137, %c0_138] : memref<1x96xf32, #tpu.memory_space<vmem>>, vector<1x96xf32>
    %c0_139 = arith.constant 0 : index
    %c0_140 = arith.constant 0 : index
    %70 = vector.load %arg72[%c0_139, %c0_140] : memref<32x32xf32, #tpu.memory_space<vmem>>, vector<32x32xf32>
    %c0_141 = arith.constant 0 : index
    %c0_142 = arith.constant 0 : index
    %71 = vector.load %arg73[%c0_141, %c0_142] : memref<32x96xf32, #tpu.memory_space<vmem>>, vector<32x96xf32>
    %c0_143 = arith.constant 0 : index
    %c0_144 = arith.constant 0 : index
    %72 = vector.load %arg74[%c0_143, %c0_144] : memref<1x32xf32, #tpu.memory_space<vmem>>, vector<1x32xf32>
    %c0_145 = arith.constant 0 : index
    %c0_146 = arith.constant 0 : index
    %73 = vector.load %arg75[%c0_145, %c0_146] : memref<1x32xf32, #tpu.memory_space<vmem>>, vector<1x32xf32>
    %c0_147 = arith.constant 0 : index
    %c0_148 = arith.constant 0 : index
    %c0_149 = arith.constant 0 : index
    %74 = vector.load %arg0[%c0_147, %c0_148, %c0_149] : memref<2x8x16xf32, #tpu.memory_space<vmem>>, vector<2x8x16xf32>
    %c0_150 = arith.constant 0 : index
    %c0_151 = arith.constant 0 : index
    %c0_152 = arith.constant 0 : index
    %75 = vector.load %arg1[%c0_150, %c0_151, %c0_152] : memref<2x8x8xf32, #tpu.memory_space<vmem>>, vector<2x8x8xf32>
    %76 = vector.shape_cast %74 : vector<2x8x16xf32> to vector<16x16xf32>
    %cst = arith.constant dense<0.000000e+00> : vector<16x32xf32>
    %77 = tpu.matmul %76, %42, %cst {dimension_numbers = #tpu.dot_dimension_numbers<[1], [0], [0], [1], [0, 0, 1, 1], [], []>} : vector<16x16xf32>, vector<16x32xf32>, vector<16x32xf32> -> vector<16x32xf32>
    %78 = vector.broadcast %43 : vector<1x32xf32> to vector<16x32xf32>
    %79 = arith.addf %77, %78 : vector<16x32xf32>
    %80 = vector.shape_cast %79 : vector<16x32xf32> to vector<2x8x32xf32>
    %81 = vector.shape_cast %75 : vector<2x8x8xf32> to vector<16x8xf32>
    %cst_153 = arith.constant dense<0.000000e+00> : vector<16x32xf32>
    %82 = tpu.matmul %81, %46, %cst_153 {dimension_numbers = #tpu.dot_dimension_numbers<[1], [0], [0], [1], [0, 0, 1, 1], [], []>} : vector<16x8xf32>, vector<8x32xf32>, vector<16x32xf32> -> vector<16x32xf32>
    %83 = vector.broadcast %47 : vector<1x32xf32> to vector<16x32xf32>
    %84 = arith.addf %82, %83 : vector<16x32xf32>
    %85 = vector.shape_cast %84 : vector<16x32xf32> to vector<2x8x32xf32>
    %86 = vector.shape_cast %80 : vector<2x8x32xf32> to vector<16x32xf32>
    %cst_154 = arith.constant dense<0.000000e+00> : vector<16x96xf32>
    %87 = tpu.matmul %86, %59, %cst_154 {dimension_numbers = #tpu.dot_dimension_numbers<[1], [0], [0], [1], [0, 0, 1, 1], [], []>} : vector<16x32xf32>, vector<32x96xf32>, vector<16x96xf32> -> vector<16x96xf32>
    %88 = vector.broadcast %57 : vector<1x96xf32> to vector<16x96xf32>
    %89 = arith.addf %87, %88 : vector<16x96xf32>
    %90 = vector.extract_strided_slice %89 {offsets = [0, 0], sizes = [16, 32], strides = [1, 1]} : vector<16x96xf32> to vector<16x32xf32>
    %91 = vector.shape_cast %90 : vector<16x32xf32> to vector<2x8x32xf32>
    %92 = vector.extract_strided_slice %89 {offsets = [0, 32], sizes = [16, 32], strides = [1, 1]} : vector<16x96xf32> to vector<16x32xf32>
    %93 = vector.shape_cast %92 : vector<16x32xf32> to vector<2x8x32xf32>
    %94 = vector.extract_strided_slice %89 {offsets = [0, 64], sizes = [16, 32], strides = [1, 1]} : vector<16x96xf32> to vector<16x32xf32>
    %95 = vector.shape_cast %94 : vector<16x32xf32> to vector<2x8x32xf32>
    %cst_155 = arith.constant 0.000000e+00 : f32
    %96 = vector.broadcast %cst_155 : f32 to vector<16x32xf32>
    %97 = vector.extract_strided_slice %91 {offsets = [0, 0, 0], sizes = [2, 8, 8], strides = [1, 1, 1]} : vector<2x8x32xf32> to vector<2x8x8xf32>
    %98 = vector.extract_strided_slice %93 {offsets = [0, 0, 0], sizes = [2, 8, 8], strides = [1, 1, 1]} : vector<2x8x32xf32> to vector<2x8x8xf32>
    "tpu.trace_start"() <{level = 10 : i32, message = "bqd,bkd->bqk"}> : () -> ()
    %cst_156 = arith.constant dense<0.000000e+00> : vector<2x8x8xf32>
    %99 = tpu.matmul %97, %98, %cst_156 {dimension_numbers = #tpu.dot_dimension_numbers<[2], [2], [1], [1], [0, 0, 0, 1, 1, 1], [0], [0]>} : vector<2x8x8xf32>, vector<2x8x8xf32>, vector<2x8x8xf32> -> vector<2x8x8xf32>
    "tpu.trace_stop"() : () -> ()
    %cst_157 = arith.constant dense<0xFF800000> : vector<2x8xf32>
    %100 = vector.multi_reduction <maximumf>, %99, %cst_157 [2] : vector<2x8x8xf32> to vector<2x8xf32>
    %101 = vector.shape_cast %100 : vector<2x8xf32> to vector<2x8x1xf32>
    %102 = vector.broadcast %101 : vector<2x8x1xf32> to vector<2x8x8xf32>
    %103 = arith.subf %99, %102 : vector<2x8x8xf32>
    %104 = math.exp %103 : vector<2x8x8xf32>
    %cst_158 = arith.constant dense<0.000000e+00> : vector<2x8xf32>
    %105 = vector.multi_reduction <add>, %104, %cst_158 [2] : vector<2x8x8xf32> to vector<2x8xf32>
    %106 = vector.shape_cast %105 : vector<2x8xf32> to vector<2x8x1xf32>
    %107 = vector.broadcast %106 : vector<2x8x1xf32> to vector<2x8x8xf32>
    %108 = arith.divf %104, %107 : vector<2x8x8xf32>
    %109 = vector.extract_strided_slice %95 {offsets = [0, 0, 0], sizes = [2, 8, 8], strides = [1, 1, 1]} : vector<2x8x32xf32> to vector<2x8x8xf32>
    "tpu.trace_start"() <{level = 10 : i32, message = "bqk,bkd->bqd"}> : () -> ()
    %cst_159 = arith.constant dense<0.000000e+00> : vector<2x8x8xf32>
    %110 = tpu.matmul %108, %109, %cst_159 {dimension_numbers = #tpu.dot_dimension_numbers<[2], [1], [1], [2], [0, 0, 0, 1, 1, 2], [0], [0]>} : vector<2x8x8xf32>, vector<2x8x8xf32>, vector<2x8x8xf32> -> vector<2x8x8xf32>
    "tpu.trace_stop"() : () -> ()
    %111 = vector.shape_cast %110 : vector<2x8x8xf32> to vector<16x8xf32>
    %112 = vector.extract_strided_slice %58 {offsets = [0, 0], sizes = [8, 32], strides = [1, 1]} : vector<32x32xf32> to vector<8x32xf32>
    %cst_160 = arith.constant dense<0.000000e+00> : vector<16x32xf32>
    %113 = tpu.matmul %111, %112, %cst_160 {dimension_numbers = #tpu.dot_dimension_numbers<[1], [0], [0], [1], [0, 0, 1, 1], [], []>} : vector<16x8xf32>, vector<8x32xf32>, vector<16x32xf32> -> vector<16x32xf32>
    %114 = arith.addf %96, %113 : vector<16x32xf32>
    %115 = vector.extract_strided_slice %91 {offsets = [0, 0, 8], sizes = [2, 8, 8], strides = [1, 1, 1]} : vector<2x8x32xf32> to vector<2x8x8xf32>
    %116 = vector.extract_strided_slice %93 {offsets = [0, 0, 8], sizes = [2, 8, 8], strides = [1, 1, 1]} : vector<2x8x32xf32> to vector<2x8x8xf32>
    "tpu.trace_start"() <{level = 10 : i32, message = "bqd,bkd->bqk"}> : () -> ()
    %cst_161 = arith.constant dense<0.000000e+00> : vector<2x8x8xf32>
    %117 = tpu.matmul %115, %116, %cst_161 {dimension_numbers = #tpu.dot_dimension_numbers<[2], [2], [1], [1], [0, 0, 0, 1, 1, 1], [0], [0]>} : vector<2x8x8xf32>, vector<2x8x8xf32>, vector<2x8x8xf32> -> vector<2x8x8xf32>
    "tpu.trace_stop"() : () -> ()
    %cst_162 = arith.constant dense<0xFF800000> : vector<2x8xf32>
    %118 = vector.multi_reduction <maximumf>, %117, %cst_162 [2] : vector<2x8x8xf32> to vector<2x8xf32>
    %119 = vector.shape_cast %118 : vector<2x8xf32> to vector<2x8x1xf32>
    %120 = vector.broadcast %119 : vector<2x8x1xf32> to vector<2x8x8xf32>
    %121 = arith.subf %117, %120 : vector<2x8x8xf32>
    %122 = math.exp %121 : vector<2x8x8xf32>
    %cst_163 = arith.constant dense<0.000000e+00> : vector<2x8xf32>
    %123 = vector.multi_reduction <add>, %122, %cst_163 [2] : vector<2x8x8xf32> to vector<2x8xf32>
    %124 = vector.shape_cast %123 : vector<2x8xf32> to vector<2x8x1xf32>
    %125 = vector.broadcast %124 : vector<2x8x1xf32> to vector<2x8x8xf32>
    %126 = arith.divf %122, %125 : vector<2x8x8xf32>
    %127 = vector.extract_strided_slice %95 {offsets = [0, 0, 8], sizes = [2, 8, 8], strides = [1, 1, 1]} : vector<2x8x32xf32> to vector<2x8x8xf32>
    "tpu.trace_start"() <{level = 10 : i32, message = "bqk,bkd->bqd"}> : () -> ()
    %cst_164 = arith.constant dense<0.000000e+00> : vector<2x8x8xf32>
    %128 = tpu.matmul %126, %127, %cst_164 {dimension_numbers = #tpu.dot_dimension_numbers<[2], [1], [1], [2], [0, 0, 0, 1, 1, 2], [0], [0]>} : vector<2x8x8xf32>, vector<2x8x8xf32>, vector<2x8x8xf32> -> vector<2x8x8xf32>
    "tpu.trace_stop"() : () -> ()
    %129 = vector.shape_cast %128 : vector<2x8x8xf32> to vector<16x8xf32>
    %130 = vector.extract_strided_slice %58 {offsets = [8, 0], sizes = [8, 32], strides = [1, 1]} : vector<32x32xf32> to vector<8x32xf32>
    %cst_165 = arith.constant dense<0.000000e+00> : vector<16x32xf32>
    %131 = tpu.matmul %129, %130, %cst_165 {dimension_numbers = #tpu.dot_dimension_numbers<[1], [0], [0], [1], [0, 0, 1, 1], [], []>} : vector<16x8xf32>, vector<8x32xf32>, vector<16x32xf32> -> vector<16x32xf32>
    %132 = arith.addf %114, %131 : vector<16x32xf32>
    %133 = vector.extract_strided_slice %91 {offsets = [0, 0, 16], sizes = [2, 8, 8], strides = [1, 1, 1]} : vector<2x8x32xf32> to vector<2x8x8xf32>
    %134 = vector.extract_strided_slice %93 {offsets = [0, 0, 16], sizes = [2, 8, 8], strides = [1, 1, 1]} : vector<2x8x32xf32> to vector<2x8x8xf32>
    "tpu.trace_start"() <{level = 10 : i32, message = "bqd,bkd->bqk"}> : () -> ()
    %cst_166 = arith.constant dense<0.000000e+00> : vector<2x8x8xf32>
    %135 = tpu.matmul %133, %134, %cst_166 {dimension_numbers = #tpu.dot_dimension_numbers<[2], [2], [1], [1], [0, 0, 0, 1, 1, 1], [0], [0]>} : vector<2x8x8xf32>, vector<2x8x8xf32>, vector<2x8x8xf32> -> vector<2x8x8xf32>
    "tpu.trace_stop"() : () -> ()
    %cst_167 = arith.constant dense<0xFF800000> : vector<2x8xf32>
    %136 = vector.multi_reduction <maximumf>, %135, %cst_167 [2] : vector<2x8x8xf32> to vector<2x8xf32>
    %137 = vector.shape_cast %136 : vector<2x8xf32> to vector<2x8x1xf32>
    %138 = vector.broadcast %137 : vector<2x8x1xf32> to vector<2x8x8xf32>
    %139 = arith.subf %135, %138 : vector<2x8x8xf32>
    %140 = math.exp %139 : vector<2x8x8xf32>
    %cst_168 = arith.constant dense<0.000000e+00> : vector<2x8xf32>
    %141 = vector.multi_reduction <add>, %140, %cst_168 [2] : vector<2x8x8xf32> to vector<2x8xf32>
    %142 = vector.shape_cast %141 : vector<2x8xf32> to vector<2x8x1xf32>
    %143 = vector.broadcast %142 : vector<2x8x1xf32> to vector<2x8x8xf32>
    %144 = arith.divf %140, %143 : vector<2x8x8xf32>
    %145 = vector.extract_strided_slice %95 {offsets = [0, 0, 16], sizes = [2, 8, 8], strides = [1, 1, 1]} : vector<2x8x32xf32> to vector<2x8x8xf32>
    "tpu.trace_start"() <{level = 10 : i32, message = "bqk,bkd->bqd"}> : () -> ()
    %cst_169 = arith.constant dense<0.000000e+00> : vector<2x8x8xf32>
    %146 = tpu.matmul %144, %145, %cst_169 {dimension_numbers = #tpu.dot_dimension_numbers<[2], [1], [1], [2], [0, 0, 0, 1, 1, 2], [0], [0]>} : vector<2x8x8xf32>, vector<2x8x8xf32>, vector<2x8x8xf32> -> vector<2x8x8xf32>
    "tpu.trace_stop"() : () -> ()
    %147 = vector.shape_cast %146 : vector<2x8x8xf32> to vector<16x8xf32>
    %148 = vector.extract_strided_slice %58 {offsets = [16, 0], sizes = [8, 32], strides = [1, 1]} : vector<32x32xf32> to vector<8x32xf32>
    %cst_170 = arith.constant dense<0.000000e+00> : vector<16x32xf32>
    %149 = tpu.matmul %147, %148, %cst_170 {dimension_numbers = #tpu.dot_dimension_numbers<[1], [0], [0], [1], [0, 0, 1, 1], [], []>} : vector<16x8xf32>, vector<8x32xf32>, vector<16x32xf32> -> vector<16x32xf32>
    %150 = arith.addf %132, %149 : vector<16x32xf32>
    %151 = vector.extract_strided_slice %91 {offsets = [0, 0, 24], sizes = [2, 8, 8], strides = [1, 1, 1]} : vector<2x8x32xf32> to vector<2x8x8xf32>
    %152 = vector.extract_strided_slice %93 {offsets = [0, 0, 24], sizes = [2, 8, 8], strides = [1, 1, 1]} : vector<2x8x32xf32> to vector<2x8x8xf32>
    "tpu.trace_start"() <{level = 10 : i32, message = "bqd,bkd->bqk"}> : () -> ()
    %cst_171 = arith.constant dense<0.000000e+00> : vector<2x8x8xf32>
    %153 = tpu.matmul %151, %152, %cst_171 {dimension_numbers = #tpu.dot_dimension_numbers<[2], [2], [1], [1], [0, 0, 0, 1, 1, 1], [0], [0]>} : vector<2x8x8xf32>, vector<2x8x8xf32>, vector<2x8x8xf32> -> vector<2x8x8xf32>
    "tpu.trace_stop"() : () -> ()
    %cst_172 = arith.constant dense<0xFF800000> : vector<2x8xf32>
    %154 = vector.multi_reduction <maximumf>, %153, %cst_172 [2] : vector<2x8x8xf32> to vector<2x8xf32>
    %155 = vector.shape_cast %154 : vector<2x8xf32> to vector<2x8x1xf32>
    %156 = vector.broadcast %155 : vector<2x8x1xf32> to vector<2x8x8xf32>
    %157 = arith.subf %153, %156 : vector<2x8x8xf32>
    %158 = math.exp %157 : vector<2x8x8xf32>
    %cst_173 = arith.constant dense<0.000000e+00> : vector<2x8xf32>
    %159 = vector.multi_reduction <add>, %158, %cst_173 [2] : vector<2x8x8xf32> to vector<2x8xf32>
    %160 = vector.shape_cast %159 : vector<2x8xf32> to vector<2x8x1xf32>
    %161 = vector.broadcast %160 : vector<2x8x1xf32> to vector<2x8x8xf32>
    %162 = arith.divf %158, %161 : vector<2x8x8xf32>
    %163 = vector.extract_strided_slice %95 {offsets = [0, 0, 24], sizes = [2, 8, 8], strides = [1, 1, 1]} : vector<2x8x32xf32> to vector<2x8x8xf32>
    "tpu.trace_start"() <{level = 10 : i32, message = "bqk,bkd->bqd"}> : () -> ()
    %cst_174 = arith.constant dense<0.000000e+00> : vector<2x8x8xf32>
    %164 = tpu.matmul %162, %163, %cst_174 {dimension_numbers = #tpu.dot_dimension_numbers<[2], [1], [1], [2], [0, 0, 0, 1, 1, 2], [0], [0]>} : vector<2x8x8xf32>, vector<2x8x8xf32>, vector<2x8x8xf32> -> vector<2x8x8xf32>
    "tpu.trace_stop"() : () -> ()
    %165 = vector.shape_cast %164 : vector<2x8x8xf32> to vector<16x8xf32>
    %166 = vector.extract_strided_slice %58 {offsets = [24, 0], sizes = [8, 32], strides = [1, 1]} : vector<32x32xf32> to vector<8x32xf32>
    %cst_175 = arith.constant dense<0.000000e+00> : vector<16x32xf32>
    %167 = tpu.matmul %165, %166, %cst_175 {dimension_numbers = #tpu.dot_dimension_numbers<[1], [0], [0], [1], [0, 0, 1, 1], [], []>} : vector<16x8xf32>, vector<8x32xf32>, vector<16x32xf32> -> vector<16x32xf32>
    %168 = arith.addf %150, %167 : vector<16x32xf32>
    %169 = vector.broadcast %56 : vector<1x32xf32> to vector<16x32xf32>
    %170 = arith.addf %168, %169 : vector<16x32xf32>
    %171 = vector.shape_cast %170 : vector<16x32xf32> to vector<2x8x32xf32>
    %172 = arith.addf %80, %171 : vector<2x8x32xf32>
    %173 = vector.shape_cast %172 : vector<2x8x32xf32> to vector<16x32xf32>
    %cst_176 = arith.constant dense<0.000000e+00> : vector<16xf32>
    %174 = vector.multi_reduction <add>, %173, %cst_176 [1] : vector<16x32xf32> to vector<16xf32>
    %175 = vector.shape_cast %174 : vector<16xf32> to vector<16x1xf32>
    %cst_177 = arith.constant 3.200000e+01 : f32
    %176 = vector.broadcast %cst_177 : f32 to vector<16x1xf32>
    %177 = arith.divf %175, %176 : vector<16x1xf32>
    %178 = vector.broadcast %177 : vector<16x1xf32> to vector<16x32xf32>
    %179 = arith.subf %173, %178 : vector<16x32xf32>
    %180 = arith.mulf %179, %179 : vector<16x32xf32>
    %cst_178 = arith.constant dense<0.000000e+00> : vector<16xf32>
    %181 = vector.multi_reduction <add>, %180, %cst_178 [1] : vector<16x32xf32> to vector<16xf32>
    %182 = vector.shape_cast %181 : vector<16xf32> to vector<16x1xf32>
    %cst_179 = arith.constant 3.200000e+01 : f32
    %183 = vector.broadcast %cst_179 : f32 to vector<16x1xf32>
    %184 = arith.divf %182, %183 : vector<16x1xf32>
    %cst_180 = arith.constant 9.99999974E-6 : f32
    %185 = vector.broadcast %cst_180 : f32 to vector<16x1xf32>
    %186 = arith.addf %184, %185 : vector<16x1xf32>
    %187 = math.rsqrt %186 : vector<16x1xf32>
    %188 = vector.broadcast %187 : vector<16x1xf32> to vector<16x32xf32>
    %189 = arith.mulf %179, %188 : vector<16x32xf32>
    %190 = vector.broadcast %52 : vector<1x32xf32> to vector<16x32xf32>
    %191 = arith.mulf %189, %190 : vector<16x32xf32>
    %192 = vector.broadcast %53 : vector<1x32xf32> to vector<16x32xf32>
    %193 = arith.addf %191, %192 : vector<16x32xf32>
    %cst_181 = arith.constant dense<0.000000e+00> : vector<16x64xf32>
    %194 = tpu.matmul %193, %48, %cst_181 {dimension_numbers = #tpu.dot_dimension_numbers<[1], [0], [0], [1], [0, 0, 1, 1], [], []>} : vector<16x32xf32>, vector<32x64xf32>, vector<16x64xf32> -> vector<16x64xf32>
    %195 = vector.broadcast %49 : vector<1x64xf32> to vector<16x64xf32>
    %196 = arith.addf %194, %195 : vector<16x64xf32>
    %cst_182 = arith.constant 0.000000e+00 : f32
    %197 = vector.broadcast %cst_182 : f32 to vector<16x64xf32>
    %198 = arith.maximumf %196, %197 : vector<16x64xf32>
    %cst_183 = arith.constant dense<0.000000e+00> : vector<16x32xf32>
    %199 = tpu.matmul %198, %50, %cst_183 {dimension_numbers = #tpu.dot_dimension_numbers<[1], [0], [0], [1], [0, 0, 1, 1], [], []>} : vector<16x64xf32>, vector<64x32xf32>, vector<16x32xf32> -> vector<16x32xf32>
    %200 = vector.broadcast %51 : vector<1x32xf32> to vector<16x32xf32>
    %201 = arith.addf %199, %200 : vector<16x32xf32>
    %202 = arith.addf %193, %201 : vector<16x32xf32>
    %cst_184 = arith.constant dense<0.000000e+00> : vector<16xf32>
    %203 = vector.multi_reduction <add>, %202, %cst_184 [1] : vector<16x32xf32> to vector<16xf32>
    %204 = vector.shape_cast %203 : vector<16xf32> to vector<16x1xf32>
    %cst_185 = arith.constant 3.200000e+01 : f32
    %205 = vector.broadcast %cst_185 : f32 to vector<16x1xf32>
    %206 = arith.divf %204, %205 : vector<16x1xf32>
    %207 = vector.broadcast %206 : vector<16x1xf32> to vector<16x32xf32>
    %208 = arith.subf %202, %207 : vector<16x32xf32>
    %209 = arith.mulf %208, %208 : vector<16x32xf32>
    %cst_186 = arith.constant dense<0.000000e+00> : vector<16xf32>
    %210 = vector.multi_reduction <add>, %209, %cst_186 [1] : vector<16x32xf32> to vector<16xf32>
    %211 = vector.shape_cast %210 : vector<16xf32> to vector<16x1xf32>
    %cst_187 = arith.constant 3.200000e+01 : f32
    %212 = vector.broadcast %cst_187 : f32 to vector<16x1xf32>
    %213 = arith.divf %211, %212 : vector<16x1xf32>
    %cst_188 = arith.constant 9.99999974E-6 : f32
    %214 = vector.broadcast %cst_188 : f32 to vector<16x1xf32>
    %215 = arith.addf %213, %214 : vector<16x1xf32>
    %216 = math.rsqrt %215 : vector<16x1xf32>
    %217 = vector.broadcast %216 : vector<16x1xf32> to vector<16x32xf32>
    %218 = arith.mulf %208, %217 : vector<16x32xf32>
    %219 = vector.broadcast %54 : vector<1x32xf32> to vector<16x32xf32>
    %220 = arith.mulf %218, %219 : vector<16x32xf32>
    %221 = vector.broadcast %55 : vector<1x32xf32> to vector<16x32xf32>
    %222 = arith.addf %220, %221 : vector<16x32xf32>
    %223 = vector.shape_cast %222 : vector<16x32xf32> to vector<2x8x32xf32>
    %224 = vector.shape_cast %223 : vector<2x8x32xf32> to vector<16x32xf32>
    %cst_189 = arith.constant dense<0.000000e+00> : vector<16x96xf32>
    %225 = tpu.matmul %224, %71, %cst_189 {dimension_numbers = #tpu.dot_dimension_numbers<[1], [0], [0], [1], [0, 0, 1, 1], [], []>} : vector<16x32xf32>, vector<32x96xf32>, vector<16x96xf32> -> vector<16x96xf32>
    %226 = vector.broadcast %69 : vector<1x96xf32> to vector<16x96xf32>
    %227 = arith.addf %225, %226 : vector<16x96xf32>
    %228 = vector.extract_strided_slice %227 {offsets = [0, 0], sizes = [16, 32], strides = [1, 1]} : vector<16x96xf32> to vector<16x32xf32>
    %229 = vector.shape_cast %228 : vector<16x32xf32> to vector<2x8x32xf32>
    %230 = vector.extract_strided_slice %227 {offsets = [0, 32], sizes = [16, 32], strides = [1, 1]} : vector<16x96xf32> to vector<16x32xf32>
    %231 = vector.shape_cast %230 : vector<16x32xf32> to vector<2x8x32xf32>
    %232 = vector.extract_strided_slice %227 {offsets = [0, 64], sizes = [16, 32], strides = [1, 1]} : vector<16x96xf32> to vector<16x32xf32>
    %233 = vector.shape_cast %232 : vector<16x32xf32> to vector<2x8x32xf32>
    %cst_190 = arith.constant 0.000000e+00 : f32
    %234 = vector.broadcast %cst_190 : f32 to vector<16x32xf32>
    %235 = vector.extract_strided_slice %229 {offsets = [0, 0, 0], sizes = [2, 8, 8], strides = [1, 1, 1]} : vector<2x8x32xf32> to vector<2x8x8xf32>
    %236 = vector.extract_strided_slice %231 {offsets = [0, 0, 0], sizes = [2, 8, 8], strides = [1, 1, 1]} : vector<2x8x32xf32> to vector<2x8x8xf32>
    "tpu.trace_start"() <{level = 10 : i32, message = "bqd,bkd->bqk"}> : () -> ()
    %cst_191 = arith.constant dense<0.000000e+00> : vector<2x8x8xf32>
    %237 = tpu.matmul %235, %236, %cst_191 {dimension_numbers = #tpu.dot_dimension_numbers<[2], [2], [1], [1], [0, 0, 0, 1, 1, 1], [0], [0]>} : vector<2x8x8xf32>, vector<2x8x8xf32>, vector<2x8x8xf32> -> vector<2x8x8xf32>
    "tpu.trace_stop"() : () -> ()
    %cst_192 = arith.constant dense<0xFF800000> : vector<2x8xf32>
    %238 = vector.multi_reduction <maximumf>, %237, %cst_192 [2] : vector<2x8x8xf32> to vector<2x8xf32>
    %239 = vector.shape_cast %238 : vector<2x8xf32> to vector<2x8x1xf32>
    %240 = vector.broadcast %239 : vector<2x8x1xf32> to vector<2x8x8xf32>
    %241 = arith.subf %237, %240 : vector<2x8x8xf32>
    %242 = math.exp %241 : vector<2x8x8xf32>
    %cst_193 = arith.constant dense<0.000000e+00> : vector<2x8xf32>
    %243 = vector.multi_reduction <add>, %242, %cst_193 [2] : vector<2x8x8xf32> to vector<2x8xf32>
    %244 = vector.shape_cast %243 : vector<2x8xf32> to vector<2x8x1xf32>
    %245 = vector.broadcast %244 : vector<2x8x1xf32> to vector<2x8x8xf32>
    %246 = arith.divf %242, %245 : vector<2x8x8xf32>
    %247 = vector.extract_strided_slice %233 {offsets = [0, 0, 0], sizes = [2, 8, 8], strides = [1, 1, 1]} : vector<2x8x32xf32> to vector<2x8x8xf32>
    "tpu.trace_start"() <{level = 10 : i32, message = "bqk,bkd->bqd"}> : () -> ()
    %cst_194 = arith.constant dense<0.000000e+00> : vector<2x8x8xf32>
    %248 = tpu.matmul %246, %247, %cst_194 {dimension_numbers = #tpu.dot_dimension_numbers<[2], [1], [1], [2], [0, 0, 0, 1, 1, 2], [0], [0]>} : vector<2x8x8xf32>, vector<2x8x8xf32>, vector<2x8x8xf32> -> vector<2x8x8xf32>
    "tpu.trace_stop"() : () -> ()
    %249 = vector.shape_cast %248 : vector<2x8x8xf32> to vector<16x8xf32>
    %250 = vector.extract_strided_slice %70 {offsets = [0, 0], sizes = [8, 32], strides = [1, 1]} : vector<32x32xf32> to vector<8x32xf32>
    %cst_195 = arith.constant dense<0.000000e+00> : vector<16x32xf32>
    %251 = tpu.matmul %249, %250, %cst_195 {dimension_numbers = #tpu.dot_dimension_numbers<[1], [0], [0], [1], [0, 0, 1, 1], [], []>} : vector<16x8xf32>, vector<8x32xf32>, vector<16x32xf32> -> vector<16x32xf32>
    %252 = arith.addf %234, %251 : vector<16x32xf32>
    %253 = vector.extract_strided_slice %229 {offsets = [0, 0, 8], sizes = [2, 8, 8], strides = [1, 1, 1]} : vector<2x8x32xf32> to vector<2x8x8xf32>
    %254 = vector.extract_strided_slice %231 {offsets = [0, 0, 8], sizes = [2, 8, 8], strides = [1, 1, 1]} : vector<2x8x32xf32> to vector<2x8x8xf32>
    "tpu.trace_start"() <{level = 10 : i32, message = "bqd,bkd->bqk"}> : () -> ()
    %cst_196 = arith.constant dense<0.000000e+00> : vector<2x8x8xf32>
    %255 = tpu.matmul %253, %254, %cst_196 {dimension_numbers = #tpu.dot_dimension_numbers<[2], [2], [1], [1], [0, 0, 0, 1, 1, 1], [0], [0]>} : vector<2x8x8xf32>, vector<2x8x8xf32>, vector<2x8x8xf32> -> vector<2x8x8xf32>
    "tpu.trace_stop"() : () -> ()
    %cst_197 = arith.constant dense<0xFF800000> : vector<2x8xf32>
    %256 = vector.multi_reduction <maximumf>, %255, %cst_197 [2] : vector<2x8x8xf32> to vector<2x8xf32>
    %257 = vector.shape_cast %256 : vector<2x8xf32> to vector<2x8x1xf32>
    %258 = vector.broadcast %257 : vector<2x8x1xf32> to vector<2x8x8xf32>
    %259 = arith.subf %255, %258 : vector<2x8x8xf32>
    %260 = math.exp %259 : vector<2x8x8xf32>
    %cst_198 = arith.constant dense<0.000000e+00> : vector<2x8xf32>
    %261 = vector.multi_reduction <add>, %260, %cst_198 [2] : vector<2x8x8xf32> to vector<2x8xf32>
    %262 = vector.shape_cast %261 : vector<2x8xf32> to vector<2x8x1xf32>
    %263 = vector.broadcast %262 : vector<2x8x1xf32> to vector<2x8x8xf32>
    %264 = arith.divf %260, %263 : vector<2x8x8xf32>
    %265 = vector.extract_strided_slice %233 {offsets = [0, 0, 8], sizes = [2, 8, 8], strides = [1, 1, 1]} : vector<2x8x32xf32> to vector<2x8x8xf32>
    "tpu.trace_start"() <{level = 10 : i32, message = "bqk,bkd->bqd"}> : () -> ()
    %cst_199 = arith.constant dense<0.000000e+00> : vector<2x8x8xf32>
    %266 = tpu.matmul %264, %265, %cst_199 {dimension_numbers = #tpu.dot_dimension_numbers<[2], [1], [1], [2], [0, 0, 0, 1, 1, 2], [0], [0]>} : vector<2x8x8xf32>, vector<2x8x8xf32>, vector<2x8x8xf32> -> vector<2x8x8xf32>
    "tpu.trace_stop"() : () -> ()
    %267 = vector.shape_cast %266 : vector<2x8x8xf32> to vector<16x8xf32>
    %268 = vector.extract_strided_slice %70 {offsets = [8, 0], sizes = [8, 32], strides = [1, 1]} : vector<32x32xf32> to vector<8x32xf32>
    %cst_200 = arith.constant dense<0.000000e+00> : vector<16x32xf32>
    %269 = tpu.matmul %267, %268, %cst_200 {dimension_numbers = #tpu.dot_dimension_numbers<[1], [0], [0], [1], [0, 0, 1, 1], [], []>} : vector<16x8xf32>, vector<8x32xf32>, vector<16x32xf32> -> vector<16x32xf32>
    %270 = arith.addf %252, %269 : vector<16x32xf32>
    %271 = vector.extract_strided_slice %229 {offsets = [0, 0, 16], sizes = [2, 8, 8], strides = [1, 1, 1]} : vector<2x8x32xf32> to vector<2x8x8xf32>
    %272 = vector.extract_strided_slice %231 {offsets = [0, 0, 16], sizes = [2, 8, 8], strides = [1, 1, 1]} : vector<2x8x32xf32> to vector<2x8x8xf32>
    "tpu.trace_start"() <{level = 10 : i32, message = "bqd,bkd->bqk"}> : () -> ()
    %cst_201 = arith.constant dense<0.000000e+00> : vector<2x8x8xf32>
    %273 = tpu.matmul %271, %272, %cst_201 {dimension_numbers = #tpu.dot_dimension_numbers<[2], [2], [1], [1], [0, 0, 0, 1, 1, 1], [0], [0]>} : vector<2x8x8xf32>, vector<2x8x8xf32>, vector<2x8x8xf32> -> vector<2x8x8xf32>
    "tpu.trace_stop"() : () -> ()
    %cst_202 = arith.constant dense<0xFF800000> : vector<2x8xf32>
    %274 = vector.multi_reduction <maximumf>, %273, %cst_202 [2] : vector<2x8x8xf32> to vector<2x8xf32>
    %275 = vector.shape_cast %274 : vector<2x8xf32> to vector<2x8x1xf32>
    %276 = vector.broadcast %275 : vector<2x8x1xf32> to vector<2x8x8xf32>
    %277 = arith.subf %273, %276 : vector<2x8x8xf32>
    %278 = math.exp %277 : vector<2x8x8xf32>
    %cst_203 = arith.constant dense<0.000000e+00> : vector<2x8xf32>
    %279 = vector.multi_reduction <add>, %278, %cst_203 [2] : vector<2x8x8xf32> to vector<2x8xf32>
    %280 = vector.shape_cast %279 : vector<2x8xf32> to vector<2x8x1xf32>
    %281 = vector.broadcast %280 : vector<2x8x1xf32> to vector<2x8x8xf32>
    %282 = arith.divf %278, %281 : vector<2x8x8xf32>
    %283 = vector.extract_strided_slice %233 {offsets = [0, 0, 16], sizes = [2, 8, 8], strides = [1, 1, 1]} : vector<2x8x32xf32> to vector<2x8x8xf32>
    "tpu.trace_start"() <{level = 10 : i32, message = "bqk,bkd->bqd"}> : () -> ()
    %cst_204 = arith.constant dense<0.000000e+00> : vector<2x8x8xf32>
    %284 = tpu.matmul %282, %283, %cst_204 {dimension_numbers = #tpu.dot_dimension_numbers<[2], [1], [1], [2], [0, 0, 0, 1, 1, 2], [0], [0]>} : vector<2x8x8xf32>, vector<2x8x8xf32>, vector<2x8x8xf32> -> vector<2x8x8xf32>
    "tpu.trace_stop"() : () -> ()
    %285 = vector.shape_cast %284 : vector<2x8x8xf32> to vector<16x8xf32>
    %286 = vector.extract_strided_slice %70 {offsets = [16, 0], sizes = [8, 32], strides = [1, 1]} : vector<32x32xf32> to vector<8x32xf32>
    %cst_205 = arith.constant dense<0.000000e+00> : vector<16x32xf32>
    %287 = tpu.matmul %285, %286, %cst_205 {dimension_numbers = #tpu.dot_dimension_numbers<[1], [0], [0], [1], [0, 0, 1, 1], [], []>} : vector<16x8xf32>, vector<8x32xf32>, vector<16x32xf32> -> vector<16x32xf32>
    %288 = arith.addf %270, %287 : vector<16x32xf32>
    %289 = vector.extract_strided_slice %229 {offsets = [0, 0, 24], sizes = [2, 8, 8], strides = [1, 1, 1]} : vector<2x8x32xf32> to vector<2x8x8xf32>
    %290 = vector.extract_strided_slice %231 {offsets = [0, 0, 24], sizes = [2, 8, 8], strides = [1, 1, 1]} : vector<2x8x32xf32> to vector<2x8x8xf32>
    "tpu.trace_start"() <{level = 10 : i32, message = "bqd,bkd->bqk"}> : () -> ()
    %cst_206 = arith.constant dense<0.000000e+00> : vector<2x8x8xf32>
    %291 = tpu.matmul %289, %290, %cst_206 {dimension_numbers = #tpu.dot_dimension_numbers<[2], [2], [1], [1], [0, 0, 0, 1, 1, 1], [0], [0]>} : vector<2x8x8xf32>, vector<2x8x8xf32>, vector<2x8x8xf32> -> vector<2x8x8xf32>
    "tpu.trace_stop"() : () -> ()
    %cst_207 = arith.constant dense<0xFF800000> : vector<2x8xf32>
    %292 = vector.multi_reduction <maximumf>, %291, %cst_207 [2] : vector<2x8x8xf32> to vector<2x8xf32>
    %293 = vector.shape_cast %292 : vector<2x8xf32> to vector<2x8x1xf32>
    %294 = vector.broadcast %293 : vector<2x8x1xf32> to vector<2x8x8xf32>
    %295 = arith.subf %291, %294 : vector<2x8x8xf32>
    %296 = math.exp %295 : vector<2x8x8xf32>
    %cst_208 = arith.constant dense<0.000000e+00> : vector<2x8xf32>
    %297 = vector.multi_reduction <add>, %296, %cst_208 [2] : vector<2x8x8xf32> to vector<2x8xf32>
    %298 = vector.shape_cast %297 : vector<2x8xf32> to vector<2x8x1xf32>
    %299 = vector.broadcast %298 : vector<2x8x1xf32> to vector<2x8x8xf32>
    %300 = arith.divf %296, %299 : vector<2x8x8xf32>
    %301 = vector.extract_strided_slice %233 {offsets = [0, 0, 24], sizes = [2, 8, 8], strides = [1, 1, 1]} : vector<2x8x32xf32> to vector<2x8x8xf32>
    "tpu.trace_start"() <{level = 10 : i32, message = "bqk,bkd->bqd"}> : () -> ()
    %cst_209 = arith.constant dense<0.000000e+00> : vector<2x8x8xf32>
    %302 = tpu.matmul %300, %301, %cst_209 {dimension_numbers = #tpu.dot_dimension_numbers<[2], [1], [1], [2], [0, 0, 0, 1, 1, 2], [0], [0]>} : vector<2x8x8xf32>, vector<2x8x8xf32>, vector<2x8x8xf32> -> vector<2x8x8xf32>
    "tpu.trace_stop"() : () -> ()
    %303 = vector.shape_cast %302 : vector<2x8x8xf32> to vector<16x8xf32>
    %304 = vector.extract_strided_slice %70 {offsets = [24, 0], sizes = [8, 32], strides = [1, 1]} : vector<32x32xf32> to vector<8x32xf32>
    %cst_210 = arith.constant dense<0.000000e+00> : vector<16x32xf32>
    %305 = tpu.matmul %303, %304, %cst_210 {dimension_numbers = #tpu.dot_dimension_numbers<[1], [0], [0], [1], [0, 0, 1, 1], [], []>} : vector<16x8xf32>, vector<8x32xf32>, vector<16x32xf32> -> vector<16x32xf32>
    %306 = arith.addf %288, %305 : vector<16x32xf32>
    %307 = vector.broadcast %68 : vector<1x32xf32> to vector<16x32xf32>
    %308 = arith.addf %306, %307 : vector<16x32xf32>
    %309 = vector.shape_cast %308 : vector<16x32xf32> to vector<2x8x32xf32>
    %310 = arith.addf %223, %309 : vector<2x8x32xf32>
    %311 = vector.shape_cast %310 : vector<2x8x32xf32> to vector<16x32xf32>
    %cst_211 = arith.constant dense<0.000000e+00> : vector<16xf32>
    %312 = vector.multi_reduction <add>, %311, %cst_211 [1] : vector<16x32xf32> to vector<16xf32>
    %313 = vector.shape_cast %312 : vector<16xf32> to vector<16x1xf32>
    %cst_212 = arith.constant 3.200000e+01 : f32
    %314 = vector.broadcast %cst_212 : f32 to vector<16x1xf32>
    %315 = arith.divf %313, %314 : vector<16x1xf32>
    %316 = vector.broadcast %315 : vector<16x1xf32> to vector<16x32xf32>
    %317 = arith.subf %311, %316 : vector<16x32xf32>
    %318 = arith.mulf %317, %317 : vector<16x32xf32>
    %cst_213 = arith.constant dense<0.000000e+00> : vector<16xf32>
    %319 = vector.multi_reduction <add>, %318, %cst_213 [1] : vector<16x32xf32> to vector<16xf32>
    %320 = vector.shape_cast %319 : vector<16xf32> to vector<16x1xf32>
    %cst_214 = arith.constant 3.200000e+01 : f32
    %321 = vector.broadcast %cst_214 : f32 to vector<16x1xf32>
    %322 = arith.divf %320, %321 : vector<16x1xf32>
    %cst_215 = arith.constant 9.99999974E-6 : f32
    %323 = vector.broadcast %cst_215 : f32 to vector<16x1xf32>
    %324 = arith.addf %322, %323 : vector<16x1xf32>
    %325 = math.rsqrt %324 : vector<16x1xf32>
    %326 = vector.broadcast %325 : vector<16x1xf32> to vector<16x32xf32>
    %327 = arith.mulf %317, %326 : vector<16x32xf32>
    %328 = vector.broadcast %64 : vector<1x32xf32> to vector<16x32xf32>
    %329 = arith.mulf %327, %328 : vector<16x32xf32>
    %330 = vector.broadcast %65 : vector<1x32xf32> to vector<16x32xf32>
    %331 = arith.addf %329, %330 : vector<16x32xf32>
    %cst_216 = arith.constant dense<0.000000e+00> : vector<16x64xf32>
    %332 = tpu.matmul %331, %60, %cst_216 {dimension_numbers = #tpu.dot_dimension_numbers<[1], [0], [0], [1], [0, 0, 1, 1], [], []>} : vector<16x32xf32>, vector<32x64xf32>, vector<16x64xf32> -> vector<16x64xf32>
    %333 = vector.broadcast %61 : vector<1x64xf32> to vector<16x64xf32>
    %334 = arith.addf %332, %333 : vector<16x64xf32>
    %cst_217 = arith.constant 0.000000e+00 : f32
    %335 = vector.broadcast %cst_217 : f32 to vector<16x64xf32>
    %336 = arith.maximumf %334, %335 : vector<16x64xf32>
    %cst_218 = arith.constant dense<0.000000e+00> : vector<16x32xf32>
    %337 = tpu.matmul %336, %62, %cst_218 {dimension_numbers = #tpu.dot_dimension_numbers<[1], [0], [0], [1], [0, 0, 1, 1], [], []>} : vector<16x64xf32>, vector<64x32xf32>, vector<16x32xf32> -> vector<16x32xf32>
    %338 = vector.broadcast %63 : vector<1x32xf32> to vector<16x32xf32>
    %339 = arith.addf %337, %338 : vector<16x32xf32>
    %340 = arith.addf %331, %339 : vector<16x32xf32>
    %cst_219 = arith.constant dense<0.000000e+00> : vector<16xf32>
    %341 = vector.multi_reduction <add>, %340, %cst_219 [1] : vector<16x32xf32> to vector<16xf32>
    %342 = vector.shape_cast %341 : vector<16xf32> to vector<16x1xf32>
    %cst_220 = arith.constant 3.200000e+01 : f32
    %343 = vector.broadcast %cst_220 : f32 to vector<16x1xf32>
    %344 = arith.divf %342, %343 : vector<16x1xf32>
    %345 = vector.broadcast %344 : vector<16x1xf32> to vector<16x32xf32>
    %346 = arith.subf %340, %345 : vector<16x32xf32>
    %347 = arith.mulf %346, %346 : vector<16x32xf32>
    %cst_221 = arith.constant dense<0.000000e+00> : vector<16xf32>
    %348 = vector.multi_reduction <add>, %347, %cst_221 [1] : vector<16x32xf32> to vector<16xf32>
    %349 = vector.shape_cast %348 : vector<16xf32> to vector<16x1xf32>
    %cst_222 = arith.constant 3.200000e+01 : f32
    %350 = vector.broadcast %cst_222 : f32 to vector<16x1xf32>
    %351 = arith.divf %349, %350 : vector<16x1xf32>
    %cst_223 = arith.constant 9.99999974E-6 : f32
    %352 = vector.broadcast %cst_223 : f32 to vector<16x1xf32>
    %353 = arith.addf %351, %352 : vector<16x1xf32>
    %354 = math.rsqrt %353 : vector<16x1xf32>
    %355 = vector.broadcast %354 : vector<16x1xf32> to vector<16x32xf32>
    %356 = arith.mulf %346, %355 : vector<16x32xf32>
    %357 = vector.broadcast %66 : vector<1x32xf32> to vector<16x32xf32>
    %358 = arith.mulf %356, %357 : vector<16x32xf32>
    %359 = vector.broadcast %67 : vector<1x32xf32> to vector<16x32xf32>
    %360 = arith.addf %358, %359 : vector<16x32xf32>
    %361 = vector.shape_cast %360 : vector<16x32xf32> to vector<2x8x32xf32>
    %362 = vector.shape_cast %361 : vector<2x8x32xf32> to vector<16x32xf32>
    %cst_224 = arith.constant dense<0.000000e+00> : vector<16xf32>
    %363 = vector.multi_reduction <add>, %362, %cst_224 [1] : vector<16x32xf32> to vector<16xf32>
    %364 = vector.shape_cast %363 : vector<16xf32> to vector<16x1xf32>
    %cst_225 = arith.constant 3.200000e+01 : f32
    %365 = vector.broadcast %cst_225 : f32 to vector<16x1xf32>
    %366 = arith.divf %364, %365 : vector<16x1xf32>
    %367 = vector.broadcast %366 : vector<16x1xf32> to vector<16x32xf32>
    %368 = arith.subf %362, %367 : vector<16x32xf32>
    %369 = arith.mulf %368, %368 : vector<16x32xf32>
    %cst_226 = arith.constant dense<0.000000e+00> : vector<16xf32>
    %370 = vector.multi_reduction <add>, %369, %cst_226 [1] : vector<16x32xf32> to vector<16xf32>
    %371 = vector.shape_cast %370 : vector<16xf32> to vector<16x1xf32>
    %cst_227 = arith.constant 3.200000e+01 : f32
    %372 = vector.broadcast %cst_227 : f32 to vector<16x1xf32>
    %373 = arith.divf %371, %372 : vector<16x1xf32>
    %cst_228 = arith.constant 9.99999974E-6 : f32
    %374 = vector.broadcast %cst_228 : f32 to vector<16x1xf32>
    %375 = arith.addf %373, %374 : vector<16x1xf32>
    %376 = math.rsqrt %375 : vector<16x1xf32>
    %377 = vector.broadcast %376 : vector<16x1xf32> to vector<16x32xf32>
    %378 = arith.mulf %368, %377 : vector<16x32xf32>
    %379 = vector.broadcast %72 : vector<1x32xf32> to vector<16x32xf32>
    %380 = arith.mulf %378, %379 : vector<16x32xf32>
    %381 = vector.broadcast %73 : vector<1x32xf32> to vector<16x32xf32>
    %382 = arith.addf %380, %381 : vector<16x32xf32>
    %383 = vector.shape_cast %382 : vector<16x32xf32> to vector<2x8x32xf32>
    %384 = vector.shape_cast %85 : vector<2x8x32xf32> to vector<16x32xf32>
    %cst_229 = arith.constant dense<0.000000e+00> : vector<16x96xf32>
    %385 = tpu.matmul %384, %19, %cst_229 {dimension_numbers = #tpu.dot_dimension_numbers<[1], [0], [0], [1], [0, 0, 1, 1], [], []>} : vector<16x32xf32>, vector<32x96xf32>, vector<16x96xf32> -> vector<16x96xf32>
    %386 = vector.broadcast %17 : vector<1x96xf32> to vector<16x96xf32>
    %387 = arith.addf %385, %386 : vector<16x96xf32>
    %388 = vector.extract_strided_slice %387 {offsets = [0, 0], sizes = [16, 32], strides = [1, 1]} : vector<16x96xf32> to vector<16x32xf32>
    %389 = vector.shape_cast %388 : vector<16x32xf32> to vector<2x8x32xf32>
    %390 = vector.extract_strided_slice %387 {offsets = [0, 32], sizes = [16, 32], strides = [1, 1]} : vector<16x96xf32> to vector<16x32xf32>
    %391 = vector.shape_cast %390 : vector<16x32xf32> to vector<2x8x32xf32>
    %392 = vector.extract_strided_slice %387 {offsets = [0, 64], sizes = [16, 32], strides = [1, 1]} : vector<16x96xf32> to vector<16x32xf32>
    %393 = vector.shape_cast %392 : vector<16x32xf32> to vector<2x8x32xf32>
    %cst_230 = arith.constant 0.000000e+00 : f32
    %394 = vector.broadcast %cst_230 : f32 to vector<16x32xf32>
    %395 = vector.extract_strided_slice %389 {offsets = [0, 0, 0], sizes = [2, 8, 8], strides = [1, 1, 1]} : vector<2x8x32xf32> to vector<2x8x8xf32>
    %396 = vector.extract_strided_slice %391 {offsets = [0, 0, 0], sizes = [2, 8, 8], strides = [1, 1, 1]} : vector<2x8x32xf32> to vector<2x8x8xf32>
    "tpu.trace_start"() <{level = 10 : i32, message = "bqd,bkd->bqk"}> : () -> ()
    %cst_231 = arith.constant dense<0.000000e+00> : vector<2x8x8xf32>
    %397 = tpu.matmul %395, %396, %cst_231 {dimension_numbers = #tpu.dot_dimension_numbers<[2], [2], [1], [1], [0, 0, 0, 1, 1, 1], [0], [0]>} : vector<2x8x8xf32>, vector<2x8x8xf32>, vector<2x8x8xf32> -> vector<2x8x8xf32>
    "tpu.trace_stop"() : () -> ()
    %cst_232 = arith.constant dense<0xFF800000> : vector<2x8xf32>
    %398 = vector.multi_reduction <maximumf>, %397, %cst_232 [2] : vector<2x8x8xf32> to vector<2x8xf32>
    %399 = vector.shape_cast %398 : vector<2x8xf32> to vector<2x8x1xf32>
    %400 = vector.broadcast %399 : vector<2x8x1xf32> to vector<2x8x8xf32>
    %401 = arith.subf %397, %400 : vector<2x8x8xf32>
    %402 = math.exp %401 : vector<2x8x8xf32>
    %cst_233 = arith.constant dense<0.000000e+00> : vector<2x8xf32>
    %403 = vector.multi_reduction <add>, %402, %cst_233 [2] : vector<2x8x8xf32> to vector<2x8xf32>
    %404 = vector.shape_cast %403 : vector<2x8xf32> to vector<2x8x1xf32>
    %405 = vector.broadcast %404 : vector<2x8x1xf32> to vector<2x8x8xf32>
    %406 = arith.divf %402, %405 : vector<2x8x8xf32>
    %407 = vector.extract_strided_slice %393 {offsets = [0, 0, 0], sizes = [2, 8, 8], strides = [1, 1, 1]} : vector<2x8x32xf32> to vector<2x8x8xf32>
    "tpu.trace_start"() <{level = 10 : i32, message = "bqk,bkd->bqd"}> : () -> ()
    %cst_234 = arith.constant dense<0.000000e+00> : vector<2x8x8xf32>
    %408 = tpu.matmul %406, %407, %cst_234 {dimension_numbers = #tpu.dot_dimension_numbers<[2], [1], [1], [2], [0, 0, 0, 1, 1, 2], [0], [0]>} : vector<2x8x8xf32>, vector<2x8x8xf32>, vector<2x8x8xf32> -> vector<2x8x8xf32>
    "tpu.trace_stop"() : () -> ()
    %409 = vector.shape_cast %408 : vector<2x8x8xf32> to vector<16x8xf32>
    %410 = vector.extract_strided_slice %18 {offsets = [0, 0], sizes = [8, 32], strides = [1, 1]} : vector<32x32xf32> to vector<8x32xf32>
    %cst_235 = arith.constant dense<0.000000e+00> : vector<16x32xf32>
    %411 = tpu.matmul %409, %410, %cst_235 {dimension_numbers = #tpu.dot_dimension_numbers<[1], [0], [0], [1], [0, 0, 1, 1], [], []>} : vector<16x8xf32>, vector<8x32xf32>, vector<16x32xf32> -> vector<16x32xf32>
    %412 = arith.addf %394, %411 : vector<16x32xf32>
    %413 = vector.extract_strided_slice %389 {offsets = [0, 0, 8], sizes = [2, 8, 8], strides = [1, 1, 1]} : vector<2x8x32xf32> to vector<2x8x8xf32>
    %414 = vector.extract_strided_slice %391 {offsets = [0, 0, 8], sizes = [2, 8, 8], strides = [1, 1, 1]} : vector<2x8x32xf32> to vector<2x8x8xf32>
    "tpu.trace_start"() <{level = 10 : i32, message = "bqd,bkd->bqk"}> : () -> ()
    %cst_236 = arith.constant dense<0.000000e+00> : vector<2x8x8xf32>
    %415 = tpu.matmul %413, %414, %cst_236 {dimension_numbers = #tpu.dot_dimension_numbers<[2], [2], [1], [1], [0, 0, 0, 1, 1, 1], [0], [0]>} : vector<2x8x8xf32>, vector<2x8x8xf32>, vector<2x8x8xf32> -> vector<2x8x8xf32>
    "tpu.trace_stop"() : () -> ()
    %cst_237 = arith.constant dense<0xFF800000> : vector<2x8xf32>
    %416 = vector.multi_reduction <maximumf>, %415, %cst_237 [2] : vector<2x8x8xf32> to vector<2x8xf32>
    %417 = vector.shape_cast %416 : vector<2x8xf32> to vector<2x8x1xf32>
    %418 = vector.broadcast %417 : vector<2x8x1xf32> to vector<2x8x8xf32>
    %419 = arith.subf %415, %418 : vector<2x8x8xf32>
    %420 = math.exp %419 : vector<2x8x8xf32>
    %cst_238 = arith.constant dense<0.000000e+00> : vector<2x8xf32>
    %421 = vector.multi_reduction <add>, %420, %cst_238 [2] : vector<2x8x8xf32> to vector<2x8xf32>
    %422 = vector.shape_cast %421 : vector<2x8xf32> to vector<2x8x1xf32>
    %423 = vector.broadcast %422 : vector<2x8x1xf32> to vector<2x8x8xf32>
    %424 = arith.divf %420, %423 : vector<2x8x8xf32>
    %425 = vector.extract_strided_slice %393 {offsets = [0, 0, 8], sizes = [2, 8, 8], strides = [1, 1, 1]} : vector<2x8x32xf32> to vector<2x8x8xf32>
    "tpu.trace_start"() <{level = 10 : i32, message = "bqk,bkd->bqd"}> : () -> ()
    %cst_239 = arith.constant dense<0.000000e+00> : vector<2x8x8xf32>
    %426 = tpu.matmul %424, %425, %cst_239 {dimension_numbers = #tpu.dot_dimension_numbers<[2], [1], [1], [2], [0, 0, 0, 1, 1, 2], [0], [0]>} : vector<2x8x8xf32>, vector<2x8x8xf32>, vector<2x8x8xf32> -> vector<2x8x8xf32>
    "tpu.trace_stop"() : () -> ()
    %427 = vector.shape_cast %426 : vector<2x8x8xf32> to vector<16x8xf32>
    %428 = vector.extract_strided_slice %18 {offsets = [8, 0], sizes = [8, 32], strides = [1, 1]} : vector<32x32xf32> to vector<8x32xf32>
    %cst_240 = arith.constant dense<0.000000e+00> : vector<16x32xf32>
    %429 = tpu.matmul %427, %428, %cst_240 {dimension_numbers = #tpu.dot_dimension_numbers<[1], [0], [0], [1], [0, 0, 1, 1], [], []>} : vector<16x8xf32>, vector<8x32xf32>, vector<16x32xf32> -> vector<16x32xf32>
    %430 = arith.addf %412, %429 : vector<16x32xf32>
    %431 = vector.extract_strided_slice %389 {offsets = [0, 0, 16], sizes = [2, 8, 8], strides = [1, 1, 1]} : vector<2x8x32xf32> to vector<2x8x8xf32>
    %432 = vector.extract_strided_slice %391 {offsets = [0, 0, 16], sizes = [2, 8, 8], strides = [1, 1, 1]} : vector<2x8x32xf32> to vector<2x8x8xf32>
    "tpu.trace_start"() <{level = 10 : i32, message = "bqd,bkd->bqk"}> : () -> ()
    %cst_241 = arith.constant dense<0.000000e+00> : vector<2x8x8xf32>
    %433 = tpu.matmul %431, %432, %cst_241 {dimension_numbers = #tpu.dot_dimension_numbers<[2], [2], [1], [1], [0, 0, 0, 1, 1, 1], [0], [0]>} : vector<2x8x8xf32>, vector<2x8x8xf32>, vector<2x8x8xf32> -> vector<2x8x8xf32>
    "tpu.trace_stop"() : () -> ()
    %cst_242 = arith.constant dense<0xFF800000> : vector<2x8xf32>
    %434 = vector.multi_reduction <maximumf>, %433, %cst_242 [2] : vector<2x8x8xf32> to vector<2x8xf32>
    %435 = vector.shape_cast %434 : vector<2x8xf32> to vector<2x8x1xf32>
    %436 = vector.broadcast %435 : vector<2x8x1xf32> to vector<2x8x8xf32>
    %437 = arith.subf %433, %436 : vector<2x8x8xf32>
    %438 = math.exp %437 : vector<2x8x8xf32>
    %cst_243 = arith.constant dense<0.000000e+00> : vector<2x8xf32>
    %439 = vector.multi_reduction <add>, %438, %cst_243 [2] : vector<2x8x8xf32> to vector<2x8xf32>
    %440 = vector.shape_cast %439 : vector<2x8xf32> to vector<2x8x1xf32>
    %441 = vector.broadcast %440 : vector<2x8x1xf32> to vector<2x8x8xf32>
    %442 = arith.divf %438, %441 : vector<2x8x8xf32>
    %443 = vector.extract_strided_slice %393 {offsets = [0, 0, 16], sizes = [2, 8, 8], strides = [1, 1, 1]} : vector<2x8x32xf32> to vector<2x8x8xf32>
    "tpu.trace_start"() <{level = 10 : i32, message = "bqk,bkd->bqd"}> : () -> ()
    %cst_244 = arith.constant dense<0.000000e+00> : vector<2x8x8xf32>
    %444 = tpu.matmul %442, %443, %cst_244 {dimension_numbers = #tpu.dot_dimension_numbers<[2], [1], [1], [2], [0, 0, 0, 1, 1, 2], [0], [0]>} : vector<2x8x8xf32>, vector<2x8x8xf32>, vector<2x8x8xf32> -> vector<2x8x8xf32>
    "tpu.trace_stop"() : () -> ()
    %445 = vector.shape_cast %444 : vector<2x8x8xf32> to vector<16x8xf32>
    %446 = vector.extract_strided_slice %18 {offsets = [16, 0], sizes = [8, 32], strides = [1, 1]} : vector<32x32xf32> to vector<8x32xf32>
    %cst_245 = arith.constant dense<0.000000e+00> : vector<16x32xf32>
    %447 = tpu.matmul %445, %446, %cst_245 {dimension_numbers = #tpu.dot_dimension_numbers<[1], [0], [0], [1], [0, 0, 1, 1], [], []>} : vector<16x8xf32>, vector<8x32xf32>, vector<16x32xf32> -> vector<16x32xf32>
    %448 = arith.addf %430, %447 : vector<16x32xf32>
    %449 = vector.extract_strided_slice %389 {offsets = [0, 0, 24], sizes = [2, 8, 8], strides = [1, 1, 1]} : vector<2x8x32xf32> to vector<2x8x8xf32>
    %450 = vector.extract_strided_slice %391 {offsets = [0, 0, 24], sizes = [2, 8, 8], strides = [1, 1, 1]} : vector<2x8x32xf32> to vector<2x8x8xf32>
    "tpu.trace_start"() <{level = 10 : i32, message = "bqd,bkd->bqk"}> : () -> ()
    %cst_246 = arith.constant dense<0.000000e+00> : vector<2x8x8xf32>
    %451 = tpu.matmul %449, %450, %cst_246 {dimension_numbers = #tpu.dot_dimension_numbers<[2], [2], [1], [1], [0, 0, 0, 1, 1, 1], [0], [0]>} : vector<2x8x8xf32>, vector<2x8x8xf32>, vector<2x8x8xf32> -> vector<2x8x8xf32>
    "tpu.trace_stop"() : () -> ()
    %cst_247 = arith.constant dense<0xFF800000> : vector<2x8xf32>
    %452 = vector.multi_reduction <maximumf>, %451, %cst_247 [2] : vector<2x8x8xf32> to vector<2x8xf32>
    %453 = vector.shape_cast %452 : vector<2x8xf32> to vector<2x8x1xf32>
    %454 = vector.broadcast %453 : vector<2x8x1xf32> to vector<2x8x8xf32>
    %455 = arith.subf %451, %454 : vector<2x8x8xf32>
    %456 = math.exp %455 : vector<2x8x8xf32>
    %cst_248 = arith.constant dense<0.000000e+00> : vector<2x8xf32>
    %457 = vector.multi_reduction <add>, %456, %cst_248 [2] : vector<2x8x8xf32> to vector<2x8xf32>
    %458 = vector.shape_cast %457 : vector<2x8xf32> to vector<2x8x1xf32>
    %459 = vector.broadcast %458 : vector<2x8x1xf32> to vector<2x8x8xf32>
    %460 = arith.divf %456, %459 : vector<2x8x8xf32>
    %461 = vector.extract_strided_slice %393 {offsets = [0, 0, 24], sizes = [2, 8, 8], strides = [1, 1, 1]} : vector<2x8x32xf32> to vector<2x8x8xf32>
    "tpu.trace_start"() <{level = 10 : i32, message = "bqk,bkd->bqd"}> : () -> ()
    %cst_249 = arith.constant dense<0.000000e+00> : vector<2x8x8xf32>
    %462 = tpu.matmul %460, %461, %cst_249 {dimension_numbers = #tpu.dot_dimension_numbers<[2], [1], [1], [2], [0, 0, 0, 1, 1, 2], [0], [0]>} : vector<2x8x8xf32>, vector<2x8x8xf32>, vector<2x8x8xf32> -> vector<2x8x8xf32>
    "tpu.trace_stop"() : () -> ()
    %463 = vector.shape_cast %462 : vector<2x8x8xf32> to vector<16x8xf32>
    %464 = vector.extract_strided_slice %18 {offsets = [24, 0], sizes = [8, 32], strides = [1, 1]} : vector<32x32xf32> to vector<8x32xf32>
    %cst_250 = arith.constant dense<0.000000e+00> : vector<16x32xf32>
    %465 = tpu.matmul %463, %464, %cst_250 {dimension_numbers = #tpu.dot_dimension_numbers<[1], [0], [0], [1], [0, 0, 1, 1], [], []>} : vector<16x8xf32>, vector<8x32xf32>, vector<16x32xf32> -> vector<16x32xf32>
    %466 = arith.addf %448, %465 : vector<16x32xf32>
    %467 = vector.broadcast %16 : vector<1x32xf32> to vector<16x32xf32>
    %468 = arith.addf %466, %467 : vector<16x32xf32>
    %469 = vector.shape_cast %468 : vector<16x32xf32> to vector<2x8x32xf32>
    %470 = arith.addf %85, %469 : vector<2x8x32xf32>
    %471 = vector.shape_cast %470 : vector<2x8x32xf32> to vector<16x32xf32>
    %cst_251 = arith.constant dense<0.000000e+00> : vector<16xf32>
    %472 = vector.multi_reduction <add>, %471, %cst_251 [1] : vector<16x32xf32> to vector<16xf32>
    %473 = vector.shape_cast %472 : vector<16xf32> to vector<16x1xf32>
    %cst_252 = arith.constant 3.200000e+01 : f32
    %474 = vector.broadcast %cst_252 : f32 to vector<16x1xf32>
    %475 = arith.divf %473, %474 : vector<16x1xf32>
    %476 = vector.broadcast %475 : vector<16x1xf32> to vector<16x32xf32>
    %477 = arith.subf %471, %476 : vector<16x32xf32>
    %478 = arith.mulf %477, %477 : vector<16x32xf32>
    %cst_253 = arith.constant dense<0.000000e+00> : vector<16xf32>
    %479 = vector.multi_reduction <add>, %478, %cst_253 [1] : vector<16x32xf32> to vector<16xf32>
    %480 = vector.shape_cast %479 : vector<16xf32> to vector<16x1xf32>
    %cst_254 = arith.constant 3.200000e+01 : f32
    %481 = vector.broadcast %cst_254 : f32 to vector<16x1xf32>
    %482 = arith.divf %480, %481 : vector<16x1xf32>
    %cst_255 = arith.constant 9.99999974E-6 : f32
    %483 = vector.broadcast %cst_255 : f32 to vector<16x1xf32>
    %484 = arith.addf %482, %483 : vector<16x1xf32>
    %485 = math.rsqrt %484 : vector<16x1xf32>
    %486 = vector.broadcast %485 : vector<16x1xf32> to vector<16x32xf32>
    %487 = arith.mulf %477, %486 : vector<16x32xf32>
    %488 = vector.broadcast %10 : vector<1x32xf32> to vector<16x32xf32>
    %489 = arith.mulf %487, %488 : vector<16x32xf32>
    %490 = vector.broadcast %11 : vector<1x32xf32> to vector<16x32xf32>
    %491 = arith.addf %489, %490 : vector<16x32xf32>
    %492 = vector.shape_cast %491 : vector<16x32xf32> to vector<2x8x32xf32>
    %493 = vector.shape_cast %492 : vector<2x8x32xf32> to vector<16x32xf32>
    %cst_256 = arith.constant dense<0.000000e+00> : vector<16x32xf32>
    %494 = tpu.matmul %493, %5, %cst_256 {dimension_numbers = #tpu.dot_dimension_numbers<[1], [0], [0], [1], [0, 0, 1, 1], [], []>} : vector<16x32xf32>, vector<32x32xf32>, vector<16x32xf32> -> vector<16x32xf32>
    %495 = vector.broadcast %2 : vector<1x32xf32> to vector<16x32xf32>
    %496 = arith.addf %494, %495 : vector<16x32xf32>
    %497 = vector.shape_cast %496 : vector<16x32xf32> to vector<2x8x32xf32>
    %498 = vector.shape_cast %383 : vector<2x8x32xf32> to vector<16x32xf32>
    %cst_257 = arith.constant dense<0.000000e+00> : vector<16x64xf32>
    %499 = tpu.matmul %498, %3, %cst_257 {dimension_numbers = #tpu.dot_dimension_numbers<[1], [0], [0], [1], [0, 0, 1, 1], [], []>} : vector<16x32xf32>, vector<32x64xf32>, vector<16x64xf32> -> vector<16x64xf32>
    %500 = vector.broadcast %0 : vector<1x64xf32> to vector<16x64xf32>
    %501 = arith.addf %499, %500 : vector<16x64xf32>
    %502 = vector.extract_strided_slice %501 {offsets = [0, 0], sizes = [16, 32], strides = [1, 1]} : vector<16x64xf32> to vector<16x32xf32>
    %503 = vector.shape_cast %502 : vector<16x32xf32> to vector<2x8x32xf32>
    %504 = vector.extract_strided_slice %501 {offsets = [0, 32], sizes = [16, 32], strides = [1, 1]} : vector<16x64xf32> to vector<16x32xf32>
    %505 = vector.shape_cast %504 : vector<16x32xf32> to vector<2x8x32xf32>
    %cst_258 = arith.constant 0.000000e+00 : f32
    %506 = vector.broadcast %cst_258 : f32 to vector<16x32xf32>
    %507 = vector.extract_strided_slice %497 {offsets = [0, 0, 0], sizes = [2, 8, 8], strides = [1, 1, 1]} : vector<2x8x32xf32> to vector<2x8x8xf32>
    %508 = vector.extract_strided_slice %503 {offsets = [0, 0, 0], sizes = [2, 8, 8], strides = [1, 1, 1]} : vector<2x8x32xf32> to vector<2x8x8xf32>
    "tpu.trace_start"() <{level = 10 : i32, message = "bqd,bkd->bqk"}> : () -> ()
    %cst_259 = arith.constant dense<0.000000e+00> : vector<2x8x8xf32>
    %509 = tpu.matmul %507, %508, %cst_259 {dimension_numbers = #tpu.dot_dimension_numbers<[2], [2], [1], [1], [0, 0, 0, 1, 1, 1], [0], [0]>} : vector<2x8x8xf32>, vector<2x8x8xf32>, vector<2x8x8xf32> -> vector<2x8x8xf32>
    "tpu.trace_stop"() : () -> ()
    %cst_260 = arith.constant dense<0xFF800000> : vector<2x8xf32>
    %510 = vector.multi_reduction <maximumf>, %509, %cst_260 [2] : vector<2x8x8xf32> to vector<2x8xf32>
    %511 = vector.shape_cast %510 : vector<2x8xf32> to vector<2x8x1xf32>
    %512 = vector.broadcast %511 : vector<2x8x1xf32> to vector<2x8x8xf32>
    %513 = arith.subf %509, %512 : vector<2x8x8xf32>
    %514 = math.exp %513 : vector<2x8x8xf32>
    %cst_261 = arith.constant dense<0.000000e+00> : vector<2x8xf32>
    %515 = vector.multi_reduction <add>, %514, %cst_261 [2] : vector<2x8x8xf32> to vector<2x8xf32>
    %516 = vector.shape_cast %515 : vector<2x8xf32> to vector<2x8x1xf32>
    %517 = vector.broadcast %516 : vector<2x8x1xf32> to vector<2x8x8xf32>
    %518 = arith.divf %514, %517 : vector<2x8x8xf32>
    %519 = vector.extract_strided_slice %505 {offsets = [0, 0, 0], sizes = [2, 8, 8], strides = [1, 1, 1]} : vector<2x8x32xf32> to vector<2x8x8xf32>
    "tpu.trace_start"() <{level = 10 : i32, message = "bqk,bkd->bqd"}> : () -> ()
    %cst_262 = arith.constant dense<0.000000e+00> : vector<2x8x8xf32>
    %520 = tpu.matmul %518, %519, %cst_262 {dimension_numbers = #tpu.dot_dimension_numbers<[2], [1], [1], [2], [0, 0, 0, 1, 1, 2], [0], [0]>} : vector<2x8x8xf32>, vector<2x8x8xf32>, vector<2x8x8xf32> -> vector<2x8x8xf32>
    "tpu.trace_stop"() : () -> ()
    %521 = vector.shape_cast %520 : vector<2x8x8xf32> to vector<16x8xf32>
    %522 = vector.extract_strided_slice %4 {offsets = [0, 0], sizes = [8, 32], strides = [1, 1]} : vector<32x32xf32> to vector<8x32xf32>
    %cst_263 = arith.constant dense<0.000000e+00> : vector<16x32xf32>
    %523 = tpu.matmul %521, %522, %cst_263 {dimension_numbers = #tpu.dot_dimension_numbers<[1], [0], [0], [1], [0, 0, 1, 1], [], []>} : vector<16x8xf32>, vector<8x32xf32>, vector<16x32xf32> -> vector<16x32xf32>
    %524 = arith.addf %506, %523 : vector<16x32xf32>
    %525 = vector.extract_strided_slice %497 {offsets = [0, 0, 8], sizes = [2, 8, 8], strides = [1, 1, 1]} : vector<2x8x32xf32> to vector<2x8x8xf32>
    %526 = vector.extract_strided_slice %503 {offsets = [0, 0, 8], sizes = [2, 8, 8], strides = [1, 1, 1]} : vector<2x8x32xf32> to vector<2x8x8xf32>
    "tpu.trace_start"() <{level = 10 : i32, message = "bqd,bkd->bqk"}> : () -> ()
    %cst_264 = arith.constant dense<0.000000e+00> : vector<2x8x8xf32>
    %527 = tpu.matmul %525, %526, %cst_264 {dimension_numbers = #tpu.dot_dimension_numbers<[2], [2], [1], [1], [0, 0, 0, 1, 1, 1], [0], [0]>} : vector<2x8x8xf32>, vector<2x8x8xf32>, vector<2x8x8xf32> -> vector<2x8x8xf32>
    "tpu.trace_stop"() : () -> ()
    %cst_265 = arith.constant dense<0xFF800000> : vector<2x8xf32>
    %528 = vector.multi_reduction <maximumf>, %527, %cst_265 [2] : vector<2x8x8xf32> to vector<2x8xf32>
    %529 = vector.shape_cast %528 : vector<2x8xf32> to vector<2x8x1xf32>
    %530 = vector.broadcast %529 : vector<2x8x1xf32> to vector<2x8x8xf32>
    %531 = arith.subf %527, %530 : vector<2x8x8xf32>
    %532 = math.exp %531 : vector<2x8x8xf32>
    %cst_266 = arith.constant dense<0.000000e+00> : vector<2x8xf32>
    %533 = vector.multi_reduction <add>, %532, %cst_266 [2] : vector<2x8x8xf32> to vector<2x8xf32>
    %534 = vector.shape_cast %533 : vector<2x8xf32> to vector<2x8x1xf32>
    %535 = vector.broadcast %534 : vector<2x8x1xf32> to vector<2x8x8xf32>
    %536 = arith.divf %532, %535 : vector<2x8x8xf32>
    %537 = vector.extract_strided_slice %505 {offsets = [0, 0, 8], sizes = [2, 8, 8], strides = [1, 1, 1]} : vector<2x8x32xf32> to vector<2x8x8xf32>
    "tpu.trace_start"() <{level = 10 : i32, message = "bqk,bkd->bqd"}> : () -> ()
    %cst_267 = arith.constant dense<0.000000e+00> : vector<2x8x8xf32>
    %538 = tpu.matmul %536, %537, %cst_267 {dimension_numbers = #tpu.dot_dimension_numbers<[2], [1], [1], [2], [0, 0, 0, 1, 1, 2], [0], [0]>} : vector<2x8x8xf32>, vector<2x8x8xf32>, vector<2x8x8xf32> -> vector<2x8x8xf32>
    "tpu.trace_stop"() : () -> ()
    %539 = vector.shape_cast %538 : vector<2x8x8xf32> to vector<16x8xf32>
    %540 = vector.extract_strided_slice %4 {offsets = [8, 0], sizes = [8, 32], strides = [1, 1]} : vector<32x32xf32> to vector<8x32xf32>
    %cst_268 = arith.constant dense<0.000000e+00> : vector<16x32xf32>
    %541 = tpu.matmul %539, %540, %cst_268 {dimension_numbers = #tpu.dot_dimension_numbers<[1], [0], [0], [1], [0, 0, 1, 1], [], []>} : vector<16x8xf32>, vector<8x32xf32>, vector<16x32xf32> -> vector<16x32xf32>
    %542 = arith.addf %524, %541 : vector<16x32xf32>
    %543 = vector.extract_strided_slice %497 {offsets = [0, 0, 16], sizes = [2, 8, 8], strides = [1, 1, 1]} : vector<2x8x32xf32> to vector<2x8x8xf32>
    %544 = vector.extract_strided_slice %503 {offsets = [0, 0, 16], sizes = [2, 8, 8], strides = [1, 1, 1]} : vector<2x8x32xf32> to vector<2x8x8xf32>
    "tpu.trace_start"() <{level = 10 : i32, message = "bqd,bkd->bqk"}> : () -> ()
    %cst_269 = arith.constant dense<0.000000e+00> : vector<2x8x8xf32>
    %545 = tpu.matmul %543, %544, %cst_269 {dimension_numbers = #tpu.dot_dimension_numbers<[2], [2], [1], [1], [0, 0, 0, 1, 1, 1], [0], [0]>} : vector<2x8x8xf32>, vector<2x8x8xf32>, vector<2x8x8xf32> -> vector<2x8x8xf32>
    "tpu.trace_stop"() : () -> ()
    %cst_270 = arith.constant dense<0xFF800000> : vector<2x8xf32>
    %546 = vector.multi_reduction <maximumf>, %545, %cst_270 [2] : vector<2x8x8xf32> to vector<2x8xf32>
    %547 = vector.shape_cast %546 : vector<2x8xf32> to vector<2x8x1xf32>
    %548 = vector.broadcast %547 : vector<2x8x1xf32> to vector<2x8x8xf32>
    %549 = arith.subf %545, %548 : vector<2x8x8xf32>
    %550 = math.exp %549 : vector<2x8x8xf32>
    %cst_271 = arith.constant dense<0.000000e+00> : vector<2x8xf32>
    %551 = vector.multi_reduction <add>, %550, %cst_271 [2] : vector<2x8x8xf32> to vector<2x8xf32>
    %552 = vector.shape_cast %551 : vector<2x8xf32> to vector<2x8x1xf32>
    %553 = vector.broadcast %552 : vector<2x8x1xf32> to vector<2x8x8xf32>
    %554 = arith.divf %550, %553 : vector<2x8x8xf32>
    %555 = vector.extract_strided_slice %505 {offsets = [0, 0, 16], sizes = [2, 8, 8], strides = [1, 1, 1]} : vector<2x8x32xf32> to vector<2x8x8xf32>
    "tpu.trace_start"() <{level = 10 : i32, message = "bqk,bkd->bqd"}> : () -> ()
    %cst_272 = arith.constant dense<0.000000e+00> : vector<2x8x8xf32>
    %556 = tpu.matmul %554, %555, %cst_272 {dimension_numbers = #tpu.dot_dimension_numbers<[2], [1], [1], [2], [0, 0, 0, 1, 1, 2], [0], [0]>} : vector<2x8x8xf32>, vector<2x8x8xf32>, vector<2x8x8xf32> -> vector<2x8x8xf32>
    "tpu.trace_stop"() : () -> ()
    %557 = vector.shape_cast %556 : vector<2x8x8xf32> to vector<16x8xf32>
    %558 = vector.extract_strided_slice %4 {offsets = [16, 0], sizes = [8, 32], strides = [1, 1]} : vector<32x32xf32> to vector<8x32xf32>
    %cst_273 = arith.constant dense<0.000000e+00> : vector<16x32xf32>
    %559 = tpu.matmul %557, %558, %cst_273 {dimension_numbers = #tpu.dot_dimension_numbers<[1], [0], [0], [1], [0, 0, 1, 1], [], []>} : vector<16x8xf32>, vector<8x32xf32>, vector<16x32xf32> -> vector<16x32xf32>
    %560 = arith.addf %542, %559 : vector<16x32xf32>
    %561 = vector.extract_strided_slice %497 {offsets = [0, 0, 24], sizes = [2, 8, 8], strides = [1, 1, 1]} : vector<2x8x32xf32> to vector<2x8x8xf32>
    %562 = vector.extract_strided_slice %503 {offsets = [0, 0, 24], sizes = [2, 8, 8], strides = [1, 1, 1]} : vector<2x8x32xf32> to vector<2x8x8xf32>
    "tpu.trace_start"() <{level = 10 : i32, message = "bqd,bkd->bqk"}> : () -> ()
    %cst_274 = arith.constant dense<0.000000e+00> : vector<2x8x8xf32>
    %563 = tpu.matmul %561, %562, %cst_274 {dimension_numbers = #tpu.dot_dimension_numbers<[2], [2], [1], [1], [0, 0, 0, 1, 1, 1], [0], [0]>} : vector<2x8x8xf32>, vector<2x8x8xf32>, vector<2x8x8xf32> -> vector<2x8x8xf32>
    "tpu.trace_stop"() : () -> ()
    %cst_275 = arith.constant dense<0xFF800000> : vector<2x8xf32>
    %564 = vector.multi_reduction <maximumf>, %563, %cst_275 [2] : vector<2x8x8xf32> to vector<2x8xf32>
    %565 = vector.shape_cast %564 : vector<2x8xf32> to vector<2x8x1xf32>
    %566 = vector.broadcast %565 : vector<2x8x1xf32> to vector<2x8x8xf32>
    %567 = arith.subf %563, %566 : vector<2x8x8xf32>
    %568 = math.exp %567 : vector<2x8x8xf32>
    %cst_276 = arith.constant dense<0.000000e+00> : vector<2x8xf32>
    %569 = vector.multi_reduction <add>, %568, %cst_276 [2] : vector<2x8x8xf32> to vector<2x8xf32>
    %570 = vector.shape_cast %569 : vector<2x8xf32> to vector<2x8x1xf32>
    %571 = vector.broadcast %570 : vector<2x8x1xf32> to vector<2x8x8xf32>
    %572 = arith.divf %568, %571 : vector<2x8x8xf32>
    %573 = vector.extract_strided_slice %505 {offsets = [0, 0, 24], sizes = [2, 8, 8], strides = [1, 1, 1]} : vector<2x8x32xf32> to vector<2x8x8xf32>
    "tpu.trace_start"() <{level = 10 : i32, message = "bqk,bkd->bqd"}> : () -> ()
    %cst_277 = arith.constant dense<0.000000e+00> : vector<2x8x8xf32>
    %574 = tpu.matmul %572, %573, %cst_277 {dimension_numbers = #tpu.dot_dimension_numbers<[2], [1], [1], [2], [0, 0, 0, 1, 1, 2], [0], [0]>} : vector<2x8x8xf32>, vector<2x8x8xf32>, vector<2x8x8xf32> -> vector<2x8x8xf32>
    "tpu.trace_stop"() : () -> ()
    %575 = vector.shape_cast %574 : vector<2x8x8xf32> to vector<16x8xf32>
    %576 = vector.extract_strided_slice %4 {offsets = [24, 0], sizes = [8, 32], strides = [1, 1]} : vector<32x32xf32> to vector<8x32xf32>
    %cst_278 = arith.constant dense<0.000000e+00> : vector<16x32xf32>
    %577 = tpu.matmul %575, %576, %cst_278 {dimension_numbers = #tpu.dot_dimension_numbers<[1], [0], [0], [1], [0, 0, 1, 1], [], []>} : vector<16x8xf32>, vector<8x32xf32>, vector<16x32xf32> -> vector<16x32xf32>
    %578 = arith.addf %560, %577 : vector<16x32xf32>
    %579 = vector.broadcast %1 : vector<1x32xf32> to vector<16x32xf32>
    %580 = arith.addf %578, %579 : vector<16x32xf32>
    %581 = vector.shape_cast %580 : vector<16x32xf32> to vector<2x8x32xf32>
    %582 = arith.addf %492, %581 : vector<2x8x32xf32>
    %583 = vector.shape_cast %582 : vector<2x8x32xf32> to vector<16x32xf32>
    %cst_279 = arith.constant dense<0.000000e+00> : vector<16xf32>
    %584 = vector.multi_reduction <add>, %583, %cst_279 [1] : vector<16x32xf32> to vector<16xf32>
    %585 = vector.shape_cast %584 : vector<16xf32> to vector<16x1xf32>
    %cst_280 = arith.constant 3.200000e+01 : f32
    %586 = vector.broadcast %cst_280 : f32 to vector<16x1xf32>
    %587 = arith.divf %585, %586 : vector<16x1xf32>
    %588 = vector.broadcast %587 : vector<16x1xf32> to vector<16x32xf32>
    %589 = arith.subf %583, %588 : vector<16x32xf32>
    %590 = arith.mulf %589, %589 : vector<16x32xf32>
    %cst_281 = arith.constant dense<0.000000e+00> : vector<16xf32>
    %591 = vector.multi_reduction <add>, %590, %cst_281 [1] : vector<16x32xf32> to vector<16xf32>
    %592 = vector.shape_cast %591 : vector<16xf32> to vector<16x1xf32>
    %cst_282 = arith.constant 3.200000e+01 : f32
    %593 = vector.broadcast %cst_282 : f32 to vector<16x1xf32>
    %594 = arith.divf %592, %593 : vector<16x1xf32>
    %cst_283 = arith.constant 9.99999974E-6 : f32
    %595 = vector.broadcast %cst_283 : f32 to vector<16x1xf32>
    %596 = arith.addf %594, %595 : vector<16x1xf32>
    %597 = math.rsqrt %596 : vector<16x1xf32>
    %598 = vector.broadcast %597 : vector<16x1xf32> to vector<16x32xf32>
    %599 = arith.mulf %589, %598 : vector<16x32xf32>
    %600 = vector.broadcast %12 : vector<1x32xf32> to vector<16x32xf32>
    %601 = arith.mulf %599, %600 : vector<16x32xf32>
    %602 = vector.broadcast %13 : vector<1x32xf32> to vector<16x32xf32>
    %603 = arith.addf %601, %602 : vector<16x32xf32>
    %cst_284 = arith.constant dense<0.000000e+00> : vector<16x64xf32>
    %604 = tpu.matmul %603, %6, %cst_284 {dimension_numbers = #tpu.dot_dimension_numbers<[1], [0], [0], [1], [0, 0, 1, 1], [], []>} : vector<16x32xf32>, vector<32x64xf32>, vector<16x64xf32> -> vector<16x64xf32>
    %605 = vector.broadcast %7 : vector<1x64xf32> to vector<16x64xf32>
    %606 = arith.addf %604, %605 : vector<16x64xf32>
    %cst_285 = arith.constant 0.000000e+00 : f32
    %607 = vector.broadcast %cst_285 : f32 to vector<16x64xf32>
    %608 = arith.maximumf %606, %607 : vector<16x64xf32>
    %cst_286 = arith.constant dense<0.000000e+00> : vector<16x32xf32>
    %609 = tpu.matmul %608, %8, %cst_286 {dimension_numbers = #tpu.dot_dimension_numbers<[1], [0], [0], [1], [0, 0, 1, 1], [], []>} : vector<16x64xf32>, vector<64x32xf32>, vector<16x32xf32> -> vector<16x32xf32>
    %610 = vector.broadcast %9 : vector<1x32xf32> to vector<16x32xf32>
    %611 = arith.addf %609, %610 : vector<16x32xf32>
    %612 = arith.addf %603, %611 : vector<16x32xf32>
    %cst_287 = arith.constant dense<0.000000e+00> : vector<16xf32>
    %613 = vector.multi_reduction <add>, %612, %cst_287 [1] : vector<16x32xf32> to vector<16xf32>
    %614 = vector.shape_cast %613 : vector<16xf32> to vector<16x1xf32>
    %cst_288 = arith.constant 3.200000e+01 : f32
    %615 = vector.broadcast %cst_288 : f32 to vector<16x1xf32>
    %616 = arith.divf %614, %615 : vector<16x1xf32>
    %617 = vector.broadcast %616 : vector<16x1xf32> to vector<16x32xf32>
    %618 = arith.subf %612, %617 : vector<16x32xf32>
    %619 = arith.mulf %618, %618 : vector<16x32xf32>
    %cst_289 = arith.constant dense<0.000000e+00> : vector<16xf32>
    %620 = vector.multi_reduction <add>, %619, %cst_289 [1] : vector<16x32xf32> to vector<16xf32>
    %621 = vector.shape_cast %620 : vector<16xf32> to vector<16x1xf32>
    %cst_290 = arith.constant 3.200000e+01 : f32
    %622 = vector.broadcast %cst_290 : f32 to vector<16x1xf32>
    %623 = arith.divf %621, %622 : vector<16x1xf32>
    %cst_291 = arith.constant 9.99999974E-6 : f32
    %624 = vector.broadcast %cst_291 : f32 to vector<16x1xf32>
    %625 = arith.addf %623, %624 : vector<16x1xf32>
    %626 = math.rsqrt %625 : vector<16x1xf32>
    %627 = vector.broadcast %626 : vector<16x1xf32> to vector<16x32xf32>
    %628 = arith.mulf %618, %627 : vector<16x32xf32>
    %629 = vector.broadcast %14 : vector<1x32xf32> to vector<16x32xf32>
    %630 = arith.mulf %628, %629 : vector<16x32xf32>
    %631 = vector.broadcast %15 : vector<1x32xf32> to vector<16x32xf32>
    %632 = arith.addf %630, %631 : vector<16x32xf32>
    %633 = vector.shape_cast %632 : vector<16x32xf32> to vector<2x8x32xf32>
    %634 = vector.shape_cast %633 : vector<2x8x32xf32> to vector<16x32xf32>
    %cst_292 = arith.constant dense<0.000000e+00> : vector<16x96xf32>
    %635 = tpu.matmul %634, %39, %cst_292 {dimension_numbers = #tpu.dot_dimension_numbers<[1], [0], [0], [1], [0, 0, 1, 1], [], []>} : vector<16x32xf32>, vector<32x96xf32>, vector<16x96xf32> -> vector<16x96xf32>
    %636 = vector.broadcast %37 : vector<1x96xf32> to vector<16x96xf32>
    %637 = arith.addf %635, %636 : vector<16x96xf32>
    %638 = vector.extract_strided_slice %637 {offsets = [0, 0], sizes = [16, 32], strides = [1, 1]} : vector<16x96xf32> to vector<16x32xf32>
    %639 = vector.shape_cast %638 : vector<16x32xf32> to vector<2x8x32xf32>
    %640 = vector.extract_strided_slice %637 {offsets = [0, 32], sizes = [16, 32], strides = [1, 1]} : vector<16x96xf32> to vector<16x32xf32>
    %641 = vector.shape_cast %640 : vector<16x32xf32> to vector<2x8x32xf32>
    %642 = vector.extract_strided_slice %637 {offsets = [0, 64], sizes = [16, 32], strides = [1, 1]} : vector<16x96xf32> to vector<16x32xf32>
    %643 = vector.shape_cast %642 : vector<16x32xf32> to vector<2x8x32xf32>
    %cst_293 = arith.constant 0.000000e+00 : f32
    %644 = vector.broadcast %cst_293 : f32 to vector<16x32xf32>
    %645 = vector.extract_strided_slice %639 {offsets = [0, 0, 0], sizes = [2, 8, 8], strides = [1, 1, 1]} : vector<2x8x32xf32> to vector<2x8x8xf32>
    %646 = vector.extract_strided_slice %641 {offsets = [0, 0, 0], sizes = [2, 8, 8], strides = [1, 1, 1]} : vector<2x8x32xf32> to vector<2x8x8xf32>
    "tpu.trace_start"() <{level = 10 : i32, message = "bqd,bkd->bqk"}> : () -> ()
    %cst_294 = arith.constant dense<0.000000e+00> : vector<2x8x8xf32>
    %647 = tpu.matmul %645, %646, %cst_294 {dimension_numbers = #tpu.dot_dimension_numbers<[2], [2], [1], [1], [0, 0, 0, 1, 1, 1], [0], [0]>} : vector<2x8x8xf32>, vector<2x8x8xf32>, vector<2x8x8xf32> -> vector<2x8x8xf32>
    "tpu.trace_stop"() : () -> ()
    %cst_295 = arith.constant dense<0xFF800000> : vector<2x8xf32>
    %648 = vector.multi_reduction <maximumf>, %647, %cst_295 [2] : vector<2x8x8xf32> to vector<2x8xf32>
    %649 = vector.shape_cast %648 : vector<2x8xf32> to vector<2x8x1xf32>
    %650 = vector.broadcast %649 : vector<2x8x1xf32> to vector<2x8x8xf32>
    %651 = arith.subf %647, %650 : vector<2x8x8xf32>
    %652 = math.exp %651 : vector<2x8x8xf32>
    %cst_296 = arith.constant dense<0.000000e+00> : vector<2x8xf32>
    %653 = vector.multi_reduction <add>, %652, %cst_296 [2] : vector<2x8x8xf32> to vector<2x8xf32>
    %654 = vector.shape_cast %653 : vector<2x8xf32> to vector<2x8x1xf32>
    %655 = vector.broadcast %654 : vector<2x8x1xf32> to vector<2x8x8xf32>
    %656 = arith.divf %652, %655 : vector<2x8x8xf32>
    %657 = vector.extract_strided_slice %643 {offsets = [0, 0, 0], sizes = [2, 8, 8], strides = [1, 1, 1]} : vector<2x8x32xf32> to vector<2x8x8xf32>
    "tpu.trace_start"() <{level = 10 : i32, message = "bqk,bkd->bqd"}> : () -> ()
    %cst_297 = arith.constant dense<0.000000e+00> : vector<2x8x8xf32>
    %658 = tpu.matmul %656, %657, %cst_297 {dimension_numbers = #tpu.dot_dimension_numbers<[2], [1], [1], [2], [0, 0, 0, 1, 1, 2], [0], [0]>} : vector<2x8x8xf32>, vector<2x8x8xf32>, vector<2x8x8xf32> -> vector<2x8x8xf32>
    "tpu.trace_stop"() : () -> ()
    %659 = vector.shape_cast %658 : vector<2x8x8xf32> to vector<16x8xf32>
    %660 = vector.extract_strided_slice %38 {offsets = [0, 0], sizes = [8, 32], strides = [1, 1]} : vector<32x32xf32> to vector<8x32xf32>
    %cst_298 = arith.constant dense<0.000000e+00> : vector<16x32xf32>
    %661 = tpu.matmul %659, %660, %cst_298 {dimension_numbers = #tpu.dot_dimension_numbers<[1], [0], [0], [1], [0, 0, 1, 1], [], []>} : vector<16x8xf32>, vector<8x32xf32>, vector<16x32xf32> -> vector<16x32xf32>
    %662 = arith.addf %644, %661 : vector<16x32xf32>
    %663 = vector.extract_strided_slice %639 {offsets = [0, 0, 8], sizes = [2, 8, 8], strides = [1, 1, 1]} : vector<2x8x32xf32> to vector<2x8x8xf32>
    %664 = vector.extract_strided_slice %641 {offsets = [0, 0, 8], sizes = [2, 8, 8], strides = [1, 1, 1]} : vector<2x8x32xf32> to vector<2x8x8xf32>
    "tpu.trace_start"() <{level = 10 : i32, message = "bqd,bkd->bqk"}> : () -> ()
    %cst_299 = arith.constant dense<0.000000e+00> : vector<2x8x8xf32>
    %665 = tpu.matmul %663, %664, %cst_299 {dimension_numbers = #tpu.dot_dimension_numbers<[2], [2], [1], [1], [0, 0, 0, 1, 1, 1], [0], [0]>} : vector<2x8x8xf32>, vector<2x8x8xf32>, vector<2x8x8xf32> -> vector<2x8x8xf32>
    "tpu.trace_stop"() : () -> ()
    %cst_300 = arith.constant dense<0xFF800000> : vector<2x8xf32>
    %666 = vector.multi_reduction <maximumf>, %665, %cst_300 [2] : vector<2x8x8xf32> to vector<2x8xf32>
    %667 = vector.shape_cast %666 : vector<2x8xf32> to vector<2x8x1xf32>
    %668 = vector.broadcast %667 : vector<2x8x1xf32> to vector<2x8x8xf32>
    %669 = arith.subf %665, %668 : vector<2x8x8xf32>
    %670 = math.exp %669 : vector<2x8x8xf32>
    %cst_301 = arith.constant dense<0.000000e+00> : vector<2x8xf32>
    %671 = vector.multi_reduction <add>, %670, %cst_301 [2] : vector<2x8x8xf32> to vector<2x8xf32>
    %672 = vector.shape_cast %671 : vector<2x8xf32> to vector<2x8x1xf32>
    %673 = vector.broadcast %672 : vector<2x8x1xf32> to vector<2x8x8xf32>
    %674 = arith.divf %670, %673 : vector<2x8x8xf32>
    %675 = vector.extract_strided_slice %643 {offsets = [0, 0, 8], sizes = [2, 8, 8], strides = [1, 1, 1]} : vector<2x8x32xf32> to vector<2x8x8xf32>
    "tpu.trace_start"() <{level = 10 : i32, message = "bqk,bkd->bqd"}> : () -> ()
    %cst_302 = arith.constant dense<0.000000e+00> : vector<2x8x8xf32>
    %676 = tpu.matmul %674, %675, %cst_302 {dimension_numbers = #tpu.dot_dimension_numbers<[2], [1], [1], [2], [0, 0, 0, 1, 1, 2], [0], [0]>} : vector<2x8x8xf32>, vector<2x8x8xf32>, vector<2x8x8xf32> -> vector<2x8x8xf32>
    "tpu.trace_stop"() : () -> ()
    %677 = vector.shape_cast %676 : vector<2x8x8xf32> to vector<16x8xf32>
    %678 = vector.extract_strided_slice %38 {offsets = [8, 0], sizes = [8, 32], strides = [1, 1]} : vector<32x32xf32> to vector<8x32xf32>
    %cst_303 = arith.constant dense<0.000000e+00> : vector<16x32xf32>
    %679 = tpu.matmul %677, %678, %cst_303 {dimension_numbers = #tpu.dot_dimension_numbers<[1], [0], [0], [1], [0, 0, 1, 1], [], []>} : vector<16x8xf32>, vector<8x32xf32>, vector<16x32xf32> -> vector<16x32xf32>
    %680 = arith.addf %662, %679 : vector<16x32xf32>
    %681 = vector.extract_strided_slice %639 {offsets = [0, 0, 16], sizes = [2, 8, 8], strides = [1, 1, 1]} : vector<2x8x32xf32> to vector<2x8x8xf32>
    %682 = vector.extract_strided_slice %641 {offsets = [0, 0, 16], sizes = [2, 8, 8], strides = [1, 1, 1]} : vector<2x8x32xf32> to vector<2x8x8xf32>
    "tpu.trace_start"() <{level = 10 : i32, message = "bqd,bkd->bqk"}> : () -> ()
    %cst_304 = arith.constant dense<0.000000e+00> : vector<2x8x8xf32>
    %683 = tpu.matmul %681, %682, %cst_304 {dimension_numbers = #tpu.dot_dimension_numbers<[2], [2], [1], [1], [0, 0, 0, 1, 1, 1], [0], [0]>} : vector<2x8x8xf32>, vector<2x8x8xf32>, vector<2x8x8xf32> -> vector<2x8x8xf32>
    "tpu.trace_stop"() : () -> ()
    %cst_305 = arith.constant dense<0xFF800000> : vector<2x8xf32>
    %684 = vector.multi_reduction <maximumf>, %683, %cst_305 [2] : vector<2x8x8xf32> to vector<2x8xf32>
    %685 = vector.shape_cast %684 : vector<2x8xf32> to vector<2x8x1xf32>
    %686 = vector.broadcast %685 : vector<2x8x1xf32> to vector<2x8x8xf32>
    %687 = arith.subf %683, %686 : vector<2x8x8xf32>
    %688 = math.exp %687 : vector<2x8x8xf32>
    %cst_306 = arith.constant dense<0.000000e+00> : vector<2x8xf32>
    %689 = vector.multi_reduction <add>, %688, %cst_306 [2] : vector<2x8x8xf32> to vector<2x8xf32>
    %690 = vector.shape_cast %689 : vector<2x8xf32> to vector<2x8x1xf32>
    %691 = vector.broadcast %690 : vector<2x8x1xf32> to vector<2x8x8xf32>
    %692 = arith.divf %688, %691 : vector<2x8x8xf32>
    %693 = vector.extract_strided_slice %643 {offsets = [0, 0, 16], sizes = [2, 8, 8], strides = [1, 1, 1]} : vector<2x8x32xf32> to vector<2x8x8xf32>
    "tpu.trace_start"() <{level = 10 : i32, message = "bqk,bkd->bqd"}> : () -> ()
    %cst_307 = arith.constant dense<0.000000e+00> : vector<2x8x8xf32>
    %694 = tpu.matmul %692, %693, %cst_307 {dimension_numbers = #tpu.dot_dimension_numbers<[2], [1], [1], [2], [0, 0, 0, 1, 1, 2], [0], [0]>} : vector<2x8x8xf32>, vector<2x8x8xf32>, vector<2x8x8xf32> -> vector<2x8x8xf32>
    "tpu.trace_stop"() : () -> ()
    %695 = vector.shape_cast %694 : vector<2x8x8xf32> to vector<16x8xf32>
    %696 = vector.extract_strided_slice %38 {offsets = [16, 0], sizes = [8, 32], strides = [1, 1]} : vector<32x32xf32> to vector<8x32xf32>
    %cst_308 = arith.constant dense<0.000000e+00> : vector<16x32xf32>
    %697 = tpu.matmul %695, %696, %cst_308 {dimension_numbers = #tpu.dot_dimension_numbers<[1], [0], [0], [1], [0, 0, 1, 1], [], []>} : vector<16x8xf32>, vector<8x32xf32>, vector<16x32xf32> -> vector<16x32xf32>
    %698 = arith.addf %680, %697 : vector<16x32xf32>
    %699 = vector.extract_strided_slice %639 {offsets = [0, 0, 24], sizes = [2, 8, 8], strides = [1, 1, 1]} : vector<2x8x32xf32> to vector<2x8x8xf32>
    %700 = vector.extract_strided_slice %641 {offsets = [0, 0, 24], sizes = [2, 8, 8], strides = [1, 1, 1]} : vector<2x8x32xf32> to vector<2x8x8xf32>
    "tpu.trace_start"() <{level = 10 : i32, message = "bqd,bkd->bqk"}> : () -> ()
    %cst_309 = arith.constant dense<0.000000e+00> : vector<2x8x8xf32>
    %701 = tpu.matmul %699, %700, %cst_309 {dimension_numbers = #tpu.dot_dimension_numbers<[2], [2], [1], [1], [0, 0, 0, 1, 1, 1], [0], [0]>} : vector<2x8x8xf32>, vector<2x8x8xf32>, vector<2x8x8xf32> -> vector<2x8x8xf32>
    "tpu.trace_stop"() : () -> ()
    %cst_310 = arith.constant dense<0xFF800000> : vector<2x8xf32>
    %702 = vector.multi_reduction <maximumf>, %701, %cst_310 [2] : vector<2x8x8xf32> to vector<2x8xf32>
    %703 = vector.shape_cast %702 : vector<2x8xf32> to vector<2x8x1xf32>
    %704 = vector.broadcast %703 : vector<2x8x1xf32> to vector<2x8x8xf32>
    %705 = arith.subf %701, %704 : vector<2x8x8xf32>
    %706 = math.exp %705 : vector<2x8x8xf32>
    %cst_311 = arith.constant dense<0.000000e+00> : vector<2x8xf32>
    %707 = vector.multi_reduction <add>, %706, %cst_311 [2] : vector<2x8x8xf32> to vector<2x8xf32>
    %708 = vector.shape_cast %707 : vector<2x8xf32> to vector<2x8x1xf32>
    %709 = vector.broadcast %708 : vector<2x8x1xf32> to vector<2x8x8xf32>
    %710 = arith.divf %706, %709 : vector<2x8x8xf32>
    %711 = vector.extract_strided_slice %643 {offsets = [0, 0, 24], sizes = [2, 8, 8], strides = [1, 1, 1]} : vector<2x8x32xf32> to vector<2x8x8xf32>
    "tpu.trace_start"() <{level = 10 : i32, message = "bqk,bkd->bqd"}> : () -> ()
    %cst_312 = arith.constant dense<0.000000e+00> : vector<2x8x8xf32>
    %712 = tpu.matmul %710, %711, %cst_312 {dimension_numbers = #tpu.dot_dimension_numbers<[2], [1], [1], [2], [0, 0, 0, 1, 1, 2], [0], [0]>} : vector<2x8x8xf32>, vector<2x8x8xf32>, vector<2x8x8xf32> -> vector<2x8x8xf32>
    "tpu.trace_stop"() : () -> ()
    %713 = vector.shape_cast %712 : vector<2x8x8xf32> to vector<16x8xf32>
    %714 = vector.extract_strided_slice %38 {offsets = [24, 0], sizes = [8, 32], strides = [1, 1]} : vector<32x32xf32> to vector<8x32xf32>
    %cst_313 = arith.constant dense<0.000000e+00> : vector<16x32xf32>
    %715 = tpu.matmul %713, %714, %cst_313 {dimension_numbers = #tpu.dot_dimension_numbers<[1], [0], [0], [1], [0, 0, 1, 1], [], []>} : vector<16x8xf32>, vector<8x32xf32>, vector<16x32xf32> -> vector<16x32xf32>
    %716 = arith.addf %698, %715 : vector<16x32xf32>
    %717 = vector.broadcast %36 : vector<1x32xf32> to vector<16x32xf32>
    %718 = arith.addf %716, %717 : vector<16x32xf32>
    %719 = vector.shape_cast %718 : vector<16x32xf32> to vector<2x8x32xf32>
    %720 = arith.addf %633, %719 : vector<2x8x32xf32>
    %721 = vector.shape_cast %720 : vector<2x8x32xf32> to vector<16x32xf32>
    %cst_314 = arith.constant dense<0.000000e+00> : vector<16xf32>
    %722 = vector.multi_reduction <add>, %721, %cst_314 [1] : vector<16x32xf32> to vector<16xf32>
    %723 = vector.shape_cast %722 : vector<16xf32> to vector<16x1xf32>
    %cst_315 = arith.constant 3.200000e+01 : f32
    %724 = vector.broadcast %cst_315 : f32 to vector<16x1xf32>
    %725 = arith.divf %723, %724 : vector<16x1xf32>
    %726 = vector.broadcast %725 : vector<16x1xf32> to vector<16x32xf32>
    %727 = arith.subf %721, %726 : vector<16x32xf32>
    %728 = arith.mulf %727, %727 : vector<16x32xf32>
    %cst_316 = arith.constant dense<0.000000e+00> : vector<16xf32>
    %729 = vector.multi_reduction <add>, %728, %cst_316 [1] : vector<16x32xf32> to vector<16xf32>
    %730 = vector.shape_cast %729 : vector<16xf32> to vector<16x1xf32>
    %cst_317 = arith.constant 3.200000e+01 : f32
    %731 = vector.broadcast %cst_317 : f32 to vector<16x1xf32>
    %732 = arith.divf %730, %731 : vector<16x1xf32>
    %cst_318 = arith.constant 9.99999974E-6 : f32
    %733 = vector.broadcast %cst_318 : f32 to vector<16x1xf32>
    %734 = arith.addf %732, %733 : vector<16x1xf32>
    %735 = math.rsqrt %734 : vector<16x1xf32>
    %736 = vector.broadcast %735 : vector<16x1xf32> to vector<16x32xf32>
    %737 = arith.mulf %727, %736 : vector<16x32xf32>
    %738 = vector.broadcast %30 : vector<1x32xf32> to vector<16x32xf32>
    %739 = arith.mulf %737, %738 : vector<16x32xf32>
    %740 = vector.broadcast %31 : vector<1x32xf32> to vector<16x32xf32>
    %741 = arith.addf %739, %740 : vector<16x32xf32>
    %742 = vector.shape_cast %741 : vector<16x32xf32> to vector<2x8x32xf32>
    %743 = vector.shape_cast %742 : vector<2x8x32xf32> to vector<16x32xf32>
    %cst_319 = arith.constant dense<0.000000e+00> : vector<16x32xf32>
    %744 = tpu.matmul %743, %25, %cst_319 {dimension_numbers = #tpu.dot_dimension_numbers<[1], [0], [0], [1], [0, 0, 1, 1], [], []>} : vector<16x32xf32>, vector<32x32xf32>, vector<16x32xf32> -> vector<16x32xf32>
    %745 = vector.broadcast %22 : vector<1x32xf32> to vector<16x32xf32>
    %746 = arith.addf %744, %745 : vector<16x32xf32>
    %747 = vector.shape_cast %746 : vector<16x32xf32> to vector<2x8x32xf32>
    %748 = vector.shape_cast %383 : vector<2x8x32xf32> to vector<16x32xf32>
    %cst_320 = arith.constant dense<0.000000e+00> : vector<16x64xf32>
    %749 = tpu.matmul %748, %23, %cst_320 {dimension_numbers = #tpu.dot_dimension_numbers<[1], [0], [0], [1], [0, 0, 1, 1], [], []>} : vector<16x32xf32>, vector<32x64xf32>, vector<16x64xf32> -> vector<16x64xf32>
    %750 = vector.broadcast %20 : vector<1x64xf32> to vector<16x64xf32>
    %751 = arith.addf %749, %750 : vector<16x64xf32>
    %752 = vector.extract_strided_slice %751 {offsets = [0, 0], sizes = [16, 32], strides = [1, 1]} : vector<16x64xf32> to vector<16x32xf32>
    %753 = vector.shape_cast %752 : vector<16x32xf32> to vector<2x8x32xf32>
    %754 = vector.extract_strided_slice %751 {offsets = [0, 32], sizes = [16, 32], strides = [1, 1]} : vector<16x64xf32> to vector<16x32xf32>
    %755 = vector.shape_cast %754 : vector<16x32xf32> to vector<2x8x32xf32>
    %cst_321 = arith.constant 0.000000e+00 : f32
    %756 = vector.broadcast %cst_321 : f32 to vector<16x32xf32>
    %757 = vector.extract_strided_slice %747 {offsets = [0, 0, 0], sizes = [2, 8, 8], strides = [1, 1, 1]} : vector<2x8x32xf32> to vector<2x8x8xf32>
    %758 = vector.extract_strided_slice %753 {offsets = [0, 0, 0], sizes = [2, 8, 8], strides = [1, 1, 1]} : vector<2x8x32xf32> to vector<2x8x8xf32>
    "tpu.trace_start"() <{level = 10 : i32, message = "bqd,bkd->bqk"}> : () -> ()
    %cst_322 = arith.constant dense<0.000000e+00> : vector<2x8x8xf32>
    %759 = tpu.matmul %757, %758, %cst_322 {dimension_numbers = #tpu.dot_dimension_numbers<[2], [2], [1], [1], [0, 0, 0, 1, 1, 1], [0], [0]>} : vector<2x8x8xf32>, vector<2x8x8xf32>, vector<2x8x8xf32> -> vector<2x8x8xf32>
    "tpu.trace_stop"() : () -> ()
    %cst_323 = arith.constant dense<0xFF800000> : vector<2x8xf32>
    %760 = vector.multi_reduction <maximumf>, %759, %cst_323 [2] : vector<2x8x8xf32> to vector<2x8xf32>
    %761 = vector.shape_cast %760 : vector<2x8xf32> to vector<2x8x1xf32>
    %762 = vector.broadcast %761 : vector<2x8x1xf32> to vector<2x8x8xf32>
    %763 = arith.subf %759, %762 : vector<2x8x8xf32>
    %764 = math.exp %763 : vector<2x8x8xf32>
    %cst_324 = arith.constant dense<0.000000e+00> : vector<2x8xf32>
    %765 = vector.multi_reduction <add>, %764, %cst_324 [2] : vector<2x8x8xf32> to vector<2x8xf32>
    %766 = vector.shape_cast %765 : vector<2x8xf32> to vector<2x8x1xf32>
    %767 = vector.broadcast %766 : vector<2x8x1xf32> to vector<2x8x8xf32>
    %768 = arith.divf %764, %767 : vector<2x8x8xf32>
    %769 = vector.extract_strided_slice %755 {offsets = [0, 0, 0], sizes = [2, 8, 8], strides = [1, 1, 1]} : vector<2x8x32xf32> to vector<2x8x8xf32>
    "tpu.trace_start"() <{level = 10 : i32, message = "bqk,bkd->bqd"}> : () -> ()
    %cst_325 = arith.constant dense<0.000000e+00> : vector<2x8x8xf32>
    %770 = tpu.matmul %768, %769, %cst_325 {dimension_numbers = #tpu.dot_dimension_numbers<[2], [1], [1], [2], [0, 0, 0, 1, 1, 2], [0], [0]>} : vector<2x8x8xf32>, vector<2x8x8xf32>, vector<2x8x8xf32> -> vector<2x8x8xf32>
    "tpu.trace_stop"() : () -> ()
    %771 = vector.shape_cast %770 : vector<2x8x8xf32> to vector<16x8xf32>
    %772 = vector.extract_strided_slice %24 {offsets = [0, 0], sizes = [8, 32], strides = [1, 1]} : vector<32x32xf32> to vector<8x32xf32>
    %cst_326 = arith.constant dense<0.000000e+00> : vector<16x32xf32>
    %773 = tpu.matmul %771, %772, %cst_326 {dimension_numbers = #tpu.dot_dimension_numbers<[1], [0], [0], [1], [0, 0, 1, 1], [], []>} : vector<16x8xf32>, vector<8x32xf32>, vector<16x32xf32> -> vector<16x32xf32>
    %774 = arith.addf %756, %773 : vector<16x32xf32>
    %775 = vector.extract_strided_slice %747 {offsets = [0, 0, 8], sizes = [2, 8, 8], strides = [1, 1, 1]} : vector<2x8x32xf32> to vector<2x8x8xf32>
    %776 = vector.extract_strided_slice %753 {offsets = [0, 0, 8], sizes = [2, 8, 8], strides = [1, 1, 1]} : vector<2x8x32xf32> to vector<2x8x8xf32>
    "tpu.trace_start"() <{level = 10 : i32, message = "bqd,bkd->bqk"}> : () -> ()
    %cst_327 = arith.constant dense<0.000000e+00> : vector<2x8x8xf32>
    %777 = tpu.matmul %775, %776, %cst_327 {dimension_numbers = #tpu.dot_dimension_numbers<[2], [2], [1], [1], [0, 0, 0, 1, 1, 1], [0], [0]>} : vector<2x8x8xf32>, vector<2x8x8xf32>, vector<2x8x8xf32> -> vector<2x8x8xf32>
    "tpu.trace_stop"() : () -> ()
    %cst_328 = arith.constant dense<0xFF800000> : vector<2x8xf32>
    %778 = vector.multi_reduction <maximumf>, %777, %cst_328 [2] : vector<2x8x8xf32> to vector<2x8xf32>
    %779 = vector.shape_cast %778 : vector<2x8xf32> to vector<2x8x1xf32>
    %780 = vector.broadcast %779 : vector<2x8x1xf32> to vector<2x8x8xf32>
    %781 = arith.subf %777, %780 : vector<2x8x8xf32>
    %782 = math.exp %781 : vector<2x8x8xf32>
    %cst_329 = arith.constant dense<0.000000e+00> : vector<2x8xf32>
    %783 = vector.multi_reduction <add>, %782, %cst_329 [2] : vector<2x8x8xf32> to vector<2x8xf32>
    %784 = vector.shape_cast %783 : vector<2x8xf32> to vector<2x8x1xf32>
    %785 = vector.broadcast %784 : vector<2x8x1xf32> to vector<2x8x8xf32>
    %786 = arith.divf %782, %785 : vector<2x8x8xf32>
    %787 = vector.extract_strided_slice %755 {offsets = [0, 0, 8], sizes = [2, 8, 8], strides = [1, 1, 1]} : vector<2x8x32xf32> to vector<2x8x8xf32>
    "tpu.trace_start"() <{level = 10 : i32, message = "bqk,bkd->bqd"}> : () -> ()
    %cst_330 = arith.constant dense<0.000000e+00> : vector<2x8x8xf32>
    %788 = tpu.matmul %786, %787, %cst_330 {dimension_numbers = #tpu.dot_dimension_numbers<[2], [1], [1], [2], [0, 0, 0, 1, 1, 2], [0], [0]>} : vector<2x8x8xf32>, vector<2x8x8xf32>, vector<2x8x8xf32> -> vector<2x8x8xf32>
    "tpu.trace_stop"() : () -> ()
    %789 = vector.shape_cast %788 : vector<2x8x8xf32> to vector<16x8xf32>
    %790 = vector.extract_strided_slice %24 {offsets = [8, 0], sizes = [8, 32], strides = [1, 1]} : vector<32x32xf32> to vector<8x32xf32>
    %cst_331 = arith.constant dense<0.000000e+00> : vector<16x32xf32>
    %791 = tpu.matmul %789, %790, %cst_331 {dimension_numbers = #tpu.dot_dimension_numbers<[1], [0], [0], [1], [0, 0, 1, 1], [], []>} : vector<16x8xf32>, vector<8x32xf32>, vector<16x32xf32> -> vector<16x32xf32>
    %792 = arith.addf %774, %791 : vector<16x32xf32>
    %793 = vector.extract_strided_slice %747 {offsets = [0, 0, 16], sizes = [2, 8, 8], strides = [1, 1, 1]} : vector<2x8x32xf32> to vector<2x8x8xf32>
    %794 = vector.extract_strided_slice %753 {offsets = [0, 0, 16], sizes = [2, 8, 8], strides = [1, 1, 1]} : vector<2x8x32xf32> to vector<2x8x8xf32>
    "tpu.trace_start"() <{level = 10 : i32, message = "bqd,bkd->bqk"}> : () -> ()
    %cst_332 = arith.constant dense<0.000000e+00> : vector<2x8x8xf32>
    %795 = tpu.matmul %793, %794, %cst_332 {dimension_numbers = #tpu.dot_dimension_numbers<[2], [2], [1], [1], [0, 0, 0, 1, 1, 1], [0], [0]>} : vector<2x8x8xf32>, vector<2x8x8xf32>, vector<2x8x8xf32> -> vector<2x8x8xf32>
    "tpu.trace_stop"() : () -> ()
    %cst_333 = arith.constant dense<0xFF800000> : vector<2x8xf32>
    %796 = vector.multi_reduction <maximumf>, %795, %cst_333 [2] : vector<2x8x8xf32> to vector<2x8xf32>
    %797 = vector.shape_cast %796 : vector<2x8xf32> to vector<2x8x1xf32>
    %798 = vector.broadcast %797 : vector<2x8x1xf32> to vector<2x8x8xf32>
    %799 = arith.subf %795, %798 : vector<2x8x8xf32>
    %800 = math.exp %799 : vector<2x8x8xf32>
    %cst_334 = arith.constant dense<0.000000e+00> : vector<2x8xf32>
    %801 = vector.multi_reduction <add>, %800, %cst_334 [2] : vector<2x8x8xf32> to vector<2x8xf32>
    %802 = vector.shape_cast %801 : vector<2x8xf32> to vector<2x8x1xf32>
    %803 = vector.broadcast %802 : vector<2x8x1xf32> to vector<2x8x8xf32>
    %804 = arith.divf %800, %803 : vector<2x8x8xf32>
    %805 = vector.extract_strided_slice %755 {offsets = [0, 0, 16], sizes = [2, 8, 8], strides = [1, 1, 1]} : vector<2x8x32xf32> to vector<2x8x8xf32>
    "tpu.trace_start"() <{level = 10 : i32, message = "bqk,bkd->bqd"}> : () -> ()
    %cst_335 = arith.constant dense<0.000000e+00> : vector<2x8x8xf32>
    %806 = tpu.matmul %804, %805, %cst_335 {dimension_numbers = #tpu.dot_dimension_numbers<[2], [1], [1], [2], [0, 0, 0, 1, 1, 2], [0], [0]>} : vector<2x8x8xf32>, vector<2x8x8xf32>, vector<2x8x8xf32> -> vector<2x8x8xf32>
    "tpu.trace_stop"() : () -> ()
    %807 = vector.shape_cast %806 : vector<2x8x8xf32> to vector<16x8xf32>
    %808 = vector.extract_strided_slice %24 {offsets = [16, 0], sizes = [8, 32], strides = [1, 1]} : vector<32x32xf32> to vector<8x32xf32>
    %cst_336 = arith.constant dense<0.000000e+00> : vector<16x32xf32>
    %809 = tpu.matmul %807, %808, %cst_336 {dimension_numbers = #tpu.dot_dimension_numbers<[1], [0], [0], [1], [0, 0, 1, 1], [], []>} : vector<16x8xf32>, vector<8x32xf32>, vector<16x32xf32> -> vector<16x32xf32>
    %810 = arith.addf %792, %809 : vector<16x32xf32>
    %811 = vector.extract_strided_slice %747 {offsets = [0, 0, 24], sizes = [2, 8, 8], strides = [1, 1, 1]} : vector<2x8x32xf32> to vector<2x8x8xf32>
    %812 = vector.extract_strided_slice %753 {offsets = [0, 0, 24], sizes = [2, 8, 8], strides = [1, 1, 1]} : vector<2x8x32xf32> to vector<2x8x8xf32>
    "tpu.trace_start"() <{level = 10 : i32, message = "bqd,bkd->bqk"}> : () -> ()
    %cst_337 = arith.constant dense<0.000000e+00> : vector<2x8x8xf32>
    %813 = tpu.matmul %811, %812, %cst_337 {dimension_numbers = #tpu.dot_dimension_numbers<[2], [2], [1], [1], [0, 0, 0, 1, 1, 1], [0], [0]>} : vector<2x8x8xf32>, vector<2x8x8xf32>, vector<2x8x8xf32> -> vector<2x8x8xf32>
    "tpu.trace_stop"() : () -> ()
    %cst_338 = arith.constant dense<0xFF800000> : vector<2x8xf32>
    %814 = vector.multi_reduction <maximumf>, %813, %cst_338 [2] : vector<2x8x8xf32> to vector<2x8xf32>
    %815 = vector.shape_cast %814 : vector<2x8xf32> to vector<2x8x1xf32>
    %816 = vector.broadcast %815 : vector<2x8x1xf32> to vector<2x8x8xf32>
    %817 = arith.subf %813, %816 : vector<2x8x8xf32>
    %818 = math.exp %817 : vector<2x8x8xf32>
    %cst_339 = arith.constant dense<0.000000e+00> : vector<2x8xf32>
    %819 = vector.multi_reduction <add>, %818, %cst_339 [2] : vector<2x8x8xf32> to vector<2x8xf32>
    %820 = vector.shape_cast %819 : vector<2x8xf32> to vector<2x8x1xf32>
    %821 = vector.broadcast %820 : vector<2x8x1xf32> to vector<2x8x8xf32>
    %822 = arith.divf %818, %821 : vector<2x8x8xf32>
    %823 = vector.extract_strided_slice %755 {offsets = [0, 0, 24], sizes = [2, 8, 8], strides = [1, 1, 1]} : vector<2x8x32xf32> to vector<2x8x8xf32>
    "tpu.trace_start"() <{level = 10 : i32, message = "bqk,bkd->bqd"}> : () -> ()
    %cst_340 = arith.constant dense<0.000000e+00> : vector<2x8x8xf32>
    %824 = tpu.matmul %822, %823, %cst_340 {dimension_numbers = #tpu.dot_dimension_numbers<[2], [1], [1], [2], [0, 0, 0, 1, 1, 2], [0], [0]>} : vector<2x8x8xf32>, vector<2x8x8xf32>, vector<2x8x8xf32> -> vector<2x8x8xf32>
    "tpu.trace_stop"() : () -> ()
    %825 = vector.shape_cast %824 : vector<2x8x8xf32> to vector<16x8xf32>
    %826 = vector.extract_strided_slice %24 {offsets = [24, 0], sizes = [8, 32], strides = [1, 1]} : vector<32x32xf32> to vector<8x32xf32>
    %cst_341 = arith.constant dense<0.000000e+00> : vector<16x32xf32>
    %827 = tpu.matmul %825, %826, %cst_341 {dimension_numbers = #tpu.dot_dimension_numbers<[1], [0], [0], [1], [0, 0, 1, 1], [], []>} : vector<16x8xf32>, vector<8x32xf32>, vector<16x32xf32> -> vector<16x32xf32>
    %828 = arith.addf %810, %827 : vector<16x32xf32>
    %829 = vector.broadcast %21 : vector<1x32xf32> to vector<16x32xf32>
    %830 = arith.addf %828, %829 : vector<16x32xf32>
    %831 = vector.shape_cast %830 : vector<16x32xf32> to vector<2x8x32xf32>
    %832 = arith.addf %742, %831 : vector<2x8x32xf32>
    %833 = vector.shape_cast %832 : vector<2x8x32xf32> to vector<16x32xf32>
    %cst_342 = arith.constant dense<0.000000e+00> : vector<16xf32>
    %834 = vector.multi_reduction <add>, %833, %cst_342 [1] : vector<16x32xf32> to vector<16xf32>
    %835 = vector.shape_cast %834 : vector<16xf32> to vector<16x1xf32>
    %cst_343 = arith.constant 3.200000e+01 : f32
    %836 = vector.broadcast %cst_343 : f32 to vector<16x1xf32>
    %837 = arith.divf %835, %836 : vector<16x1xf32>
    %838 = vector.broadcast %837 : vector<16x1xf32> to vector<16x32xf32>
    %839 = arith.subf %833, %838 : vector<16x32xf32>
    %840 = arith.mulf %839, %839 : vector<16x32xf32>
    %cst_344 = arith.constant dense<0.000000e+00> : vector<16xf32>
    %841 = vector.multi_reduction <add>, %840, %cst_344 [1] : vector<16x32xf32> to vector<16xf32>
    %842 = vector.shape_cast %841 : vector<16xf32> to vector<16x1xf32>
    %cst_345 = arith.constant 3.200000e+01 : f32
    %843 = vector.broadcast %cst_345 : f32 to vector<16x1xf32>
    %844 = arith.divf %842, %843 : vector<16x1xf32>
    %cst_346 = arith.constant 9.99999974E-6 : f32
    %845 = vector.broadcast %cst_346 : f32 to vector<16x1xf32>
    %846 = arith.addf %844, %845 : vector<16x1xf32>
    %847 = math.rsqrt %846 : vector<16x1xf32>
    %848 = vector.broadcast %847 : vector<16x1xf32> to vector<16x32xf32>
    %849 = arith.mulf %839, %848 : vector<16x32xf32>
    %850 = vector.broadcast %32 : vector<1x32xf32> to vector<16x32xf32>
    %851 = arith.mulf %849, %850 : vector<16x32xf32>
    %852 = vector.broadcast %33 : vector<1x32xf32> to vector<16x32xf32>
    %853 = arith.addf %851, %852 : vector<16x32xf32>
    %cst_347 = arith.constant dense<0.000000e+00> : vector<16x64xf32>
    %854 = tpu.matmul %853, %26, %cst_347 {dimension_numbers = #tpu.dot_dimension_numbers<[1], [0], [0], [1], [0, 0, 1, 1], [], []>} : vector<16x32xf32>, vector<32x64xf32>, vector<16x64xf32> -> vector<16x64xf32>
    %855 = vector.broadcast %27 : vector<1x64xf32> to vector<16x64xf32>
    %856 = arith.addf %854, %855 : vector<16x64xf32>
    %cst_348 = arith.constant 0.000000e+00 : f32
    %857 = vector.broadcast %cst_348 : f32 to vector<16x64xf32>
    %858 = arith.maximumf %856, %857 : vector<16x64xf32>
    %cst_349 = arith.constant dense<0.000000e+00> : vector<16x32xf32>
    %859 = tpu.matmul %858, %28, %cst_349 {dimension_numbers = #tpu.dot_dimension_numbers<[1], [0], [0], [1], [0, 0, 1, 1], [], []>} : vector<16x64xf32>, vector<64x32xf32>, vector<16x32xf32> -> vector<16x32xf32>
    %860 = vector.broadcast %29 : vector<1x32xf32> to vector<16x32xf32>
    %861 = arith.addf %859, %860 : vector<16x32xf32>
    %862 = arith.addf %853, %861 : vector<16x32xf32>
    %cst_350 = arith.constant dense<0.000000e+00> : vector<16xf32>
    %863 = vector.multi_reduction <add>, %862, %cst_350 [1] : vector<16x32xf32> to vector<16xf32>
    %864 = vector.shape_cast %863 : vector<16xf32> to vector<16x1xf32>
    %cst_351 = arith.constant 3.200000e+01 : f32
    %865 = vector.broadcast %cst_351 : f32 to vector<16x1xf32>
    %866 = arith.divf %864, %865 : vector<16x1xf32>
    %867 = vector.broadcast %866 : vector<16x1xf32> to vector<16x32xf32>
    %868 = arith.subf %862, %867 : vector<16x32xf32>
    %869 = arith.mulf %868, %868 : vector<16x32xf32>
    %cst_352 = arith.constant dense<0.000000e+00> : vector<16xf32>
    %870 = vector.multi_reduction <add>, %869, %cst_352 [1] : vector<16x32xf32> to vector<16xf32>
    %871 = vector.shape_cast %870 : vector<16xf32> to vector<16x1xf32>
    %cst_353 = arith.constant 3.200000e+01 : f32
    %872 = vector.broadcast %cst_353 : f32 to vector<16x1xf32>
    %873 = arith.divf %871, %872 : vector<16x1xf32>
    %cst_354 = arith.constant 9.99999974E-6 : f32
    %874 = vector.broadcast %cst_354 : f32 to vector<16x1xf32>
    %875 = arith.addf %873, %874 : vector<16x1xf32>
    %876 = math.rsqrt %875 : vector<16x1xf32>
    %877 = vector.broadcast %876 : vector<16x1xf32> to vector<16x32xf32>
    %878 = arith.mulf %868, %877 : vector<16x32xf32>
    %879 = vector.broadcast %34 : vector<1x32xf32> to vector<16x32xf32>
    %880 = arith.mulf %878, %879 : vector<16x32xf32>
    %881 = vector.broadcast %35 : vector<1x32xf32> to vector<16x32xf32>
    %882 = arith.addf %880, %881 : vector<16x32xf32>
    %883 = vector.shape_cast %882 : vector<16x32xf32> to vector<2x8x32xf32>
    %884 = vector.shape_cast %883 : vector<2x8x32xf32> to vector<16x32xf32>
    %cst_355 = arith.constant dense<0.000000e+00> : vector<16xf32>
    %885 = vector.multi_reduction <add>, %884, %cst_355 [1] : vector<16x32xf32> to vector<16xf32>
    %886 = vector.shape_cast %885 : vector<16xf32> to vector<16x1xf32>
    %cst_356 = arith.constant 3.200000e+01 : f32
    %887 = vector.broadcast %cst_356 : f32 to vector<16x1xf32>
    %888 = arith.divf %886, %887 : vector<16x1xf32>
    %889 = vector.broadcast %888 : vector<16x1xf32> to vector<16x32xf32>
    %890 = arith.subf %884, %889 : vector<16x32xf32>
    %891 = arith.mulf %890, %890 : vector<16x32xf32>
    %cst_357 = arith.constant dense<0.000000e+00> : vector<16xf32>
    %892 = vector.multi_reduction <add>, %891, %cst_357 [1] : vector<16x32xf32> to vector<16xf32>
    %893 = vector.shape_cast %892 : vector<16xf32> to vector<16x1xf32>
    %cst_358 = arith.constant 3.200000e+01 : f32
    %894 = vector.broadcast %cst_358 : f32 to vector<16x1xf32>
    %895 = arith.divf %893, %894 : vector<16x1xf32>
    %cst_359 = arith.constant 9.99999974E-6 : f32
    %896 = vector.broadcast %cst_359 : f32 to vector<16x1xf32>
    %897 = arith.addf %895, %896 : vector<16x1xf32>
    %898 = math.rsqrt %897 : vector<16x1xf32>
    %899 = vector.broadcast %898 : vector<16x1xf32> to vector<16x32xf32>
    %900 = arith.mulf %890, %899 : vector<16x32xf32>
    %901 = vector.broadcast %40 : vector<1x32xf32> to vector<16x32xf32>
    %902 = arith.mulf %900, %901 : vector<16x32xf32>
    %903 = vector.broadcast %41 : vector<1x32xf32> to vector<16x32xf32>
    %904 = arith.addf %902, %903 : vector<16x32xf32>
    %cst_360 = arith.constant dense<0.000000e+00> : vector<16x8xf32>
    %905 = tpu.matmul %904, %44, %cst_360 {dimension_numbers = #tpu.dot_dimension_numbers<[1], [0], [0], [1], [0, 0, 1, 1], [], []>} : vector<16x32xf32>, vector<32x8xf32>, vector<16x8xf32> -> vector<16x8xf32>
    %906 = vector.broadcast %45 : vector<1x8xf32> to vector<16x8xf32>
    %907 = arith.addf %905, %906 : vector<16x8xf32>
    %908 = vector.shape_cast %907 : vector<16x8xf32> to vector<2x8x8xf32>
    %c0_361 = arith.constant 0 : index
    %c0_362 = arith.constant 0 : index
    %c0_363 = arith.constant 0 : index
    %909 = vector.load %arg76[%c0_361, %c0_362, %c0_363] : memref<2x8x8xf32, #tpu.memory_space<vmem>>, vector<2x8x8xf32>
    tpu.vector_store %arg76[%c0_361, %c0_362, %c0_363], %908 {strides = array<i32>} : memref<2x8x8xf32, #tpu.memory_space<vmem>>, vector<2x8x8xf32>,
    return
  }
}

</mosaic_0001>

<bundles_post_ra>
// kernel: tpu_custom_call.1
= control target key start
LH: loop header
LB: loop body
LE: loop exit
PB: predicated region body
PF: predicated region fallthrough
CT: control target
= control target key end

     0   :  { %s16438_s6 = smov 1   ;;  %s16439_s10 = smov 2   ;;  %s18382_s0 = inlined_call_operand.smem [shape: u32[77], index: -1, kind: input, shape index: {}] }
   0x1   :  { %s16585_s5 = sld [smem:[%s18382_s0]]   ;;  %s16440_s14 = smov 3  }
   0x2   :  { %s16590_s9 = sld [smem:[%s18382_s0 + %s16438_s6]]   ;;  %s16441_s18 = smov 4  }
   0x3   :  { %s16595_s13 = sld [smem:[%s18382_s0 + %s16439_s10]]   ;;  %s16442_s22 = smov 5  }
   0x4   :  { %s16600_s17 = sld [smem:[%s18382_s0 + %s16440_s14]]   ;;  %s16443_s26 = smov 6  }
   0x5   :  { %s16605_s21 = sld [smem:[%s18382_s0 + %s16441_s18]]   ;;  %s16444_s30 = smov 7  }
   0x6   :  { %s16610_s25 = sld [smem:[%s18382_s0 + %s16442_s22]]   ;;  %s16445_s4 = smov 8  }
   0x7   :  { %18437 = sst [smem:[#allocation100_spill]] %s16585_s5  ;;  %s16446_s10 = smov 9  }
   0x8   :  { %s16615_s29 = sld [smem:[%s18382_s0 + %s16443_s26]]   ;;  %s16447_s15 = smov 10  }
   0x9   :  { %18438 = sst [smem:[#allocation101_spill]] %s16595_s13  ;;  %s16448_s20 = smov 11  }
   0xa   :  { %18439 = sst [smem:[#allocation102_spill]] %s16600_s17  ;;  %s16449_s26 = smov 12  }
   0xb   :  { %s16620_s3 = sld [smem:[%s18382_s0 + %s16444_s30]]   ;;  %s16450_s1 = smov 13  }
   0xc   :  { %18440 = sst [smem:[#allocation103_spill]] %s16610_s25  ;;  %s16451_s7 = smov 14  }
   0xd   :  { %s16625_s8 = sld [smem:[%s18382_s0 + %s16445_s4]]   ;;  %s16453_s22 = smov 16  }
   0xe   :  { %18441 = sst [smem:[#allocation104_spill]] %s16615_s29  ;;  %s16454_s28 = smov 17  }
   0xf   :  { %s16630_s14 = sld [smem:[%s18382_s0 + %s16446_s10]]  }
  0x10   :  { %s16635_s19 = sld [smem:[%s18382_s0 + %s16447_s15]]   ;;  %s16452_s15 = smov 15  }
  0x11   :  { %18442 = sst [smem:[#allocation105_spill]] %s16620_s3 }
  0x12   :  { %s16640_s24 = sld [smem:[%s18382_s0 + %s16448_s20]]  }
  0x13   :  { %18443 = sst [smem:[#allocation106_spill]] %s16625_s8 }
  0x14   :  { %s16645_s30 = sld [smem:[%s18382_s0 + %s16449_s26]]  }
  0x15   :  { %18444 = sst [smem:[#allocation107_spill]] %s16630_s14 }
  0x16   :  { %18445 = sst [smem:[#allocation108_spill]] %s16635_s19 }
  0x17   :  { %s16650_s6 = sld [smem:[%s18382_s0 + %s16450_s1]]  }
  0x18   :  { %s16655_s12 = sld [smem:[%s18382_s0 + %s16451_s7]]   ;;  %s16455_s7 = smov 18  }
  0x19   :  { %s16660_s20 = sld [smem:[%s18382_s0 + %s16452_s15]]   ;;  %s16456_s15 = smov 19  }
  0x1a   :  { %18446 = sst [smem:[#allocation109_spill]] %s16645_s30 }
  0x1b   :  { %s16665_s27 = sld [smem:[%s18382_s0 + %s16453_s22]]   ;;  %s16457_s22 = smov 20  }
  0x1c   :  { %s16670_s4 = sld [smem:[%s18382_s0 + %s16454_s28]]   ;;  %s16458_s28 = smov 21  }
  0x1d   :  { %s16675_s19 = sld [smem:[%s18382_s0 + %s16455_s7]]   ;;  %s16459_s7 = smov 22  }
  0x1e   :  { %18447 = sst [smem:[#allocation110_spill]] %s16655_s12 }
  0x1f   :  { %s16680_s8 = sld [smem:[%s18382_s0 + %s16456_s15]]   ;;  %s16460_s15 = smov 23  }
  0x20   :  { %s16685_s29 = sld [smem:[%s18382_s0 + %s16457_s22]]   ;;  %s16461_s22 = smov 24  }
  0x21   :  { %18448 = sst [smem:[#allocation111_spill]] %s16665_s27 }
  0x22   :  { %s16690_s13 = sld [smem:[%s18382_s0 + %s16458_s28]]   ;;  %s16462_s28 = smov 25  }
  0x23   :  { %18449 = sst [smem:[#allocation112_spill]] %s16675_s19 }
  0x24   :  { %s16695_s3 = sld [smem:[%s18382_s0 + %s16459_s7]]   ;;  %s16463_s7 = smov 26  }
  0x25   :  { %s16700_s25 = sld [smem:[%s18382_s0 + %s16460_s15]]   ;;  %s16464_s15 = smov 27  }
  0x26   :  { %18450 = sst [smem:[#allocation113_spill]] %s16685_s29 }
  0x27   :  { %s16705_s29 = sld [smem:[%s18382_s0 + %s16461_s22]]   ;;  %s16465_s22 = smov 28  }
  0x28   :  { %18451 = sst [smem:[#allocation114_spill]] %s16690_s13 }
  0x29   :  { %s16710_s13 = sld [smem:[%s18382_s0 + %s16462_s28]]   ;;  %s16466_s28 = smov 29  }
  0x2a   :  { %18452 = sst [smem:[#allocation115_spill]] %s16695_s3 }
  0x2b   :  { %s16715_s3 = sld [smem:[%s18382_s0 + %s16463_s7]]   ;;  %s16467_s7 = smov 30  }
  0x2c   :  { %s16720_s19 = sld [smem:[%s18382_s0 + %s16464_s15]]   ;;  %s16468_s15 = smov 31  }
  0x2d   :  { %18453 = sst [smem:[#allocation116_spill]] %s16705_s29 }
  0x2e   :  { %s16725_s29 = sld [smem:[%s18382_s0 + %s16465_s22]]   ;;  %s16469_s22 = smov 32  }
  0x2f   :  { %18454 = sst [smem:[#allocation117_spill]] %s16710_s13 }
  0x30   :  { %s16730_s13 = sld [smem:[%s18382_s0 + %s16466_s28]]   ;;  %s16470_s28 = smov 33  }
  0x31   :  { %18455 = sst [smem:[#allocation118_spill]] %s16715_s3 }
  0x32   :  { %18456 = sst [smem:[#allocation119_spill]] %s16720_s19 }
  0x33   :  { %s16735_s3 = sld [smem:[%s18382_s0 + %s16467_s7]]   ;;  %s16471_s7 = smov 34  }
  0x34   :  { %18457 = sst [smem:[#allocation120_spill]] %s16725_s29 }
  0x35   :  { %s16740_s19 = sld [smem:[%s18382_s0 + %s16468_s15]]   ;;  %s16472_s15 = smov 35  }
  0x36   :  { %s16745_s29 = sld [smem:[%s18382_s0 + %s16469_s22]]   ;;  %s16473_s22 = smov 36  }
  0x37   :  { %s16750_s27 = sld [smem:[%s18382_s0 + %s16470_s28]]   ;;  %s16474_s28 = smov 37  }
  0x38   :  { %s16765_s12 = sld [smem:[%s18382_s0 + %s16473_s22]]   ;;  %s16477_s22 = smov 40  }
  0x39   :  { %18458 = sst [smem:[#allocation121_spill]] %s16735_s3 }
  0x3a   :  { %s16755_s3 = sld [smem:[%s18382_s0 + %s16471_s7]]   ;;  %s16475_s7 = smov 38  }
  0x3b   :  { %18459 = sst [smem:[#allocation122_spill]] %s16740_s19 }
  0x3c   :  { %s16760_s19 = sld [smem:[%s18382_s0 + %s16472_s15]]   ;;  %s16476_s15 = smov 39  }
  0x3d   :  { %18460 = sst [smem:[#allocation123_spill]] %s16750_s27 }
  0x3e   :  { %s16770_s27 = sld [smem:[%s18382_s0 + %s16474_s28]]   ;;  %s16478_s28 = smov 41  }
  0x3f   :  { %s16775_s30 = sld [smem:[%s18382_s0 + %s16475_s7]]   ;;  %s16479_s7 = smov 42  }
  0x40   :  { %s16785_s14 = sld [smem:[%s18382_s0 + %s16477_s22]]   ;;  %s16481_s22 = smov 44  }
  0x41   :  { %s16795_s17 = sld [smem:[%s18382_s0 + %s16479_s7]]   ;;  %s16483_s7 = smov 46  }
  0x42   :  { %18461 = sst [smem:[#allocation124_spill]] %s16760_s19 }
  0x43   :  { %s16780_s19 = sld [smem:[%s18382_s0 + %s16476_s15]]   ;;  %s16480_s15 = smov 43  }
  0x44   :  { %18462 = sst [smem:[#allocation125_spill]] %s16770_s27 }
  0x45   :  { %s16790_s27 = sld [smem:[%s18382_s0 + %s16478_s28]]   ;;  %s16482_s28 = smov 45  }
  0x46   :  { %18464 = sst [smem:[#allocation127_spill]] %s16785_s14 }
  0x47   :  { %s16805_s14 = sld [smem:[%s18382_s0 + %s16481_s22]]   ;;  %s16485_s22 = smov 48  }
  0x48   :  { %s16815_s5 = sld [smem:[%s18382_s0 + %s16483_s7]]   ;;  %s16487_s7 = smov 50  }
  0x49   :  { %18463 = sst [smem:[#allocation126_spill]] %s16780_s19 }
  0x4a   :  { %s16800_s19 = sld [smem:[%s18382_s0 + %s16480_s15]]   ;;  %s16484_s15 = smov 47  }
  0x4b   :  { %18465 = sst [smem:[#allocation128_spill]] %s16790_s27 }
  0x4c   :  { %s16810_s27 = sld [smem:[%s18382_s0 + %s16482_s28]]   ;;  %s16486_s28 = smov 49  }
  0x4d   :  { %18467 = sst [smem:[#allocation130_spill]] %s16805_s14 }
  0x4e   :  { %18469 = sst [smem:[#allocation132_spill]] %s16815_s5 }
  0x4f   :  { %s16825_s14 = sld [smem:[%s18382_s0 + %s16485_s22]]   ;;  %s16489_s22 = smov 52  }
  0x50   :  { %18466 = sst [smem:[#allocation129_spill]] %s16800_s19 }
  0x51   :  { %s16820_s19 = sld [smem:[%s18382_s0 + %s16484_s15]]   ;;  %s16488_s15 = smov 51  }
  0x52   :  { %18468 = sst [smem:[#allocation131_spill]] %s16810_s27 }
  0x53   :  { %s16830_s27 = sld [smem:[%s18382_s0 + %s16486_s28]]   ;;  %s16490_s28 = smov 53  }
  0x54   :  { %s16835_s5 = sld [smem:[%s18382_s0 + %s16487_s7]]   ;;  %s16491_s7 = smov 54  }
  0x55   :  { %18471 = sst [smem:[#allocation134_spill]] %s16825_s14 }
  0x56   :  { %s16845_s14 = sld [smem:[%s18382_s0 + %s16489_s22]]   ;;  %s16493_s22 = smov 56  }
  0x57   :  { %18470 = sst [smem:[#allocation133_spill]] %s16820_s19 }
  0x58   :  { %s16840_s19 = sld [smem:[%s18382_s0 + %s16488_s15]]   ;;  %s16492_s15 = smov 55  }
  0x59   :  { %18472 = sst [smem:[#allocation135_spill]] %s16830_s27 }
  0x5a   :  { %18473 = sst [smem:[#allocation136_spill]] %s16835_s5 }
  0x5b   :  { %s16850_s27 = sld [smem:[%s18382_s0 + %s16490_s28]]   ;;  %s16494_s28 = smov 57  }
  0x5c   :  { %18475 = sst [smem:[#allocation138_spill]] %s16845_s14 }
  0x5d   :  { %s16855_s5 = sld [smem:[%s18382_s0 + %s16491_s7]]   ;;  %s16495_s7 = smov 58  }
  0x5e   :  { %18474 = sst [smem:[#allocation137_spill]] %s16840_s19 }
  0x5f   :  { %s16860_s19 = sld [smem:[%s18382_s0 + %s16492_s15]]   ;;  %s16496_s15 = smov 59  }
  0x60   :  { %s16865_s14 = sld [smem:[%s18382_s0 + %s16493_s22]]   ;;  %s16497_s22 = smov 60  }
  0x61   :  { %18476 = sst [smem:[#allocation139_spill]] %s16850_s27 }
  0x62   :  { %s16870_s27 = sld [smem:[%s18382_s0 + %s16494_s28]]   ;;  %s16498_s28 = smov 61  }
  0x63   :  { %18477 = sst [smem:[#allocation140_spill]] %s16855_s5 }
  0x64   :  { %s16875_s5 = sld [smem:[%s18382_s0 + %s16495_s7]]   ;;  %s16499_s7 = smov 62  }
  0x65   :  { %18478 = sst [smem:[#allocation141_spill]] %s16860_s19 }
  0x66   :  { %18479 = sst [smem:[#allocation142_spill]] %s16865_s14 }
  0x67   :  { %s16880_s19 = sld [smem:[%s18382_s0 + %s16496_s15]]   ;;  %s16500_s15 = smov 63  }
  0x68   :  { %18480 = sst [smem:[#allocation143_spill]] %s16870_s27 }
  0x69   :  { %s16885_s14 = sld [smem:[%s18382_s0 + %s16497_s22]]   ;;  %s16501_s22 = smov 64  }
  0x6a   :  { %18481 = sst [smem:[#allocation144_spill]] %s16875_s5 }
  0x6b   :  { %s16890_s27 = sld [smem:[%s18382_s0 + %s16498_s28]]   ;;  %s16502_s28 = smov 65  }
  0x6c   :  { %s16895_s5 = sld [smem:[%s18382_s0 + %s16499_s7]]   ;;  %s16503_s7 = smov 66  }
  0x6d   :  { %18482 = sst [smem:[#allocation145_spill]] %s16880_s19 }
  0x6e   :  { %s16900_s19 = sld [smem:[%s18382_s0 + %s16500_s15]]   ;;  %s16504_s15 = smov 67  }
  0x6f   :  { %18483 = sst [smem:[#allocation146_spill]] %s16885_s14 }
  0x70   :  { %s16905_s14 = sld [smem:[%s18382_s0 + %s16501_s22]]   ;;  %s16505_s22 = smov 68  }
  0x71   :  { %18484 = sst [smem:[#allocation147_spill]] %s16890_s27 }
  0x72   :  { %18485 = sst [smem:[#allocation148_spill]] %s16895_s5 }
  0x73   :  { %s16910_s27 = sld [smem:[%s18382_s0 + %s16502_s28]]   ;;  %s16506_s28 = smov 69  }
  0x74   :  { %18486 = sst [smem:[#allocation149_spill]] %s16900_s19 }
  0x75   :  { %s16915_s5 = sld [smem:[%s18382_s0 + %s16503_s7]]   ;;  %s16507_s7 = smov 70  }
  0x76   :  { %18487 = sst [smem:[#allocation150_spill]] %s16905_s14 }
  0x77   :  { %s16920_s19 = sld [smem:[%s18382_s0 + %s16504_s15]]   ;;  %s16508_s15 = smov 71  }
  0x78   :  { %s16925_s14 = sld [smem:[%s18382_s0 + %s16505_s22]]   ;;  %s16509_s22 = smov 72  }
  0x79   :  { %18488 = sst [smem:[#allocation151_spill]] %s16910_s27 }
  0x7a   :  { %s16930_s27 = sld [smem:[%s18382_s0 + %s16506_s28]]   ;;  %s16510_s28 = smov 73  }
  0x7b   :  { %18489 = sst [smem:[#allocation152_spill]] %s16915_s5 }
  0x7c   :  { %s16935_s5 = sld [smem:[%s18382_s0 + %s16507_s7]]   ;;  %s16511_s7 = smov 74  }
  0x7d   :  { %18490 = sst [smem:[#allocation153_spill]] %s16920_s19 }
  0x7e   :  { %18491 = sst [smem:[#allocation154_spill]] %s16925_s14 }
  0x7f   :  { %s16940_s19 = sld [smem:[%s18382_s0 + %s16508_s15]]   ;;  %s16512_s15 = smov 75  }
  0x80   :  { %18492 = sst [smem:[#allocation155_spill]] %s16930_s27 }
  0x81   :  { %s16945_s14 = sld [smem:[%s18382_s0 + %s16509_s22]]   ;;  %s16513_s22 = smov 76  }
  0x82   :  { %18493 = sst [smem:[#allocation156_spill]] %s16935_s5 }
  0x83   :  { %s16950_s27 = sld [smem:[%s18382_s0 + %s16510_s28]]  }
  0x84   :  { %s16955_s5 = sld [smem:[%s18382_s0 + %s16511_s7]]  }
  0x85   :  { %18494 = sst [smem:[#allocation157_spill]] %s16940_s19 }
  0x86   :  { %s16960_s19 = sld [smem:[%s18382_s0 + %s16512_s15]]  }
  0x87   :  { %18495 = sst [smem:[#allocation158_spill]] %s16945_s14 }
  0x88   :  { %s16965_s14 = sld [smem:[%s18382_s0 + %s16513_s22]]  }
  0x89   :  { %158 = vsyncpa [#allocation3], 0 }
  0x8a   :  { %159 = vsyncpa [#allocation6], 0 }
  0x8b   :  { %160 = vsyncpa [#allocation9], 0 }
  0x8c   :  { %161 = vsyncpa [#allocation12], 0 }
  0x8d   :  { %162 = vsyncpa [#allocation15], 0 }
  0x8e   :  { %163 = vsyncpa [#allocation18], 0 }
  0x8f   :  { %164 = vsyncpa [#allocation21], 0 }
  0x90   :  { %165 = vsyncpa [#allocation24], 0 }
  0x91   :  { %166 = vsyncpa [#allocation27], 0 }
  0x92   :  { %167 = vsyncpa [#allocation30], 0 }
  0x93   :  { %168 = vsyncpa [#allocation33], 0 }
  0x94   :  { %169 = vsyncpa [#allocation36], 0 }
  0x95   :  { %170 = vsyncpa [#allocation39], 0 }
  0x96   :  { %171 = vsyncpa [#allocation42], 0 }
  0x97   :  { %172 = vsyncpa [#allocation45], 0 }
  0x98   :  { %173 = vsyncpa [#allocation48], 0 }
  0x99   :  { %174 = vsyncpa [#allocation51], 0 }
  0x9a   :  { %175 = vsyncpa [#allocation54], 0 }
  0x9b   :  { %176 = vsyncpa [#allocation57], 0 }
  0x9c   :  { %177 = vsyncpa [#allocation60], 0 }
  0x9d   :  { %178 = vsyncpa [#allocation63], 0 }
  0x9e   :  { %179 = vsyncpa [#allocation66], 0 }
  0x9f   :  { %180 = vsyncpa [#allocation69], 0 }
  0xa0   :  { %181 = vsyncpa [#allocation72], 0 }
  0xa1   :  { %182 = vsyncpa [#allocation4], 0  ;;  %s16514_s0 = smov [#allocation5]   ;;  %s16515_s1 = smov [#allocation8]  }
  0xa2   :  { %s200_s28 = sshll.u32 %s16514_s0, 4  ;;  %s225_s2 = sshll.u32 %s16515_s1, 4  ;;  %s201_s28 = int_to_ptr.vmem [resolvable:$true] %s200_s28  ;;  %s16967_s2 = int_to_ptr.vmem [resolvable:$true] %s225_s2 }
  0xa3   :  { %s15332_s7 = scalar_lea.hbm %s16590_s9, 256 }
  0xa4   :  { %p15333_p0 = scmp.ne.s32.totalorder %s16590_s9, %s15332_s7  ;;  %p15336_p1 = scmp.lt.u32.totalorder %s15332_s7, %s16590_s9 }
  0xa6   :  { %p15338_p2 = pnand %p15336_p1, %p15333_p0 }
  0xa8   :  { %15341 = shalt.err (!%p15338_p2)
}
  0xa9   :  { %s15342_s10 = scalar_lea.vmem %s201_s28, 256  ;;  %p15347_p4 = scmp.lt.s32.totalorder %s201_s28, %s201_s28 }
  0xaa   :  { %p15343_p3 = scmp.ne.s32.totalorder %s201_s28, %s15342_s10  ;;  %p15348_p5 = scmp.lt.s32.totalorder %s15342_s10, %s15342_s10 }
  0xac   :  { %p15349_p6 = por %p15348_p5, %p15347_p4 }
  0xae   :  { %p15350_p7 = pnand %p15349_p6, %p15343_p3 }
  0xb0   :  { %15353 = shalt.err (!%p15350_p7)
}
  0xb1   :  { %s16516_s11 = smov 128   ;;  %s16517_s15 = smov 8  }
  0xb2   :  { %206 = dma.hbm_to_vmem [thread:$0]  %s16590_s9, 256, %s201_s28, [#allocation6], %s16516_s11, %s16516_s11, %s16517_s15  }
  0xb3   :  { %s15354_s16 = scalar_lea.hbm %s16605_s21, 16 }
  0xb4   :  { %p15355_p8 = scmp.ne.s32.totalorder %s16605_s21, %s15354_s16  ;;  %p15358_p9 = scmp.lt.u32.totalorder %s15354_s16, %s16605_s21 }
  0xb6   :  { %p15360_p10 = pnand %p15358_p9, %p15355_p8 }
  0xb8   :  { %15363 = shalt.err (!%p15360_p10)
}
  0xb9   :  { %s15364_s18 = scalar_lea.vmem %s16967_s2, 16  ;;  %s15368_s22 = scalar_lea.vmem %s16967_s2, 32 }
  0xba   :  { %p15365_p11 = scmp.ne.s32.totalorder %s16967_s2, %s15364_s18  ;;  %p15369_p12 = scmp.lt.s32.totalorder %s16967_s2, %s16967_s2 }
  0xbb   :  { %p15370_p13 = scmp.lt.s32.totalorder %s15368_s22, %s15364_s18 }
  0xbd   :  { %p15371_p0 = por %p15370_p13, %p15369_p12 }
  0xbf   :  { %p15372_p1 = pnand %p15371_p0, %p15365_p11 }
  0xc1   :  { %15375 = shalt.err (!%p15372_p1)
}
  0xc2   :  { %228 = dma.hbm_to_vmem [thread:$0]  %s16605_s21, 16, %s16967_s2, [#allocation9]  }
  0xc3   :  { %s16518_s9 = smov [#allocation11]   ;;  %s16519_s26 = smov [#allocation14]  }
  0xc4   :  { %s255_s23 = sshll.u32 %s16518_s9, 4  ;;  %s275_s0 = sshll.u32 %s16519_s26, 4  ;;  %s256_s23 = int_to_ptr.vmem [resolvable:$true] %s255_s23  ;;  %s276_s0 = int_to_ptr.vmem [resolvable:$true] %s275_s0 }
  0xc5   :  { %s15376_s28 = scalar_lea.hbm %s16640_s24, 16 }
  0xc6   :  { %p15377_p2 = scmp.ne.s32.totalorder %s16640_s24, %s15376_s28  ;;  %p15380_p3 = scmp.lt.u32.totalorder %s15376_s28, %s16640_s24 }
  0xc8   :  { %p15382_p4 = pnand %p15380_p3, %p15377_p2 }
  0xca   :  { %15385 = shalt.err (!%p15382_p4)
}
  0xcb   :  { %s15386_s1 = scalar_lea.vmem %s256_s23, 16  ;;  %s15390_s7 = scalar_lea.vmem %s256_s23, 32 }
  0xcc   :  { %p15387_p5 = scmp.ne.s32.totalorder %s256_s23, %s15386_s1  ;;  %p15391_p6 = scmp.lt.s32.totalorder %s256_s23, %s256_s23 }
  0xcd   :  { %p15392_p7 = scmp.lt.s32.totalorder %s15390_s7, %s15386_s1 }
  0xcf   :  { %p15393_p8 = por %p15392_p7, %p15391_p6 }
  0xd1   :  { %p15394_p9 = pnand %p15393_p8, %p15387_p5 }
  0xd3   :  { %15397 = shalt.err (!%p15394_p9)
}
  0xd4   :  { %258 = dma.hbm_to_vmem [thread:$0]  %s16640_s24, 16, %s256_s23, [#allocation12]  }
  0xd5   :  { %s15398_s21 = scalar_lea.hbm %s16650_s6, 16 }
  0xd6   :  { %p15399_p10 = scmp.ne.s32.totalorder %s16650_s6, %s15398_s21  ;;  %p15402_p11 = scmp.lt.u32.totalorder %s15398_s21, %s16650_s6 }
  0xd8   :  { %p15404_p12 = pnand %p15402_p11, %p15399_p10 }
  0xda   :  { %15407 = shalt.err (!%p15404_p12)
}
  0xdb   :  { %s15408_s2 = scalar_lea.vmem %s276_s0, 16  ;;  %s15412_s10 = scalar_lea.vmem %s276_s0, 32 }
  0xdc   :  { %p15409_p13 = scmp.ne.s32.totalorder %s276_s0, %s15408_s2  ;;  %p15413_p0 = scmp.lt.s32.totalorder %s276_s0, %s276_s0 }
  0xdd   :  { %p15414_p1 = scmp.lt.s32.totalorder %s15412_s10, %s15408_s2 }
  0xdf   :  { %p15415_p2 = por %p15414_p1, %p15413_p0 }
  0xe1   :  { %p15416_p3 = pnand %p15415_p2, %p15409_p13 }
  0xe3   :  { %15419 = shalt.err (!%p15416_p3)
}
  0xe4   :  { %278 = dma.hbm_to_vmem [thread:$0]  %s16650_s6, 16, %s276_s0, [#allocation15]  }
  0xe5   :  { %s16520_s16 = smov [#allocation17]   ;;  %s16521_s18 = smov [#allocation20]  }
  0xe6   :  { %s295_s24 = sshll.u32 %s16520_s16, 4  ;;  %s315_s22 = sshll.u32 %s16521_s18, 4  ;;  %s296_s24 = int_to_ptr.vmem [resolvable:$true] %s295_s24  ;;  %s316_s22 = int_to_ptr.vmem [resolvable:$true] %s315_s22 }
  0xe7   :  { %s15420_s9 = scalar_lea.hbm %s16660_s20, 16 }
  0xe8   :  { %p15421_p4 = scmp.ne.s32.totalorder %s16660_s20, %s15420_s9  ;;  %p15424_p5 = scmp.lt.u32.totalorder %s15420_s9, %s16660_s20 }
  0xea   :  { %p15426_p6 = pnand %p15424_p5, %p15421_p4 }
  0xec   :  { %15429 = shalt.err (!%p15426_p6)
}
  0xed   :  { %s15430_s23 = scalar_lea.vmem %s296_s24, 16  ;;  %s15434_s26 = scalar_lea.vmem %s296_s24, 32 }
  0xee   :  { %p15431_p7 = scmp.ne.s32.totalorder %s296_s24, %s15430_s23  ;;  %p15435_p8 = scmp.lt.s32.totalorder %s296_s24, %s296_s24 }
  0xef   :  { %p15436_p9 = scmp.lt.s32.totalorder %s15434_s26, %s15430_s23 }
  0xf1   :  { %p15437_p10 = por %p15436_p9, %p15435_p8 }
  0xf3   :  { %p15438_p11 = pnand %p15437_p10, %p15431_p7 }
  0xf5   :  { %15441 = shalt.err (!%p15438_p11)
}
  0xf6   :  { %298 = dma.hbm_to_vmem [thread:$0]  %s16660_s20, 16, %s296_s24, [#allocation18]  }
  0xf7   :  { %s15442_s6 = scalar_lea.hbm %s16670_s4, 16 }
  0xf8   :  { %p15443_p12 = scmp.ne.s32.totalorder %s16670_s4, %s15442_s6  ;;  %p15446_p13 = scmp.lt.u32.totalorder %s15442_s6, %s16670_s4 }
  0xfa   :  { %p15448_p0 = pnand %p15446_p13, %p15443_p12 }
  0xfc   :  { %15451 = shalt.err (!%p15448_p0)
}
  0xfd   :  { %s15452_s0 = scalar_lea.vmem %s316_s22, 16  ;;  %s15456_s28 = scalar_lea.vmem %s316_s22, 32 }
  0xfe   :  { %p15453_p1 = scmp.ne.s32.totalorder %s316_s22, %s15452_s0  ;;  %p15457_p2 = scmp.lt.s32.totalorder %s316_s22, %s316_s22 }
  0xff   :  { %p15458_p3 = scmp.lt.s32.totalorder %s15456_s28, %s15452_s0 }
 0x101   :  { %p15459_p4 = por %p15458_p3, %p15457_p2 }
 0x103   :  { %p15460_p5 = pnand %p15459_p4, %p15453_p1 }
 0x105   :  { %15463 = shalt.err (!%p15460_p5)
}
 0x106   :  { %318 = dma.hbm_to_vmem [thread:$0]  %s16670_s4, 16, %s316_s22, [#allocation21]  }
 0x107   :  { %s16522_s1 = smov [#allocation23]   ;;  %s16523_s7 = smov [#allocation26]  }
 0x108   :  { %s335_s20 = sshll.u32 %s16522_s1, 4  ;;  %s359_s21 = sshll.u32 %s16523_s7, 4  ;;  %s336_s20 = int_to_ptr.vmem [resolvable:$true] %s335_s20  ;;  %s360_s21 = int_to_ptr.vmem [resolvable:$true] %s359_s21 }
 0x109   :  { %s15464_s2 = scalar_lea.hbm %s16680_s8, 16 }
 0x10a   :  { %p15465_p6 = scmp.ne.s32.totalorder %s16680_s8, %s15464_s2  ;;  %p15468_p7 = scmp.lt.u32.totalorder %s15464_s2, %s16680_s8 }
 0x10c   :  { %p15470_p8 = pnand %p15468_p7, %p15465_p6 }
 0x10e   :  { %15473 = shalt.err (!%p15470_p8)
}
 0x10f   :  { %s15474_s10 = scalar_lea.vmem %s336_s20, 16  ;;  %s15478_s16 = scalar_lea.vmem %s336_s20, 32 }
 0x110   :  { %p15475_p9 = scmp.ne.s32.totalorder %s336_s20, %s15474_s10  ;;  %p15479_p10 = scmp.lt.s32.totalorder %s336_s20, %s336_s20 }
 0x111   :  { %p15480_p11 = scmp.lt.s32.totalorder %s15478_s16, %s15474_s10 }
 0x113   :  { %p15481_p12 = por %p15480_p11, %p15479_p10 }
 0x115   :  { %p15482_p13 = pnand %p15481_p12, %p15475_p9 }
 0x117   :  { %15485 = shalt.err (!%p15482_p13)
}
 0x118   :  { %338 = dma.hbm_to_vmem [thread:$0]  %s16680_s8, 16, %s336_s20, [#allocation24]  }
 0x119   :  { %s15486_s4 = scalar_lea.hbm %s16700_s25, 16 }
 0x11a   :  { %p15487_p0 = scmp.ne.s32.totalorder %s16700_s25, %s15486_s4  ;;  %p15490_p1 = scmp.lt.u32.totalorder %s15486_s4, %s16700_s25 }
 0x11c   :  { %p15492_p2 = pnand %p15490_p1, %p15487_p0 }
 0x11e   :  { %15495 = shalt.err (!%p15492_p2)
}
 0x11f   :  { %s15496_s24 = scalar_lea.vmem %s360_s21, 16  ;;  %s15500_s18 = scalar_lea.vmem %s360_s21, 32 }
 0x120   :  { %p15497_p3 = scmp.ne.s32.totalorder %s360_s21, %s15496_s24  ;;  %p15501_p4 = scmp.lt.s32.totalorder %s360_s21, %s360_s21 }
 0x121   :  { %p15502_p5 = scmp.lt.s32.totalorder %s15500_s18, %s15496_s24 }
 0x123   :  { %p15503_p6 = por %p15502_p5, %p15501_p4 }
 0x125   :  { %p15504_p7 = pnand %p15503_p6, %p15497_p3 }
 0x127   :  { %15507 = shalt.err (!%p15504_p7)
}
 0x128   :  { %362 = dma.hbm_to_vmem [thread:$0]  %s16700_s25, 16, %s360_s21, [#allocation27]  }
 0x129   :  { %s16524_s22 = smov [#allocation29]   ;;  %s16525_s9 = smov [#allocation32]  }
 0x12a   :  { %s387_s8 = sshll.u32 %s16524_s22, 4  ;;  %s409_s23 = sshll.u32 %s16525_s9, 4  ;;  %s388_s8 = int_to_ptr.vmem [resolvable:$true] %s387_s8  ;;  %s410_s23 = int_to_ptr.vmem [resolvable:$true] %s409_s23 }
 0x12b   :  { %s15508_s26 = scalar_lea.hbm %s16730_s13, 16 }
 0x12c   :  { %p15509_p8 = scmp.ne.s32.totalorder %s16730_s13, %s15508_s26  ;;  %p15512_p9 = scmp.lt.u32.totalorder %s15508_s26, %s16730_s13 }
 0x12e   :  { %p15514_p10 = pnand %p15512_p9, %p15509_p8 }
 0x130   :  { %15517 = shalt.err (!%p15514_p10)
}
 0x131   :  { %s15518_s6 = scalar_lea.vmem %s388_s8, 16  ;;  %s15522_s0 = scalar_lea.vmem %s388_s8, 32 }
 0x132   :  { %p15519_p11 = scmp.ne.s32.totalorder %s388_s8, %s15518_s6  ;;  %p15523_p12 = scmp.lt.s32.totalorder %s388_s8, %s388_s8 }
 0x133   :  { %p15524_p13 = scmp.lt.s32.totalorder %s15522_s0, %s15518_s6 }
 0x135   :  { %p15525_p0 = por %p15524_p13, %p15523_p12 }
 0x137   :  { %p15526_p1 = pnand %p15525_p0, %p15519_p11 }
 0x139   :  { %15529 = shalt.err (!%p15526_p1)
}
 0x13a   :  { %390 = dma.hbm_to_vmem [thread:$0]  %s16730_s13, 16, %s388_s8, [#allocation30]  }
 0x13b   :  { %s15530_s25 = scalar_lea.hbm %s16745_s29, 16 }
 0x13c   :  { %p15531_p2 = scmp.ne.s32.totalorder %s16745_s29, %s15530_s25  ;;  %p15534_p3 = scmp.lt.u32.totalorder %s15530_s25, %s16745_s29 }
 0x13e   :  { %p15536_p4 = pnand %p15534_p3, %p15531_p2 }
 0x140   :  { %15539 = shalt.err (!%p15536_p4)
}
 0x141   :  { %s15540_s28 = scalar_lea.vmem %s410_s23, 16  ;;  %s15544_s1 = scalar_lea.vmem %s410_s23, 32 }
 0x142   :  { %p15541_p5 = scmp.ne.s32.totalorder %s410_s23, %s15540_s28  ;;  %p15545_p6 = scmp.lt.s32.totalorder %s410_s23, %s410_s23 }
 0x143   :  { %p15546_p7 = scmp.lt.s32.totalorder %s15544_s1, %s15540_s28 }
 0x145   :  { %p15547_p8 = por %p15546_p7, %p15545_p6 }
 0x147   :  { %p15548_p9 = pnand %p15547_p8, %p15541_p5 }
 0x149   :  { %15551 = shalt.err (!%p15548_p9)
}
 0x14a   :  { %412 = dma.hbm_to_vmem [thread:$0]  %s16745_s29, 16, %s410_s23, [#allocation33]  }
 0x14b   :  { %s16526_s20 = smov [#allocation35]   ;;  %s16527_s7 = smov [#allocation38]  }
 0x14c   :  { %s429_s13 = sshll.u32 %s16526_s20, 4  ;;  %s449_s21 = sshll.u32 %s16527_s7, 4  ;;  %s430_s13 = int_to_ptr.vmem [resolvable:$true] %s429_s13  ;;  %s450_s21 = int_to_ptr.vmem [resolvable:$true] %s449_s21 }
 0x14d   :  { %s15552_s2 = scalar_lea.hbm %s16755_s3, 16 }
 0x14e   :  { %p15553_p10 = scmp.ne.s32.totalorder %s16755_s3, %s15552_s2  ;;  %p15556_p11 = scmp.lt.u32.totalorder %s15552_s2, %s16755_s3 }
 0x150   :  { %p15558_p12 = pnand %p15556_p11, %p15553_p10 }
 0x152   :  { %15561 = shalt.err (!%p15558_p12)
}
 0x153   :  { %s15562_s10 = scalar_lea.vmem %s430_s13, 16  ;;  %s15566_s16 = scalar_lea.vmem %s430_s13, 32 }
 0x154   :  { %p15563_p13 = scmp.ne.s32.totalorder %s430_s13, %s15562_s10  ;;  %p15567_p0 = scmp.lt.s32.totalorder %s430_s13, %s430_s13 }
 0x155   :  { %p15568_p1 = scmp.lt.s32.totalorder %s15566_s16, %s15562_s10 }
 0x157   :  { %p15569_p2 = por %p15568_p1, %p15567_p0 }
 0x159   :  { %p15570_p3 = pnand %p15569_p2, %p15563_p13 }
 0x15b   :  { %15573 = shalt.err (!%p15570_p3)
}
 0x15c   :  { %432 = dma.hbm_to_vmem [thread:$0]  %s16755_s3, 16, %s430_s13, [#allocation36]  }
 0x15d   :  { %s15574_s29 = scalar_lea.hbm %s16765_s12, 16 }
 0x15e   :  { %p15575_p4 = scmp.ne.s32.totalorder %s16765_s12, %s15574_s29  ;;  %p15578_p5 = scmp.lt.u32.totalorder %s15574_s29, %s16765_s12 }
 0x160   :  { %p15580_p6 = pnand %p15578_p5, %p15575_p4 }
 0x162   :  { %15583 = shalt.err (!%p15580_p6)
}
 0x163   :  { %s15584_s4 = scalar_lea.vmem %s450_s21, 16  ;;  %s15588_s24 = scalar_lea.vmem %s450_s21, 32 }
 0x164   :  { %p15585_p7 = scmp.ne.s32.totalorder %s450_s21, %s15584_s4  ;;  %p15589_p8 = scmp.lt.s32.totalorder %s450_s21, %s450_s21 }
 0x165   :  { %p15590_p9 = scmp.lt.s32.totalorder %s15588_s24, %s15584_s4 }
 0x167   :  { %p15591_p10 = por %p15590_p9, %p15589_p8 }
 0x169   :  { %p15592_p11 = pnand %p15591_p10, %p15585_p7 }
 0x16b   :  { %15595 = shalt.err (!%p15592_p11)
}
 0x16c   :  { %452 = dma.hbm_to_vmem [thread:$0]  %s16765_s12, 16, %s450_s21, [#allocation39]  }
 0x16d   :  { %s16528_s18 = smov [#allocation41]   ;;  %s16529_s22 = smov [#allocation44]  }
 0x16e   :  { %s469_s3 = sshll.u32 %s16528_s18, 4  ;;  %s493_s8 = sshll.u32 %s16529_s22, 4  ;;  %s470_s3 = int_to_ptr.vmem [resolvable:$true] %s469_s3  ;;  %s494_s8 = int_to_ptr.vmem [resolvable:$true] %s493_s8 }
 0x16f   :  { %s15596_s9 = scalar_lea.hbm %s16775_s30, 16 }
 0x170   :  { %p15597_p12 = scmp.ne.s32.totalorder %s16775_s30, %s15596_s9  ;;  %p15600_p13 = scmp.lt.u32.totalorder %s15596_s9, %s16775_s30 }
 0x172   :  { %p15602_p0 = pnand %p15600_p13, %p15597_p12 }
 0x174   :  { %15605 = shalt.err (!%p15602_p0)
}
 0x175   :  { %s15606_s23 = scalar_lea.vmem %s470_s3, 16  ;;  %s15610_s26 = scalar_lea.vmem %s470_s3, 32 }
 0x176   :  { %p15607_p1 = scmp.ne.s32.totalorder %s470_s3, %s15606_s23  ;;  %p15611_p2 = scmp.lt.s32.totalorder %s470_s3, %s470_s3 }
 0x177   :  { %p15612_p3 = scmp.lt.s32.totalorder %s15610_s26, %s15606_s23 }
 0x179   :  { %p15613_p4 = por %p15612_p3, %p15611_p2 }
 0x17b   :  { %p15614_p5 = pnand %p15613_p4, %p15607_p1 }
 0x17d   :  { %15617 = shalt.err (!%p15614_p5)
}
 0x17e   :  { %472 = dma.hbm_to_vmem [thread:$0]  %s16775_s30, 16, %s470_s3, [#allocation42]  }
 0x17f   :  { %s15618_s12 = scalar_lea.hbm %s16795_s17, 16 }
 0x180   :  { %p15619_p6 = scmp.ne.s32.totalorder %s16795_s17, %s15618_s12  ;;  %p15622_p7 = scmp.lt.u32.totalorder %s15618_s12, %s16795_s17 }
 0x182   :  { %p15624_p8 = pnand %p15622_p7, %p15619_p6 }
 0x184   :  { %15627 = shalt.err (!%p15624_p8)
}
 0x185   :  { %s15628_s6 = scalar_lea.vmem %s494_s8, 16  ;;  %s15632_s0 = scalar_lea.vmem %s494_s8, 32 }
 0x186   :  { %p15629_p9 = scmp.ne.s32.totalorder %s494_s8, %s15628_s6  ;;  %p15633_p10 = scmp.lt.s32.totalorder %s494_s8, %s494_s8 }
 0x187   :  { %p15634_p11 = scmp.lt.s32.totalorder %s15632_s0, %s15628_s6 }
 0x189   :  { %p15635_p12 = por %p15634_p11, %p15633_p10 }
 0x18b   :  { %p15636_p13 = pnand %p15635_p12, %p15629_p9 }
 0x18d   :  { %15639 = shalt.err (!%p15636_p13)
}
 0x18e   :  { %s18496_s25 = sld [smem:[#allocation130_spill]]  ;;  %s16530_s28 = smov [#allocation47]  }
 0x18f   :  { %496 = dma.hbm_to_vmem [thread:$0]  %s16795_s17, 16, %s494_s8, [#allocation45]  }
 0x190   :  { %s512_s30 = sshll.u32 %s16530_s28, 4  ;;  %s16531_s1 = smov [#allocation50]   ;;  %s513_s30 = int_to_ptr.vmem [resolvable:$true] %s512_s30 }
 0x191   :  { %s537_s20 = sshll.u32 %s16531_s1, 4  ;;  %s538_s20 = int_to_ptr.vmem [resolvable:$true] %s537_s20 }
 0x194   :  { %s15640_s13 = scalar_lea.hbm %s18496_s25, 256 }
 0x195   :  { %p15641_p0 = scmp.ne.s32.totalorder %s18496_s25, %s15640_s13  ;;  %p15644_p1 = scmp.lt.u32.totalorder %s15640_s13, %s18496_s25 }
 0x197   :  { %p15646_p2 = pnand %p15644_p1, %p15641_p0 }
 0x199   :  { %15649 = shalt.err (!%p15646_p2)
}
 0x19a   :  { %s15650_s7 = scalar_lea.vmem %s513_s30, 256  ;;  %p15655_p4 = scmp.lt.s32.totalorder %s513_s30, %s513_s30 }
 0x19b   :  { %p15651_p3 = scmp.ne.s32.totalorder %s513_s30, %s15650_s7  ;;  %p15656_p5 = scmp.lt.s32.totalorder %s15650_s7, %s15650_s7 }
 0x19d   :  { %p15657_p6 = por %p15656_p5, %p15655_p4 }
 0x19f   :  { %p15658_p7 = pnand %p15657_p6, %p15651_p3 }
 0x1a1   :  { %15661 = shalt.err (!%p15658_p7)
}
 0x1a2   :  { %s18497_s17 = sld [smem:[#allocation133_spill]] }
 0x1a3   :  { %518 = dma.hbm_to_vmem [thread:$0]  %s18496_s25, 256, %s513_s30, [#allocation48], %s16516_s11, %s16516_s11, %s16517_s15  }
 0x1a8   :  { %s15662_s21 = scalar_lea.hbm %s18497_s17, 16 }
 0x1a9   :  { %p15663_p8 = scmp.ne.s32.totalorder %s18497_s17, %s15662_s21  ;;  %p15666_p9 = scmp.lt.u32.totalorder %s15662_s21, %s18497_s17 }
 0x1ab   :  { %p15668_p10 = pnand %p15666_p9, %p15663_p8 }
 0x1ad   :  { %15671 = shalt.err (!%p15668_p10)
}
 0x1ae   :  { %s15672_s2 = scalar_lea.vmem %s538_s20, 16  ;;  %s15676_s10 = scalar_lea.vmem %s538_s20, 32 }
 0x1af   :  { %p15673_p11 = scmp.ne.s32.totalorder %s538_s20, %s15672_s2  ;;  %p15677_p12 = scmp.lt.s32.totalorder %s538_s20, %s538_s20 }
 0x1b0   :  { %p15678_p13 = scmp.lt.s32.totalorder %s15676_s10, %s15672_s2 }
 0x1b2   :  { %p15679_p0 = por %p15678_p13, %p15677_p12 }
 0x1b4   :  { %p15680_p1 = pnand %p15679_p0, %p15673_p11 }
 0x1b6   :  { %15683 = shalt.err (!%p15680_p1)
}
 0x1b7   :  { %s18498_s16 = sld [smem:[#allocation135_spill]]  ;;  %s16532_s29 = smov [#allocation53]  }
 0x1b8   :  { %540 = dma.hbm_to_vmem [thread:$0]  %s18497_s17, 16, %s538_s20, [#allocation51]  }
 0x1b9   :  { %s557_s4 = sshll.u32 %s16532_s29, 4  ;;  %s16533_s24 = smov [#allocation56]   ;;  %s558_s4 = int_to_ptr.vmem [resolvable:$true] %s557_s4 }
 0x1ba   :  { %s581_s18 = sshll.u32 %s16533_s24, 4  ;;  %s582_s18 = int_to_ptr.vmem [resolvable:$true] %s581_s18 }
 0x1bd   :  { %s15684_s3 = scalar_lea.hbm %s18498_s16, 16 }
 0x1be   :  { %p15685_p2 = scmp.ne.s32.totalorder %s18498_s16, %s15684_s3  ;;  %p15688_p3 = scmp.lt.u32.totalorder %s15684_s3, %s18498_s16 }
 0x1c0   :  { %p15690_p4 = pnand %p15688_p3, %p15685_p2 }
 0x1c2   :  { %15693 = shalt.err (!%p15690_p4)
}
 0x1c3   :  { %s15694_s22 = scalar_lea.vmem %s558_s4, 16  ;;  %s15698_s8 = scalar_lea.vmem %s558_s4, 32 }
 0x1c4   :  { %p15695_p5 = scmp.ne.s32.totalorder %s558_s4, %s15694_s22  ;;  %p15699_p6 = scmp.lt.s32.totalorder %s558_s4, %s558_s4 }
 0x1c5   :  { %p15700_p7 = scmp.lt.s32.totalorder %s15698_s8, %s15694_s22 }
 0x1c7   :  { %p15701_p8 = por %p15700_p7, %p15699_p6 }
 0x1c9   :  { %p15702_p9 = pnand %p15701_p8, %p15695_p5 }
 0x1cb   :  { %15705 = shalt.err (!%p15702_p9)
}
 0x1cc   :  { %s18499_s9 = sld [smem:[#allocation139_spill]] }
 0x1cd   :  { %560 = dma.hbm_to_vmem [thread:$0]  %s18498_s16, 16, %s558_s4, [#allocation54]  }
 0x1d2   :  { %s15706_s23 = scalar_lea.hbm %s18499_s9, 16 }
 0x1d3   :  { %p15707_p10 = scmp.ne.s32.totalorder %s18499_s9, %s15706_s23  ;;  %p15710_p11 = scmp.lt.u32.totalorder %s15706_s23, %s18499_s9 }
 0x1d5   :  { %p15712_p12 = pnand %p15710_p11, %p15707_p10 }
 0x1d7   :  { %15715 = shalt.err (!%p15712_p12)
}
 0x1d8   :  { %s15716_s26 = scalar_lea.vmem %s582_s18, 16  ;;  %s15720_s12 = scalar_lea.vmem %s582_s18, 32 }
 0x1d9   :  { %p15717_p13 = scmp.ne.s32.totalorder %s582_s18, %s15716_s26  ;;  %p15721_p0 = scmp.lt.s32.totalorder %s582_s18, %s582_s18 }
 0x1da   :  { %p15722_p1 = scmp.lt.s32.totalorder %s15720_s12, %s15716_s26 }
 0x1dc   :  { %p15723_p2 = por %p15722_p1, %p15721_p0 }
 0x1de   :  { %p15724_p3 = pnand %p15723_p2, %p15717_p13 }
 0x1e0   :  { %15727 = shalt.err (!%p15724_p3)
}
 0x1e1   :  { %s18500_s6 = sld [smem:[#allocation141_spill]]  ;;  %s16534_s0 = smov [#allocation59]  }
 0x1e2   :  { %584 = dma.hbm_to_vmem [thread:$0]  %s18499_s9, 16, %s582_s18, [#allocation57]  }
 0x1e3   :  { %s601_s25 = sshll.u32 %s16534_s0, 4  ;;  %s16535_s28 = smov [#allocation62]   ;;  %s602_s25 = int_to_ptr.vmem [resolvable:$true] %s601_s25 }
 0x1e4   :  { %s621_s30 = sshll.u32 %s16535_s28, 4  ;;  %s622_s30 = int_to_ptr.vmem [resolvable:$true] %s621_s30 }
 0x1e7   :  { %s15728_s1 = scalar_lea.hbm %s18500_s6, 16 }
 0x1e8   :  { %p15729_p4 = scmp.ne.s32.totalorder %s18500_s6, %s15728_s1  ;;  %p15732_p5 = scmp.lt.u32.totalorder %s15728_s1, %s18500_s6 }
 0x1ea   :  { %p15734_p6 = pnand %p15732_p5, %p15729_p4 }
 0x1ec   :  { %15737 = shalt.err (!%p15734_p6)
}
 0x1ed   :  { %s15738_s20 = scalar_lea.vmem %s602_s25, 16  ;;  %s15742_s13 = scalar_lea.vmem %s602_s25, 32 }
 0x1ee   :  { %p15739_p7 = scmp.ne.s32.totalorder %s602_s25, %s15738_s20  ;;  %p15743_p8 = scmp.lt.s32.totalorder %s602_s25, %s602_s25 }
 0x1ef   :  { %p15744_p9 = scmp.lt.s32.totalorder %s15742_s13, %s15738_s20 }
 0x1f1   :  { %p15745_p10 = por %p15744_p9, %p15743_p8 }
 0x1f3   :  { %p15746_p11 = pnand %p15745_p10, %p15739_p7 }
 0x1f5   :  { %15749 = shalt.err (!%p15746_p11)
}
 0x1f6   :  { %s18501_s7 = sld [smem:[#allocation143_spill]] }
 0x1f7   :  { %604 = dma.hbm_to_vmem [thread:$0]  %s18500_s6, 16, %s602_s25, [#allocation60]  }
 0x1fc   :  { %s15750_s17 = scalar_lea.hbm %s18501_s7, 16 }
 0x1fd   :  { %p15751_p12 = scmp.ne.s32.totalorder %s18501_s7, %s15750_s17  ;;  %p15754_p13 = scmp.lt.u32.totalorder %s15750_s17, %s18501_s7 }
 0x1ff   :  { %p15756_p0 = pnand %p15754_p13, %p15751_p12 }
 0x201   :  { %15759 = shalt.err (!%p15756_p0)
}
 0x202   :  { %s15760_s21 = scalar_lea.vmem %s622_s30, 16  ;;  %s15764_s2 = scalar_lea.vmem %s622_s30, 32 }
 0x203   :  { %p15761_p1 = scmp.ne.s32.totalorder %s622_s30, %s15760_s21  ;;  %p15765_p2 = scmp.lt.s32.totalorder %s622_s30, %s622_s30 }
 0x204   :  { %p15766_p3 = scmp.lt.s32.totalorder %s15764_s2, %s15760_s21 }
 0x206   :  { %p15767_p4 = por %p15766_p3, %p15765_p2 }
 0x208   :  { %p15768_p5 = pnand %p15767_p4, %p15761_p1 }
 0x20a   :  { %15771 = shalt.err (!%p15768_p5)
}
 0x20b   :  { %s18502_s10 = sld [smem:[#allocation145_spill]]  ;;  %s16536_s16 = smov [#allocation65]  }
 0x20c   :  { %624 = dma.hbm_to_vmem [thread:$0]  %s18501_s7, 16, %s622_s30, [#allocation63]  }
 0x20d   :  { %s641_s29 = sshll.u32 %s16536_s16, 4  ;;  %s16537_s4 = smov [#allocation68]   ;;  %s642_s29 = int_to_ptr.vmem [resolvable:$true] %s641_s29 }
 0x20e   :  { %s669_s24 = sshll.u32 %s16537_s4, 4  ;;  %s670_s24 = int_to_ptr.vmem [resolvable:$true] %s669_s24 }
 0x211   :  { %s15772_s18 = scalar_lea.hbm %s18502_s10, 16 }
 0x212   :  { %p15773_p6 = scmp.ne.s32.totalorder %s18502_s10, %s15772_s18  ;;  %p15776_p7 = scmp.lt.u32.totalorder %s15772_s18, %s18502_s10 }
 0x214   :  { %p15778_p8 = pnand %p15776_p7, %p15773_p6 }
 0x216   :  { %15781 = shalt.err (!%p15778_p8)
}
 0x217   :  { %s15782_s3 = scalar_lea.vmem %s642_s29, 16  ;;  %s15786_s22 = scalar_lea.vmem %s642_s29, 32 }
 0x218   :  { %p15783_p9 = scmp.ne.s32.totalorder %s642_s29, %s15782_s3  ;;  %p15787_p10 = scmp.lt.s32.totalorder %s642_s29, %s642_s29 }
 0x219   :  { %p15788_p11 = scmp.lt.s32.totalorder %s15786_s22, %s15782_s3 }
 0x21b   :  { %p15789_p12 = por %p15788_p11, %p15787_p10 }
 0x21d   :  { %p15790_p13 = pnand %p15789_p12, %p15783_p9 }
 0x21f   :  { %15793 = shalt.err (!%p15790_p13)
}
 0x220   :  { %s18503_s8 = sld [smem:[#allocation151_spill]] }
 0x221   :  { %644 = dma.hbm_to_vmem [thread:$0]  %s18502_s10, 16, %s642_s29, [#allocation66]  }
 0x226   :  { %s15794_s9 = scalar_lea.hbm %s18503_s8, 16 }
 0x227   :  { %p15795_p0 = scmp.ne.s32.totalorder %s18503_s8, %s15794_s9  ;;  %p15798_p1 = scmp.lt.u32.totalorder %s15794_s9, %s18503_s8 }
 0x229   :  { %p15800_p2 = pnand %p15798_p1, %p15795_p0 }
 0x22b   :  { %15803 = shalt.err (!%p15800_p2)
}
 0x22c   :  { %s15804_s23 = scalar_lea.vmem %s670_s24, 16  ;;  %s15808_s26 = scalar_lea.vmem %s670_s24, 32 }
 0x22d   :  { %p15805_p3 = scmp.ne.s32.totalorder %s670_s24, %s15804_s23  ;;  %p15809_p4 = scmp.lt.s32.totalorder %s670_s24, %s670_s24 }
 0x22e   :  { %p15810_p5 = scmp.lt.s32.totalorder %s15808_s26, %s15804_s23 }
 0x230   :  { %p15811_p6 = por %p15810_p5, %p15809_p4 }
 0x232   :  { %p15812_p7 = pnand %p15811_p6, %p15805_p3 }
 0x234   :  { %15815 = shalt.err (!%p15812_p7)
}
 0x235   :  { %s18504_s12 = sld [smem:[#allocation153_spill]]  ;;  %s16538_s6 = smov [#allocation71]  }
 0x236   :  { %672 = dma.hbm_to_vmem [thread:$0]  %s18503_s8, 16, %s670_s24, [#allocation69]  }
 0x237   :  { %s689_s0 = sshll.u32 %s16538_s6, 4  ;;  %s16539_s25 = smov [#allocation2]   ;;  %s690_s0 = int_to_ptr.vmem [resolvable:$true] %s689_s0 }
 0x238   :  { %s188_s28 = sshll.u32 %s16539_s25, 4  ;;  %s17069_s28 = int_to_ptr.vmem [resolvable:$true] %s188_s28 }
 0x23b   :  { %s15816_s30 = scalar_lea.hbm %s18504_s12, 16 }
 0x23c   :  { %p15817_p8 = scmp.ne.s32.totalorder %s18504_s12, %s15816_s30  ;;  %p15820_p9 = scmp.lt.u32.totalorder %s15816_s30, %s18504_s12 }
 0x23e   :  { %p15822_p10 = pnand %p15820_p9, %p15817_p8 }
 0x240   :  { %15825 = shalt.err (!%p15822_p10)
}
 0x241   :  { %s15826_s1 = scalar_lea.vmem %s690_s0, 16  ;;  %s15830_s20 = scalar_lea.vmem %s690_s0, 32 }
 0x242   :  { %p15827_p11 = scmp.ne.s32.totalorder %s690_s0, %s15826_s1  ;;  %p15831_p12 = scmp.lt.s32.totalorder %s690_s0, %s690_s0 }
 0x243   :  { %p15832_p13 = scmp.lt.s32.totalorder %s15830_s20, %s15826_s1 }
 0x245   :  { %p15833_p0 = por %p15832_p13, %p15831_p12 }
 0x247   :  { %p15834_p1 = pnand %p15833_p0, %p15827_p11 }
 0x249   :  { %15837 = shalt.err (!%p15834_p1)
}
 0x24a   :  { %s18505_s13 = sld [smem:[#allocation100_spill]] }
 0x24b   :  { %692 = dma.hbm_to_vmem [thread:$0]  %s18504_s12, 16, %s690_s0, [#allocation72]  }
 0x250   :  { %s15838_s7 = scalar_lea.hbm %s18505_s13, 256 }
 0x251   :  { %p15839_p2 = scmp.ne.s32.totalorder %s18505_s13, %s15838_s7  ;;  %p15842_p3 = scmp.lt.u32.totalorder %s15838_s7, %s18505_s13 }
 0x253   :  { %p15844_p4 = pnand %p15842_p3, %p15839_p2 }
 0x255   :  { %15847 = shalt.err (!%p15844_p4)
}
 0x256   :  { %s15848_s17 = scalar_lea.vmem %s17069_s28, 256  ;;  %p15853_p6 = scmp.lt.s32.totalorder %s17069_s28, %s17069_s28 }
 0x257   :  { %p15849_p5 = scmp.ne.s32.totalorder %s17069_s28, %s15848_s17  ;;  %p15854_p7 = scmp.lt.s32.totalorder %s15848_s17, %s15848_s17 }
 0x259   :  { %p15855_p8 = por %p15854_p7, %p15853_p6 }
 0x25b   :  { %p15856_p9 = pnand %p15855_p8, %p15849_p5 }
 0x25d   :  { %15859 = shalt.err (!%p15856_p9)
}
 0x25e   :  { %s18506_s21 = sld [smem:[#allocation102_spill]]  ;;  %s16540_s2 = smov [#allocation7]  }
 0x25f   :  { %194 = dma.hbm_to_vmem [thread:$0]  %s18505_s13, 256, %s17069_s28, [#allocation3], %s16516_s11, %s16516_s11, %s16517_s15  }
 0x260   :  { %s215_s10 = sshll.u32 %s16540_s2, 4  ;;  %s16541_s16 = smov [#allocation10]   ;;  %s216_s10 = int_to_ptr.vmem [resolvable:$true] %s215_s10 }
 0x261   :  { %s243_s29 = sshll.u32 %s16541_s16, 4  ;;  %s244_s29 = int_to_ptr.vmem [resolvable:$true] %s243_s29 }
 0x264   :  { %s15860_s4 = scalar_lea.hbm %s18506_s21, 16 }
 0x265   :  { %p15861_p10 = scmp.ne.s32.totalorder %s18506_s21, %s15860_s4  ;;  %p15864_p11 = scmp.lt.u32.totalorder %s15860_s4, %s18506_s21 }
 0x267   :  { %p15866_p12 = pnand %p15864_p11, %p15861_p10 }
 0x269   :  { %15869 = shalt.err (!%p15866_p12)
}
 0x26a   :  { %s15870_s24 = scalar_lea.vmem %s216_s10, 16  ;;  %s15874_s18 = scalar_lea.vmem %s216_s10, 32 }
 0x26b   :  { %p15871_p13 = scmp.ne.s32.totalorder %s216_s10, %s15870_s24  ;;  %p15875_p0 = scmp.lt.s32.totalorder %s216_s10, %s216_s10 }
 0x26c   :  { %p15876_p1 = scmp.lt.s32.totalorder %s15874_s18, %s15870_s24 }
 0x26e   :  { %p15877_p2 = por %p15876_p1, %p15875_p0 }
 0x270   :  { %p15878_p3 = pnand %p15877_p2, %p15871_p13 }
 0x272   :  { %15881 = shalt.err (!%p15878_p3)
}
 0x273   :  { %s18507_s3 = sld [smem:[#allocation107_spill]] }
 0x274   :  { %218 = dma.hbm_to_vmem [thread:$0]  %s18506_s21, 16, %s216_s10, [#allocation6]  }
 0x279   :  { %s15882_s22 = scalar_lea.hbm %s18507_s3, 16 }
 0x27a   :  { %p15883_p4 = scmp.ne.s32.totalorder %s18507_s3, %s15882_s22  ;;  %p15886_p5 = scmp.lt.u32.totalorder %s15882_s22, %s18507_s3 }
 0x27c   :  { %p15888_p6 = pnand %p15886_p5, %p15883_p4 }
 0x27e   :  { %15891 = shalt.err (!%p15888_p6)
}
 0x27f   :  { %s15892_s8 = scalar_lea.vmem %s244_s29, 16  ;;  %s15896_s9 = scalar_lea.vmem %s244_s29, 32 }
 0x280   :  { %p15893_p7 = scmp.ne.s32.totalorder %s244_s29, %s15892_s8  ;;  %p15897_p8 = scmp.lt.s32.totalorder %s244_s29, %s244_s29 }
 0x281   :  { %p15898_p9 = scmp.lt.s32.totalorder %s15896_s9, %s15892_s8 }
 0x283   :  { %p15899_p10 = por %p15898_p9, %p15897_p8 }
 0x285   :  { %p15900_p11 = pnand %p15899_p10, %p15893_p7 }
 0x287   :  { %15903 = shalt.err (!%p15900_p11)
}
 0x288   :  { %s18508_s23 = sld [smem:[#allocation109_spill]]  ;;  %s16542_s26 = smov [#allocation13]  }
 0x289   :  { %246 = dma.hbm_to_vmem [thread:$0]  %s18507_s3, 16, %s244_s29, [#allocation9]  }
 0x28a   :  { %s265_s12 = sshll.u32 %s16542_s26, 4  ;;  %s16543_s6 = smov [#allocation16]   ;;  %s266_s12 = int_to_ptr.vmem [resolvable:$true] %s265_s12 }
 0x28b   :  { %s285_s0 = sshll.u32 %s16543_s6, 4  ;;  %s286_s0 = int_to_ptr.vmem [resolvable:$true] %s285_s0 }
 0x28e   :  { %s15904_s25 = scalar_lea.hbm %s18508_s23, 16 }
 0x28f   :  { %p15905_p12 = scmp.ne.s32.totalorder %s18508_s23, %s15904_s25  ;;  %p15908_p13 = scmp.lt.u32.totalorder %s15904_s25, %s18508_s23 }
 0x291   :  { %p15910_p0 = pnand %p15908_p13, %p15905_p12 }
 0x293   :  { %15913 = shalt.err (!%p15910_p0)
}
 0x294   :  { %s15914_s28 = scalar_lea.vmem %s266_s12, 16  ;;  %s15918_s30 = scalar_lea.vmem %s266_s12, 32 }
 0x295   :  { %p15915_p1 = scmp.ne.s32.totalorder %s266_s12, %s15914_s28  ;;  %p15919_p2 = scmp.lt.s32.totalorder %s266_s12, %s266_s12 }
 0x296   :  { %p15920_p3 = scmp.lt.s32.totalorder %s15918_s30, %s15914_s28 }
 0x298   :  { %p15921_p4 = por %p15920_p3, %p15919_p2 }
 0x29a   :  { %p15922_p5 = pnand %p15921_p4, %p15915_p1 }
 0x29c   :  { %15925 = shalt.err (!%p15922_p5)
}
 0x29d   :  { %s18509_s1 = sld [smem:[#allocation110_spill]] }
 0x29e   :  { %268 = dma.hbm_to_vmem [thread:$0]  %s18508_s23, 16, %s266_s12, [#allocation12]  }
 0x2a3   :  { %s15926_s20 = scalar_lea.hbm %s18509_s1, 16 }
 0x2a4   :  { %p15927_p6 = scmp.ne.s32.totalorder %s18509_s1, %s15926_s20  ;;  %p15930_p7 = scmp.lt.u32.totalorder %s15926_s20, %s18509_s1 }
 0x2a6   :  { %p15932_p8 = pnand %p15930_p7, %p15927_p6 }
 0x2a8   :  { %15935 = shalt.err (!%p15932_p8)
}
 0x2a9   :  { %s15936_s13 = scalar_lea.vmem %s286_s0, 16  ;;  %s15940_s7 = scalar_lea.vmem %s286_s0, 32 }
 0x2aa   :  { %p15937_p9 = scmp.ne.s32.totalorder %s286_s0, %s15936_s13  ;;  %p15941_p10 = scmp.lt.s32.totalorder %s286_s0, %s286_s0 }
 0x2ab   :  { %p15942_p11 = scmp.lt.s32.totalorder %s15940_s7, %s15936_s13 }
 0x2ad   :  { %p15943_p12 = por %p15942_p11, %p15941_p10 }
 0x2af   :  { %p15944_p13 = pnand %p15943_p12, %p15937_p9 }
 0x2b1   :  { %15947 = shalt.err (!%p15944_p13)
}
 0x2b2   :  { %s18510_s17 = sld [smem:[#allocation111_spill]]  ;;  %s16544_s21 = smov [#allocation19]  }
 0x2b3   :  { %288 = dma.hbm_to_vmem [thread:$0]  %s18509_s1, 16, %s286_s0, [#allocation15]  }
 0x2b4   :  { %s305_s2 = sshll.u32 %s16544_s21, 4  ;;  %s16545_s10 = smov [#allocation22]   ;;  %s306_s2 = int_to_ptr.vmem [resolvable:$true] %s305_s2 }
 0x2b5   :  { %s325_s16 = sshll.u32 %s16545_s10, 4  ;;  %s326_s16 = int_to_ptr.vmem [resolvable:$true] %s325_s16 }
 0x2b8   :  { %s15948_s29 = scalar_lea.hbm %s18510_s17, 16 }
 0x2b9   :  { %p15949_p0 = scmp.ne.s32.totalorder %s18510_s17, %s15948_s29  ;;  %p15952_p1 = scmp.lt.u32.totalorder %s15948_s29, %s18510_s17 }
 0x2bb   :  { %p15954_p2 = pnand %p15952_p1, %p15949_p0 }
 0x2bd   :  { %15957 = shalt.err (!%p15954_p2)
}
 0x2be   :  { %s15958_s4 = scalar_lea.vmem %s306_s2, 16  ;;  %s15962_s24 = scalar_lea.vmem %s306_s2, 32 }
 0x2bf   :  { %p15959_p3 = scmp.ne.s32.totalorder %s306_s2, %s15958_s4  ;;  %p15963_p4 = scmp.lt.s32.totalorder %s306_s2, %s306_s2 }
 0x2c0   :  { %p15964_p5 = scmp.lt.s32.totalorder %s15962_s24, %s15958_s4 }
 0x2c2   :  { %p15965_p6 = por %p15964_p5, %p15963_p4 }
 0x2c4   :  { %p15966_p7 = pnand %p15965_p6, %p15959_p3 }
 0x2c6   :  { %15969 = shalt.err (!%p15966_p7)
}
 0x2c7   :  { %s18511_s18 = sld [smem:[#allocation112_spill]] }
 0x2c8   :  { %308 = dma.hbm_to_vmem [thread:$0]  %s18510_s17, 16, %s306_s2, [#allocation18]  }
 0x2cd   :  { %s15970_s3 = scalar_lea.hbm %s18511_s18, 16 }
 0x2ce   :  { %p15971_p8 = scmp.ne.s32.totalorder %s18511_s18, %s15970_s3  ;;  %p15974_p9 = scmp.lt.u32.totalorder %s15970_s3, %s18511_s18 }
 0x2d0   :  { %p15976_p10 = pnand %p15974_p9, %p15971_p8 }
 0x2d2   :  { %15979 = shalt.err (!%p15976_p10)
}
 0x2d3   :  { %s15980_s22 = scalar_lea.vmem %s326_s16, 16  ;;  %s15984_s8 = scalar_lea.vmem %s326_s16, 32 }
 0x2d4   :  { %p15981_p11 = scmp.ne.s32.totalorder %s326_s16, %s15980_s22  ;;  %p15985_p12 = scmp.lt.s32.totalorder %s326_s16, %s326_s16 }
 0x2d5   :  { %p15986_p13 = scmp.lt.s32.totalorder %s15984_s8, %s15980_s22 }
 0x2d7   :  { %p15987_p0 = por %p15986_p13, %p15985_p12 }
 0x2d9   :  { %p15988_p1 = pnand %p15987_p0, %p15981_p11 }
 0x2db   :  { %15991 = shalt.err (!%p15988_p1)
}
 0x2dc   :  { %s18512_s9 = sld [smem:[#allocation115_spill]]  ;;  %s16546_s23 = smov [#allocation25]  }
 0x2dd   :  { %328 = dma.hbm_to_vmem [thread:$0]  %s18511_s18, 16, %s326_s16, [#allocation21]  }
 0x2de   :  { %s349_s26 = sshll.u32 %s16546_s23, 4  ;;  %s16547_s12 = smov [#allocation28]   ;;  %s350_s26 = int_to_ptr.vmem [resolvable:$true] %s349_s26 }
 0x2df   :  { %s369_s6 = sshll.u32 %s16547_s12, 4  ;;  %s370_s6 = int_to_ptr.vmem [resolvable:$true] %s369_s6 }
 0x2e2   :  { %s15992_s0 = scalar_lea.hbm %s18512_s9, 16 }
 0x2e3   :  { %p15993_p2 = scmp.ne.s32.totalorder %s18512_s9, %s15992_s0  ;;  %p15996_p3 = scmp.lt.u32.totalorder %s15992_s0, %s18512_s9 }
 0x2e5   :  { %p15998_p4 = pnand %p15996_p3, %p15993_p2 }
 0x2e7   :  { %16001 = shalt.err (!%p15998_p4)
}
 0x2e8   :  { %s16002_s25 = scalar_lea.vmem %s350_s26, 16  ;;  %s16006_s28 = scalar_lea.vmem %s350_s26, 32 }
 0x2e9   :  { %p16003_p5 = scmp.ne.s32.totalorder %s350_s26, %s16002_s25  ;;  %p16007_p6 = scmp.lt.s32.totalorder %s350_s26, %s350_s26 }
 0x2ea   :  { %p16008_p7 = scmp.lt.s32.totalorder %s16006_s28, %s16002_s25 }
 0x2ec   :  { %p16009_p8 = por %p16008_p7, %p16007_p6 }
 0x2ee   :  { %p16010_p9 = pnand %p16009_p8, %p16003_p5 }
 0x2f0   :  { %16013 = shalt.err (!%p16010_p9)
}
 0x2f1   :  { %s18513_s30 = sld [smem:[#allocation116_spill]] }
 0x2f2   :  { %352 = dma.hbm_to_vmem [thread:$0]  %s18512_s9, 16, %s350_s26, [#allocation24]  }
 0x2f7   :  { %s16014_s1 = scalar_lea.hbm %s18513_s30, 16 }
 0x2f8   :  { %p16015_p10 = scmp.ne.s32.totalorder %s18513_s30, %s16014_s1  ;;  %p16018_p11 = scmp.lt.u32.totalorder %s16014_s1, %s18513_s30 }
 0x2fa   :  { %p16020_p12 = pnand %p16018_p11, %p16015_p10 }
 0x2fc   :  { %16023 = shalt.err (!%p16020_p12)
}
 0x2fd   :  { %s16024_s20 = scalar_lea.vmem %s370_s6, 16  ;;  %s16028_s13 = scalar_lea.vmem %s370_s6, 32 }
 0x2fe   :  { %p16025_p13 = scmp.ne.s32.totalorder %s370_s6, %s16024_s20  ;;  %p16029_p0 = scmp.lt.s32.totalorder %s370_s6, %s370_s6 }
 0x2ff   :  { %p16030_p1 = scmp.lt.s32.totalorder %s16028_s13, %s16024_s20 }
 0x301   :  { %p16031_p2 = por %p16030_p1, %p16029_p0 }
 0x303   :  { %p16032_p3 = pnand %p16031_p2, %p16025_p13 }
 0x305   :  { %16035 = shalt.err (!%p16032_p3)
}
 0x306   :  { %s18514_s7 = sld [smem:[#allocation122_spill]]  ;;  %s16548_s17 = smov [#allocation31]  }
 0x307   :  { %372 = dma.hbm_to_vmem [thread:$0]  %s18513_s30, 16, %s370_s6, [#allocation27]  }
 0x308   :  { %s399_s21 = sshll.u32 %s16548_s17, 4  ;;  %s16549_s2 = smov [#allocation34]   ;;  %s400_s21 = int_to_ptr.vmem [resolvable:$true] %s399_s21 }
 0x309   :  { %s419_s10 = sshll.u32 %s16549_s2, 4  ;;  %s420_s10 = int_to_ptr.vmem [resolvable:$true] %s419_s10 }
 0x30c   :  { %s16036_s16 = scalar_lea.hbm %s18514_s7, 16 }
 0x30d   :  { %p16037_p4 = scmp.ne.s32.totalorder %s18514_s7, %s16036_s16  ;;  %p16040_p5 = scmp.lt.u32.totalorder %s16036_s16, %s18514_s7 }
 0x30f   :  { %p16042_p6 = pnand %p16040_p5, %p16037_p4 }
 0x311   :  { %16045 = shalt.err (!%p16042_p6)
}
 0x312   :  { %s16046_s29 = scalar_lea.vmem %s400_s21, 16  ;;  %s16050_s4 = scalar_lea.vmem %s400_s21, 32 }
 0x313   :  { %p16047_p7 = scmp.ne.s32.totalorder %s400_s21, %s16046_s29  ;;  %p16051_p8 = scmp.lt.s32.totalorder %s400_s21, %s400_s21 }
 0x314   :  { %p16052_p9 = scmp.lt.s32.totalorder %s16050_s4, %s16046_s29 }
 0x316   :  { %p16053_p10 = por %p16052_p9, %p16051_p8 }
 0x318   :  { %p16054_p11 = pnand %p16053_p10, %p16047_p7 }
 0x31a   :  { %16057 = shalt.err (!%p16054_p11)
}
 0x31b   :  { %s18515_s24 = sld [smem:[#allocation123_spill]] }
 0x31c   :  { %402 = dma.hbm_to_vmem [thread:$0]  %s18514_s7, 16, %s400_s21, [#allocation30]  }
 0x321   :  { %s16058_s18 = scalar_lea.hbm %s18515_s24, 16 }
 0x322   :  { %p16059_p12 = scmp.ne.s32.totalorder %s18515_s24, %s16058_s18  ;;  %p16062_p13 = scmp.lt.u32.totalorder %s16058_s18, %s18515_s24 }
 0x324   :  { %p16064_p0 = pnand %p16062_p13, %p16059_p12 }
 0x326   :  { %16067 = shalt.err (!%p16064_p0)
}
 0x327   :  { %s16068_s3 = scalar_lea.vmem %s420_s10, 16  ;;  %s16072_s22 = scalar_lea.vmem %s420_s10, 32 }
 0x328   :  { %p16069_p1 = scmp.ne.s32.totalorder %s420_s10, %s16068_s3  ;;  %p16073_p2 = scmp.lt.s32.totalorder %s420_s10, %s420_s10 }
 0x329   :  { %p16074_p3 = scmp.lt.s32.totalorder %s16072_s22, %s16068_s3 }
 0x32b   :  { %p16075_p4 = por %p16074_p3, %p16073_p2 }
 0x32d   :  { %p16076_p5 = pnand %p16075_p4, %p16069_p1 }
 0x32f   :  { %16079 = shalt.err (!%p16076_p5)
}
 0x330   :  { %s18516_s8 = sld [smem:[#allocation124_spill]]  ;;  %s16550_s9 = smov [#allocation37]  }
 0x331   :  { %422 = dma.hbm_to_vmem [thread:$0]  %s18515_s24, 16, %s420_s10, [#allocation33]  }
 0x332   :  { %s439_s23 = sshll.u32 %s16550_s9, 4  ;;  %s16551_s26 = smov [#allocation40]   ;;  %s440_s23 = int_to_ptr.vmem [resolvable:$true] %s439_s23 }
 0x333   :  { %s459_s12 = sshll.u32 %s16551_s26, 4  ;;  %s460_s12 = int_to_ptr.vmem [resolvable:$true] %s459_s12 }
 0x336   :  { %s16080_s6 = scalar_lea.hbm %s18516_s8, 16 }
 0x337   :  { %p16081_p6 = scmp.ne.s32.totalorder %s18516_s8, %s16080_s6  ;;  %p16084_p7 = scmp.lt.u32.totalorder %s16080_s6, %s18516_s8 }
 0x339   :  { %p16086_p8 = pnand %p16084_p7, %p16081_p6 }
 0x33b   :  { %16089 = shalt.err (!%p16086_p8)
}
 0x33c   :  { %s16090_s0 = scalar_lea.vmem %s440_s23, 16  ;;  %s16094_s25 = scalar_lea.vmem %s440_s23, 32 }
 0x33d   :  { %p16091_p9 = scmp.ne.s32.totalorder %s440_s23, %s16090_s0  ;;  %p16095_p10 = scmp.lt.s32.totalorder %s440_s23, %s440_s23 }
 0x33e   :  { %p16096_p11 = scmp.lt.s32.totalorder %s16094_s25, %s16090_s0 }
 0x340   :  { %p16097_p12 = por %p16096_p11, %p16095_p10 }
 0x342   :  { %p16098_p13 = pnand %p16097_p12, %p16091_p9 }
 0x344   :  { %16101 = shalt.err (!%p16098_p13)
}
 0x345   :  { %s18517_s28 = sld [smem:[#allocation125_spill]] }
 0x346   :  { %442 = dma.hbm_to_vmem [thread:$0]  %s18516_s8, 16, %s440_s23, [#allocation36]  }
 0x34b   :  { %s16102_s30 = scalar_lea.hbm %s18517_s28, 16 }
 0x34c   :  { %p16103_p0 = scmp.ne.s32.totalorder %s18517_s28, %s16102_s30  ;;  %p16106_p1 = scmp.lt.u32.totalorder %s16102_s30, %s18517_s28 }
 0x34e   :  { %p16108_p2 = pnand %p16106_p1, %p16103_p0 }
 0x350   :  { %16111 = shalt.err (!%p16108_p2)
}
 0x351   :  { %s16112_s1 = scalar_lea.vmem %s460_s12, 16  ;;  %s16116_s20 = scalar_lea.vmem %s460_s12, 32 }
 0x352   :  { %p16113_p3 = scmp.ne.s32.totalorder %s460_s12, %s16112_s1  ;;  %p16117_p4 = scmp.lt.s32.totalorder %s460_s12, %s460_s12 }
 0x353   :  { %p16118_p5 = scmp.lt.s32.totalorder %s16116_s20, %s16112_s1 }
 0x355   :  { %p16119_p6 = por %p16118_p5, %p16117_p4 }
 0x357   :  { %p16120_p7 = pnand %p16119_p6, %p16113_p3 }
 0x359   :  { %16123 = shalt.err (!%p16120_p7)
}
 0x35a   :  { %s18518_s13 = sld [smem:[#allocation126_spill]]  ;;  %s16552_s7 = smov [#allocation43]  }
 0x35b   :  { %462 = dma.hbm_to_vmem [thread:$0]  %s18517_s28, 16, %s460_s12, [#allocation39]  }
 0x35c   :  { %s479_s17 = sshll.u32 %s16552_s7, 4  ;;  %s16553_s21 = smov [#allocation46]   ;;  %s480_s17 = int_to_ptr.vmem [resolvable:$true] %s479_s17 }
 0x35d   :  { %s503_s2 = sshll.u32 %s16553_s21, 4  ;;  %s504_s2 = int_to_ptr.vmem [resolvable:$true] %s503_s2 }
 0x360   :  { %s16124_s10 = scalar_lea.hbm %s18518_s13, 16 }
 0x361   :  { %p16125_p8 = scmp.ne.s32.totalorder %s18518_s13, %s16124_s10  ;;  %p16128_p9 = scmp.lt.u32.totalorder %s16124_s10, %s18518_s13 }
 0x363   :  { %p16130_p10 = pnand %p16128_p9, %p16125_p8 }
 0x365   :  { %16133 = shalt.err (!%p16130_p10)
}
 0x366   :  { %s16134_s16 = scalar_lea.vmem %s480_s17, 16  ;;  %s16138_s29 = scalar_lea.vmem %s480_s17, 32 }
 0x367   :  { %p16135_p11 = scmp.ne.s32.totalorder %s480_s17, %s16134_s16  ;;  %p16139_p12 = scmp.lt.s32.totalorder %s480_s17, %s480_s17 }
 0x368   :  { %p16140_p13 = scmp.lt.s32.totalorder %s16138_s29, %s16134_s16 }
 0x36a   :  { %p16141_p0 = por %p16140_p13, %p16139_p12 }
 0x36c   :  { %p16142_p1 = pnand %p16141_p0, %p16135_p11 }
 0x36e   :  { %16145 = shalt.err (!%p16142_p1)
}
 0x36f   :  { %s18519_s4 = sld [smem:[#allocation129_spill]] }
 0x370   :  { %482 = dma.hbm_to_vmem [thread:$0]  %s18518_s13, 16, %s480_s17, [#allocation42]  }
 0x375   :  { %s16146_s24 = scalar_lea.hbm %s18519_s4, 16 }
 0x376   :  { %p16147_p2 = scmp.ne.s32.totalorder %s18519_s4, %s16146_s24  ;;  %p16150_p3 = scmp.lt.u32.totalorder %s16146_s24, %s18519_s4 }
 0x378   :  { %p16152_p4 = pnand %p16150_p3, %p16147_p2 }
 0x37a   :  { %16155 = shalt.err (!%p16152_p4)
}
 0x37b   :  { %s16156_s18 = scalar_lea.vmem %s504_s2, 16  ;;  %s16160_s3 = scalar_lea.vmem %s504_s2, 32 }
 0x37c   :  { %p16157_p5 = scmp.ne.s32.totalorder %s504_s2, %s16156_s18  ;;  %p16161_p6 = scmp.lt.s32.totalorder %s504_s2, %s504_s2 }
 0x37d   :  { %p16162_p7 = scmp.lt.s32.totalorder %s16160_s3, %s16156_s18 }
 0x37f   :  { %p16163_p8 = por %p16162_p7, %p16161_p6 }
 0x381   :  { %p16164_p9 = pnand %p16163_p8, %p16157_p5 }
 0x383   :  { %16167 = shalt.err (!%p16164_p9)
}
 0x384   :  { %s18520_s22 = sld [smem:[#allocation131_spill]]  ;;  %s16554_s8 = smov [#allocation49]  }
 0x385   :  { %506 = dma.hbm_to_vmem [thread:$0]  %s18519_s4, 16, %s504_s2, [#allocation45]  }
 0x386   :  { %s525_s9 = sshll.u32 %s16554_s8, 4  ;;  %s16555_s23 = smov [#allocation52]   ;;  %s526_s9 = int_to_ptr.vmem [resolvable:$true] %s525_s9 }
 0x387   :  { %s547_s26 = sshll.u32 %s16555_s23, 4  ;;  %s548_s26 = int_to_ptr.vmem [resolvable:$true] %s547_s26 }
 0x38a   :  { %s16168_s12 = scalar_lea.hbm %s18520_s22, 16 }
 0x38b   :  { %p16169_p10 = scmp.ne.s32.totalorder %s18520_s22, %s16168_s12  ;;  %p16172_p11 = scmp.lt.u32.totalorder %s16168_s12, %s18520_s22 }
 0x38d   :  { %p16174_p12 = pnand %p16172_p11, %p16169_p10 }
 0x38f   :  { %16177 = shalt.err (!%p16174_p12)
}
 0x390   :  { %s16178_s6 = scalar_lea.vmem %s526_s9, 16  ;;  %s16182_s0 = scalar_lea.vmem %s526_s9, 32 }
 0x391   :  { %p16179_p13 = scmp.ne.s32.totalorder %s526_s9, %s16178_s6  ;;  %p16183_p0 = scmp.lt.s32.totalorder %s526_s9, %s526_s9 }
 0x392   :  { %p16184_p1 = scmp.lt.s32.totalorder %s16182_s0, %s16178_s6 }
 0x394   :  { %p16185_p2 = por %p16184_p1, %p16183_p0 }
 0x396   :  { %p16186_p3 = pnand %p16185_p2, %p16179_p13 }
 0x398   :  { %16189 = shalt.err (!%p16186_p3)
}
 0x399   :  { %s18521_s25 = sld [smem:[#allocation134_spill]] }
 0x39a   :  { %528 = dma.hbm_to_vmem [thread:$0]  %s18520_s22, 16, %s526_s9, [#allocation48]  }
 0x39f   :  { %s16190_s28 = scalar_lea.hbm %s18521_s25, 128 }
 0x3a0   :  { %p16191_p4 = scmp.ne.s32.totalorder %s18521_s25, %s16190_s28  ;;  %p16194_p5 = scmp.lt.u32.totalorder %s16190_s28, %s18521_s25 }
 0x3a2   :  { %p16196_p6 = pnand %p16194_p5, %p16191_p4 }
 0x3a4   :  { %16199 = shalt.err (!%p16196_p6)
}
 0x3a5   :  { %s16200_s30 = scalar_lea.vmem %s548_s26, 128  ;;  %p16205_p8 = scmp.lt.s32.totalorder %s548_s26, %s548_s26 }
 0x3a6   :  { %p16201_p7 = scmp.ne.s32.totalorder %s548_s26, %s16200_s30  ;;  %p16206_p9 = scmp.lt.s32.totalorder %s16200_s30, %s16200_s30 }
 0x3a8   :  { %p16207_p10 = por %p16206_p9, %p16205_p8 }
 0x3aa   :  { %p16208_p11 = pnand %p16207_p10, %p16201_p7 }
 0x3ac   :  { %16211 = shalt.err (!%p16208_p11)
}
 0x3ad   :  { %s18522_s1 = sld [smem:[#allocation137_spill]]  ;;  %s16556_s20 = smov [#allocation55]  }
 0x3ae   :  { %550 = dma.hbm_to_vmem [thread:$0]  %s18521_s25, 128, %s548_s26, [#allocation51]  }
 0x3af   :  { %s569_s13 = sshll.u32 %s16556_s20, 4  ;;  %s16557_s7 = smov [#allocation58]   ;;  %s570_s13 = int_to_ptr.vmem [resolvable:$true] %s569_s13 }
 0x3b0   :  { %s591_s17 = sshll.u32 %s16557_s7, 4  ;;  %s592_s17 = int_to_ptr.vmem [resolvable:$true] %s591_s17 }
 0x3b3   :  { %s16212_s21 = scalar_lea.hbm %s18522_s1, 16 }
 0x3b4   :  { %p16213_p12 = scmp.ne.s32.totalorder %s18522_s1, %s16212_s21  ;;  %p16216_p13 = scmp.lt.u32.totalorder %s16212_s21, %s18522_s1 }
 0x3b6   :  { %p16218_p0 = pnand %p16216_p13, %p16213_p12 }
 0x3b8   :  { %16221 = shalt.err (!%p16218_p0)
}
 0x3b9   :  { %s16222_s2 = scalar_lea.vmem %s570_s13, 16  ;;  %s16226_s10 = scalar_lea.vmem %s570_s13, 32 }
 0x3ba   :  { %p16223_p1 = scmp.ne.s32.totalorder %s570_s13, %s16222_s2  ;;  %p16227_p2 = scmp.lt.s32.totalorder %s570_s13, %s570_s13 }
 0x3bb   :  { %p16228_p3 = scmp.lt.s32.totalorder %s16226_s10, %s16222_s2 }
 0x3bd   :  { %p16229_p4 = por %p16228_p3, %p16227_p2 }
 0x3bf   :  { %p16230_p5 = pnand %p16229_p4, %p16223_p1 }
 0x3c1   :  { %16233 = shalt.err (!%p16230_p5)
}
 0x3c2   :  { %s18523_s16 = sld [smem:[#allocation140_spill]] }
 0x3c3   :  { %572 = dma.hbm_to_vmem [thread:$0]  %s18522_s1, 16, %s570_s13, [#allocation54]  }
 0x3c8   :  { %s16234_s29 = scalar_lea.hbm %s18523_s16, 16 }
 0x3c9   :  { %p16235_p6 = scmp.ne.s32.totalorder %s18523_s16, %s16234_s29  ;;  %p16238_p7 = scmp.lt.u32.totalorder %s16234_s29, %s18523_s16 }
 0x3cb   :  { %p16240_p8 = pnand %p16238_p7, %p16235_p6 }
 0x3cd   :  { %16243 = shalt.err (!%p16240_p8)
}
 0x3ce   :  { %s16244_s4 = scalar_lea.vmem %s592_s17, 16  ;;  %s16248_s24 = scalar_lea.vmem %s592_s17, 32 }
 0x3cf   :  { %p16245_p9 = scmp.ne.s32.totalorder %s592_s17, %s16244_s4  ;;  %p16249_p10 = scmp.lt.s32.totalorder %s592_s17, %s592_s17 }
 0x3d0   :  { %p16250_p11 = scmp.lt.s32.totalorder %s16248_s24, %s16244_s4 }
 0x3d2   :  { %p16251_p12 = por %p16250_p11, %p16249_p10 }
 0x3d4   :  { %p16252_p13 = pnand %p16251_p12, %p16245_p9 }
 0x3d6   :  { %16255 = shalt.err (!%p16252_p13)
}
 0x3d7   :  { %s18524_s18 = sld [smem:[#allocation142_spill]]  ;;  %s16558_s3 = smov [#allocation61]  }
 0x3d8   :  { %594 = dma.hbm_to_vmem [thread:$0]  %s18523_s16, 16, %s592_s17, [#allocation57]  }
 0x3d9   :  { %s611_s22 = sshll.u32 %s16558_s3, 4  ;;  %s16559_s8 = smov [#allocation64]   ;;  %s612_s22 = int_to_ptr.vmem [resolvable:$true] %s611_s22 }
 0x3da   :  { %s631_s9 = sshll.u32 %s16559_s8, 4  ;;  %s632_s9 = int_to_ptr.vmem [resolvable:$true] %s631_s9 }
 0x3dd   :  { %s16256_s23 = scalar_lea.hbm %s18524_s18, 16 }
 0x3de   :  { %p16257_p0 = scmp.ne.s32.totalorder %s18524_s18, %s16256_s23  ;;  %p16260_p1 = scmp.lt.u32.totalorder %s16256_s23, %s18524_s18 }
 0x3e0   :  { %p16262_p2 = pnand %p16260_p1, %p16257_p0 }
 0x3e2   :  { %16265 = shalt.err (!%p16262_p2)
}
 0x3e3   :  { %s16266_s26 = scalar_lea.vmem %s612_s22, 16  ;;  %s16270_s12 = scalar_lea.vmem %s612_s22, 32 }
 0x3e4   :  { %p16267_p3 = scmp.ne.s32.totalorder %s612_s22, %s16266_s26  ;;  %p16271_p4 = scmp.lt.s32.totalorder %s612_s22, %s612_s22 }
 0x3e5   :  { %p16272_p5 = scmp.lt.s32.totalorder %s16270_s12, %s16266_s26 }
 0x3e7   :  { %p16273_p6 = por %p16272_p5, %p16271_p4 }
 0x3e9   :  { %p16274_p7 = pnand %p16273_p6, %p16267_p3 }
 0x3eb   :  { %16277 = shalt.err (!%p16274_p7)
}
 0x3ec   :  { %s18525_s6 = sld [smem:[#allocation144_spill]] }
 0x3ed   :  { %614 = dma.hbm_to_vmem [thread:$0]  %s18524_s18, 16, %s612_s22, [#allocation60]  }
 0x3f2   :  { %s16278_s0 = scalar_lea.hbm %s18525_s6, 16 }
 0x3f3   :  { %p16279_p8 = scmp.ne.s32.totalorder %s18525_s6, %s16278_s0  ;;  %p16282_p9 = scmp.lt.u32.totalorder %s16278_s0, %s18525_s6 }
 0x3f5   :  { %p16284_p10 = pnand %p16282_p9, %p16279_p8 }
 0x3f7   :  { %16287 = shalt.err (!%p16284_p10)
}
 0x3f8   :  { %s16288_s25 = scalar_lea.vmem %s632_s9, 16  ;;  %s16292_s28 = scalar_lea.vmem %s632_s9, 32 }
 0x3f9   :  { %p16289_p11 = scmp.ne.s32.totalorder %s632_s9, %s16288_s25  ;;  %p16293_p12 = scmp.lt.s32.totalorder %s632_s9, %s632_s9 }
 0x3fa   :  { %p16294_p13 = scmp.lt.s32.totalorder %s16292_s28, %s16288_s25 }
 0x3fc   :  { %p16295_p0 = por %p16294_p13, %p16293_p12 }
 0x3fe   :  { %p16296_p1 = pnand %p16295_p0, %p16289_p11 }
 0x400   :  { %16299 = shalt.err (!%p16296_p1)
}
 0x401   :  { %s18526_s30 = sld [smem:[#allocation149_spill]]  ;;  %s16560_s1 = smov [#allocation67]  }
 0x402   :  { %634 = dma.hbm_to_vmem [thread:$0]  %s18525_s6, 16, %s632_s9, [#allocation63]  }
 0x403   :  { %s657_s20 = sshll.u32 %s16560_s1, 4  ;;  %s16561_s13 = smov [#allocation70]   ;;  %s658_s20 = int_to_ptr.vmem [resolvable:$true] %s657_s20 }
 0x404   :  { %s679_s7 = sshll.u32 %s16561_s13, 4  ;;  %s680_s7 = int_to_ptr.vmem [resolvable:$true] %s679_s7 }
 0x407   :  { %s16300_s17 = scalar_lea.hbm %s18526_s30, 16 }
 0x408   :  { %p16301_p2 = scmp.ne.s32.totalorder %s18526_s30, %s16300_s17  ;;  %p16304_p3 = scmp.lt.u32.totalorder %s16300_s17, %s18526_s30 }
 0x40a   :  { %p16306_p4 = pnand %p16304_p3, %p16301_p2 }
 0x40c   :  { %16309 = shalt.err (!%p16306_p4)
}
 0x40d   :  { %s16310_s21 = scalar_lea.vmem %s658_s20, 16  ;;  %s16314_s2 = scalar_lea.vmem %s658_s20, 32 }
 0x40e   :  { %p16311_p5 = scmp.ne.s32.totalorder %s658_s20, %s16310_s21  ;;  %p16315_p6 = scmp.lt.s32.totalorder %s658_s20, %s658_s20 }
 0x40f   :  { %p16316_p7 = scmp.lt.s32.totalorder %s16314_s2, %s16310_s21 }
 0x411   :  { %p16317_p8 = por %p16316_p7, %p16315_p6 }
 0x413   :  { %p16318_p9 = pnand %p16317_p8, %p16311_p5 }
 0x415   :  { %16321 = shalt.err (!%p16318_p9)
}
 0x416   :  { %s18527_s10 = sld [smem:[#allocation152_spill]] }
 0x417   :  { %660 = dma.hbm_to_vmem [thread:$0]  %s18526_s30, 16, %s658_s20, [#allocation66]  }
 0x41c   :  { %s16322_s16 = scalar_lea.hbm %s18527_s10, 16 }
 0x41d   :  { %p16323_p10 = scmp.ne.s32.totalorder %s18527_s10, %s16322_s16  ;;  %p16326_p11 = scmp.lt.u32.totalorder %s16322_s16, %s18527_s10 }
 0x41f   :  { %p16328_p12 = pnand %p16326_p11, %p16323_p10 }
 0x421   :  { %16331 = shalt.err (!%p16328_p12)
}
 0x422   :  { %s16332_s29 = scalar_lea.vmem %s680_s7, 16  ;;  %s16336_s4 = scalar_lea.vmem %s680_s7, 32 }
 0x423   :  { %p16333_p13 = scmp.ne.s32.totalorder %s680_s7, %s16332_s29  ;;  %p16337_p0 = scmp.lt.s32.totalorder %s680_s7, %s680_s7 }
 0x424   :  { %p16338_p1 = scmp.lt.s32.totalorder %s16336_s4, %s16332_s29 }
 0x426   :  { %p16339_p2 = por %p16338_p1, %p16337_p0 }
 0x428   :  { %p16340_p3 = pnand %p16339_p2, %p16333_p13 }
 0x42a   :  { %16343 = shalt.err (!%p16340_p3)
}
 0x42b   :  { %682 = dma.hbm_to_vmem [thread:$0]  %s18527_s10, 16, %s680_s7, [#allocation69]  }
 0x42c   :  { %s16562_s24 = smov [#allocation73]   ;;  %s16344_s3 = scalar_lea.hbm %s16950_s27, 512 }
 0x42d   :  { %s708_s18 = sshll.u32 %s16562_s24, 4  ;;  %p16345_p4 = scmp.ne.s32.totalorder %s16950_s27, %s16344_s3  ;;  %s709_s18 = int_to_ptr.vmem [resolvable:$true] %s708_s18 }
 0x42e   :  { %p16348_p5 = scmp.lt.u32.totalorder %s16344_s3, %s16950_s27 }
 0x430   :  { %p16350_p6 = pnand %p16348_p5, %p16345_p4 }
 0x432   :  { %16353 = shalt.err (!%p16350_p6)
}
 0x433   :  { %s16354_s22 = scalar_lea.vmem %s709_s18, 512  ;;  %p16359_p8 = scmp.lt.s32.totalorder %s709_s18, %s709_s18 }
 0x434   :  { %p16355_p7 = scmp.ne.s32.totalorder %s709_s18, %s16354_s22  ;;  %p16360_p9 = scmp.lt.s32.totalorder %s16354_s22, %s16354_s22 }
 0x436   :  { %p16361_p10 = por %p16360_p9, %p16359_p8 }
 0x438   :  { %p16362_p11 = pnand %p16361_p10, %p16355_p7 }
 0x43a   :  { %16365 = shalt.err (!%p16362_p11)
}
 0x43b   :  { %714 = dma.hbm_to_vmem [thread:$0]  %s16950_s27, 512, %s709_s18, [#allocation72], %s16516_s11, %s16516_s11, %s16517_s15  }
 0x43c   :  { %16388 = dma.done.wait [#allocation3], 256  }
 0x43d   :  { %16389 = vsyncadd [#allocation3], 4294967040 }
 0x43e   :  { %16390 = dma.done.wait [#allocation6], 272  }
 0x43f   :  { %16391 = vsyncadd [#allocation6], 4294967024 }
 0x440   :  { %16392 = dma.done.wait [#allocation9], 32  }
 0x441   :  { %16393 = vsyncadd [#allocation9], 4294967264 }
 0x442   :  { %16394 = dma.done.wait [#allocation12], 32  }
 0x443   :  { %16395 = vsyncadd [#allocation12], 4294967264 }
 0x444   :  { %16396 = dma.done.wait [#allocation15], 32  }
 0x445   :  { %16397 = vsyncadd [#allocation15], 4294967264 }
 0x446   :  { %16398 = dma.done.wait [#allocation18], 32  }
 0x447   :  { %16399 = vsyncadd [#allocation18], 4294967264 }
 0x448   :  { %16400 = dma.done.wait [#allocation21], 32  }
 0x449   :  { %16401 = vsyncadd [#allocation21], 4294967264 }
 0x44a   :  { %16402 = dma.done.wait [#allocation24], 32  }
 0x44b   :  { %16403 = vsyncadd [#allocation24], 4294967264 }
 0x44c   :  { %16404 = dma.done.wait [#allocation27], 32  }
 0x44d   :  { %16405 = vsyncadd [#allocation27], 4294967264 }
 0x44e   :  { %16406 = dma.done.wait [#allocation30], 32  }
 0x44f   :  { %16407 = vsyncadd [#allocation30], 4294967264 }
 0x450   :  { %16408 = dma.done.wait [#allocation33], 32  }
 0x451   :  { %16409 = vsyncadd [#allocation33], 4294967264 }
 0x452   :  { %16410 = dma.done.wait [#allocation36], 32  }
 0x453   :  { %16411 = vsyncadd [#allocation36], 4294967264 }
 0x454   :  { %16412 = dma.done.wait [#allocation39], 32  }
 0x455   :  { %16413 = vsyncadd [#allocation39], 4294967264 }
 0x456   :  { %16414 = dma.done.wait [#allocation42], 32  }
 0x457   :  { %16415 = vsyncadd [#allocation42], 4294967264 }
 0x458   :  { %16416 = dma.done.wait [#allocation45], 32  }
 0x459   :  { %16417 = vsyncadd [#allocation45], 4294967264 }
 0x45a   :  { %16418 = dma.done.wait [#allocation48], 272  }
 0x45b   :  { %16419 = vsyncadd [#allocation48], 4294967024 }
 0x45c   :  { %16420 = dma.done.wait [#allocation51], 144  }
 0x45d   :  { %16421 = vsyncadd [#allocation51], 4294967152 }
 0x45e   :  { %16422 = dma.done.wait [#allocation54], 32  }
 0x45f   :  { %16423 = vsyncadd [#allocation54], 4294967264 }
 0x460   :  { %16424 = dma.done.wait [#allocation57], 32  }
 0x461   :  { %16425 = vsyncadd [#allocation57], 4294967264 }
 0x462   :  { %16426 = dma.done.wait [#allocation60], 32  }
 0x463   :  { %16427 = vsyncadd [#allocation60], 4294967264 }
 0x464   :  { %16428 = dma.done.wait [#allocation63], 32  }
 0x465   :  { %16429 = vsyncadd [#allocation63], 4294967264 }
 0x466   :  { %16430 = dma.done.wait [#allocation66], 32  }
 0x467   :  { %16431 = vsyncadd [#allocation66], 4294967264 }
 0x468   :  { %16432 = dma.done.wait [#allocation69], 32  }
 0x469   :  { %16433 = vsyncadd [#allocation69], 4294967264 }
 0x46a   :  { %16434 = dma.done.wait [#allocation72], 528  }
 0x46b   :  { %16435 = vsyncadd [#allocation72], 4294966768  ;;  %s18528_s27 = sld [smem:[#allocation147_spill]]  ;;  %vm1030_vm0 = vcmask 130048   ;;  %v952_v0 = vld [vmem:[#allocation47] sm:$0xff]  ;;  %v953_v1 = vld [vmem:[#allocation47 + $0x8] sm:$0xff] }
 0x46c   :  { %v1020_v2 = vld [vmem:[#allocation2] sm:$0xff]  ;;  %v14745_v3 = vpack.c.bf16 %v953_v1, %v952_v0  ;;  %v1021_v7 = vld [vmem:[#allocation2 + $0x8] sm:$0xff]  ;;  %vm1206_vm1 = vcmask 261120   ;;  %v1022_v17 = vld [vmem:[#allocation5] sm:$0xff]  ;;  %vm1118_vm2 = vcmask 64512   ;;  %v16563_v19 = vmov 0.0  }
 0x46d   :  { %13918 = vmatprep.mubr.msk.f32.mxu0 %vm1030_vm0, %v1020_v2  ;;  %v13246_v11 = vld [vmem:[#allocation49] ss:$0 sm:$0xff]  ;;  %v960_v16 = vld [vmem:[#allocation52] sm:$0xff]  ;;  %v1023_v18 = vld [vmem:[#allocation5 + $0x8] sm:$0xff]  ;;  %vm16564_vm3 = vmmov 0   ;;  %s16565_s8 = smov 96  }
 0x46e   :  { %14746 = vmatprep.subr.bf16.mxu0 %v14745_v3  ;;  %v13252_v20 = vld [vmem:[#allocation65] ss:$0 sm:$0xff]  ;;  %s16566_s9 = smov 64   ;;  %s16567_s23 = smov 120   ;;  %vm3082_vm4 = vcmask 523264  }
 0x46f   :  { %14748 = vmatpush3.bf16.msra.mxu0 %v14745_v3  ;;  %s16568_s26 = smov 88   ;;  %s16569_s12 = smov 80  }
 0x470   :  { %13921 = vmatprep.subr.mxu0 %v960_v16  ;;  %s16570_s6 = smov 56   ;;  %s16571_s0 = smov 112  }
 0x471   :  { %v986_v4 = vld [vmem:[%s18528_s27] sm:$0xff]  ;;  %v987_v5 = vld [vmem:[%s18528_s27 + $0x8] sm:$0xff]  ;;  %v988_v8 = vld [vmem:[%s18528_s27 + $0x10] sm:$0xff]  ;;  %s16572_s25 = smov 48   ;;  %s16573_s28 = smov 72  }
 0x472   :  { %v14749_v6 = vpack.c.bf16 %v987_v5, %v986_v4  ;;  %13919 = vmatmul.mubr.msk.f32.vlgmr.msra.gmra.mrb[0].mxu0 %vm1030_vm0, %v1021_v7  ;;  %v989_v9 = vld [vmem:[%s18528_s27 + $0x18] sm:$0xff]  ;;  %s16574_s30 = smov 104   ;;  %s18529_s1 = sld [smem:[#allocation146_spill]] }
 0x473   :  { %v14753_v10 = vpack.c.bf16 %v989_v9, %v988_v8  ;;  %13923 = vmatprep.mubr.msk.f32.mxu0 %vm1118_vm2, %v1022_v17  ;;  %13922 = vmatpush3.msra.mxu0 %v960_v16  ;;  %s16575_s20 = smov 40   ;;  %s18530_s13 = sld [smem:[#allocation136_spill]] }
 0x474   :  { %14750 = vmatprep.subr.bf16.mxu1 %v14749_v6  ;;  %13937 = vmatprep.subr.mxu0 %v16563_v19  ;;  %s18531_s7 = sld [smem:[#allocation138_spill]]  ;;  %s18532_s17 = sld [smem:[#allocation157_spill]] }
 0x475   :  { %14752 = vmatpush3.bf16.msra.mxu1 %v14749_v6  ;;  %s18533_s21 = sld [smem:[#allocation158_spill]]  ;;  %s18534_s2 = sld [smem:[#allocation156_spill]] }
 0x476   :  { %14754 = vmatprep.subr.bf16.mxu1 %v14753_v10  ;;  %13924 = vmatmul.mubr.msk.f32.vlgmr.msra.gmra.mrb[2].mxu0 %vm1118_vm2, %v1023_v18  ;;  %s18535_s10 = sld [smem:[#allocation148_spill]]  ;;  %s18536_s16 = sld [smem:[#allocation114_spill]] }
 0x477   :  { %13939 = vmatprep.mubr.msk.f32.mxu0 %vm16564_vm3, %v16563_v19  ;;  %s18537_s29 = sld [smem:[#allocation150_spill]]  ;;  %s18538_s4 = sld [smem:[#allocation113_spill]] }
 0x478   :  { %s18539_s24 = sld [smem:[#allocation154_spill]]  ;;  %s18540_s18 = sld [smem:[#allocation155_spill]] }
 0x479   :  { %14756 = vmatpush3.bf16.msra.mxu1 %v14753_v10  ;;  %s18541_s3 = sld [smem:[#allocation103_spill]]  ;;  %s18542_s22 = sld [smem:[#allocation105_spill]] }
 0x47a   :  { %13947 = vmatprep.subr.mxu1 %v16563_v19  ;;  %s18545_s27 = sld [smem:[#allocation106_spill]] }
 0x545   :  { %v13920_v12 = vpop.f32.mrb[0].mxu0 }
 0x546   :  { %v1103_v13 = vpop.f32.mrb[1].mxu0  ;;  %v17188_v15 = vadd.f32 %v13920_v12, %v13246_v11 }
 0x547   :  { %v17186_v14 = vadd.f32 %v13246_v11, %v1103_v13 }
 0x549   :  { %13934 = vmatprep.mubr.msk.f32.mxu1 %vm1206_vm1, %v17186_v14  ;;  %v17214_v25 = vpop.f32.mrb[2].mxu0 }
 0x54a   :  { %13935 = vmatmul.mubr.msk.f32.vlgmr.msra.gmra.mrb[0].mxu1 %vm1206_vm1, %v17188_v15  ;;  %v17216_v26 = vpop.f32.mrb[3].mxu0 }
 0x54b   :  { %13949 = vmatprep.mubr.msk.f32.mxu1 %vm16564_vm3, %v16563_v19 }
 0x61d   :  { %v13936_v21 = vpop.f32.mrb[0].mxu1 }
 0x61e   :  { %v1279_v22 = vpop.f32.mrb[1].mxu1  ;;  %v17206_v24 = vadd.f32 %v13936_v21, %v13252_v20 }
 0x61f   :  { %v17202_v23 = vadd.f32 %v13252_v20, %v1279_v22 }
 0x621   :  { %1289 = vrot.lane.b32.xlu0 %v17202_v23, %s16565_s8 }
 0x625   :  { %1366 = vrot.lane.b32.xlu0 %v17206_v24, %s16565_s8 }
 0x629   :  { %1540 = vrot.lane.b32.xlu0 %v17206_v24, %s16566_s9 }
 0x62d   :  { %1694 = vrot.lane.b32.xlu0 %v17206_v24, %s16567_s23 }
 0x693   :  { %v1290_v27 = vpop.permute.xlu0 %1289 }
 0x694   :  { %13938 = vmatpush3.xpose.msk.msra.mxu0 %vm1118_vm2, %v1290_v27 }
 0x695   :  { %13942 = vmatprep.subr.mxu0 %v16563_v19 }
 0x697   :  { %13940 = vmatmul.mubr.msk.f32.vlgmr.msra.gmra.mrb[4].mxu0 %vm1118_vm2, %v17202_v23  ;;  %v1367_v28 = vpop.permute.xlu0 %1366 }
 0x698   :  { %13943 = vmatpush3.xpose.msk.msra.mxu0 %vm1118_vm2, %v1367_v28  ;;  %13944 = vmatprep.mubr.msk.f32.mxu0 %vm16564_vm3, %v16563_v19 }
 0x699   :  { %13952 = vmatprep.subr.mxu0 %v16563_v19 }
 0x69b   :  { %13945 = vmatmul.mubr.msk.f32.vlgmr.msra.gmra.mrb[6].mxu0 %vm1118_vm2, %v17206_v24  ;;  %v1541_v29 = vpop.permute.xlu0 %1540 }
 0x69c   :  { %13953 = vmatpush3.msra.mxu0 %v1541_v29  ;;  %13954 = vmatprep.mubr.msk.f32.mxu0 %vm16564_vm3, %v16563_v19 }
 0x69d   :  { %13962 = vmatprep.subr.mxu0 %v16563_v19 }
 0x69f   :  { %v1695_v36 = vpop.permute.xlu0 %1694 }
 0x76a   :  { %v1361_v30 = vpop.f32.mrb[4].mxu0 }
 0x76b   :  { %v13941_v31 = vpop.f32.mrb[5].mxu0  ;;  %v1442_v32 = vsel %vm1118_vm2, %v1361_v30, -inf }
 0x76c   :  { %1443 = vmax.xlane.f32.xlu0 %v1442_v32  ;;  %v983_v32 = vld [vmem:[%s18529_s1 + $0x8] sm:$0xff] }
 0x76e   :  { %v1438_v33 = vpop.f32.mrb[6].mxu0 }
 0x76f   :  { %v13946_v34 = vpop.f32.mrb[7].mxu0  ;;  %v1445_v35 = vsel %vm1118_vm2, %v1438_v33, -inf }
 0x770   :  { %1446 = vmax.xlane.f32.xlu1 %v1445_v35 }
 0x782   :  { %1464 = vrot.lane.b32.xlu0 %v17202_v23, %s16566_s9 }
 0x786   :  { %1616 = vrot.lane.b32.xlu0 %v17202_v23, %s16567_s23 }
 0x7f9   :  { %v1444_v37 = vpop.xlane.xlu0 %1443 }
 0x7fa   :  { %v1448_v44 = vsub.f32 %v1361_v30, %v1444_v37 }
 0x7fc   :  { %v1450_v45 = vmul.f32 1.442695, %v1448_v44 }
 0x7fd   :  { %v1447_v38 = vpop.xlane.xlu1 %1446  ;;  %v1465_v39 = vpop.permute.xlu0 %1464 }
 0x7fe   :  { %v1449_v40 = vsub.f32 %v1438_v33, %v1447_v38  ;;  %13948 = vmatpush3.msra.mxu1 %v1465_v39  ;;  %v982_v33 = vld [vmem:[%s18529_s1] sm:$0xff] }
 0x7ff   :  { %13957 = vmatprep.subr.mxu1 %v16563_v19 }
 0x800   :  { %v1452_v41 = vmul.f32 1.442695, %v1449_v40 }
 0x801   :  { %v1617_v56 = vpop.permute.xlu0 %1616 }
 0x802   :  { %15092 = vpow2.f32 %v1452_v41 }
 0x803   :  { %15094 = vpow2.f32 %v1450_v45 }
 0x80c   :  { %v15093_v42 = vpop.eup %15092 }
 0x80d   :  { %v1457_v43 = vsel %vm1118_vm2, %v15093_v42, 0.0  ;;  %v15095_v46 = vpop.eup %15094 }
 0x80e   :  { %1458 = vadd.xlane.f32.xlu1 %v1457_v43  ;;  %v1454_v47 = vsel %vm1118_vm2, %v15095_v46, 0.0 }
 0x81f   :  { %1696 = vrot.lane.b32.xlu1 %v17206_v24, %s16568_s26 }
 0x843   :  { %1455 = vadd.xlane.f32.xlu1 %v1454_v47 }
 0x854   :  { %1618 = vrot.lane.b32.xlu1 %v17202_v23, %s16568_s26 }
 0x858   :  { %2110 = vrot.lane.b32.xlu1 %v17202_v23, %s16569_s12 }
 0x89b   :  { %v1459_v48 = vpop.xlane.xlu1 %1458 }
 0x89c   :  { %15096 = vrcp.f32 %v1459_v48 }
 0x89f   :  { %v1697_v51 = vpop.permute.xlu1 %1696 }
 0x8a6   :  { %v15097_v49 = vpop.eup %15096 }
 0x8a7   :  { %v1463_v50 = vmul.f32 %v15097_v49, %v15093_v42 }
 0x8a9   :  { %13955 = vmatmul.mubr.msk.f32.vlgmr.msra.gmra.mrb[8].mxu0 %vm1118_vm2, %v1463_v50 }
 0x8aa   :  { %13963 = vmatpush3.xpose.msk.msra.mxu0 %vm1118_vm2, %v1697_v51  ;;  %13964 = vmatprep.mubr.msk.f32.mxu0 %vm16564_vm3, %v16563_v19 }
 0x8ab   :  { %13972 = vmatprep.subr.mxu0 %v16563_v19 }
 0x8ad   :  { %13965 = vmatmul.mubr.msk.f32.vlgmr.msra.gmra.mrb[10].mxu0 %vm1118_vm2, %v1695_v36 }
 0x8ae   :  { %13974 = vmatprep.mubr.msk.f32.mxu0 %vm16564_vm3, %v16563_v19 }
 0x8d0   :  { %v1456_v52 = vpop.xlane.xlu1 %1455 }
 0x8d1   :  { %15098 = vrcp.f32 %v1456_v52 }
 0x8d4   :  { %v1619_v55 = vpop.permute.xlu1 %1618 }
 0x8d8   :  { %v2111_v20 = vpop.permute.xlu1 %2110 }
 0x8db   :  { %v15099_v53 = vpop.eup %15098 }
 0x8dc   :  { %v1461_v54 = vmul.f32 %v15099_v53, %v15095_v46 }
 0x8de   :  { %13950 = vmatmul.mubr.msk.f32.vlgmr.msra.gmra.mrb[2].mxu1 %vm1118_vm2, %v1461_v54 }
 0x8df   :  { %13958 = vmatpush3.xpose.msk.msra.mxu1 %vm1118_vm2, %v1619_v55  ;;  %13959 = vmatprep.mubr.msk.f32.mxu1 %vm16564_vm3, %v16563_v19  ;;  %v984_v55 = vld [vmem:[%s18529_s1 + $0x10] sm:$0xff] }
 0x8e0   :  { %13967 = vmatprep.subr.mxu1 %v16563_v19 }
 0x8e2   :  { %13960 = vmatmul.mubr.msk.f32.vlgmr.msra.gmra.mrb[4].mxu1 %vm1118_vm2, %v1617_v56 }
 0x8e3   :  { %13969 = vmatprep.mubr.msk.f32.mxu1 %vm16564_vm3, %v16563_v19 }
 0x97c   :  { %v17262_v57 = vpop.f32.mrb[8].mxu0 }
 0x97d   :  { %v13956_v58 = vpop.f32.mrb[9].mxu0 }
 0x980   :  { %v1768_v59 = vpop.f32.mrb[10].mxu0 }
 0x981   :  { %v13966_v60 = vpop.f32.mrb[11].mxu0  ;;  %v1775_v61 = vsel %vm1118_vm2, %v1768_v59, -inf }
 0x982   :  { %1776 = vmax.xlane.f32.xlu0 %v1775_v61 }
 0x998   :  { %1870 = vrot.lane.b32.xlu0 %v17206_v24, %s16570_s6 }
 0x99c   :  { %2108 = vrot.lane.b32.xlu0 %v17202_v23, %s16571_s0 }
 0x9a0   :  { %2188 = vrot.lane.b32.xlu0 %v17206_v24, %s16569_s12 }
 0x9b1   :  { %v17271_v62 = vpop.f32.mrb[2].mxu1 }
 0x9b2   :  { %v13951_v63 = vpop.f32.mrb[3].mxu1 }
 0x9b5   :  { %v1690_v0 = vpop.f32.mrb[4].mxu1 }
 0x9b6   :  { %v13961_v1 = vpop.f32.mrb[5].mxu1  ;;  %v1772_v2 = vsel %vm1118_vm2, %v1690_v0, -inf }
 0x9bf   :  { %1773 = vmax.xlane.f32.xlu0 %v1772_v2 }
 0x9d5   :  { %1794 = vrot.lane.b32.xlu0 %v17202_v23, %s16570_s6 }
 0x9d9   :  { %2286 = vrot.lane.b32.xlu0 %v17202_v23, %s16572_s25 }
 0x9dd   :  { %2523 = vrot.lane.b32.xlu0 %v17202_v23, %s16573_s28 }
 0x9e1   :  { %2601 = vrot.lane.b32.xlu0 %v17206_v24, %s16573_s28 }
 0x9e5   :  { %2521 = vrot.lane.b32.xlu0 %v17202_v23, %s16574_s30 }
 0x9e9   :  { %2599 = vrot.lane.b32.xlu0 %v17206_v24, %s16574_s30 }
 0xa0f   :  { %v1777_v3 = vpop.xlane.xlu0 %1776 }
 0xa10   :  { %v1779_v4 = vsub.f32 %v1768_v59, %v1777_v3 }
 0xa12   :  { %v1782_v5 = vmul.f32 1.442695, %v1779_v4 }
 0xa13   :  { %v1871_v6 = vpop.permute.xlu0 %1870 }
 0xa14   :  { %15100 = vpow2.f32 %v1782_v5  ;;  %13973 = vmatpush3.msra.mxu0 %v1871_v6 }
 0xa15   :  { %13987 = vmatprep.subr.mxu0 %v16563_v19 }
 0xa17   :  { %v2109_v9 = vpop.permute.xlu0 %2108 }
 0xa1b   :  { %v2189_v10 = vpop.permute.xlu0 %2188 }
 0xa1e   :  { %v15101_v7 = vpop.eup %15100 }
 0xa1f   :  { %v1787_v8 = vsel %vm1118_vm2, %v15101_v7, 0.0 }
 0xa20   :  { %1788 = vadd.xlane.f32.xlu1 %v1787_v8 }
 0xa31   :  { %2186 = vrot.lane.b32.xlu1 %v17206_v24, %s16571_s0 }
 0xa4c   :  { %v1774_v11 = vpop.xlane.xlu0 %1773 }
 0xa4d   :  { %v1778_v12 = vsub.f32 %v1690_v0, %v1774_v11 }
 0xa4f   :  { %v1780_v13 = vmul.f32 1.442695, %v1778_v12 }
 0xa50   :  { %v1795_v16 = vpop.permute.xlu0 %1794 }
 0xa51   :  { %15102 = vpow2.f32 %v1780_v13  ;;  %13968 = vmatpush3.msra.mxu1 %v1795_v16 }
 0xa52   :  { %13977 = vmatprep.subr.mxu1 %v983_v32 }
 0xa54   :  { %v2287_v44 = vpop.permute.xlu0 %2286 }
 0xa58   :  { %v2524_v59 = vpop.permute.xlu0 %2523 }
 0xa5b   :  { %v15103_v17 = vpop.eup %15102 }
 0xa5c   :  { %v1784_v18 = vsel %vm1118_vm2, %v15103_v17, 0.0  ;;  %v2602_v63 = vpop.permute.xlu0 %2601 }
 0xa5d   :  { %1785 = vadd.xlane.f32.xlu1 %v1784_v18 }
 0xa60   :  { %v2522_v1 = vpop.permute.xlu0 %2521 }
 0xa64   :  { %v2600_v6 = vpop.permute.xlu0 %2599 }
 0xaad   :  { %v1789_v21 = vpop.xlane.xlu1 %1788 }
 0xaae   :  { %15104 = vrcp.f32 %v1789_v21 }
 0xab1   :  { %v2187_v28 = vpop.permute.xlu1 %2186 }
 0xab8   :  { %v15105_v22 = vpop.eup %15104 }
 0xab9   :  { %v1793_v27 = vmul.f32 %v15105_v22, %v15101_v7 }
 0xabb   :  { %13975 = vmatmul.mubr.msk.f32.vlgmr.msra.gmra.mrb[12].mxu0 %vm1118_vm2, %v1793_v27 }
 0xabc   :  { %13988 = vmatpush3.xpose.msk.msra.mxu0 %vm1118_vm2, %v2111_v20  ;;  %13989 = vmatprep.mubr.msk.f32.mxu0 %vm16564_vm3, %v16563_v19 }
 0xabd   :  { %13992 = vmatprep.subr.mxu0 %v16563_v19 }
 0xabf   :  { %13990 = vmatmul.mubr.msk.f32.vlgmr.msra.gmra.mrb[14].mxu0 %vm1118_vm2, %v2109_v9 }
 0xac0   :  { %13993 = vmatpush3.xpose.msk.msra.mxu0 %vm1118_vm2, %v2189_v10  ;;  %13994 = vmatprep.mubr.msk.f32.mxu0 %vm16564_vm3, %v16563_v19 }
 0xac1   :  { %14002 = vmatprep.subr.mxu0 %v16563_v19 }
 0xac3   :  { %13995 = vmatmul.mubr.msk.f32.vlgmr.msra.gmra.mrb[16].mxu0 %vm1118_vm2, %v2187_v28 }
 0xac4   :  { %14004 = vmatprep.mubr.msk.f32.mxu0 %vm16564_vm3, %v16563_v19 }
 0xaea   :  { %v1786_v29 = vpop.xlane.xlu1 %1785 }
 0xaeb   :  { %15106 = vrcp.f32 %v1786_v29 }
 0xaf5   :  { %v15107_v30 = vpop.eup %15106 }
 0xaf6   :  { %v1791_v31 = vmul.f32 %v15107_v30, %v15103_v17 }
 0xaf8   :  { %13970 = vmatmul.mubr.msk.f32.vlgmr.msra.gmra.mrb[6].mxu1 %vm1118_vm2, %v1791_v31 }
 0xaf9   :  { %13978 = vmatpush3.msra.mxu1 %v983_v32 }
 0xafa   :  { %13982 = vmatprep.subr.mxu1 %v982_v33 }
 0xb8e   :  { %v1942_v34 = vpop.f32.mrb[12].mxu0 }
 0xb8f   :  { %v13976_v35 = vpop.f32.mrb[13].mxu0 }
 0xb92   :  { %v2182_v36 = vpop.f32.mrb[14].mxu0 }
 0xb93   :  { %v13991_v37 = vpop.f32.mrb[15].mxu0  ;;  %v2264_v38 = vsel %vm1118_vm2, %v2182_v36, -inf }
 0xb94   :  { %2265 = vmax.xlane.f32.xlu1 %v2264_v38 }
 0xb96   :  { %v2260_v39 = vpop.f32.mrb[16].mxu0 }
 0xb97   :  { %v13996_v40 = vpop.f32.mrb[17].mxu0  ;;  %v2267_v41 = vsel %vm1118_vm2, %v2260_v39, -inf }
 0xb98   :  { %2268 = vmax.xlane.f32.xlu1 %v2267_v41 }
 0xbcb   :  { %v1866_v42 = vpop.f32.mrb[6].mxu1 }
 0xbcc   :  { %v13971_v43 = vpop.f32.mrb[7].mxu1  ;;  %13979 = vmatprep.mubr.msk.f32.mxu1 %vm1118_vm2, %v1866_v42 }
 0xbcd   :  { %13980 = vmatmul.mubr.msk.f32.vlgmr.msra.gmra.mrb[8].mxu1 %vm1118_vm2, %v1942_v34  ;;  %v985_v34 = vld [vmem:[%s18529_s1 + $0x18] sm:$0xff]  ;;  %s18546_s1 = sld [smem:[#allocation108_spill]] }
 0xbce   :  { %13984 = vmatprep.mubr.msk.f32.mxu1 %vm1118_vm2, %v17271_v62  ;;  %13983 = vmatpush3.msra.mxu1 %v982_v33 }
 0xbcf   :  { %13997 = vmatprep.subr.mxu1 %v16563_v19 }
 0xbd5   :  { %13985 = vmatmul.mubr.msk.f32.vlgmr.msra.gmra.mrb[8].mxu1 %vm1118_vm2, %v17262_v57 }
 0xbd6   :  { %13998 = vmatpush3.msra.mxu1 %v2287_v44  ;;  %13999 = vmatprep.mubr.msk.f32.mxu1 %vm16564_vm3, %v16563_v19 }
 0xbd7   :  { %14007 = vmatprep.subr.mxu1 %v984_v55 }
 0xc21   :  { %v2266_v45 = vpop.xlane.xlu1 %2265 }
 0xc22   :  { %v2270_v46 = vsub.f32 %v2182_v36, %v2266_v45 }
 0xc24   :  { %v2272_v47 = vmul.f32 1.442695, %v2270_v46 }
 0xc25   :  { %v2269_v48 = vpop.xlane.xlu1 %2268 }
 0xc26   :  { %15108 = vpow2.f32 %v2272_v47  ;;  %v2271_v49 = vsub.f32 %v2260_v39, %v2269_v48 }
 0xc28   :  { %v2274_v50 = vmul.f32 1.442695, %v2271_v49 }
 0xc2a   :  { %15110 = vpow2.f32 %v2274_v50 }
 0xc30   :  { %v15109_v51 = vpop.eup %15108 }
 0xc31   :  { %v2276_v52 = vsel %vm1118_vm2, %v15109_v51, 0.0 }
 0xc32   :  { %2277 = vadd.xlane.f32.xlu1 %v2276_v52 }
 0xc34   :  { %v15111_v53 = vpop.eup %15110 }
 0xc35   :  { %v2279_v54 = vsel %vm1118_vm2, %v15111_v53, 0.0 }
 0xc36   :  { %2280 = vadd.xlane.f32.xlu1 %v2279_v54 }
 0xc47   :  { %2362 = vrot.lane.b32.xlu1 %v17206_v24, %s16572_s25 }
 0xcbf   :  { %v2278_v56 = vpop.xlane.xlu1 %2277 }
 0xcc0   :  { %15112 = vrcp.f32 %v2278_v56 }
 0xcc3   :  { %v2281_v57 = vpop.xlane.xlu1 %2280 }
 0xcc4   :  { %15114 = vrcp.f32 %v2281_v57 }
 0xcc7   :  { %v2363_v58 = vpop.permute.xlu1 %2362 }
 0xcc8   :  { %14003 = vmatpush3.msra.mxu0 %v2363_v58  ;;  %v962_v58 = vld [vmem:[%s18530_s13] sm:$0xff] }
 0xcc9   :  { %14012 = vmatprep.subr.mxu0 %v16563_v19 }
 0xcca   :  { %v15113_v60 = vpop.eup %15112 }
 0xccb   :  { %v2283_v61 = vmul.f32 %v15113_v60, %v15109_v51  ;;  %v964_v60 = vld [vmem:[%s18530_s13 + $0x10] sm:$0xff] }
 0xccd   :  { %14000 = vmatmul.mubr.msk.f32.vlgmr.msra.gmra.mrb[10].mxu1 %vm1118_vm2, %v2283_v61 }
 0xcce   :  { %v15115_v62 = vpop.eup %15114  ;;  %14008 = vmatpush3.msra.mxu1 %v984_v55 }
 0xccf   :  { %v2285_v0 = vmul.f32 %v15115_v62, %v15111_v53  ;;  %14017 = vmatprep.subr.mxu1 %v16563_v19  ;;  %v965_v62 = vld [vmem:[%s18530_s13 + $0x18] sm:$0xff] }
 0xcd1   :  { %14005 = vmatmul.mubr.msk.f32.vlgmr.msra.gmra.mrb[18].mxu0 %vm1118_vm2, %v2285_v0  ;;  %v967_v0 = vld [vmem:[%s18531_s7] sm:$0xff] }
 0xcd2   :  { %14013 = vmatpush3.xpose.msk.msra.mxu0 %vm1118_vm2, %v2524_v59  ;;  %14014 = vmatprep.mubr.msk.f32.mxu0 %vm16564_vm3, %v16563_v19  ;;  %v963_v59 = vld [vmem:[%s18530_s13 + $0x8] sm:$0xff]  ;;  %s18547_s13 = sld [smem:[#allocation128_spill]] }
 0xcd3   :  { %14022 = vmatprep.subr.mxu0 %v16563_v19  ;;  %v14757_v61 = vpack.c.bf16 %v963_v59, %v962_v58  ;;  %v1015_v58 = vld [vmem:[#allocation73 + $0x8] sm:$0xff]  ;;  %v1016_v59 = vld [vmem:[#allocation73 + $0x10] sm:$0xff] }
 0xcd5   :  { %14015 = vmatmul.mubr.msk.f32.vlgmr.msra.gmra.mrb[20].mxu0 %vm1118_vm2, %v2522_v1  ;;  %v968_v1 = vld [vmem:[%s18531_s7 + $0x8] sm:$0xff] }
 0xcd6   :  { %14024 = vmatprep.mubr.msk.f32.mxu0 %vm16564_vm3, %v16563_v19 }
 0xda0   :  { %v2358_v2 = vpop.f32.mrb[10].mxu1 }
 0xda1   :  { %v14001_v3 = vpop.f32.mrb[11].mxu1  ;;  %14009 = vmatprep.mubr.msk.f32.mxu1 %vm1118_vm2, %v2358_v2  ;;  %v969_v2 = vld [vmem:[%s18531_s7 + $0x10] sm:$0xff] }
 0xda2   :  { %v14765_v3 = vpack.c.bf16 %v968_v1, %v967_v0 }
 0xda4   :  { %v2434_v4 = vpop.f32.mrb[18].mxu0 }
 0xda5   :  { %v14006_v5 = vpop.f32.mrb[19].mxu0  ;;  %14010 = vmatmul.mubr.msk.f32.vlgmr.msra.gmra.mrb[8].mxu1 %vm1118_vm2, %v2434_v4  ;;  %v970_v4 = vld [vmem:[%s18531_s7 + $0x18] sm:$0xff] }
 0xda6   :  { %14018 = vmatpush3.xpose.msk.msra.mxu1 %vm1118_vm2, %v2602_v63  ;;  %14019 = vmatprep.mubr.msk.f32.mxu1 %vm16564_vm3, %v16563_v19  ;;  %v14761_v63 = vpack.c.bf16 %v965_v62, %v964_v60  ;;  %v14769_v5 = vpack.c.bf16 %v970_v4, %v969_v2 }
 0xda7   :  { %14027 = vmatprep.subr.mxu1 %v16563_v19 }
 0xda8   :  { %v2595_v7 = vpop.f32.mrb[20].mxu0 }
 0xda9   :  { %v14016_v8 = vpop.f32.mrb[21].mxu0  ;;  %14020 = vmatmul.mubr.msk.f32.vlgmr.msra.gmra.mrb[12].mxu1 %vm1118_vm2, %v2600_v6  ;;  %v2677_v9 = vsel %vm1118_vm2, %v2595_v7, -inf  ;;  %v971_v6 = vld [vmem:[%s18531_s7 + $0x20] sm:$0xff] }
 0xdaa   :  { %2678 = vmax.xlane.f32.xlu1 %v2677_v9  ;;  %14029 = vmatprep.mubr.msk.f32.mxu1 %vm16564_vm3, %v16563_v19 }
 0xe37   :  { %v2679_v10 = vpop.xlane.xlu1 %2678 }
 0xe38   :  { %v2683_v11 = vsub.f32 %v2595_v7, %v2679_v10  ;;  %v972_v7 = vld [vmem:[%s18531_s7 + $0x28] sm:$0xff] }
 0xe39   :  { %v14773_v8 = vpack.c.bf16 %v972_v7, %v971_v6  ;;  %v13296_v6 = vld [vmem:[#allocation61] ss:$0 sm:$0xff] }
 0xe3a   :  { %v2685_v12 = vmul.f32 1.442695, %v2683_v11 }
 0xe3c   :  { %15116 = vpow2.f32 %v2685_v12 }
 0xe46   :  { %v15117_v18 = vpop.eup %15116 }
 0xe47   :  { %v2689_v20 = vsel %vm1118_vm2, %v15117_v18, 0.0 }
 0xe7c   :  { %v2673_v13 = vpop.f32.mrb[12].mxu1 }
 0xe7d   :  { %v14021_v16 = vpop.f32.mrb[13].mxu1  ;;  %v2680_v17 = vsel %vm1118_vm2, %v2673_v13, -inf }
 0xe7e   :  { %2681 = vmax.xlane.f32.xlu0 %v2680_v17 }
 0xe82   :  { %2690 = vadd.xlane.f32.xlu0 %v2689_v20 }
 0xe98   :  { %2699 = vrot.lane.b32.xlu0 %v17202_v23, %s16575_s20 }
 0xf0b   :  { %v2682_v21 = vpop.xlane.xlu0 %2681 }
 0xf0c   :  { %v2684_v22 = vsub.f32 %v2673_v13, %v2682_v21 }
 0xf0e   :  { %v2687_v27 = vmul.f32 1.442695, %v2684_v22 }
 0xf0f   :  { %v2691_v28 = vpop.xlane.xlu0 %2690 }
 0xf10   :  { %15118 = vpow2.f32 %v2687_v27  ;;  %v13289_v27 = vld [vmem:[#allocation59] ss:$0 sm:$0xff] }
 0xf11   :  { %15120 = vrcp.f32 %v2691_v28 }
 0xf13   :  { %v2700_v29 = vpop.permute.xlu0 %2699 }
 0xf14   :  { %14023 = vmatpush3.msra.mxu0 %v2700_v29 }
 0xf15   :  { %14758 = vmatprep.subr.bf16.mxu0 %v14757_v61 }
 0xf1a   :  { %v15119_v30 = vpop.eup %15118 }
 0xf1b   :  { %v15121_v31 = vpop.eup %15120  ;;  %v2692_v32 = vsel %vm1118_vm2, %v15119_v30, 0.0 }
 0xf1c   :  { %2693 = vadd.xlane.f32.xlu1 %v2692_v32  ;;  %v2696_v33 = vmul.f32 %v15121_v31, %v15117_v18  ;;  %v13288_v18 = vld [vmem:[#allocation58] ss:$0 sm:$0xff]  ;;  %v973_v32 = vld [vmem:[%s18531_s7 + $0x30] sm:$0xff] }
 0xf1e   :  { %14025 = vmatmul.mubr.msk.f32.vlgmr.msra.gmra.mrb[22].mxu0 %vm1118_vm2, %v2696_v33  ;;  %v974_v33 = vld [vmem:[%s18531_s7 + $0x38] sm:$0xff] }
 0xf1f   :  { %14760 = vmatpush3.bf16.msra.mxu0 %v14757_v61  ;;  %v1017_v61 = vld [vmem:[#allocation73 + $0x18] sm:$0xff] }
 0xf20   :  { %14762 = vmatprep.subr.bf16.mxu0 %v14761_v63  ;;  %v14785_v62 = vpack.c.bf16 %v1017_v61, %v1016_v59 }
 0xf23   :  { %14764 = vmatpush3.bf16.msra.mxu0 %v14761_v63 }
 0xf2d   :  { %2775 = vrot.lane.b32.xlu1 %v17206_v24, %s16575_s20  ;;  %v13287_v24 = vld [vmem:[#allocation64] ss:$0 sm:$0xff] }
 0xfa9   :  { %v2694_v23 = vpop.xlane.xlu1 %2693 }
 0xfaa   :  { %15122 = vrcp.f32 %v2694_v23  ;;  %v14777_v23 = vpack.c.bf16 %v974_v33, %v973_v32 }
 0xfad   :  { %v2776_v35 = vpop.permute.xlu1 %2775 }
 0xfae   :  { %14028 = vmatpush3.msra.mxu1 %v2776_v35 }
 0xfaf   :  { %14032 = vmatprep.subr.mxu1 %v985_v34 }
 0xfb4   :  { %v15123_v36 = vpop.eup %15122 }
 0xfb5   :  { %v2698_v37 = vmul.f32 %v15123_v36, %v15119_v30 }
 0xfb7   :  { %14030 = vmatmul.mubr.msk.f32.vlgmr.msra.gmra.mrb[14].mxu1 %vm1118_vm2, %v2698_v37 }
 0xfb8   :  { %14033 = vmatpush3.msra.mxu1 %v985_v34  ;;  %v13290_v34 = vld [vmem:[#allocation55] ss:$0 sm:$0xff] }
 0xfb9   :  { %14766 = vmatprep.subr.bf16.mxu1 %v14765_v3 }
 0xff1   :  { %v2771_v38 = vpop.f32.mrb[22].mxu0 }
 0xff2   :  { %v14026_v39 = vpop.f32.mrb[23].mxu0  ;;  %14034 = vmatprep.mubr.msk.f32.mxu1 %vm1118_vm2, %v2771_v38 }
0x108a   :  { %v2847_v40 = vpop.f32.mrb[14].mxu1 }
0x108b   :  { %v14031_v41 = vpop.f32.mrb[15].mxu1  ;;  %14035 = vmatmul.mubr.msk.f32.vlgmr.msra.gmra.mrb[8].mxu1 %vm1118_vm2, %v2847_v40 }
0x108c   :  { %14768 = vmatpush3.bf16.msra.mxu1 %v14765_v3  ;;  %v13293_v41 = vld [vmem:[#allocation56] ss:$0 sm:$0xff] }
0x108d   :  { %14770 = vmatprep.subr.bf16.mxu1 %v14769_v5 }
0x1090   :  { %14772 = vmatpush3.bf16.msra.mxu1 %v14769_v5 }
0x1091   :  { %14774 = vmatprep.subr.bf16.mxu1 %v14773_v8 }
0x1094   :  { %14776 = vmatpush3.bf16.msra.mxu1 %v14773_v8 }
0x1095   :  { %14778 = vmatprep.subr.bf16.mxu1 %v14777_v23 }
0x1098   :  { %14780 = vmatpush3.bf16.msra.mxu1 %v14777_v23 }
0x1099   :  { %14088 = vmatprep.subr.mxu1 %v16563_v19 }
0x115e   :  { %v14036_v42 = vpop.f32.mrb[8].mxu1 }
0x115f   :  { %v2941_v43 = vadd.f32 %v14036_v42, %v13287_v24  ;;  %v2923_v44 = vpop.f32.mrb[9].mxu1 }
0x1160   :  { %v2940_v45 = vadd.f32 %v13287_v24, %v2923_v44 }
0x1161   :  { %v2943_v46 = vadd.f32 %v2941_v43, %v17188_v15 }
0x1162   :  { %v2942_v47 = vadd.f32 %v2940_v45, %v17186_v14 }
0x1163   :  { %v2947_v48 = vsel %vm1206_vm1, %v2943_v46, 0.0 }
0x1164   :  { %2948 = vadd.xlane.f32.xlu0 %v2947_v48  ;;  %v2944_v49 = vsel %vm1206_vm1, %v2942_v47, 0.0 }
0x1165   :  { %2945 = vadd.xlane.f32.xlu1 %v2944_v49 }
0x11f1   :  { %v2949_v50 = vpop.xlane.xlu0 %2948 }
0x11f2   :  { %v2952_v51 = vmul.f32 0.03125, %v2949_v50  ;;  %v2946_v52 = vpop.xlane.xlu1 %2945 }
0x11f3   :  { %v2951_v53 = vmul.f32 0.03125, %v2946_v52 }
0x11f4   :  { %v2954_v54 = vsub.f32 %v2943_v46, %v2952_v51 }
0x11f5   :  { %v2953_v55 = vsub.f32 %v2942_v47, %v2951_v53 }
0x11f6   :  { %v2956_v56 = vmul.f32 %v2954_v54, %v2954_v54 }
0x11f7   :  { %v2955_v15 = vmul.f32 %v2953_v55, %v2953_v55 }
0x11f8   :  { %v2960_v14 = vsel %vm1206_vm1, %v2956_v56, 0.0 }
0x11f9   :  { %2961 = vadd.xlane.f32.xlu1 %v2960_v14  ;;  %v2957_v57 = vsel %vm1206_vm1, %v2955_v15, 0.0 }
0x11fa   :  { %2958 = vadd.xlane.f32.xlu0 %v2957_v57  ;;  %v1014_v57 = vld [vmem:[#allocation73] sm:$0xff] }
0x11fb   :  { %v14781_v60 = vpack.c.bf16 %v1015_v58, %v1014_v57 }
0x11fd   :  { %14782 = vmatprep.subr.bf16.mxu0 %v14781_v60 }
0x1286   :  { %v2962_v9 = vpop.xlane.xlu1 %2961 }
0x1287   :  { %v2964_v10 = vmul.f32 0.03125, %v2962_v9  ;;  %v2959_v11 = vpop.xlane.xlu0 %2958 }
0x1288   :  { %v2963_v12 = vmul.f32 0.03125, %v2959_v11 }
0x1289   :  { %v2966_v13 = vadd.f32 1e-05, %v2964_v10  ;;  %v13297_v10 = vld [vmem:[#allocation62] ss:$0 sm:$0xff] }
0x128a   :  { %v2965_v16 = vadd.f32 1e-05, %v2963_v12 }
0x128b   :  { %15124 = vrsqrt.f32 %v2966_v13 }
0x128c   :  { %15126 = vrsqrt.f32 %v2965_v16 }
0x1295   :  { %v15125_v17 = vpop.eup %15124 }
0x1296   :  { %v15127_v20 = vpop.eup %15126  ;;  %v2970_v21 = vmul.f32 %v15125_v17, %v2954_v54  ;;  %v13298_v17 = vld [vmem:[%s18532_s17] ss:$0 sm:$0xff] }
0x1297   :  { %v2969_v22 = vmul.f32 %v15127_v20, %v2953_v55 }
0x1298   :  { %v2978_v28 = vmul.f32 %v13288_v18, %v2970_v21 }
0x1299   :  { %v2977_v29 = vmul.f32 %v13288_v18, %v2969_v22 }
0x129a   :  { %v2986_v31 = vadd.f32 %v13289_v27, %v2978_v28 }
0x129b   :  { %v2985_v30 = vadd.f32 %v13289_v27, %v2977_v29 }
0x129d   :  { %14045 = vmatprep.mubr.msk.f32.mxu0 %vm1206_vm1, %v2985_v30 }
0x129e   :  { %14046 = vmatmul.mubr.msk.f32.vlgmr.msra.gmra.mrb[24].mxu0 %vm1206_vm1, %v2986_v31 }
0x129f   :  { %14784 = vmatpush3.bf16.msra.mxu0 %v14781_v60 }
0x12a0   :  { %14786 = vmatprep.subr.bf16.mxu0 %v14785_v62 }
0x12a3   :  { %14788 = vmatpush3.bf16.msra.mxu0 %v14785_v62 }
0x12a4   :  { %14078 = vmatprep.subr.mxu0 %v16563_v19 }
0x1371   :  { %v14047_v35 = vpop.f32.mrb[24].mxu0 }
0x1372   :  { %v3071_v36 = vadd.f32 %v14047_v35, %v13290_v34  ;;  %v3065_v37 = vpop.f32.mrb[25].mxu0 }
0x1373   :  { %v3066_v38 = vadd.f32 %v13290_v34, %v3065_v37 }
0x1374   :  { %v3075_v40 = vmax.f32 %v3071_v36, 0.0 }
0x1375   :  { %v3074_v39 = vmax.f32 %v3066_v38, 0.0 }
0x1377   :  { %14064 = vmatprep.mubr.msk.f32.mxu1 %vm3082_vm4, %v3074_v39 }
0x1378   :  { %14065 = vmatmul.mubr.msk.f32.vlgmr.msra.gmra.mrb[16].mxu1 %vm3082_vm4, %v3075_v40 }
0x1379   :  { %14090 = vmatprep.mubr.msk.f32.mxu1 %vm16564_vm3, %v16563_v19 }
0x144b   :  { %v14066_v24 = vpop.f32.mrb[16].mxu1 }
0x144c   :  { %v3161_v42 = vadd.f32 %v14066_v24, %v13293_v41  ;;  %v3155_v43 = vpop.f32.mrb[17].mxu1 }
0x144d   :  { %v3156_v44 = vadd.f32 %v13293_v41, %v3155_v43 }
0x144e   :  { %v3165_v45 = vadd.f32 %v3161_v42, %v2986_v31 }
0x144f   :  { %v3164_v46 = vadd.f32 %v3156_v44, %v2985_v30 }
0x1450   :  { %v3169_v47 = vsel %vm1206_vm1, %v3165_v45, 0.0 }
0x1451   :  { %3170 = vadd.xlane.f32.xlu1 %v3169_v47  ;;  %v3166_v48 = vsel %vm1206_vm1, %v3164_v46, 0.0 }
0x1452   :  { %3167 = vadd.xlane.f32.xlu0 %v3166_v48 }
0x14de   :  { %v3171_v49 = vpop.xlane.xlu1 %3170 }
0x14df   :  { %v3173_v50 = vmul.f32 0.03125, %v3171_v49  ;;  %v3168_v51 = vpop.xlane.xlu0 %3167 }
0x14e0   :  { %v3172_v52 = vmul.f32 0.03125, %v3168_v51 }
0x14e1   :  { %v3175_v53 = vsub.f32 %v3165_v45, %v3173_v50 }
0x14e2   :  { %v3174_v54 = vsub.f32 %v3164_v46, %v3172_v52 }
0x14e3   :  { %v3177_v55 = vmul.f32 %v3175_v53, %v3175_v53 }
0x14e4   :  { %v3176_v56 = vmul.f32 %v3174_v54, %v3174_v54 }
0x14e5   :  { %v3181_v15 = vsel %vm1206_vm1, %v3177_v55, 0.0 }
0x14e6   :  { %3182 = vadd.xlane.f32.xlu1 %v3181_v15  ;;  %v3178_v14 = vsel %vm1206_vm1, %v3176_v56, 0.0 }
0x14e7   :  { %3179 = vadd.xlane.f32.xlu0 %v3178_v14 }
0x1573   :  { %v3183_v63 = vpop.xlane.xlu1 %3182 }
0x1574   :  { %v3185_v0 = vmul.f32 0.03125, %v3183_v63  ;;  %v3180_v1 = vpop.xlane.xlu0 %3179 }
0x1575   :  { %v3184_v2 = vmul.f32 0.03125, %v3180_v1 }
0x1576   :  { %v3187_v3 = vadd.f32 1e-05, %v3185_v0 }
0x1577   :  { %v3186_v4 = vadd.f32 1e-05, %v3184_v2 }
0x1578   :  { %15128 = vrsqrt.f32 %v3187_v3 }
0x1579   :  { %15130 = vrsqrt.f32 %v3186_v4 }
0x1582   :  { %v15129_v5 = vpop.eup %15128 }
0x1583   :  { %v15131_v7 = vpop.eup %15130  ;;  %v3191_v8 = vmul.f32 %v15129_v5, %v3175_v53 }
0x1584   :  { %v3190_v9 = vmul.f32 %v15131_v7, %v3174_v54 }
0x1585   :  { %v3199_v11 = vmul.f32 %v13296_v6, %v3191_v8 }
0x1586   :  { %v3198_v12 = vmul.f32 %v13296_v6, %v3190_v9 }
0x1587   :  { %v17388_v16 = vadd.f32 %v13297_v10, %v3199_v11 }
0x1588   :  { %v17386_v13 = vadd.f32 %v13297_v10, %v3198_v12 }
0x158a   :  { %14075 = vmatprep.mubr.msk.f32.mxu0 %vm1206_vm1, %v17386_v13 }
0x158b   :  { %14076 = vmatmul.mubr.msk.f32.vlgmr.msra.gmra.mrb[26].mxu0 %vm1206_vm1, %v17388_v16 }
0x158c   :  { %14080 = vmatprep.mubr.msk.f32.mxu0 %vm16564_vm3, %v16563_v19 }
0x165e   :  { %v14077_v18 = vpop.f32.mrb[26].mxu0 }
0x165f   :  { %v17397_v20 = vadd.f32 %v14077_v18, %v13298_v17  ;;  %v3286_v21 = vpop.f32.mrb[27].mxu0 }
0x1660   :  { %v17399_v22 = vadd.f32 %v13298_v17, %v3286_v21 }
0x1661   :  { %3373 = vrot.lane.b32.xlu1 %v17397_v20, %s16565_s8 }
0x1662   :  { %3296 = vrot.lane.b32.xlu0 %v17399_v22, %s16565_s8 }
0x16d3   :  { %v3374_v28 = vpop.permute.xlu1 %3373 }
0x16d4   :  { %v3297_v27 = vpop.permute.xlu0 %3296 }
0x16d5   :  { %14079 = vmatpush3.xpose.msk.msra.mxu0 %vm1118_vm2, %v3297_v27 }
0x16d6   :  { %14083 = vmatprep.subr.mxu0 %v16563_v19 }
0x16d8   :  { %14081 = vmatmul.mubr.msk.f32.vlgmr.msra.gmra.mrb[28].mxu0 %vm1118_vm2, %v17399_v22 }
0x16d9   :  { %14084 = vmatpush3.xpose.msk.msra.mxu0 %vm1118_vm2, %v3374_v28  ;;  %14085 = vmatprep.mubr.msk.f32.mxu0 %vm16564_vm3, %v16563_v19 }
0x16da   :  { %14093 = vmatprep.subr.mxu0 %v16563_v19 }
0x16dc   :  { %14086 = vmatmul.mubr.msk.f32.vlgmr.msra.gmra.mrb[30].mxu0 %vm1118_vm2, %v17397_v20 }
0x16dd   :  { %14095 = vmatprep.mubr.msk.f32.mxu0 %vm16564_vm3, %v16563_v19 }
0x17ab   :  { %v3368_v29 = vpop.f32.mrb[28].mxu0 }
0x17ac   :  { %v14082_v30 = vpop.f32.mrb[29].mxu0  ;;  %v3449_v38 = vsel %vm1118_vm2, %v3368_v29, -inf }
0x17af   :  { %v3445_v31 = vpop.f32.mrb[30].mxu0 }
0x17b0   :  { %v14087_v32 = vpop.f32.mrb[31].mxu0  ;;  %v3452_v33 = vsel %vm1118_vm2, %v3445_v31, -inf }
0x17b1   :  { %3453 = vmax.xlane.f32.xlu1 %v3452_v33 }
0x17c2   :  { %3703 = vrot.lane.b32.xlu1 %v17397_v20, %s16568_s26 }
0x17c6   :  { %3701 = vrot.lane.b32.xlu1 %v17397_v20, %s16567_s23 }
0x183e   :  { %v3454_v23 = vpop.xlane.xlu1 %3453 }
0x183f   :  { %v3456_v34 = vsub.f32 %v3445_v31, %v3454_v23 }
0x1841   :  { %v3459_v35 = vmul.f32 1.442695, %v3456_v34 }
0x1842   :  { %v3704_v24 = vpop.permute.xlu1 %3703 }
0x1843   :  { %15132 = vpow2.f32 %v3459_v35 }
0x1846   :  { %v3702_v43 = vpop.permute.xlu1 %3701 }
0x184d   :  { %v15133_v36 = vpop.eup %15132 }
0x184e   :  { %v3464_v37 = vsel %vm1118_vm2, %v15133_v36, 0.0 }
0x184f   :  { %3465 = vadd.xlane.f32.xlu0 %v3464_v37 }
0x1865   :  { %3547 = vrot.lane.b32.xlu0 %v17397_v20, %s16566_s9 }
0x1884   :  { %3450 = vmax.xlane.f32.xlu0 %v3449_v38 }
0x189a   :  { %3471 = vrot.lane.b32.xlu0 %v17399_v22, %s16566_s9 }
0x189e   :  { %3623 = vrot.lane.b32.xlu0 %v17399_v22, %s16567_s23 }
0x18dc   :  { %v3466_v39 = vpop.xlane.xlu0 %3465 }
0x18dd   :  { %15134 = vrcp.f32 %v3466_v39  ;;  %v1011_v39 = vld [vmem:[%s18533_s21 + $0x8] sm:$0xff] }
0x18e0   :  { %v3548_v40 = vpop.permute.xlu0 %3547 }
0x18e1   :  { %14094 = vmatpush3.msra.mxu0 %v3548_v40  ;;  %v1010_v40 = vld [vmem:[%s18533_s21] sm:$0xff] }
0x18e2   :  { %14103 = vmatprep.subr.mxu0 %v16563_v19 }
0x18e7   :  { %v15135_v41 = vpop.eup %15134 }
0x18e8   :  { %v3470_v42 = vmul.f32 %v15135_v41, %v15133_v36 }
0x18ea   :  { %14096 = vmatmul.mubr.msk.f32.vlgmr.msra.gmra.mrb[32].mxu0 %vm1118_vm2, %v3470_v42 }
0x18eb   :  { %14104 = vmatpush3.xpose.msk.msra.mxu0 %vm1118_vm2, %v3704_v24  ;;  %14105 = vmatprep.mubr.msk.f32.mxu0 %vm16564_vm3, %v16563_v19 }
0x18ec   :  { %14113 = vmatprep.subr.mxu0 %v16563_v19 }
0x18ee   :  { %14106 = vmatmul.mubr.msk.f32.vlgmr.msra.gmra.mrb[34].mxu0 %vm1118_vm2, %v3702_v43 }
0x18ef   :  { %14115 = vmatprep.mubr.msk.f32.mxu0 %vm16564_vm3, %v16563_v19 }
0x1911   :  { %v3451_v44 = vpop.xlane.xlu0 %3450 }
0x1912   :  { %v3455_v45 = vsub.f32 %v3368_v29, %v3451_v44 }
0x1914   :  { %v3457_v46 = vmul.f32 1.442695, %v3455_v45 }
0x1915   :  { %v3472_v47 = vpop.permute.xlu0 %3471 }
0x1916   :  { %15136 = vpow2.f32 %v3457_v46  ;;  %14089 = vmatpush3.msra.mxu1 %v3472_v47 }
0x1917   :  { %14098 = vmatprep.subr.mxu1 %v16563_v19 }
0x1919   :  { %v3624_v56 = vpop.permute.xlu0 %3623 }
0x1920   :  { %v15137_v48 = vpop.eup %15136 }
0x1921   :  { %v3461_v49 = vsel %vm1118_vm2, %v15137_v48, 0.0 }
0x1922   :  { %3462 = vadd.xlane.f32.xlu1 %v3461_v49 }
0x1933   :  { %3625 = vrot.lane.b32.xlu1 %v17399_v22, %s16568_s26 }
0x19af   :  { %v3463_v50 = vpop.xlane.xlu1 %3462 }
0x19b0   :  { %15138 = vrcp.f32 %v3463_v50 }
0x19b3   :  { %v3626_v53 = vpop.permute.xlu1 %3625 }
0x19ba   :  { %v15139_v51 = vpop.eup %15138 }
0x19bb   :  { %v3468_v52 = vmul.f32 %v15139_v51, %v15137_v48 }
0x19bd   :  { %14091 = vmatmul.mubr.msk.f32.vlgmr.msra.gmra.mrb[18].mxu1 %vm1118_vm2, %v3468_v52  ;;  %v17444_v54 = vpop.f32.mrb[32].mxu0  ;;  %v1012_v52 = vld [vmem:[%s18533_s21 + $0x10] sm:$0xff] }
0x19be   :  { %14099 = vmatpush3.xpose.msk.msra.mxu1 %vm1118_vm2, %v3626_v53  ;;  %v14097_v55 = vpop.f32.mrb[33].mxu0  ;;  %14100 = vmatprep.mubr.msk.f32.mxu1 %vm16564_vm3, %v16563_v19 }
0x19bf   :  { %14108 = vmatprep.subr.mxu1 %v16563_v19 }
0x19c1   :  { %14101 = vmatmul.mubr.msk.f32.vlgmr.msra.gmra.mrb[20].mxu1 %vm1118_vm2, %v3624_v56  ;;  %v3775_v15 = vpop.f32.mrb[34].mxu0 }
0x19c2   :  { %v14107_v14 = vpop.f32.mrb[35].mxu0  ;;  %v3782_v57 = vsel %vm1118_vm2, %v3775_v15, -inf  ;;  %14110 = vmatprep.mubr.msk.f32.mxu1 %vm16564_vm3, %v16563_v19 }
0x19c3   :  { %3783 = vmax.xlane.f32.xlu1 %v3782_v57 }
0x19d4   :  { %4117 = vrot.lane.b32.xlu1 %v17399_v22, %s16569_s12 }
0x19d8   :  { %4115 = vrot.lane.b32.xlu1 %v17399_v22, %s16571_s0 }
0x19dc   :  { %4193 = vrot.lane.b32.xlu1 %v17397_v20, %s16571_s0 }
0x1a50   :  { %v3784_v58 = vpop.xlane.xlu1 %3783 }
0x1a51   :  { %v3786_v59 = vsub.f32 %v3775_v15, %v3784_v58 }
0x1a53   :  { %v3789_v60 = vmul.f32 1.442695, %v3786_v59 }
0x1a54   :  { %v4118_v6 = vpop.permute.xlu1 %4117 }
0x1a55   :  { %15140 = vpow2.f32 %v3789_v60 }
0x1a58   :  { %v4116_v9 = vpop.permute.xlu1 %4115 }
0x1a5c   :  { %v4194_v11 = vpop.permute.xlu1 %4193 }
0x1a5f   :  { %v15141_v61 = vpop.eup %15140 }
0x1a60   :  { %v3794_v62 = vsel %vm1118_vm2, %v15141_v61, 0.0 }
0x1a61   :  { %3795 = vadd.xlane.f32.xlu0 %v3794_v62 }
0x1a77   :  { %3877 = vrot.lane.b32.xlu0 %v17397_v20, %s16570_s6 }
0x1a7b   :  { %4195 = vrot.lane.b32.xlu0 %v17397_v20, %s16569_s12 }
0x1a90   :  { %v17465_v63 = vpop.f32.mrb[18].mxu1 }
0x1a91   :  { %v14092_v0 = vpop.f32.mrb[19].mxu1 }
0x1a94   :  { %v3697_v1 = vpop.f32.mrb[20].mxu1 }
0x1a95   :  { %v14102_v2 = vpop.f32.mrb[21].mxu1  ;;  %v3779_v3 = vsel %vm1118_vm2, %v3697_v1, -inf }
0x1a9a   :  { %3780 = vmax.xlane.f32.xlu0 %v3779_v3 }
0x1ab0   :  { %3801 = vrot.lane.b32.xlu0 %v17399_v22, %s16570_s6 }
0x1ab4   :  { %4293 = vrot.lane.b32.xlu0 %v17399_v22, %s16572_s25 }
0x1ab8   :  { %4530 = vrot.lane.b32.xlu0 %v17399_v22, %s16573_s28 }
0x1abc   :  { %4608 = vrot.lane.b32.xlu0 %v17397_v20, %s16573_s28 }
0x1ac0   :  { %4528 = vrot.lane.b32.xlu0 %v17399_v22, %s16574_s30 }
0x1ac4   :  { %4606 = vrot.lane.b32.xlu0 %v17397_v20, %s16574_s30 }
0x1aee   :  { %v3796_v4 = vpop.xlane.xlu0 %3795 }
0x1aef   :  { %15142 = vrcp.f32 %v3796_v4 }
0x1af2   :  { %v3878_v5 = vpop.permute.xlu0 %3877 }
0x1af3   :  { %14114 = vmatpush3.msra.mxu0 %v3878_v5 }
0x1af4   :  { %14128 = vmatprep.subr.mxu0 %v16563_v19 }
0x1af6   :  { %v4196_v10 = vpop.permute.xlu0 %4195 }
0x1af9   :  { %v15143_v7 = vpop.eup %15142 }
0x1afa   :  { %v3800_v8 = vmul.f32 %v15143_v7, %v15141_v61 }
0x1afc   :  { %14116 = vmatmul.mubr.msk.f32.vlgmr.msra.gmra.mrb[36].mxu0 %vm1118_vm2, %v3800_v8 }
0x1afd   :  { %14129 = vmatpush3.xpose.msk.msra.mxu0 %vm1118_vm2, %v4118_v6  ;;  %14130 = vmatprep.mubr.msk.f32.mxu0 %vm16564_vm3, %v16563_v19 }
0x1afe   :  { %14133 = vmatprep.subr.mxu0 %v16563_v19 }
0x1b00   :  { %14131 = vmatmul.mubr.msk.f32.vlgmr.msra.gmra.mrb[38].mxu0 %vm1118_vm2, %v4116_v9 }
0x1b01   :  { %14134 = vmatpush3.xpose.msk.msra.mxu0 %vm1118_vm2, %v4196_v10  ;;  %14135 = vmatprep.mubr.msk.f32.mxu0 %vm16564_vm3, %v16563_v19 }
0x1b02   :  { %14143 = vmatprep.subr.mxu0 %v16563_v19 }
0x1b04   :  { %14136 = vmatmul.mubr.msk.f32.vlgmr.msra.gmra.mrb[40].mxu0 %vm1118_vm2, %v4194_v11 }
0x1b05   :  { %14145 = vmatprep.mubr.msk.f32.mxu0 %vm16564_vm3, %v16563_v19 }
0x1b27   :  { %v3781_v12 = vpop.xlane.xlu0 %3780 }
0x1b28   :  { %v3785_v17 = vsub.f32 %v3697_v1, %v3781_v12 }
0x1b2a   :  { %v3787_v18 = vmul.f32 1.442695, %v3785_v17 }
0x1b2b   :  { %v3802_v21 = vpop.permute.xlu0 %3801 }
0x1b2c   :  { %15144 = vpow2.f32 %v3787_v18  ;;  %14109 = vmatpush3.msra.mxu1 %v3802_v21 }
0x1b2d   :  { %14118 = vmatprep.subr.mxu1 %v1011_v39 }
0x1b2f   :  { %v4294_v53 = vpop.permute.xlu0 %4293 }
0x1b33   :  { %v4531_v14 = vpop.permute.xlu0 %4530 }
0x1b36   :  { %v15145_v27 = vpop.eup %15144 }
0x1b37   :  { %v3791_v28 = vsel %vm1118_vm2, %v15145_v27, 0.0 }
0x1b38   :  { %3792 = vadd.xlane.f32.xlu1 %v3791_v28 }
0x1bc5   :  { %v3793_v29 = vpop.xlane.xlu1 %3792 }
0x1bc6   :  { %15146 = vrcp.f32 %v3793_v29 }
0x1bcf   :  { %v3949_v30 = vpop.f32.mrb[36].mxu0 }
0x1bd0   :  { %v15147_v31 = vpop.eup %15146  ;;  %v14117_v32 = vpop.f32.mrb[37].mxu0 }
0x1bd1   :  { %v3798_v33 = vmul.f32 %v15147_v31, %v15145_v27 }
0x1bd3   :  { %14111 = vmatmul.mubr.msk.f32.vlgmr.msra.gmra.mrb[22].mxu1 %vm1118_vm2, %v3798_v33  ;;  %v4189_v23 = vpop.f32.mrb[38].mxu0 }
0x1bd4   :  { %v14132_v34 = vpop.f32.mrb[39].mxu0  ;;  %v4271_v35 = vsel %vm1118_vm2, %v4189_v23, -inf  ;;  %14119 = vmatpush3.msra.mxu1 %v1011_v39 }
0x1bd5   :  { %4272 = vmax.xlane.f32.xlu1 %v4271_v35  ;;  %14123 = vmatprep.subr.mxu1 %v1010_v40 }
0x1bd7   :  { %v4267_v36 = vpop.f32.mrb[40].mxu0 }
0x1bd8   :  { %v14137_v37 = vpop.f32.mrb[41].mxu0  ;;  %v4274_v38 = vsel %vm1118_vm2, %v4267_v36, -inf }
0x1bd9   :  { %4275 = vmax.xlane.f32.xlu1 %v4274_v38 }
0x1c62   :  { %v4273_v41 = vpop.xlane.xlu1 %4272 }
0x1c63   :  { %v4277_v24 = vsub.f32 %v4189_v23, %v4273_v41  ;;  %v1013_v23 = vld [vmem:[%s18533_s21 + $0x18] sm:$0xff] }
0x1c65   :  { %v4279_v42 = vmul.f32 1.442695, %v4277_v24 }
0x1c66   :  { %v4276_v43 = vpop.xlane.xlu1 %4275 }
0x1c67   :  { %15148 = vpow2.f32 %v4279_v42  ;;  %v4278_v44 = vsub.f32 %v4267_v36, %v4276_v43 }
0x1c69   :  { %v4281_v45 = vmul.f32 1.442695, %v4278_v44 }
0x1c6b   :  { %15150 = vpow2.f32 %v4281_v45 }
0x1c71   :  { %v15149_v46 = vpop.eup %15148 }
0x1c72   :  { %v4283_v47 = vsel %vm1118_vm2, %v15149_v46, 0.0 }
0x1c73   :  { %4284 = vadd.xlane.f32.xlu1 %v4283_v47 }
0x1c75   :  { %v15151_v48 = vpop.eup %15150 }
0x1c76   :  { %v4286_v49 = vsel %vm1118_vm2, %v15151_v48, 0.0 }
0x1c77   :  { %4287 = vadd.xlane.f32.xlu1 %v4286_v49 }
0x1c88   :  { %4369 = vrot.lane.b32.xlu1 %v17397_v20, %s16572_s25 }
0x1ca6   :  { %v3873_v50 = vpop.f32.mrb[22].mxu1 }
0x1ca7   :  { %v14112_v51 = vpop.f32.mrb[23].mxu1  ;;  %14120 = vmatprep.mubr.msk.f32.mxu1 %vm1118_vm2, %v3873_v50 }
0x1ca8   :  { %14121 = vmatmul.mubr.msk.f32.vlgmr.msra.gmra.mrb[24].mxu1 %vm1118_vm2, %v3949_v30 }
0x1ca9   :  { %14125 = vmatprep.mubr.msk.f32.mxu1 %vm1118_vm2, %v17465_v63  ;;  %14124 = vmatpush3.msra.mxu1 %v1010_v40 }
0x1caa   :  { %14138 = vmatprep.subr.mxu1 %v16563_v19 }
0x1cb0   :  { %14126 = vmatmul.mubr.msk.f32.vlgmr.msra.gmra.mrb[24].mxu1 %vm1118_vm2, %v17444_v54  ;;  %v4609_v54 = vpop.permute.xlu0 %4608 }
0x1cb1   :  { %14139 = vmatpush3.msra.mxu1 %v4294_v53  ;;  %14140 = vmatprep.mubr.msk.f32.mxu1 %vm16564_vm3, %v16563_v19 }
0x1cb2   :  { %14148 = vmatprep.subr.mxu1 %v1012_v52 }
0x1cb4   :  { %v4529_v61 = vpop.permute.xlu0 %4528 }
0x1cb8   :  { %v4607_v2 = vpop.permute.xlu0 %4606 }
0x1d00   :  { %v4285_v55 = vpop.xlane.xlu1 %4284 }
0x1d01   :  { %15152 = vrcp.f32 %v4285_v55 }
0x1d04   :  { %v4288_v56 = vpop.xlane.xlu1 %4287 }
0x1d05   :  { %15154 = vrcp.f32 %v4288_v56 }
0x1d08   :  { %v4370_v15 = vpop.permute.xlu1 %4369 }
0x1d09   :  { %14144 = vmatpush3.msra.mxu0 %v4370_v15  ;;  %v990_v15 = vld [vmem:[%s18535_s10] sm:$0xff] }
0x1d0a   :  { %14153 = vmatprep.subr.mxu0 %v16563_v19 }
0x1d0b   :  { %v15153_v57 = vpop.eup %15152 }
0x1d0c   :  { %v4290_v58 = vmul.f32 %v15153_v57, %v15149_v46  ;;  %v992_v57 = vld [vmem:[%s18535_s10 + $0x10] sm:$0xff] }
0x1d0e   :  { %14141 = vmatmul.mubr.msk.f32.vlgmr.msra.gmra.mrb[26].mxu1 %vm1118_vm2, %v4290_v58 }
0x1d0f   :  { %v15155_v59 = vpop.eup %15154  ;;  %14149 = vmatpush3.msra.mxu1 %v1012_v52 }
0x1d10   :  { %v4292_v60 = vmul.f32 %v15155_v59, %v15151_v48  ;;  %14158 = vmatprep.subr.mxu1 %v16563_v19  ;;  %v993_v59 = vld [vmem:[%s18535_s10 + $0x18] sm:$0xff] }
0x1d12   :  { %14146 = vmatmul.mubr.msk.f32.vlgmr.msra.gmra.mrb[42].mxu0 %vm1118_vm2, %v4292_v60  ;;  %v901_v60 = vld [vmem:[%s18536_s16] sm:$0xff] }
0x1d13   :  { %14154 = vmatpush3.xpose.msk.msra.mxu0 %vm1118_vm2, %v4531_v14  ;;  %14155 = vmatprep.mubr.msk.f32.mxu0 %vm16564_vm3, %v16563_v19  ;;  %v991_v14 = vld [vmem:[%s18535_s10 + $0x8] sm:$0xff] }
0x1d14   :  { %14163 = vmatprep.subr.mxu0 %v16563_v19  ;;  %v14789_v58 = vpack.c.bf16 %v991_v14, %v990_v15 }
0x1d16   :  { %14156 = vmatmul.mubr.msk.f32.vlgmr.msra.gmra.mrb[44].mxu0 %vm1118_vm2, %v4529_v61  ;;  %v902_v61 = vld [vmem:[%s18536_s16 + $0x8] sm:$0xff] }
0x1d17   :  { %14165 = vmatprep.mubr.msk.f32.mxu0 %vm16564_vm3, %v16563_v19 }
0x1de1   :  { %v4365_v62 = vpop.f32.mrb[26].mxu1 }
0x1de2   :  { %v14142_v63 = vpop.f32.mrb[27].mxu1  ;;  %14150 = vmatprep.mubr.msk.f32.mxu1 %vm1118_vm2, %v4365_v62  ;;  %v14813_v62 = vpack.c.bf16 %v902_v61, %v901_v60 }
0x1de3   :  { %v995_v63 = vld [vmem:[%s18537_s29] sm:$0xff] }
0x1de5   :  { %v4441_v0 = vpop.f32.mrb[42].mxu0 }
0x1de6   :  { %v14147_v1 = vpop.f32.mrb[43].mxu0  ;;  %14151 = vmatmul.mubr.msk.f32.vlgmr.msra.gmra.mrb[24].mxu1 %vm1118_vm2, %v4441_v0  ;;  %v996_v0 = vld [vmem:[%s18537_s29 + $0x8] sm:$0xff] }
0x1de7   :  { %14159 = vmatpush3.xpose.msk.msra.mxu1 %vm1118_vm2, %v4609_v54  ;;  %14160 = vmatprep.mubr.msk.f32.mxu1 %vm16564_vm3, %v16563_v19  ;;  %v14793_v54 = vpack.c.bf16 %v993_v59, %v992_v57  ;;  %v997_v1 = vld [vmem:[%s18537_s29 + $0x10] sm:$0xff] }
0x1de8   :  { %14168 = vmatprep.subr.mxu1 %v16563_v19 }
0x1de9   :  { %v4602_v3 = vpop.f32.mrb[44].mxu0 }
0x1dea   :  { %v14157_v4 = vpop.f32.mrb[45].mxu0  ;;  %14161 = vmatmul.mubr.msk.f32.vlgmr.msra.gmra.mrb[28].mxu1 %vm1118_vm2, %v4607_v2  ;;  %v4684_v5 = vsel %vm1118_vm2, %v4602_v3, -inf  ;;  %v14797_v2 = vpack.c.bf16 %v996_v0, %v995_v63 }
0x1deb   :  { %4685 = vmax.xlane.f32.xlu1 %v4684_v5  ;;  %14170 = vmatprep.mubr.msk.f32.mxu1 %vm16564_vm3, %v16563_v19  ;;  %v999_v5 = vld [vmem:[%s18537_s29 + $0x20] sm:$0xff] }
0x1e78   :  { %v4686_v6 = vpop.xlane.xlu1 %4685 }
0x1e79   :  { %v4690_v7 = vsub.f32 %v4602_v3, %v4686_v6  ;;  %v998_v3 = vld [vmem:[%s18537_s29 + $0x18] sm:$0xff]  ;;  %v1000_v6 = vld [vmem:[%s18537_s29 + $0x28] sm:$0xff] }
0x1e7a   :  { %v14801_v4 = vpack.c.bf16 %v998_v3, %v997_v1 }
0x1e7b   :  { %v4692_v8 = vmul.f32 1.442695, %v4690_v7  ;;  %v14805_v7 = vpack.c.bf16 %v1000_v6, %v999_v5 }
0x1e7d   :  { %15156 = vpow2.f32 %v4692_v8 }
0x1e87   :  { %v15157_v12 = vpop.eup %15156 }
0x1e88   :  { %v4696_v17 = vsel %vm1118_vm2, %v15157_v12, 0.0 }
0x1ebd   :  { %v4680_v9 = vpop.f32.mrb[28].mxu1 }
0x1ebe   :  { %v14162_v10 = vpop.f32.mrb[29].mxu1  ;;  %v4687_v11 = vsel %vm1118_vm2, %v4680_v9, -inf }
0x1ebf   :  { %4688 = vmax.xlane.f32.xlu0 %v4687_v11 }
0x1ec3   :  { %4697 = vadd.xlane.f32.xlu0 %v4696_v17 }
0x1ed9   :  { %4706 = vrot.lane.b32.xlu0 %v17399_v22, %s16575_s20 }
0x1f4c   :  { %v4689_v18 = vpop.xlane.xlu0 %4688 }
0x1f4d   :  { %v4691_v21 = vsub.f32 %v4680_v9, %v4689_v18 }
0x1f4f   :  { %v4694_v27 = vmul.f32 1.442695, %v4691_v21  ;;  %v13334_v21 = vld [vmem:[#allocation70] ss:$0 sm:$0xff] }
0x1f50   :  { %v4698_v28 = vpop.xlane.xlu0 %4697 }
0x1f51   :  { %15158 = vpow2.f32 %v4694_v27 }
0x1f52   :  { %15160 = vrcp.f32 %v4698_v28 }
0x1f54   :  { %v4707_v29 = vpop.permute.xlu0 %4706 }
0x1f55   :  { %14164 = vmatpush3.msra.mxu0 %v4707_v29 }
0x1f56   :  { %14790 = vmatprep.subr.bf16.mxu0 %v14789_v58 }
0x1f5b   :  { %v15159_v30 = vpop.eup %15158 }
0x1f5c   :  { %v15161_v31 = vpop.eup %15160  ;;  %v4699_v32 = vsel %vm1118_vm2, %v15159_v30, 0.0 }
0x1f5d   :  { %4700 = vadd.xlane.f32.xlu1 %v4699_v32  ;;  %v4703_v33 = vmul.f32 %v15161_v31, %v15157_v12 }
0x1f5f   :  { %14166 = vmatmul.mubr.msk.f32.vlgmr.msra.gmra.mrb[46].mxu0 %vm1118_vm2, %v4703_v33  ;;  %v903_v33 = vld [vmem:[%s18536_s16 + $0x10] sm:$0xff] }
0x1f60   :  { %14792 = vmatpush3.bf16.msra.mxu0 %v14789_v58 }
0x1f61   :  { %14794 = vmatprep.subr.bf16.mxu0 %v14793_v54 }
0x1f64   :  { %14796 = vmatpush3.bf16.msra.mxu0 %v14793_v54 }
0x1f65   :  { %14814 = vmatprep.subr.bf16.mxu0 %v14813_v62 }
0x1f6e   :  { %4782 = vrot.lane.b32.xlu1 %v17397_v20, %s16575_s20  ;;  %v13333_v20 = vld [vmem:[%s18534_s2] ss:$0 sm:$0xff] }
0x1fea   :  { %v4701_v22 = vpop.xlane.xlu1 %4700 }
0x1feb   :  { %15162 = vrcp.f32 %v4701_v22  ;;  %v904_v22 = vld [vmem:[%s18536_s16 + $0x18] sm:$0xff] }
0x1fee   :  { %v4783_v34 = vpop.permute.xlu1 %4782 }
0x1fef   :  { %14169 = vmatpush3.msra.mxu1 %v4783_v34 }
0x1ff0   :  { %14173 = vmatprep.subr.mxu1 %v1013_v23 }
0x1ff5   :  { %v15163_v35 = vpop.eup %15162 }
0x1ff6   :  { %v4705_v36 = vmul.f32 %v15163_v35, %v15159_v30  ;;  %v13335_v30 = vld [vmem:[#allocation71] ss:$0 sm:$0xff] }
0x1ff8   :  { %14171 = vmatmul.mubr.msk.f32.vlgmr.msra.gmra.mrb[30].mxu1 %vm1118_vm2, %v4705_v36  ;;  %v14817_v36 = vpack.c.bf16 %v904_v22, %v903_v33 }
0x1ff9   :  { %14174 = vmatpush3.msra.mxu1 %v1013_v23  ;;  %v13249_v23 = vld [vmem:[#allocation53] ss:$0 sm:$0xff] }
0x1ffa   :  { %14798 = vmatprep.subr.bf16.mxu1 %v14797_v2 }
0x2032   :  { %v4778_v37 = vpop.f32.mrb[46].mxu0 }
0x2033   :  { %v14167_v38 = vpop.f32.mrb[47].mxu0  ;;  %14175 = vmatprep.mubr.msk.f32.mxu1 %vm1118_vm2, %v4778_v37  ;;  %v17573_v37 = vadd.f32 %v13249_v23, %v17216_v26  ;;  %v1001_v26 = vld [vmem:[%s18537_s29 + $0x30] sm:$0xff] }
0x2034   :  { %v17582_v38 = vadd.f32 %v17214_v25, %v13249_v23 }
0x20cb   :  { %v4854_v39 = vpop.f32.mrb[30].mxu1 }
0x20cc   :  { %v14172_v40 = vpop.f32.mrb[31].mxu1  ;;  %14176 = vmatmul.mubr.msk.f32.vlgmr.msra.gmra.mrb[24].mxu1 %vm1118_vm2, %v4854_v39  ;;  %v1002_v39 = vld [vmem:[%s18537_s29 + $0x38] sm:$0xff] }
0x20cd   :  { %14800 = vmatpush3.bf16.msra.mxu1 %v14797_v2  ;;  %v14809_v40 = vpack.c.bf16 %v1002_v39, %v1001_v26 }
0x20ce   :  { %14802 = vmatprep.subr.bf16.mxu1 %v14801_v4 }
0x20d1   :  { %14804 = vmatpush3.bf16.msra.mxu1 %v14801_v4 }
0x20d2   :  { %14806 = vmatprep.subr.bf16.mxu1 %v14805_v7 }
0x20d5   :  { %14808 = vmatpush3.bf16.msra.mxu1 %v14805_v7 }
0x20d6   :  { %14810 = vmatprep.subr.bf16.mxu1 %v14809_v40 }
0x20d9   :  { %14812 = vmatpush3.bf16.msra.mxu1 %v14809_v40 }
0x20da   :  { %14229 = vmatprep.subr.mxu1 %v16563_v19 }
0x219f   :  { %v14177_v41 = vpop.f32.mrb[24].mxu1 }
0x21a0   :  { %v4948_v24 = vadd.f32 %v14177_v41, %v13333_v20  ;;  %v4930_v42 = vpop.f32.mrb[25].mxu1 }
0x21a1   :  { %v4947_v43 = vadd.f32 %v13333_v20, %v4930_v42  ;;  %v13336_v20 = vld [vmem:[#allocation67] ss:$0 sm:$0xff] }
0x21a2   :  { %v4950_v44 = vadd.f32 %v4948_v24, %v17388_v16 }
0x21a3   :  { %v4949_v45 = vadd.f32 %v4947_v43, %v17386_v13 }
0x21a4   :  { %v4954_v46 = vsel %vm1206_vm1, %v4950_v44, 0.0 }
0x21a5   :  { %4955 = vadd.xlane.f32.xlu0 %v4954_v46  ;;  %v4951_v47 = vsel %vm1206_vm1, %v4949_v45, 0.0 }
0x21a6   :  { %4952 = vadd.xlane.f32.xlu1 %v4951_v47 }
0x2232   :  { %v4956_v48 = vpop.xlane.xlu0 %4955 }
0x2233   :  { %v4958_v49 = vmul.f32 0.03125, %v4956_v48  ;;  %v4953_v50 = vpop.xlane.xlu1 %4952 }
0x2234   :  { %v4957_v51 = vmul.f32 0.03125, %v4953_v50 }
0x2235   :  { %v4960_v52 = vsub.f32 %v4950_v44, %v4958_v49 }
0x2236   :  { %v4959_v53 = vsub.f32 %v4949_v45, %v4957_v51  ;;  %v13346_v45 = vld [vmem:[#allocation23] ss:$0 sm:$0xff] }
0x2237   :  { %v4962_v55 = vmul.f32 %v4960_v52, %v4960_v52 }
0x2238   :  { %v4961_v16 = vmul.f32 %v4959_v53, %v4959_v53 }
0x2239   :  { %v4966_v13 = vsel %vm1206_vm1, %v4962_v55, 0.0 }
0x223a   :  { %4967 = vadd.xlane.f32.xlu1 %v4966_v13  ;;  %v4963_v56 = vsel %vm1206_vm1, %v4961_v16, 0.0 }
0x223b   :  { %4964 = vadd.xlane.f32.xlu0 %v4963_v56 }
0x22c7   :  { %v4968_v8 = vpop.xlane.xlu1 %4967 }
0x22c8   :  { %v4970_v9 = vmul.f32 0.03125, %v4968_v8  ;;  %v4965_v10 = vpop.xlane.xlu0 %4964 }
0x22c9   :  { %v4969_v11 = vmul.f32 0.03125, %v4965_v10 }
0x22ca   :  { %v4972_v12 = vadd.f32 1e-05, %v4970_v9 }
0x22cb   :  { %v4971_v17 = vadd.f32 1e-05, %v4969_v11 }
0x22cc   :  { %15164 = vrsqrt.f32 %v4972_v12 }
0x22cd   :  { %15166 = vrsqrt.f32 %v4971_v17 }
0x22d6   :  { %v15165_v18 = vpop.eup %15164 }
0x22d7   :  { %v15167_v27 = vpop.eup %15166  ;;  %v4976_v28 = vmul.f32 %v15165_v18, %v4960_v52  ;;  %v17616_v52 = vld [vmem:[#allocation68] ss:$0 sm:$0xff] }
0x22d8   :  { %v4975_v29 = vmul.f32 %v15167_v27, %v4959_v53 }
0x22d9   :  { %v4984_v31 = vmul.f32 %v13334_v21, %v4976_v28 }
0x22da   :  { %v4983_v32 = vmul.f32 %v13334_v21, %v4975_v29 }
0x22db   :  { %v17570_v35 = vadd.f32 %v13335_v30, %v4984_v31 }
0x22dc   :  { %v17568_v34 = vadd.f32 %v13335_v30, %v4983_v32 }
0x22de   :  { %14186 = vmatprep.mubr.msk.f32.mxu0 %vm1206_vm1, %v17568_v34 }
0x22df   :  { %14187 = vmatmul.mubr.msk.f32.vlgmr.msra.gmra.mrb[48].mxu0 %vm1206_vm1, %v17570_v35 }
0x22e0   :  { %14816 = vmatpush3.bf16.msra.mxu0 %v14813_v62  ;;  %14216 = vmatprep.mubr.msk.f32.mxu0 %vm1206_vm1, %v17573_v37 }
0x22e1   :  { %14818 = vmatprep.subr.bf16.mxu0 %v14817_v36 }
0x22e4   :  { %14820 = vmatpush3.bf16.msra.mxu0 %v14817_v36 }
0x22e5   :  { %14219 = vmatprep.subr.mxu0 %v16563_v19 }
0x22e7   :  { %14217 = vmatmul.mubr.msk.f32.vlgmr.msra.gmra.mrb[50].mxu0 %vm1206_vm1, %v17582_v38 }
0x22e8   :  { %14221 = vmatprep.mubr.msk.f32.mxu0 %vm16564_vm3, %v16563_v19 }
0x23b2   :  { %v14188_v41 = vpop.f32.mrb[48].mxu0 }
0x23b3   :  { %v5077_v24 = vadd.f32 %v14188_v41, %v13336_v20  ;;  %v5071_v25 = vpop.f32.mrb[49].mxu0 }
0x23b4   :  { %v5072_v42 = vadd.f32 %v13336_v20, %v5071_v25 }
0x23b5   :  { %v5081_v44 = vmax.f32 %v5077_v24, 0.0 }
0x23b6   :  { %v5080_v43 = vmax.f32 %v5072_v42, 0.0 }
0x23b8   :  { %14205 = vmatprep.mubr.msk.f32.mxu1 %vm3082_vm4, %v5080_v43 }
0x23b9   :  { %14206 = vmatmul.mubr.msk.f32.vlgmr.msra.gmra.mrb[32].mxu1 %vm3082_vm4, %v5081_v44 }
0x23ba   :  { %v14218_v46 = vpop.f32.mrb[50].mxu0  ;;  %14231 = vmatprep.mubr.msk.f32.mxu1 %vm16564_vm3, %v16563_v19 }
0x23bb   :  { %v17596_v47 = vadd.f32 %v14218_v46, %v13346_v45  ;;  %v5333_v48 = vpop.f32.mrb[51].mxu0 }
0x23bc   :  { %v17598_v49 = vadd.f32 %v13346_v45, %v5333_v48 }
0x23bd   :  { %5420 = vrot.lane.b32.xlu1 %v17596_v47, %s16565_s8 }
0x23be   :  { %5343 = vrot.lane.b32.xlu0 %v17598_v49, %s16565_s8 }
0x242f   :  { %v5421_v51 = vpop.permute.xlu1 %5420 }
0x2430   :  { %v5344_v50 = vpop.permute.xlu0 %5343 }
0x2431   :  { %14220 = vmatpush3.xpose.msk.msra.mxu0 %vm1118_vm2, %v5344_v50 }
0x2432   :  { %14224 = vmatprep.subr.mxu0 %v16563_v19 }
0x2434   :  { %14222 = vmatmul.mubr.msk.f32.vlgmr.msra.gmra.mrb[52].mxu0 %vm1118_vm2, %v17598_v49 }
0x2435   :  { %14225 = vmatpush3.xpose.msk.msra.mxu0 %vm1118_vm2, %v5421_v51  ;;  %14226 = vmatprep.mubr.msk.f32.mxu0 %vm16564_vm3, %v16563_v19 }
0x2436   :  { %14234 = vmatprep.subr.mxu0 %v16563_v19 }
0x2438   :  { %14227 = vmatmul.mubr.msk.f32.vlgmr.msra.gmra.mrb[54].mxu0 %vm1118_vm2, %v17596_v47 }
0x2439   :  { %14236 = vmatprep.mubr.msk.f32.mxu0 %vm16564_vm3, %v16563_v19 }
0x248c   :  { %v17618_v53 = vpop.f32.mrb[32].mxu1 }
0x248d   :  { %v5160_v55 = vpop.f32.mrb[33].mxu1 }
0x248e   :  { %v17621_v16 = vadd.f32 %v17616_v52, %v5160_v55 }
0x2507   :  { %v5415_v13 = vpop.f32.mrb[52].mxu0 }
0x2508   :  { %v14223_v56 = vpop.f32.mrb[53].mxu0  ;;  %v5496_v62 = vsel %vm1118_vm2, %v5415_v13, -inf }
0x250b   :  { %v5492_v15 = vpop.f32.mrb[54].mxu0 }
0x250c   :  { %v14228_v14 = vpop.f32.mrb[55].mxu0  ;;  %v5499_v57 = vsel %vm1118_vm2, %v5492_v15, -inf }
0x250d   :  { %5500 = vmax.xlane.f32.xlu1 %v5499_v57 }
0x251e   :  { %5750 = vrot.lane.b32.xlu1 %v17596_v47, %s16568_s26 }
0x2522   :  { %5748 = vrot.lane.b32.xlu1 %v17596_v47, %s16567_s23 }
0x259a   :  { %v5501_v58 = vpop.xlane.xlu1 %5500 }
0x259b   :  { %v5503_v59 = vsub.f32 %v5492_v15, %v5501_v58 }
0x259d   :  { %v5506_v54 = vmul.f32 1.442695, %v5503_v59 }
0x259e   :  { %v5751_v2 = vpop.permute.xlu1 %5750 }
0x259f   :  { %15168 = vpow2.f32 %v5506_v54 }
0x25a2   :  { %v5749_v4 = vpop.permute.xlu1 %5748 }
0x25a9   :  { %v15169_v60 = vpop.eup %15168 }
0x25aa   :  { %v5511_v61 = vsel %vm1118_vm2, %v15169_v60, 0.0 }
0x25ab   :  { %5512 = vadd.xlane.f32.xlu0 %v5511_v61 }
0x25c1   :  { %5594 = vrot.lane.b32.xlu0 %v17596_v47, %s16566_s9 }
0x25e0   :  { %5497 = vmax.xlane.f32.xlu0 %v5496_v62 }
0x25f6   :  { %5518 = vrot.lane.b32.xlu0 %v17598_v49, %s16566_s9 }
0x25fa   :  { %5670 = vrot.lane.b32.xlu0 %v17598_v49, %s16567_s23 }
0x2638   :  { %v5513_v63 = vpop.xlane.xlu0 %5512 }
0x2639   :  { %15170 = vrcp.f32 %v5513_v63 }
0x263c   :  { %v5595_v0 = vpop.permute.xlu0 %5594 }
0x263d   :  { %14235 = vmatpush3.msra.mxu0 %v5595_v0 }
0x263e   :  { %14244 = vmatprep.subr.mxu0 %v16563_v19 }
0x2643   :  { %v15171_v1 = vpop.eup %15170 }
0x2644   :  { %v5517_v3 = vmul.f32 %v15171_v1, %v15169_v60 }
0x2646   :  { %14237 = vmatmul.mubr.msk.f32.vlgmr.msra.gmra.mrb[56].mxu0 %vm1118_vm2, %v5517_v3  ;;  %v897_v3 = vld [vmem:[%s18538_s4] sm:$0xff] }
0x2647   :  { %14245 = vmatpush3.xpose.msk.msra.mxu0 %vm1118_vm2, %v5751_v2  ;;  %14246 = vmatprep.mubr.msk.f32.mxu0 %vm16564_vm3, %v16563_v19  ;;  %v898_v2 = vld [vmem:[%s18538_s4 + $0x8] sm:$0xff] }
0x2648   :  { %14254 = vmatprep.subr.mxu0 %v16563_v19 }
0x264a   :  { %14247 = vmatmul.mubr.msk.f32.vlgmr.msra.gmra.mrb[58].mxu0 %vm1118_vm2, %v5749_v4 }
0x264b   :  { %14256 = vmatprep.mubr.msk.f32.mxu0 %vm16564_vm3, %v16563_v19 }
0x266d   :  { %v5498_v5 = vpop.xlane.xlu0 %5497 }
0x266e   :  { %v5502_v6 = vsub.f32 %v5415_v13, %v5498_v5 }
0x2670   :  { %v5504_v7 = vmul.f32 1.442695, %v5502_v6 }
0x2671   :  { %v5519_v8 = vpop.permute.xlu0 %5518 }
0x2672   :  { %15172 = vpow2.f32 %v5504_v7  ;;  %14230 = vmatpush3.msra.mxu1 %v5519_v8 }
0x2673   :  { %14239 = vmatprep.subr.mxu1 %v16563_v19 }
0x2675   :  { %v5671_v28 = vpop.permute.xlu0 %5670 }
0x267c   :  { %v15173_v9 = vpop.eup %15172 }
0x267d   :  { %v5508_v10 = vsel %vm1118_vm2, %v15173_v9, 0.0 }
0x267e   :  { %5509 = vadd.xlane.f32.xlu1 %v5508_v10 }
0x268f   :  { %5672 = vrot.lane.b32.xlu1 %v17598_v49, %s16568_s26 }
0x270b   :  { %v5510_v11 = vpop.xlane.xlu1 %5509 }
0x270c   :  { %15174 = vrcp.f32 %v5510_v11 }
0x270f   :  { %v5673_v18 = vpop.permute.xlu1 %5672 }
0x2716   :  { %v15175_v12 = vpop.eup %15174 }
0x2717   :  { %v5515_v17 = vmul.f32 %v15175_v12, %v15173_v9 }
0x2719   :  { %14232 = vmatmul.mubr.msk.f32.vlgmr.msra.gmra.mrb[34].mxu1 %vm1118_vm2, %v5515_v17  ;;  %v17650_v21 = vpop.f32.mrb[56].mxu0 }
0x271a   :  { %14240 = vmatpush3.xpose.msk.msra.mxu1 %vm1118_vm2, %v5673_v18  ;;  %v14238_v27 = vpop.f32.mrb[57].mxu0  ;;  %14241 = vmatprep.mubr.msk.f32.mxu1 %vm16564_vm3, %v16563_v19 }
0x271b   :  { %14249 = vmatprep.subr.mxu1 %v16563_v19 }
0x271d   :  { %14242 = vmatmul.mubr.msk.f32.vlgmr.msra.gmra.mrb[36].mxu1 %vm1118_vm2, %v5671_v28  ;;  %v5822_v29 = vpop.f32.mrb[58].mxu0  ;;  %v899_v28 = vld [vmem:[%s18538_s4 + $0x10] sm:$0xff] }
0x271e   :  { %v14248_v30 = vpop.f32.mrb[59].mxu0  ;;  %v5829_v31 = vsel %vm1118_vm2, %v5822_v29, -inf  ;;  %14251 = vmatprep.mubr.msk.f32.mxu1 %vm16564_vm3, %v16563_v19 }
0x271f   :  { %5830 = vmax.xlane.f32.xlu1 %v5829_v31 }
0x2730   :  { %6164 = vrot.lane.b32.xlu1 %v17598_v49, %s16569_s12 }
0x2734   :  { %6162 = vrot.lane.b32.xlu1 %v17598_v49, %s16571_s0 }
0x2738   :  { %6240 = vrot.lane.b32.xlu1 %v17596_v47, %s16571_s0 }
0x27ac   :  { %v5831_v32 = vpop.xlane.xlu1 %5830 }
0x27ad   :  { %v5833_v33 = vsub.f32 %v5822_v29, %v5831_v32 }
0x27af   :  { %v5836_v22 = vmul.f32 1.442695, %v5833_v33 }
0x27b0   :  { %v6165_v42 = vpop.permute.xlu1 %6164 }
0x27b1   :  { %15176 = vpow2.f32 %v5836_v22 }
0x27b4   :  { %v6163_v45 = vpop.permute.xlu1 %6162 }
0x27b8   :  { %v6241_v48 = vpop.permute.xlu1 %6240 }
0x27bb   :  { %v15177_v23 = vpop.eup %15176 }
0x27bc   :  { %v5841_v36 = vsel %vm1118_vm2, %v15177_v23, 0.0 }
0x27bd   :  { %5842 = vadd.xlane.f32.xlu0 %v5841_v36 }
0x27d3   :  { %5924 = vrot.lane.b32.xlu0 %v17596_v47, %s16570_s6 }
0x27d7   :  { %6242 = vrot.lane.b32.xlu0 %v17596_v47, %s16569_s12 }
0x27ec   :  { %v17671_v26 = vpop.f32.mrb[34].mxu1 }
0x27ed   :  { %v14233_v39 = vpop.f32.mrb[35].mxu1 }
0x27f0   :  { %v5744_v40 = vpop.f32.mrb[36].mxu1 }
0x27f1   :  { %v14243_v20 = vpop.f32.mrb[37].mxu1  ;;  %v5826_v41 = vsel %vm1118_vm2, %v5744_v40, -inf }
0x27f6   :  { %5827 = vmax.xlane.f32.xlu0 %v5826_v41 }
0x280c   :  { %5848 = vrot.lane.b32.xlu0 %v17598_v49, %s16570_s6 }
0x2810   :  { %6340 = vrot.lane.b32.xlu0 %v17598_v49, %s16572_s25 }
0x2814   :  { %6577 = vrot.lane.b32.xlu0 %v17598_v49, %s16573_s28 }
0x2818   :  { %6655 = vrot.lane.b32.xlu0 %v17596_v47, %s16573_s28 }
0x281c   :  { %6575 = vrot.lane.b32.xlu0 %v17598_v49, %s16574_s30 }
0x2820   :  { %6653 = vrot.lane.b32.xlu0 %v17596_v47, %s16574_s30 }
0x284a   :  { %v5843_v24 = vpop.xlane.xlu0 %5842 }
0x284b   :  { %15178 = vrcp.f32 %v5843_v24 }
0x284e   :  { %v5925_v25 = vpop.permute.xlu0 %5924 }
0x284f   :  { %14255 = vmatpush3.msra.mxu0 %v5925_v25 }
0x2850   :  { %14269 = vmatprep.subr.mxu0 %v16563_v19 }
0x2852   :  { %v6243_v46 = vpop.permute.xlu0 %6242 }
0x2855   :  { %v15179_v43 = vpop.eup %15178 }
0x2856   :  { %v5847_v44 = vmul.f32 %v15179_v43, %v15177_v23 }
0x2858   :  { %14257 = vmatmul.mubr.msk.f32.vlgmr.msra.gmra.mrb[60].mxu0 %vm1118_vm2, %v5847_v44 }
0x2859   :  { %14270 = vmatpush3.xpose.msk.msra.mxu0 %vm1118_vm2, %v6165_v42  ;;  %14271 = vmatprep.mubr.msk.f32.mxu0 %vm16564_vm3, %v16563_v19 }
0x285a   :  { %14274 = vmatprep.subr.mxu0 %v16563_v19 }
0x285c   :  { %14272 = vmatmul.mubr.msk.f32.vlgmr.msra.gmra.mrb[62].mxu0 %vm1118_vm2, %v6163_v45 }
0x285d   :  { %14275 = vmatpush3.xpose.msk.msra.mxu0 %vm1118_vm2, %v6243_v46  ;;  %14276 = vmatprep.mubr.msk.f32.mxu0 %vm16564_vm3, %v16563_v19 }
0x285e   :  { %14284 = vmatprep.subr.mxu0 %v16563_v19 }
0x2860   :  { %14277 = vmatmul.mubr.msk.f32.vlgmr.msra.gmra.mrb[64].mxu0 %vm1118_vm2, %v6241_v48 }
0x2861   :  { %14286 = vmatprep.mubr.msk.f32.mxu0 %vm16564_vm3, %v16563_v19 }
0x2883   :  { %v5828_v50 = vpop.xlane.xlu0 %5827 }
0x2884   :  { %v5832_v51 = vsub.f32 %v5744_v40, %v5828_v50 }
0x2886   :  { %v5834_v55 = vmul.f32 1.442695, %v5832_v51 }
0x2887   :  { %v5849_v13 = vpop.permute.xlu0 %5848 }
0x2888   :  { %15180 = vpow2.f32 %v5834_v55  ;;  %14250 = vmatpush3.msra.mxu1 %v5849_v13 }
0x2889   :  { %14259 = vmatprep.subr.mxu1 %v898_v2 }
0x288b   :  { %v6341_v29 = vpop.permute.xlu0 %6340 }
0x288f   :  { %v6578_v33 = vpop.permute.xlu0 %6577 }
0x2892   :  { %v15181_v56 = vpop.eup %15180 }
0x2893   :  { %v5838_v15 = vsel %vm1118_vm2, %v15181_v56, 0.0 }
0x2894   :  { %5839 = vadd.xlane.f32.xlu1 %v5838_v15  ;;  %v5166_v15 = vadd.f32 %v17618_v53, %v17616_v52  ;;  %v5169_v53 = vadd.f32 %v17621_v16, %v17568_v34 }
0x2921   :  { %v5840_v14 = vpop.xlane.xlu1 %5839 }
0x2922   :  { %15182 = vrcp.f32 %v5840_v14  ;;  %v5170_v14 = vadd.f32 %v5166_v15, %v17570_v35 }
0x292b   :  { %v5996_v57 = vpop.f32.mrb[60].mxu0 }
0x292c   :  { %v15183_v58 = vpop.eup %15182  ;;  %v14258_v59 = vpop.f32.mrb[61].mxu0 }
0x292d   :  { %v5845_v54 = vmul.f32 %v15183_v58, %v15181_v56 }
0x292f   :  { %14252 = vmatmul.mubr.msk.f32.vlgmr.msra.gmra.mrb[38].mxu1 %vm1118_vm2, %v5845_v54  ;;  %v6236_v60 = vpop.f32.mrb[62].mxu0 }
0x2930   :  { %v14273_v61 = vpop.f32.mrb[63].mxu0  ;;  %v6318_v62 = vsel %vm1118_vm2, %v6236_v60, -inf  ;;  %14260 = vmatpush3.msra.mxu1 %v898_v2  ;;  %v5171_v2 = vsel %vm1206_vm1, %v5169_v53, 0.0 }
0x2931   :  { %6319 = vmax.xlane.f32.xlu1 %v6318_v62  ;;  %14264 = vmatprep.subr.mxu1 %v897_v3 }
0x2933   :  { %v6314_v63 = vpop.f32.mrb[64].mxu0 }
0x2934   :  { %v14278_v0 = vpop.f32.mrb[65].mxu0  ;;  %v6321_v1 = vsel %vm1118_vm2, %v6314_v63, -inf }
0x2935   :  { %6322 = vmax.xlane.f32.xlu1 %v6321_v1 }
0x29be   :  { %v6320_v4 = vpop.xlane.xlu1 %6319 }
0x29bf   :  { %v6324_v5 = vsub.f32 %v6236_v60, %v6320_v4 }
0x29c1   :  { %v6326_v6 = vmul.f32 1.442695, %v6324_v5 }
0x29c2   :  { %v6323_v7 = vpop.xlane.xlu1 %6322 }
0x29c3   :  { %15184 = vpow2.f32 %v6326_v6  ;;  %v6325_v8 = vsub.f32 %v6314_v63, %v6323_v7 }
0x29c5   :  { %v6328_v9 = vmul.f32 1.442695, %v6325_v8 }
0x29c7   :  { %15186 = vpow2.f32 %v6328_v9 }
0x29cd   :  { %v15185_v10 = vpop.eup %15184 }
0x29ce   :  { %v6330_v11 = vsel %vm1118_vm2, %v15185_v10, 0.0 }
0x29cf   :  { %6331 = vadd.xlane.f32.xlu1 %v6330_v11 }
0x29d1   :  { %v15187_v12 = vpop.eup %15186 }
0x29d2   :  { %v6333_v17 = vsel %vm1118_vm2, %v15187_v12, 0.0 }
0x29d3   :  { %6334 = vadd.xlane.f32.xlu1 %v6333_v17 }
0x29e4   :  { %6416 = vrot.lane.b32.xlu1 %v17596_v47, %s16572_s25 }
0x2a02   :  { %v5920_v18 = vpop.f32.mrb[38].mxu1 }
0x2a03   :  { %v14253_v27 = vpop.f32.mrb[39].mxu1  ;;  %14261 = vmatprep.mubr.msk.f32.mxu1 %vm1118_vm2, %v5920_v18 }
0x2a04   :  { %14262 = vmatmul.mubr.msk.f32.vlgmr.msra.gmra.mrb[40].mxu1 %vm1118_vm2, %v5996_v57  ;;  %v5174_v57 = vsel %vm1206_vm1, %v5170_v14, 0.0 }
0x2a05   :  { %14266 = vmatprep.mubr.msk.f32.mxu1 %vm1118_vm2, %v17671_v26  ;;  %14265 = vmatpush3.msra.mxu1 %v897_v3 }
0x2a06   :  { %14279 = vmatprep.subr.mxu1 %v16563_v19 }
0x2a0c   :  { %14267 = vmatmul.mubr.msk.f32.vlgmr.msra.gmra.mrb[40].mxu1 %vm1118_vm2, %v17650_v21  ;;  %v6656_v21 = vpop.permute.xlu0 %6655 }
0x2a0d   :  { %14280 = vmatpush3.msra.mxu1 %v6341_v29  ;;  %14281 = vmatprep.mubr.msk.f32.mxu1 %vm16564_vm3, %v16563_v19 }
0x2a0e   :  { %14289 = vmatprep.subr.mxu1 %v899_v28 }
0x2a10   :  { %v6576_v39 = vpop.permute.xlu0 %6575 }
0x2a14   :  { %v6654_v25 = vpop.permute.xlu0 %6653 }
0x2a5c   :  { %v6332_v30 = vpop.xlane.xlu1 %6331 }
0x2a5d   :  { %15188 = vrcp.f32 %v6332_v30 }
0x2a60   :  { %v6335_v31 = vpop.xlane.xlu1 %6334 }
0x2a61   :  { %15190 = vrcp.f32 %v6335_v31  ;;  %v13343_v31 = vld [vmem:[%s18540_s18] ss:$0 sm:$0xff] }
0x2a64   :  { %v6417_v32 = vpop.permute.xlu1 %6416 }
0x2a65   :  { %14285 = vmatpush3.msra.mxu0 %v6417_v32 }
0x2a66   :  { %14294 = vmatprep.subr.mxu0 %v16563_v19 }
0x2a67   :  { %v15189_v22 = vpop.eup %15188 }
0x2a68   :  { %v6337_v23 = vmul.f32 %v15189_v22, %v15185_v10 }
0x2a6a   :  { %14282 = vmatmul.mubr.msk.f32.vlgmr.msra.gmra.mrb[42].mxu1 %vm1118_vm2, %v6337_v23  ;;  %v900_v23 = vld [vmem:[%s18538_s4 + $0x18] sm:$0xff] }
0x2a6b   :  { %v15191_v36 = vpop.eup %15190  ;;  %14290 = vmatpush3.msra.mxu1 %v899_v28  ;;  %v13342_v28 = vld [vmem:[%s18539_s24] ss:$0 sm:$0xff] }
0x2a6c   :  { %v6339_v26 = vmul.f32 %v15191_v36, %v15187_v12  ;;  %14299 = vmatprep.subr.mxu1 %v16563_v19 }
0x2a6e   :  { %14287 = vmatmul.mubr.msk.f32.vlgmr.msra.gmra.mrb[66].mxu0 %vm1118_vm2, %v6339_v26 }
0x2a6f   :  { %14295 = vmatpush3.xpose.msk.msra.mxu0 %vm1118_vm2, %v6578_v33  ;;  %14296 = vmatprep.mubr.msk.f32.mxu0 %vm16564_vm3, %v16563_v19 }
0x2a70   :  { %14304 = vmatprep.subr.mxu0 %v16563_v19 }
0x2a72   :  { %14297 = vmatmul.mubr.msk.f32.vlgmr.msra.gmra.mrb[68].mxu0 %vm1118_vm2, %v6576_v39 }
0x2a73   :  { %14306 = vmatprep.mubr.msk.f32.mxu0 %vm16564_vm3, %v16563_v19 }
0x2b3d   :  { %v6412_v40 = vpop.f32.mrb[42].mxu1 }
0x2b3e   :  { %v14283_v20 = vpop.f32.mrb[43].mxu1  ;;  %14291 = vmatprep.mubr.msk.f32.mxu1 %vm1118_vm2, %v6412_v40 }
0x2b41   :  { %v6488_v41 = vpop.f32.mrb[66].mxu0 }
0x2b42   :  { %v14288_v24 = vpop.f32.mrb[67].mxu0  ;;  %14292 = vmatmul.mubr.msk.f32.vlgmr.msra.gmra.mrb[40].mxu1 %vm1118_vm2, %v6488_v41 }
0x2b43   :  { %14300 = vmatpush3.xpose.msk.msra.mxu1 %vm1118_vm2, %v6656_v21  ;;  %14301 = vmatprep.mubr.msk.f32.mxu1 %vm16564_vm3, %v16563_v19 }
0x2b44   :  { %14309 = vmatprep.subr.mxu1 %v16563_v19 }
0x2b45   :  { %v6649_v42 = vpop.f32.mrb[68].mxu0 }
0x2b46   :  { %v14298_v43 = vpop.f32.mrb[69].mxu0  ;;  %14302 = vmatmul.mubr.msk.f32.vlgmr.msra.gmra.mrb[44].mxu1 %vm1118_vm2, %v6654_v25  ;;  %v6731_v44 = vsel %vm1118_vm2, %v6649_v42, -inf }
0x2b47   :  { %6732 = vmax.xlane.f32.xlu1 %v6731_v44  ;;  %14311 = vmatprep.mubr.msk.f32.mxu1 %vm16564_vm3, %v16563_v19 }
0x2bd4   :  { %v6733_v45 = vpop.xlane.xlu1 %6732 }
0x2bd5   :  { %v6737_v46 = vsub.f32 %v6649_v42, %v6733_v45 }
0x2bd7   :  { %v6739_v48 = vmul.f32 1.442695, %v6737_v46 }
0x2bd9   :  { %15192 = vpow2.f32 %v6739_v48  ;;  %v13381_v48 = vld [vmem:[#allocation22] ss:$0 sm:$0xff] }
0x2be3   :  { %v15193_v13 = vpop.eup %15192 }
0x2be4   :  { %v6743_v56 = vsel %vm1118_vm2, %v15193_v13, 0.0 }
0x2c19   :  { %v6727_v50 = vpop.f32.mrb[44].mxu1 }
0x2c1a   :  { %v14303_v51 = vpop.f32.mrb[45].mxu1  ;;  %v6734_v55 = vsel %vm1118_vm2, %v6727_v50, -inf }
0x2c1b   :  { %6735 = vmax.xlane.f32.xlu0 %v6734_v55 }
0x2c1f   :  { %6744 = vadd.xlane.f32.xlu0 %v6743_v56 }
0x2c35   :  { %6753 = vrot.lane.b32.xlu0 %v17598_v49, %s16575_s20 }
0x2c54   :  { %5175 = vadd.xlane.f32.xlu0 %v5174_v57 }
0x2ca8   :  { %v6736_v58 = vpop.xlane.xlu0 %6735 }
0x2ca9   :  { %v6738_v59 = vsub.f32 %v6727_v50, %v6736_v58 }
0x2cab   :  { %v6741_v54 = vmul.f32 1.442695, %v6738_v59 }
0x2cac   :  { %v6745_v60 = vpop.xlane.xlu0 %6744 }
0x2cad   :  { %15194 = vpow2.f32 %v6741_v54 }
0x2cae   :  { %15196 = vrcp.f32 %v6745_v60 }
0x2cb0   :  { %v6754_v61 = vpop.permute.xlu0 %6753 }
0x2cb1   :  { %14305 = vmatpush3.msra.mxu0 %v6754_v61 }
0x2cb7   :  { %v15195_v62 = vpop.eup %15194 }
0x2cb8   :  { %v15197_v63 = vpop.eup %15196  ;;  %v6746_v49 = vsel %vm1118_vm2, %v15195_v62, 0.0 }
0x2cb9   :  { %6747 = vadd.xlane.f32.xlu1 %v6746_v49  ;;  %v6750_v0 = vmul.f32 %v15197_v63, %v15193_v13  ;;  %v863_v63 = vld [vmem:[%s18541_s3] sm:$0xff]  ;;  %v864_v49 = vld [vmem:[%s18541_s3 + $0x8] sm:$0xff] }
0x2cbb   :  { %14307 = vmatmul.mubr.msk.f32.vlgmr.msra.gmra.mrb[70].mxu0 %vm1118_vm2, %v6750_v0  ;;  %v14829_v0 = vpack.c.bf16 %v864_v49, %v863_v63 }
0x2cca   :  { %6829 = vrot.lane.b32.xlu1 %v17596_v47, %s16575_s20 }
0x2ce1   :  { %v5176_v35 = vpop.xlane.xlu0 %5175 }
0x2ce2   :  { %v5178_v52 = vmul.f32 0.03125, %v5176_v35  ;;  %v866_v35 = vld [vmem:[%s18541_s3 + $0x18] sm:$0xff] }
0x2ce4   :  { %v5180_v1 = vsub.f32 %v5170_v14, %v5178_v52 }
0x2ce6   :  { %v5182_v3 = vmul.f32 %v5180_v1, %v5180_v1 }
0x2ce8   :  { %v5186_v4 = vsel %vm1206_vm1, %v5182_v3, 0.0 }
0x2cee   :  { %5172 = vadd.xlane.f32.xlu1 %v5171_v2 }
0x2cf2   :  { %5187 = vadd.xlane.f32.xlu1 %v5186_v4 }
0x2d46   :  { %v6748_v5 = vpop.xlane.xlu1 %6747 }
0x2d47   :  { %15198 = vrcp.f32 %v6748_v5 }
0x2d4a   :  { %v6830_v6 = vpop.permute.xlu1 %6829 }
0x2d4b   :  { %14310 = vmatpush3.msra.mxu1 %v6830_v6 }
0x2d4c   :  { %14314 = vmatprep.subr.mxu1 %v900_v23 }
0x2d51   :  { %v15199_v7 = vpop.eup %15198 }
0x2d52   :  { %v6752_v47 = vmul.f32 %v15199_v7, %v15195_v62 }
0x2d54   :  { %14312 = vmatmul.mubr.msk.f32.vlgmr.msra.gmra.mrb[46].mxu1 %vm1118_vm2, %v6752_v47 }
0x2d55   :  { %14315 = vmatpush3.msra.mxu1 %v900_v23  ;;  %v872_v23 = vld [vmem:[%s18542_s22 + $0x8] sm:$0xff] }
0x2d56   :  { %14830 = vmatprep.subr.bf16.mxu1 %v14829_v0 }
0x2d7b   :  { %v5173_v8 = vpop.xlane.xlu1 %5172 }
0x2d7c   :  { %v5177_v34 = vmul.f32 0.03125, %v5173_v8 }
0x2d7e   :  { %v5179_v16 = vsub.f32 %v5169_v53, %v5177_v34 }
0x2d7f   :  { %v5188_v9 = vpop.xlane.xlu1 %5187 }
0x2d80   :  { %v5190_v10 = vmul.f32 0.03125, %v5188_v9  ;;  %v5181_v11 = vmul.f32 %v5179_v16, %v5179_v16 }
0x2d82   :  { %v5192_v12 = vadd.f32 1e-05, %v5190_v10  ;;  %v5183_v17 = vsel %vm1206_vm1, %v5181_v11, 0.0 }
0x2d83   :  { %5184 = vadd.xlane.f32.xlu0 %v5183_v17  ;;  %v13344_v17 = vld [vmem:[%s16955_s5] ss:$0 sm:$0xff]  ;;  %s18543_s5 = sld [smem:[#allocation101_spill]] }
0x2d84   :  { %15200 = vrsqrt.f32 %v5192_v12 }
0x2d8e   :  { %v15201_v18 = vpop.eup %15200  ;;  %v6825_v27 = vpop.f32.mrb[70].mxu0 }
0x2d8f   :  { %v14308_v29 = vpop.f32.mrb[71].mxu0  ;;  %14316 = vmatprep.mubr.msk.f32.mxu1 %vm1118_vm2, %v6825_v27  ;;  %v5196_v30 = vmul.f32 %v15201_v18, %v5180_v1 }
0x2d90   :  { %v13345_v29 = vld [vmem:[%s16960_s19] ss:$0 sm:$0xff]  ;;  %s18544_s19 = sld [smem:[#allocation104_spill]] }
0x2d91   :  { %v5204_v32 = vmul.f32 %v13342_v28, %v5196_v30 }
0x2d93   :  { %v5212_v33 = vadd.f32 %v13343_v31, %v5204_v32 }
0x2d95   :  { %v5216_v22 = vsel %vm1206_vm1, %v5212_v33, 0.0 }
0x2d96   :  { %5217 = vadd.xlane.f32.xlu1 %v5216_v22  ;;  %v871_v22 = vld [vmem:[%s18542_s22] sm:$0xff] }
0x2e10   :  { %v5185_v36 = vpop.xlane.xlu0 %5184 }
0x2e11   :  { %v5189_v21 = vmul.f32 0.03125, %v5185_v36  ;;  %v873_v36 = vld [vmem:[%s18542_s22 + $0x10] sm:$0xff] }
0x2e13   :  { %v5191_v26 = vadd.f32 1e-05, %v5189_v21  ;;  %v14821_v21 = vpack.c.bf16 %v872_v23, %v871_v22 }
0x2e15   :  { %15202 = vrsqrt.f32 %v5191_v26  ;;  %v874_v26 = vld [vmem:[%s18542_s22 + $0x18] sm:$0xff]  ;;  %14822 = vmatprep.subr.bf16.mxu0 %v14821_v21 }
0x2e16   :  { %14824 = vmatpush3.bf16.msra.mxu0 %v14821_v21 }
0x2e1f   :  { %v15203_v39 = vpop.eup %15202 }
0x2e20   :  { %v5195_v40 = vmul.f32 %v15203_v39, %v5179_v16  ;;  %v14825_v39 = vpack.c.bf16 %v874_v26, %v873_v36 }
0x2e22   :  { %v5203_v20 = vmul.f32 %v13342_v28, %v5195_v40  ;;  %14826 = vmatprep.subr.bf16.mxu0 %v14825_v39 }
0x2e23   :  { %v5218_v43 = vpop.xlane.xlu1 %5217  ;;  %14828 = vmatpush3.bf16.msra.mxu0 %v14825_v39 }
0x2e24   :  { %v5211_v41 = vadd.f32 %v13343_v31, %v5203_v20  ;;  %v5220_v45 = vmul.f32 0.03125, %v5218_v43  ;;  %14341 = vmatprep.subr.mxu0 %v16563_v19 }
0x2e26   :  { %v5213_v24 = vsel %vm1206_vm1, %v5211_v41, 0.0  ;;  %v5222_v51 = vsub.f32 %v5212_v33, %v5220_v45 }
0x2e27   :  { %5214 = vadd.xlane.f32.xlu0 %v5213_v24  ;;  %v6901_v25 = vpop.f32.mrb[46].mxu1 }
0x2e28   :  { %v14313_v42 = vpop.f32.mrb[47].mxu1  ;;  %14317 = vmatmul.mubr.msk.f32.vlgmr.msra.gmra.mrb[40].mxu1 %vm1118_vm2, %v6901_v25  ;;  %v5224_v59 = vmul.f32 %v5222_v51, %v5222_v51 }
0x2e29   :  { %14832 = vmatpush3.bf16.msra.mxu1 %v14829_v0 }
0x2e2a   :  { %v5228_v61 = vsel %vm1206_vm1, %v5224_v59, 0.0 }
0x2eb4   :  { %v5215_v44 = vpop.xlane.xlu0 %5214 }
0x2eb5   :  { %v5219_v46 = vmul.f32 0.03125, %v5215_v44  ;;  %v13382_v44 = vld [vmem:[#allocation13] ss:$0 sm:$0xff] }
0x2eb7   :  { %v5221_v56 = vsub.f32 %v5211_v41, %v5219_v46 }
0x2eb9   :  { %v5223_v60 = vmul.f32 %v5221_v56, %v5221_v56 }
0x2ebb   :  { %v5225_v62 = vsel %vm1206_vm1, %v5223_v60, 0.0 }
0x2efb   :  { %v14318_v50 = vpop.f32.mrb[40].mxu1 }
0x2efc   :  { %v6995_v55 = vadd.f32 %v14318_v50, %v13381_v48  ;;  %v6977_v13 = vpop.f32.mrb[41].mxu1  ;;  %v13383_v50 = vld [vmem:[#allocation14] ss:$0 sm:$0xff] }
0x2efd   :  { %v6994_v15 = vadd.f32 %v13381_v48, %v6977_v13 }
0x2efe   :  { %v6997_v14 = vadd.f32 %v6995_v55, %v17582_v38  ;;  %v865_v38 = vld [vmem:[%s18541_s3 + $0x10] sm:$0xff] }
0x2eff   :  { %v6996_v57 = vadd.f32 %v6994_v15, %v17573_v37  ;;  %v14833_v37 = vpack.c.bf16 %v866_v35, %v865_v38  ;;  %v13387_v15 = vld [vmem:[%s18543_s5] ss:$0 sm:$0xff] }
0x2f00   :  { %v7001_v58 = vsel %vm1206_vm1, %v6997_v14, 0.0 }
0x2f01   :  { %7002 = vadd.xlane.f32.xlu1 %v7001_v58  ;;  %v6998_v54 = vsel %vm1206_vm1, %v6996_v57, 0.0  ;;  %14834 = vmatprep.subr.bf16.mxu1 %v14833_v37 }
0x2f02   :  { %6999 = vadd.xlane.f32.xlu0 %v6998_v54  ;;  %14836 = vmatpush3.bf16.msra.mxu1 %v14833_v37  ;;  %v13384_v54 = vld [vmem:[#allocation8] ss:$0 sm:$0xff] }
0x2f03   :  { %14351 = vmatprep.subr.mxu1 %v16563_v19 }
0x2f05   :  { %5229 = vadd.xlane.f32.xlu1 %v5228_v61 }
0x2f06   :  { %5226 = vadd.xlane.f32.xlu0 %v5225_v62 }
0x2f8e   :  { %v7003_v52 = vpop.xlane.xlu1 %7002 }
0x2f8f   :  { %v7005_v53 = vmul.f32 0.03125, %v7003_v52  ;;  %v7000_v1 = vpop.xlane.xlu0 %6999 }
0x2f90   :  { %v7004_v2 = vmul.f32 0.03125, %v7000_v1 }
0x2f91   :  { %v7007_v3 = vsub.f32 %v6997_v14, %v7005_v53 }
0x2f92   :  { %v7006_v4 = vsub.f32 %v6996_v57, %v7004_v2  ;;  %v5230_v5 = vpop.xlane.xlu1 %5229 }
0x2f93   :  { %v5232_v6 = vmul.f32 0.03125, %v5230_v5  ;;  %v5227_v7 = vpop.xlane.xlu0 %5226  ;;  %v7009_v47 = vmul.f32 %v7007_v3, %v7007_v3 }
0x2f94   :  { %v5231_v8 = vmul.f32 0.03125, %v5227_v7  ;;  %v7008_v34 = vmul.f32 %v7006_v4, %v7006_v4 }
0x2f95   :  { %v5234_v16 = vadd.f32 1e-05, %v5232_v6  ;;  %v7013_v9 = vsel %vm1206_vm1, %v7009_v47, 0.0 }
0x2f96   :  { %v5233_v10 = vadd.f32 1e-05, %v5231_v8  ;;  %7014 = vadd.xlane.f32.xlu1 %v7013_v9  ;;  %v7010_v11 = vsel %vm1206_vm1, %v7008_v34, 0.0 }
0x2f97   :  { %15204 = vrsqrt.f32 %v5234_v16  ;;  %7011 = vadd.xlane.f32.xlu0 %v7010_v11 }
0x2f98   :  { %15206 = vrsqrt.f32 %v5233_v10 }
0x2fa1   :  { %v15205_v12 = vpop.eup %15204 }
0x2fa2   :  { %v15207_v18 = vpop.eup %15206  ;;  %v5238_v27 = vmul.f32 %v15205_v12, %v5222_v51 }
0x2fa3   :  { %v5237_v28 = vmul.f32 %v15207_v18, %v5221_v56 }
0x2fa4   :  { %v5246_v30 = vmul.f32 %v13344_v17, %v5238_v27 }
0x2fa5   :  { %v5245_v31 = vmul.f32 %v13344_v17, %v5237_v28 }
0x2fa6   :  { %v17783_v33 = vadd.f32 %v13345_v29, %v5246_v30 }
0x2fa7   :  { %v17781_v32 = vadd.f32 %v13345_v29, %v5245_v31 }
0x2fa9   :  { %14338 = vmatprep.mubr.msk.f32.mxu1 %vm1206_vm1, %v17781_v32 }
0x2faa   :  { %14339 = vmatmul.mubr.msk.f32.vlgmr.msra.gmra.mrb[48].mxu1 %vm1206_vm1, %v17783_v33 }
0x2fab   :  { %14353 = vmatprep.mubr.msk.f32.mxu1 %vm16564_vm3, %v16563_v19 }
0x3023   :  { %v7015_v40 = vpop.xlane.xlu1 %7014 }
0x3024   :  { %v7017_v20 = vmul.f32 0.03125, %v7015_v40  ;;  %v7012_v41 = vpop.xlane.xlu0 %7011 }
0x3025   :  { %v7016_v24 = vmul.f32 0.03125, %v7012_v41 }
0x3026   :  { %v7019_v25 = vadd.f32 1e-05, %v7017_v20 }
0x3027   :  { %v7018_v42 = vadd.f32 1e-05, %v7016_v24 }
0x3028   :  { %15208 = vrsqrt.f32 %v7019_v25 }
0x3029   :  { %15210 = vrsqrt.f32 %v7018_v42 }
0x3032   :  { %v15209_v43 = vpop.eup %15208 }
0x3033   :  { %v15211_v45 = vpop.eup %15210  ;;  %v7023_v46 = vmul.f32 %v15209_v43, %v7007_v3 }
0x3034   :  { %v7022_v48 = vmul.f32 %v15211_v45, %v7006_v4 }
0x3035   :  { %v7031_v51 = vmul.f32 %v13382_v44, %v7023_v46 }
0x3036   :  { %v7030_v55 = vmul.f32 %v13382_v44, %v7022_v48 }
0x3037   :  { %v17798_v56 = vadd.f32 %v13383_v50, %v7031_v51 }
0x3038   :  { %v17796_v13 = vadd.f32 %v13383_v50, %v7030_v55 }
0x303a   :  { %14327 = vmatprep.mubr.msk.f32.mxu0 %vm1206_vm1, %v17796_v13 }
0x303b   :  { %14328 = vmatmul.mubr.msk.f32.vlgmr.msra.gmra.mrb[72].mxu0 %vm1206_vm1, %v17798_v56 }
0x303c   :  { %14343 = vmatprep.mubr.msk.f32.mxu0 %vm16564_vm3, %v16563_v19 }
0x307d   :  { %v14340_v14 = vpop.f32.mrb[48].mxu1 }
0x307e   :  { %v17807_v57 = vadd.f32 %v14340_v14, %v13387_v15  ;;  %v7205_v58 = vpop.f32.mrb[49].mxu1 }
0x307f   :  { %v17809_v59 = vadd.f32 %v13387_v15, %v7205_v58 }
0x3080   :  { %7620 = vrot.lane.b32.xlu1 %v17807_v57, %s16567_s23 }
0x3081   :  { %14342 = vmatpush3.xpose.msk.msra.mxu0 %vm1118_vm2, %v17809_v59 }
0x3082   :  { %14346 = vmatprep.subr.mxu0 %v16563_v19 }
0x30f2   :  { %v7621_v9 = vpop.permute.xlu1 %7620 }
0x310e   :  { %v14329_v60 = vpop.f32.mrb[72].mxu0 }
0x310f   :  { %v7118_v61 = vpop.f32.mrb[73].mxu0  ;;  %v17824_v63 = vadd.f32 %v14329_v60, %v13384_v54 }
0x3110   :  { %v17816_v62 = vadd.f32 %v13384_v54, %v7118_v61 }
0x3112   :  { %14344 = vmatmul.mubr.msk.f32.vlgmr.msra.gmra.mrb[74].mxu0 %vm1118_vm2, %v17816_v62 }
0x3113   :  { %14347 = vmatpush3.xpose.msk.msra.mxu0 %vm1118_vm2, %v17807_v57  ;;  %14348 = vmatprep.mubr.msk.f32.mxu0 %vm16564_vm3, %v16563_v19 }
0x3114   :  { %14356 = vmatprep.subr.mxu0 %v16563_v19 }
0x3116   :  { %14349 = vmatmul.mubr.msk.f32.vlgmr.msra.gmra.mrb[76].mxu0 %vm1118_vm2, %v17824_v63 }
0x3117   :  { %14358 = vmatprep.mubr.msk.f32.mxu0 %vm16564_vm3, %v16563_v19 }
0x31e5   :  { %v7286_v49 = vpop.f32.mrb[74].mxu0 }
0x31e6   :  { %v14345_v38 = vpop.f32.mrb[75].mxu0  ;;  %v7366_v52 = vsel %vm1118_vm2, %v7286_v49, -inf }
0x31e9   :  { %v7362_v0 = vpop.f32.mrb[76].mxu0 }
0x31ea   :  { %v14350_v35 = vpop.f32.mrb[77].mxu0  ;;  %v7369_v37 = vsel %vm1118_vm2, %v7362_v0, -inf }
0x31eb   :  { %7370 = vmax.xlane.f32.xlu0 %v7369_v37 }
0x3201   :  { %7464 = vrot.lane.b32.xlu0 %v17807_v57, %s16565_s8 }
0x3220   :  { %7367 = vmax.xlane.f32.xlu0 %v7366_v52 }
0x3236   :  { %7388 = vrot.lane.b32.xlu0 %v17809_v59, %s16565_s8 }
0x323a   :  { %7540 = vrot.lane.b32.xlu0 %v17816_v62, %s16567_s23 }
0x3278   :  { %v7371_v53 = vpop.xlane.xlu0 %7370 }
0x3279   :  { %v7373_v1 = vsub.f32 %v7362_v0, %v7371_v53 }
0x327b   :  { %v7376_v2 = vmul.f32 1.442695, %v7373_v1 }
0x327c   :  { %v7465_v3 = vpop.permute.xlu0 %7464 }
0x327d   :  { %15212 = vpow2.f32 %v7376_v2  ;;  %14357 = vmatpush3.msra.mxu0 %v7465_v3 }
0x327e   :  { %14366 = vmatprep.subr.mxu0 %v16563_v19 }
0x3287   :  { %v15213_v4 = vpop.eup %15212 }
0x3288   :  { %v7381_v5 = vsel %vm1118_vm2, %v15213_v4, 0.0 }
0x3289   :  { %7382 = vadd.xlane.f32.xlu1 %v7381_v5  ;;  %v868_v5 = vld [vmem:[%s18544_s19 + $0x8] sm:$0xff] }
0x329a   :  { %7618 = vrot.lane.b32.xlu1 %v17824_v63, %s16567_s23 }
0x32ad   :  { %v7368_v6 = vpop.xlane.xlu0 %7367 }
0x32ae   :  { %v7372_v7 = vsub.f32 %v7286_v49, %v7368_v6  ;;  %v867_v6 = vld [vmem:[%s18544_s19] sm:$0xff] }
0x32b0   :  { %v7374_v47 = vmul.f32 1.442695, %v7372_v7 }
0x32b1   :  { %v7389_v8 = vpop.permute.xlu0 %7388 }
0x32b2   :  { %15214 = vpow2.f32 %v7374_v47  ;;  %14352 = vmatpush3.msra.mxu1 %v7389_v8 }
0x32b3   :  { %14361 = vmatprep.subr.mxu1 %v16563_v19 }
0x32b5   :  { %v7541_v30 = vpop.permute.xlu0 %7540 }
0x32bc   :  { %v15215_v34 = vpop.eup %15214 }
0x32bd   :  { %v7378_v16 = vsel %vm1118_vm2, %v15215_v34, 0.0 }
0x32be   :  { %7379 = vadd.xlane.f32.xlu1 %v7378_v16 }
0x32cf   :  { %7542 = vrot.lane.b32.xlu1 %v17809_v59, %s16567_s23 }
0x3316   :  { %v7383_v10 = vpop.xlane.xlu1 %7382 }
0x3317   :  { %15216 = vrcp.f32 %v7383_v10 }
0x331a   :  { %v7619_v17 = vpop.permute.xlu1 %7618 }
0x3321   :  { %v15217_v11 = vpop.eup %15216 }
0x3322   :  { %v7387_v12 = vmul.f32 %v15217_v11, %v15213_v4 }
0x3324   :  { %14359 = vmatmul.mubr.msk.f32.vlgmr.msra.gmra.mrb[78].mxu0 %vm1118_vm2, %v7387_v12 }
0x3325   :  { %14367 = vmatpush3.xpose.msk.msra.mxu0 %vm1118_vm2, %v7621_v9  ;;  %14368 = vmatprep.mubr.msk.f32.mxu0 %vm16564_vm3, %v16563_v19 }
0x3326   :  { %14376 = vmatprep.subr.mxu0 %v16563_v19 }
0x3328   :  { %14369 = vmatmul.mubr.msk.f32.vlgmr.msra.gmra.mrb[80].mxu0 %vm1118_vm2, %v7619_v17 }
0x3329   :  { %14378 = vmatprep.mubr.msk.f32.mxu0 %vm16564_vm3, %v16563_v19 }
0x334b   :  { %v7380_v18 = vpop.xlane.xlu1 %7379 }
0x334c   :  { %15218 = vrcp.f32 %v7380_v18 }
0x334f   :  { %v7543_v29 = vpop.permute.xlu1 %7542 }
0x3356   :  { %v15219_v27 = vpop.eup %15218 }
0x3357   :  { %v7385_v28 = vmul.f32 %v15219_v27, %v15215_v34 }
0x3359   :  { %14354 = vmatmul.mubr.msk.f32.vlgmr.msra.gmra.mrb[50].mxu1 %vm1118_vm2, %v7385_v28  ;;  %v869_v28 = vld [vmem:[%s18544_s19 + $0x10] sm:$0xff] }
0x335a   :  { %14362 = vmatpush3.xpose.msk.msra.mxu1 %vm1118_vm2, %v7543_v29  ;;  %14363 = vmatprep.mubr.msk.f32.mxu1 %vm16564_vm3, %v16563_v19 }
0x335b   :  { %14371 = vmatprep.subr.mxu1 %v16563_v19 }
0x335d   :  { %14364 = vmatmul.mubr.msk.f32.vlgmr.msra.gmra.mrb[52].mxu1 %vm1118_vm2, %v7541_v30 }
0x335e   :  { %14373 = vmatprep.mubr.msk.f32.mxu1 %vm16564_vm3, %v16563_v19 }
0x33f7   :  { %v17863_v31 = vpop.f32.mrb[78].mxu0 }
0x33f8   :  { %v14360_v22 = vpop.f32.mrb[79].mxu0 }
0x33fb   :  { %v7692_v23 = vpop.f32.mrb[80].mxu0 }
0x33fc   :  { %v14370_v36 = vpop.f32.mrb[81].mxu0  ;;  %v7699_v21 = vsel %vm1118_vm2, %v7692_v23, -inf }
0x33fd   :  { %7700 = vmax.xlane.f32.xlu1 %v7699_v21 }
0x340e   :  { %8034 = vrot.lane.b32.xlu1 %v17809_v59, %s16571_s0 }
0x3412   :  { %8032 = vrot.lane.b32.xlu1 %v17816_v62, %s16571_s0 }
0x3416   :  { %8110 = vrot.lane.b32.xlu1 %v17824_v63, %s16571_s0 }
0x342c   :  { %v17872_v26 = vpop.f32.mrb[50].mxu1 }
0x342d   :  { %v14355_v39 = vpop.f32.mrb[51].mxu1 }
0x3430   :  { %v7614_v40 = vpop.f32.mrb[52].mxu1 }
0x3431   :  { %v14365_v20 = vpop.f32.mrb[53].mxu1  ;;  %v7696_v44 = vsel %vm1118_vm2, %v7614_v40, -inf }
0x348a   :  { %v7701_v41 = vpop.xlane.xlu1 %7700 }
0x348b   :  { %v7703_v24 = vsub.f32 %v7692_v23, %v7701_v41 }
0x348d   :  { %v7706_v25 = vmul.f32 1.442695, %v7703_v24 }
0x348e   :  { %v8035_v48 = vpop.permute.xlu1 %8034 }
0x348f   :  { %15220 = vpow2.f32 %v7706_v25 }
0x3492   :  { %v8033_v55 = vpop.permute.xlu1 %8032 }
0x3496   :  { %v8111_v14 = vpop.permute.xlu1 %8110 }
0x3499   :  { %v15221_v42 = vpop.eup %15220 }
0x349a   :  { %v7711_v43 = vsel %vm1118_vm2, %v15221_v42, 0.0 }
0x349b   :  { %7712 = vadd.xlane.f32.xlu0 %v7711_v43 }
0x34b1   :  { %7794 = vrot.lane.b32.xlu0 %v17807_v57, %s16568_s26 }
0x34b5   :  { %8112 = vrot.lane.b32.xlu0 %v17807_v57, %s16571_s0 }
0x34d4   :  { %7697 = vmax.xlane.f32.xlu0 %v7696_v44 }
0x34ea   :  { %7718 = vrot.lane.b32.xlu0 %v17809_v59, %s16568_s26 }
0x34ee   :  { %8210 = vrot.lane.b32.xlu0 %v17809_v59, %s16569_s12 }
0x34f2   :  { %8447 = vrot.lane.b32.xlu0 %v17809_v59, %s16574_s30 }
0x34f6   :  { %8525 = vrot.lane.b32.xlu0 %v17807_v57, %s16574_s30 }
0x34fa   :  { %8445 = vrot.lane.b32.xlu0 %v17816_v62, %s16574_s30 }
0x34fe   :  { %8523 = vrot.lane.b32.xlu0 %v17824_v63, %s16574_s30 }
0x3528   :  { %v7713_v45 = vpop.xlane.xlu0 %7712 }
0x3529   :  { %15222 = vrcp.f32 %v7713_v45 }
0x352c   :  { %v7795_v46 = vpop.permute.xlu0 %7794 }
0x352d   :  { %14377 = vmatpush3.msra.mxu0 %v7795_v46 }
0x352e   :  { %14391 = vmatprep.subr.mxu0 %v16563_v19 }
0x3530   :  { %v8113_v15 = vpop.permute.xlu0 %8112 }
0x3533   :  { %v15223_v50 = vpop.eup %15222 }
0x3534   :  { %v7717_v51 = vmul.f32 %v15223_v50, %v15221_v42 }
0x3536   :  { %14379 = vmatmul.mubr.msk.f32.vlgmr.msra.gmra.mrb[82].mxu0 %vm1118_vm2, %v7717_v51 }
0x3537   :  { %14392 = vmatpush3.xpose.msk.msra.mxu0 %vm1118_vm2, %v8035_v48  ;;  %14393 = vmatprep.mubr.msk.f32.mxu0 %vm16564_vm3, %v16563_v19 }
0x3538   :  { %14396 = vmatprep.subr.mxu0 %v16563_v19 }
0x353a   :  { %14394 = vmatmul.mubr.msk.f32.vlgmr.msra.gmra.mrb[84].mxu0 %vm1118_vm2, %v8033_v55 }
0x353b   :  { %14397 = vmatpush3.xpose.msk.msra.mxu0 %vm1118_vm2, %v8113_v15  ;;  %14398 = vmatprep.mubr.msk.f32.mxu0 %vm16564_vm3, %v16563_v19 }
0x353c   :  { %14406 = vmatprep.subr.mxu0 %v16563_v19 }
0x353e   :  { %14399 = vmatmul.mubr.msk.f32.vlgmr.msra.gmra.mrb[86].mxu0 %vm1118_vm2, %v8111_v14 }
0x353f   :  { %14408 = vmatprep.mubr.msk.f32.mxu0 %vm16564_vm3, %v16563_v19 }
0x3561   :  { %v7698_v58 = vpop.xlane.xlu0 %7697 }
0x3562   :  { %v7702_v54 = vsub.f32 %v7614_v40, %v7698_v58 }
0x3564   :  { %v7704_v60 = vmul.f32 1.442695, %v7702_v54 }
0x3565   :  { %v7719_v61 = vpop.permute.xlu0 %7718 }
0x3566   :  { %15224 = vpow2.f32 %v7704_v60  ;;  %14372 = vmatpush3.msra.mxu1 %v7719_v61 }
0x3567   :  { %14381 = vmatprep.subr.mxu1 %v868_v5 }
0x3569   :  { %v8211_v29 = vpop.permute.xlu0 %8210 }
0x356d   :  { %v8448_v36 = vpop.permute.xlu0 %8447 }
0x3570   :  { %v15225_v62 = vpop.eup %15224 }
0x3571   :  { %v7708_v63 = vsel %vm1118_vm2, %v15225_v62, 0.0 }
0x3572   :  { %7709 = vadd.xlane.f32.xlu1 %v7708_v63 }
0x35ff   :  { %v7710_v49 = vpop.xlane.xlu1 %7709 }
0x3600   :  { %15226 = vrcp.f32 %v7710_v49 }
0x3609   :  { %v7866_v38 = vpop.f32.mrb[82].mxu0 }
0x360a   :  { %v15227_v0 = vpop.eup %15226  ;;  %v14380_v35 = vpop.f32.mrb[83].mxu0 }
0x360b   :  { %v7715_v37 = vmul.f32 %v15227_v0, %v15225_v62 }
0x360d   :  { %14374 = vmatmul.mubr.msk.f32.vlgmr.msra.gmra.mrb[54].mxu1 %vm1118_vm2, %v7715_v37  ;;  %v8106_v52 = vpop.f32.mrb[84].mxu0 }
0x360e   :  { %v14395_v53 = vpop.f32.mrb[85].mxu0  ;;  %v8188_v1 = vsel %vm1118_vm2, %v8106_v52, -inf  ;;  %14382 = vmatpush3.msra.mxu1 %v868_v5 }
0x360f   :  { %8189 = vmax.xlane.f32.xlu1 %v8188_v1  ;;  %14386 = vmatprep.subr.mxu1 %v867_v6 }
0x3611   :  { %v8184_v2 = vpop.f32.mrb[86].mxu0 }
0x3612   :  { %v14400_v3 = vpop.f32.mrb[87].mxu0  ;;  %v8191_v4 = vsel %vm1118_vm2, %v8184_v2, -inf }
0x3613   :  { %8192 = vmax.xlane.f32.xlu1 %v8191_v4 }
0x369c   :  { %v8190_v7 = vpop.xlane.xlu1 %8189 }
0x369d   :  { %v8194_v47 = vsub.f32 %v8106_v52, %v8190_v7  ;;  %v870_v52 = vld [vmem:[%s18544_s19 + $0x18] sm:$0xff] }
0x369f   :  { %v8196_v8 = vmul.f32 1.442695, %v8194_v47 }
0x36a0   :  { %v8193_v34 = vpop.xlane.xlu1 %8192 }
0x36a1   :  { %15228 = vpow2.f32 %v8196_v8  ;;  %v8195_v16 = vsub.f32 %v8184_v2, %v8193_v34 }
0x36a3   :  { %v8198_v9 = vmul.f32 1.442695, %v8195_v16 }
0x36a5   :  { %15230 = vpow2.f32 %v8198_v9 }
0x36ab   :  { %v15229_v10 = vpop.eup %15228 }
0x36ac   :  { %v8200_v11 = vsel %vm1118_vm2, %v15229_v10, 0.0 }
0x36ad   :  { %8201 = vadd.xlane.f32.xlu1 %v8200_v11 }
0x36af   :  { %v15231_v12 = vpop.eup %15230 }
0x36b0   :  { %v8203_v17 = vsel %vm1118_vm2, %v15231_v12, 0.0 }
0x36b1   :  { %8204 = vadd.xlane.f32.xlu1 %v8203_v17 }
0x36c2   :  { %8286 = vrot.lane.b32.xlu1 %v17807_v57, %s16569_s12 }
0x36e0   :  { %v7790_v18 = vpop.f32.mrb[54].mxu1 }
0x36e1   :  { %v14375_v27 = vpop.f32.mrb[55].mxu1  ;;  %14383 = vmatprep.mubr.msk.f32.mxu1 %vm1118_vm2, %v7790_v18 }
0x36e2   :  { %14384 = vmatmul.mubr.msk.f32.vlgmr.msra.gmra.mrb[56].mxu1 %vm1118_vm2, %v7866_v38 }
0x36e3   :  { %14388 = vmatprep.mubr.msk.f32.mxu1 %vm1118_vm2, %v17872_v26  ;;  %14387 = vmatpush3.msra.mxu1 %v867_v6 }
0x36e4   :  { %14401 = vmatprep.subr.mxu1 %v16563_v19 }
0x36ea   :  { %14389 = vmatmul.mubr.msk.f32.vlgmr.msra.gmra.mrb[56].mxu1 %vm1118_vm2, %v17863_v31  ;;  %v8526_v31 = vpop.permute.xlu0 %8525 }
0x36eb   :  { %14402 = vmatpush3.msra.mxu1 %v8211_v29  ;;  %14403 = vmatprep.mubr.msk.f32.mxu1 %vm16564_vm3, %v16563_v19 }
0x36ec   :  { %14411 = vmatprep.subr.mxu1 %v869_v28 }
0x36ee   :  { %v8446_v20 = vpop.permute.xlu0 %8445 }
0x36f2   :  { %v8524_v43 = vpop.permute.xlu0 %8523 }
0x373a   :  { %v8202_v30 = vpop.xlane.xlu1 %8201 }
0x373b   :  { %15232 = vrcp.f32 %v8202_v30 }
0x373e   :  { %v8205_v22 = vpop.xlane.xlu1 %8204 }
0x373f   :  { %15234 = vrcp.f32 %v8205_v22 }
0x3742   :  { %v8287_v23 = vpop.permute.xlu1 %8286 }
0x3743   :  { %14407 = vmatpush3.msra.mxu0 %v8287_v23  ;;  %v875_v23 = vld [vmem:[%s18545_s27] sm:$0xff] }
0x3744   :  { %14416 = vmatprep.subr.mxu0 %v16563_v19 }
0x3745   :  { %v15233_v21 = vpop.eup %15232 }
0x3746   :  { %v8207_v26 = vmul.f32 %v15233_v21, %v15229_v10 }
0x3748   :  { %14404 = vmatmul.mubr.msk.f32.vlgmr.msra.gmra.mrb[58].mxu1 %vm1118_vm2, %v8207_v26  ;;  %v877_v26 = vld [vmem:[%s18545_s27 + $0x10] sm:$0xff] }
0x3749   :  { %v15235_v39 = vpop.eup %15234  ;;  %14412 = vmatpush3.msra.mxu1 %v869_v28 }
0x374a   :  { %v8209_v40 = vmul.f32 %v15235_v39, %v15231_v12  ;;  %14421 = vmatprep.subr.mxu1 %v16563_v19  ;;  %v878_v39 = vld [vmem:[%s18545_s27 + $0x18] sm:$0xff] }
0x374c   :  { %14409 = vmatmul.mubr.msk.f32.vlgmr.msra.gmra.mrb[88].mxu0 %vm1118_vm2, %v8209_v40  ;;  %v880_v40 = vld [vmem:[%s18546_s1] sm:$0xff] }
0x374d   :  { %14417 = vmatpush3.xpose.msk.msra.mxu0 %vm1118_vm2, %v8448_v36  ;;  %14418 = vmatprep.mubr.msk.f32.mxu0 %vm16564_vm3, %v16563_v19  ;;  %v876_v36 = vld [vmem:[%s18545_s27 + $0x8] sm:$0xff] }
0x374e   :  { %14426 = vmatprep.subr.mxu0 %v16563_v19  ;;  %v14837_v21 = vpack.c.bf16 %v876_v36, %v875_v23  ;;  %v947_v23 = vld [vmem:[%s18547_s13 + $0x8] sm:$0xff] }
0x3750   :  { %14419 = vmatmul.mubr.msk.f32.vlgmr.msra.gmra.mrb[90].mxu0 %vm1118_vm2, %v8446_v20  ;;  %v881_v20 = vld [vmem:[%s18546_s1 + $0x8] sm:$0xff] }
0x3751   :  { %14428 = vmatprep.mubr.msk.f32.mxu0 %vm16564_vm3, %v16563_v19 }
0x381b   :  { %v8282_v41 = vpop.f32.mrb[58].mxu1 }
0x381c   :  { %v14405_v24 = vpop.f32.mrb[59].mxu1  ;;  %14413 = vmatprep.mubr.msk.f32.mxu1 %vm1118_vm2, %v8282_v41  ;;  %v882_v41 = vld [vmem:[%s18546_s1 + $0x10] sm:$0xff] }
0x381d   :  { %v14845_v24 = vpack.c.bf16 %v881_v20, %v880_v40 }
0x381f   :  { %v8358_v25 = vpop.f32.mrb[88].mxu0 }
0x3820   :  { %v14410_v42 = vpop.f32.mrb[89].mxu0  ;;  %14414 = vmatmul.mubr.msk.f32.vlgmr.msra.gmra.mrb[56].mxu1 %vm1118_vm2, %v8358_v25  ;;  %v883_v25 = vld [vmem:[%s18546_s1 + $0x18] sm:$0xff] }
0x3821   :  { %14422 = vmatpush3.xpose.msk.msra.mxu1 %vm1118_vm2, %v8526_v31  ;;  %14423 = vmatprep.mubr.msk.f32.mxu1 %vm16564_vm3, %v16563_v19  ;;  %v14841_v31 = vpack.c.bf16 %v878_v39, %v877_v26  ;;  %v14849_v42 = vpack.c.bf16 %v883_v25, %v882_v41  ;;  %v949_v26 = vld [vmem:[%s18547_s13 + $0x18] sm:$0xff] }
0x3822   :  { %14431 = vmatprep.subr.mxu1 %v16563_v19 }
0x3823   :  { %v8519_v44 = vpop.f32.mrb[90].mxu0 }
0x3824   :  { %v14420_v45 = vpop.f32.mrb[91].mxu0  ;;  %14424 = vmatmul.mubr.msk.f32.vlgmr.msra.gmra.mrb[60].mxu1 %vm1118_vm2, %v8524_v43  ;;  %v8601_v46 = vsel %vm1118_vm2, %v8519_v44, -inf  ;;  %v884_v43 = vld [vmem:[%s18546_s1 + $0x20] sm:$0xff] }
0x3825   :  { %8602 = vmax.xlane.f32.xlu1 %v8601_v46  ;;  %14433 = vmatprep.mubr.msk.f32.mxu1 %vm16564_vm3, %v16563_v19 }
0x38b2   :  { %v8603_v48 = vpop.xlane.xlu1 %8602 }
0x38b3   :  { %v8607_v50 = vsub.f32 %v8519_v44, %v8603_v48  ;;  %v885_v44 = vld [vmem:[%s18546_s1 + $0x28] sm:$0xff] }
0x38b4   :  { %v14853_v45 = vpack.c.bf16 %v885_v44, %v884_v43  ;;  %v13431_v43 = vld [vmem:[#allocation19] ss:$0 sm:$0xff] }
0x38b5   :  { %v8609_v51 = vmul.f32 1.442695, %v8607_v50 }
0x38b7   :  { %15236 = vpow2.f32 %v8609_v51 }
0x38c1   :  { %v15237_v58 = vpop.eup %15236 }
0x38c2   :  { %v8613_v54 = vsel %vm1118_vm2, %v15237_v58, 0.0 }
0x38f7   :  { %v8597_v55 = vpop.f32.mrb[60].mxu1 }
0x38f8   :  { %v14425_v15 = vpop.f32.mrb[61].mxu1  ;;  %v8604_v14 = vsel %vm1118_vm2, %v8597_v55, -inf }
0x38f9   :  { %8605 = vmax.xlane.f32.xlu0 %v8604_v14 }
0x38fd   :  { %8614 = vadd.xlane.f32.xlu0 %v8613_v54 }
0x3913   :  { %8623 = vrot.lane.b32.xlu0 %v17809_v59, %s16573_s28 }
0x3986   :  { %v8606_v60 = vpop.xlane.xlu0 %8605 }
0x3987   :  { %v8608_v61 = vsub.f32 %v8597_v55, %v8606_v60 }
0x3989   :  { %v8611_v62 = vmul.f32 1.442695, %v8608_v61 }
0x398a   :  { %v8615_v63 = vpop.xlane.xlu0 %8614 }
0x398b   :  { %15238 = vpow2.f32 %v8611_v62  ;;  %v13424_v62 = vld [vmem:[#allocation17] ss:$0 sm:$0xff] }
0x398c   :  { %15240 = vrcp.f32 %v8615_v63 }
0x398e   :  { %v8624_v49 = vpop.permute.xlu0 %8623 }
0x398f   :  { %14427 = vmatpush3.msra.mxu0 %v8624_v49 }
0x3990   :  { %14838 = vmatprep.subr.bf16.mxu0 %v14837_v21 }
0x3995   :  { %v15239_v38 = vpop.eup %15238 }
0x3996   :  { %v15241_v0 = vpop.eup %15240  ;;  %v8616_v35 = vsel %vm1118_vm2, %v15239_v38, 0.0 }
0x3997   :  { %8617 = vadd.xlane.f32.xlu1 %v8616_v35  ;;  %v8620_v37 = vmul.f32 %v15241_v0, %v15237_v58  ;;  %v13423_v58 = vld [vmem:[#allocation16] ss:$0 sm:$0xff]  ;;  %v886_v35 = vld [vmem:[%s18546_s1 + $0x30] sm:$0xff] }
0x3999   :  { %14429 = vmatmul.mubr.msk.f32.vlgmr.msra.gmra.mrb[92].mxu0 %vm1118_vm2, %v8620_v37  ;;  %v887_v37 = vld [vmem:[%s18546_s1 + $0x38] sm:$0xff] }
0x399a   :  { %14840 = vmatpush3.bf16.msra.mxu0 %v14837_v21  ;;  %v948_v21 = vld [vmem:[%s18547_s13 + $0x10] sm:$0xff] }
0x399b   :  { %14842 = vmatprep.subr.bf16.mxu0 %v14841_v31  ;;  %v14865_v39 = vpack.c.bf16 %v949_v26, %v948_v21 }
0x399e   :  { %14844 = vmatpush3.bf16.msra.mxu0 %v14841_v31 }
0x39a8   :  { %8699 = vrot.lane.b32.xlu1 %v17807_v57, %s16573_s28  ;;  %v13422_v57 = vld [vmem:[#allocation7] ss:$0 sm:$0xff] }
0x3a24   :  { %v8618_v59 = vpop.xlane.xlu1 %8617 }
0x3a25   :  { %15242 = vrcp.f32 %v8618_v59  ;;  %v14857_v59 = vpack.c.bf16 %v887_v37, %v886_v35 }
0x3a28   :  { %v8700_v53 = vpop.permute.xlu1 %8699 }
0x3a29   :  { %14432 = vmatpush3.msra.mxu1 %v8700_v53 }
0x3a2a   :  { %14436 = vmatprep.subr.mxu1 %v870_v52 }
0x3a2f   :  { %v15243_v1 = vpop.eup %15242 }
0x3a30   :  { %v8622_v2 = vmul.f32 %v15243_v1, %v15239_v38 }
0x3a32   :  { %14434 = vmatmul.mubr.msk.f32.vlgmr.msra.gmra.mrb[62].mxu1 %vm1118_vm2, %v8622_v2 }
0x3a33   :  { %14437 = vmatpush3.msra.mxu1 %v870_v52  ;;  %v13425_v52 = vld [vmem:[#allocation10] ss:$0 sm:$0xff] }
0x3a34   :  { %14846 = vmatprep.subr.bf16.mxu1 %v14845_v24 }
0x3a6c   :  { %v8695_v3 = vpop.f32.mrb[92].mxu0 }
0x3a6d   :  { %v14430_v4 = vpop.f32.mrb[93].mxu0  ;;  %14438 = vmatprep.mubr.msk.f32.mxu1 %vm1118_vm2, %v8695_v3 }
0x3b05   :  { %v8771_v5 = vpop.f32.mrb[62].mxu1 }
0x3b06   :  { %v14435_v6 = vpop.f32.mrb[63].mxu1  ;;  %14439 = vmatmul.mubr.msk.f32.vlgmr.msra.gmra.mrb[56].mxu1 %vm1118_vm2, %v8771_v5 }
0x3b07   :  { %14848 = vmatpush3.bf16.msra.mxu1 %v14845_v24  ;;  %v13428_v6 = vld [vmem:[#allocation11] ss:$0 sm:$0xff] }
0x3b08   :  { %14850 = vmatprep.subr.bf16.mxu1 %v14849_v42 }
0x3b0b   :  { %14852 = vmatpush3.bf16.msra.mxu1 %v14849_v42 }
0x3b0c   :  { %14854 = vmatprep.subr.bf16.mxu1 %v14853_v45 }
0x3b0f   :  { %14856 = vmatpush3.bf16.msra.mxu1 %v14853_v45 }
0x3b10   :  { %14858 = vmatprep.subr.bf16.mxu1 %v14857_v59 }
0x3b13   :  { %14860 = vmatpush3.bf16.msra.mxu1 %v14857_v59 }
0x3b14   :  { %14492 = vmatprep.subr.mxu1 %v16563_v19 }
0x3bd9   :  { %v14440_v7 = vpop.f32.mrb[56].mxu1 }
0x3bda   :  { %v8865_v47 = vadd.f32 %v14440_v7, %v13422_v57  ;;  %v8847_v8 = vpop.f32.mrb[57].mxu1 }
0x3bdb   :  { %v8864_v34 = vadd.f32 %v13422_v57, %v8847_v8 }
0x3bdc   :  { %v8867_v16 = vadd.f32 %v8865_v47, %v17798_v56 }
0x3bdd   :  { %v8866_v9 = vadd.f32 %v8864_v34, %v17796_v13 }
0x3bde   :  { %v8871_v10 = vsel %vm1206_vm1, %v8867_v16, 0.0 }
0x3bdf   :  { %8872 = vadd.xlane.f32.xlu0 %v8871_v10  ;;  %v8868_v11 = vsel %vm1206_vm1, %v8866_v9, 0.0 }
0x3be0   :  { %8869 = vadd.xlane.f32.xlu1 %v8868_v11 }
0x3c6c   :  { %v8873_v12 = vpop.xlane.xlu0 %8872 }
0x3c6d   :  { %v8875_v17 = vmul.f32 0.03125, %v8873_v12  ;;  %v8870_v18 = vpop.xlane.xlu1 %8869 }
0x3c6e   :  { %v8874_v27 = vmul.f32 0.03125, %v8870_v18 }
0x3c6f   :  { %v8877_v28 = vsub.f32 %v8867_v16, %v8875_v17 }
0x3c70   :  { %v8876_v29 = vsub.f32 %v8866_v9, %v8874_v27 }
0x3c71   :  { %v8879_v30 = vmul.f32 %v8877_v28, %v8877_v28 }
0x3c72   :  { %v8878_v56 = vmul.f32 %v8876_v29, %v8876_v29 }
0x3c73   :  { %v8883_v13 = vsel %vm1206_vm1, %v8879_v30, 0.0 }
0x3c74   :  { %8884 = vadd.xlane.f32.xlu1 %v8883_v13  ;;  %v8880_v22 = vsel %vm1206_vm1, %v8878_v56, 0.0 }
0x3c75   :  { %8881 = vadd.xlane.f32.xlu0 %v8880_v22  ;;  %v946_v22 = vld [vmem:[%s18547_s13] sm:$0xff] }
0x3c76   :  { %v14861_v36 = vpack.c.bf16 %v947_v23, %v946_v22 }
0x3c78   :  { %14862 = vmatprep.subr.bf16.mxu0 %v14861_v36 }
0x3d01   :  { %v8885_v46 = vpop.xlane.xlu1 %8884 }
0x3d02   :  { %v8887_v48 = vmul.f32 0.03125, %v8885_v46  ;;  %v8882_v50 = vpop.xlane.xlu0 %8881 }
0x3d03   :  { %v8886_v51 = vmul.f32 0.03125, %v8882_v50 }
0x3d04   :  { %v8889_v55 = vadd.f32 1e-05, %v8887_v48  ;;  %v13432_v48 = vld [vmem:[#allocation20] ss:$0 sm:$0xff] }
0x3d05   :  { %v8888_v15 = vadd.f32 1e-05, %v8886_v51 }
0x3d06   :  { %15244 = vrsqrt.f32 %v8889_v55 }
0x3d07   :  { %15246 = vrsqrt.f32 %v8888_v15 }
0x3d10   :  { %v15245_v14 = vpop.eup %15244 }
0x3d11   :  { %v15247_v54 = vpop.eup %15246  ;;  %v8893_v60 = vmul.f32 %v15245_v14, %v8877_v28  ;;  %v13433_v14 = vld [vmem:[#allocation43] ss:$0 sm:$0xff] }
0x3d12   :  { %v8892_v61 = vmul.f32 %v15247_v54, %v8876_v29 }
0x3d13   :  { %v8901_v63 = vmul.f32 %v13423_v58, %v8893_v60 }
0x3d14   :  { %v8900_v49 = vmul.f32 %v13423_v58, %v8892_v61 }
0x3d15   :  { %v8909_v0 = vadd.f32 %v13424_v62, %v8901_v63 }
0x3d16   :  { %v8908_v38 = vadd.f32 %v13424_v62, %v8900_v49 }
0x3d18   :  { %14449 = vmatprep.mubr.msk.f32.mxu0 %vm1206_vm1, %v8908_v38 }
0x3d19   :  { %14450 = vmatmul.mubr.msk.f32.vlgmr.msra.gmra.mrb[94].mxu0 %vm1206_vm1, %v8909_v0 }
0x3d1a   :  { %14864 = vmatpush3.bf16.msra.mxu0 %v14861_v36 }
0x3d1b   :  { %14866 = vmatprep.subr.bf16.mxu0 %v14865_v39 }
0x3d1e   :  { %14868 = vmatpush3.bf16.msra.mxu0 %v14865_v39 }
0x3d1f   :  { %14482 = vmatprep.subr.mxu0 %v16563_v19 }
0x3dec   :  { %v14451_v53 = vpop.f32.mrb[94].mxu0 }
0x3ded   :  { %v8994_v1 = vadd.f32 %v14451_v53, %v13425_v52  ;;  %v8988_v2 = vpop.f32.mrb[95].mxu0 }
0x3dee   :  { %v8989_v3 = vadd.f32 %v13425_v52, %v8988_v2 }
0x3def   :  { %v8998_v5 = vmax.f32 %v8994_v1, 0.0 }
0x3df0   :  { %v8997_v4 = vmax.f32 %v8989_v3, 0.0 }
0x3df2   :  { %14468 = vmatprep.mubr.msk.f32.mxu1 %vm3082_vm4, %v8997_v4 }
0x3df3   :  { %14469 = vmatmul.mubr.msk.f32.vlgmr.msra.gmra.mrb[64].mxu1 %vm3082_vm4, %v8998_v5 }
0x3df4   :  { %14494 = vmatprep.mubr.msk.f32.mxu1 %vm16564_vm3, %v16563_v19 }
0x3ec6   :  { %v14470_v57 = vpop.f32.mrb[64].mxu1 }
0x3ec7   :  { %v9083_v7 = vadd.f32 %v14470_v57, %v13428_v6  ;;  %v9077_v47 = vpop.f32.mrb[65].mxu1 }
0x3ec8   :  { %v9078_v8 = vadd.f32 %v13428_v6, %v9077_v47 }
0x3ec9   :  { %v9087_v34 = vadd.f32 %v9083_v7, %v8909_v0 }
0x3eca   :  { %v9086_v16 = vadd.f32 %v9078_v8, %v8908_v38 }
0x3ecb   :  { %v9091_v9 = vsel %vm1206_vm1, %v9087_v34, 0.0 }
0x3ecc   :  { %9092 = vadd.xlane.f32.xlu1 %v9091_v9  ;;  %v9088_v10 = vsel %vm1206_vm1, %v9086_v16, 0.0 }
0x3ecd   :  { %9089 = vadd.xlane.f32.xlu0 %v9088_v10 }
0x3f59   :  { %v9093_v11 = vpop.xlane.xlu1 %9092 }
0x3f5a   :  { %v9095_v12 = vmul.f32 0.03125, %v9093_v11  ;;  %v9090_v17 = vpop.xlane.xlu0 %9089 }
0x3f5b   :  { %v9094_v18 = vmul.f32 0.03125, %v9090_v17 }
0x3f5c   :  { %v9097_v27 = vsub.f32 %v9087_v34, %v9095_v12 }
0x3f5d   :  { %v9096_v28 = vsub.f32 %v9086_v16, %v9094_v18 }
0x3f5e   :  { %v9099_v29 = vmul.f32 %v9097_v27, %v9097_v27 }
0x3f5f   :  { %v9098_v30 = vmul.f32 %v9096_v28, %v9096_v28 }
0x3f60   :  { %v9103_v56 = vsel %vm1206_vm1, %v9099_v29, 0.0 }
0x3f61   :  { %9104 = vadd.xlane.f32.xlu1 %v9103_v56  ;;  %v9100_v13 = vsel %vm1206_vm1, %v9098_v30, 0.0 }
0x3f62   :  { %9101 = vadd.xlane.f32.xlu0 %v9100_v13 }
0x3fee   :  { %v9105_v31 = vpop.xlane.xlu1 %9104 }
0x3fef   :  { %v9107_v40 = vmul.f32 0.03125, %v9105_v31  ;;  %v9102_v20 = vpop.xlane.xlu0 %9101 }
0x3ff0   :  { %v9106_v41 = vmul.f32 0.03125, %v9102_v20 }
0x3ff1   :  { %v9109_v24 = vadd.f32 1e-05, %v9107_v40 }
0x3ff2   :  { %v9108_v25 = vadd.f32 1e-05, %v9106_v41 }
0x3ff3   :  { %15248 = vrsqrt.f32 %v9109_v24 }
0x3ff4   :  { %15250 = vrsqrt.f32 %v9108_v25 }
0x3ffd   :  { %v15249_v42 = vpop.eup %15248 }
0x3ffe   :  { %v15251_v44 = vpop.eup %15250  ;;  %v9113_v45 = vmul.f32 %v15249_v42, %v9097_v27 }
0x3fff   :  { %v9112_v46 = vmul.f32 %v15251_v44, %v9096_v28 }
0x4000   :  { %v9121_v50 = vmul.f32 %v13431_v43, %v9113_v45 }
0x4001   :  { %v9120_v51 = vmul.f32 %v13431_v43, %v9112_v46 }
0x4002   :  { %v17995_v15 = vadd.f32 %v13432_v48, %v9121_v50 }
0x4003   :  { %v17993_v55 = vadd.f32 %v13432_v48, %v9120_v51 }
0x4005   :  { %14479 = vmatprep.mubr.msk.f32.mxu0 %vm1206_vm1, %v17993_v55 }
0x4006   :  { %14480 = vmatmul.mubr.msk.f32.vlgmr.msra.gmra.mrb[96].mxu0 %vm1206_vm1, %v17995_v15 }
0x4007   :  { %14484 = vmatprep.mubr.msk.f32.mxu0 %vm16564_vm3, %v16563_v19 }
0x40d9   :  { %v14481_v58 = vpop.f32.mrb[96].mxu0 }
0x40da   :  { %v18003_v54 = vadd.f32 %v14481_v58, %v13433_v14  ;;  %v9208_v60 = vpop.f32.mrb[97].mxu0 }
0x40db   :  { %v18005_v61 = vadd.f32 %v13433_v14, %v9208_v60 }
0x40dc   :  { %9295 = vrot.lane.b32.xlu1 %v18003_v54, %s16565_s8 }
0x40dd   :  { %9218 = vrot.lane.b32.xlu0 %v18005_v61, %s16565_s8 }
0x414e   :  { %v9296_v63 = vpop.permute.xlu1 %9295 }
0x414f   :  { %v9219_v62 = vpop.permute.xlu0 %9218 }
0x4150   :  { %14483 = vmatpush3.xpose.msk.msra.mxu0 %vm1118_vm2, %v9219_v62 }
0x4151   :  { %14487 = vmatprep.subr.mxu0 %v16563_v19 }
0x4153   :  { %14485 = vmatmul.mubr.msk.f32.vlgmr.msra.gmra.mrb[98].mxu0 %vm1118_vm2, %v18005_v61 }
0x4154   :  { %14488 = vmatpush3.xpose.msk.msra.mxu0 %vm1118_vm2, %v9296_v63  ;;  %14489 = vmatprep.mubr.msk.f32.mxu0 %vm16564_vm3, %v16563_v19 }
0x4155   :  { %14497 = vmatprep.subr.mxu0 %v16563_v19 }
0x4157   :  { %14490 = vmatmul.mubr.msk.f32.vlgmr.msra.gmra.mrb[100].mxu0 %vm1118_vm2, %v18003_v54 }
0x4158   :  { %14499 = vmatprep.mubr.msk.f32.mxu0 %vm16564_vm3, %v16563_v19 }
0x4226   :  { %v9290_v49 = vpop.f32.mrb[98].mxu0 }
0x4227   :  { %v14486_v38 = vpop.f32.mrb[99].mxu0  ;;  %v9371_v3 = vsel %vm1118_vm2, %v9290_v49, -inf }
0x422a   :  { %v9367_v0 = vpop.f32.mrb[100].mxu0 }
0x422b   :  { %v14491_v35 = vpop.f32.mrb[101].mxu0  ;;  %v9374_v37 = vsel %vm1118_vm2, %v9367_v0, -inf }
0x422c   :  { %9375 = vmax.xlane.f32.xlu1 %v9374_v37 }
0x423d   :  { %9625 = vrot.lane.b32.xlu1 %v18003_v54, %s16568_s26 }
0x4241   :  { %9623 = vrot.lane.b32.xlu1 %v18003_v54, %s16567_s23 }
0x42b9   :  { %v9376_v59 = vpop.xlane.xlu1 %9375 }
0x42ba   :  { %v9378_v52 = vsub.f32 %v9367_v0, %v9376_v59 }
0x42bc   :  { %v9381_v53 = vmul.f32 1.442695, %v9378_v52 }
0x42bd   :  { %v9626_v57 = vpop.permute.xlu1 %9625 }
0x42be   :  { %15252 = vpow2.f32 %v9381_v53 }
0x42c1   :  { %v9624_v47 = vpop.permute.xlu1 %9623 }
0x42c8   :  { %v15253_v1 = vpop.eup %15252 }
0x42c9   :  { %v9386_v2 = vsel %vm1118_vm2, %v15253_v1, 0.0 }
0x42ca   :  { %9387 = vadd.xlane.f32.xlu0 %v9386_v2 }
0x42e0   :  { %9469 = vrot.lane.b32.xlu0 %v18003_v54, %s16566_s9 }
0x42ff   :  { %9372 = vmax.xlane.f32.xlu0 %v9371_v3 }
0x4315   :  { %9393 = vrot.lane.b32.xlu0 %v18005_v61, %s16566_s9  ;;  %s18548_s9 = sld [smem:[#allocation127_spill]] }
0x4319   :  { %9545 = vrot.lane.b32.xlu0 %v18005_v61, %s16567_s23 }
0x4357   :  { %v9388_v4 = vpop.xlane.xlu0 %9387 }
0x4358   :  { %15254 = vrcp.f32 %v9388_v4  ;;  %v943_v4 = vld [vmem:[%s18548_s9 + $0x8] sm:$0xff] }
0x435b   :  { %v9470_v5 = vpop.permute.xlu0 %9469 }
0x435c   :  { %14498 = vmatpush3.msra.mxu0 %v9470_v5  ;;  %v942_v5 = vld [vmem:[%s18548_s9] sm:$0xff] }
0x435d   :  { %14507 = vmatprep.subr.mxu0 %v16563_v19 }
0x4362   :  { %v15255_v6 = vpop.eup %15254 }
0x4363   :  { %v9392_v7 = vmul.f32 %v15255_v6, %v15253_v1 }
0x4365   :  { %14500 = vmatmul.mubr.msk.f32.vlgmr.msra.gmra.mrb[102].mxu0 %vm1118_vm2, %v9392_v7 }
0x4366   :  { %14508 = vmatpush3.xpose.msk.msra.mxu0 %vm1118_vm2, %v9626_v57  ;;  %14509 = vmatprep.mubr.msk.f32.mxu0 %vm16564_vm3, %v16563_v19 }
0x4367   :  { %14517 = vmatprep.subr.mxu0 %v16563_v19 }
0x4369   :  { %14510 = vmatmul.mubr.msk.f32.vlgmr.msra.gmra.mrb[104].mxu0 %vm1118_vm2, %v9624_v47 }
0x436a   :  { %14519 = vmatprep.mubr.msk.f32.mxu0 %vm16564_vm3, %v16563_v19 }
0x438c   :  { %v9373_v8 = vpop.xlane.xlu0 %9372 }
0x438d   :  { %v9377_v34 = vsub.f32 %v9290_v49, %v9373_v8 }
0x438f   :  { %v9379_v16 = vmul.f32 1.442695, %v9377_v34 }
0x4390   :  { %v9394_v9 = vpop.permute.xlu0 %9393 }
0x4391   :  { %15256 = vpow2.f32 %v9379_v16  ;;  %14493 = vmatpush3.msra.mxu1 %v9394_v9 }
0x4392   :  { %14502 = vmatprep.subr.mxu1 %v16563_v19 }
0x4394   :  { %v9546_v30 = vpop.permute.xlu0 %9545 }
0x439b   :  { %v15257_v10 = vpop.eup %15256 }
0x439c   :  { %v9383_v11 = vsel %vm1118_vm2, %v15257_v10, 0.0 }
0x439d   :  { %9384 = vadd.xlane.f32.xlu1 %v9383_v11 }
0x43ae   :  { %9547 = vrot.lane.b32.xlu1 %v18005_v61, %s16568_s26 }
0x442a   :  { %v9385_v12 = vpop.xlane.xlu1 %9384 }
0x442b   :  { %15258 = vrcp.f32 %v9385_v12 }
0x442e   :  { %v9548_v27 = vpop.permute.xlu1 %9547 }
0x4435   :  { %v15259_v17 = vpop.eup %15258 }
0x4436   :  { %v9390_v18 = vmul.f32 %v15259_v17, %v15257_v10 }
0x4438   :  { %14495 = vmatmul.mubr.msk.f32.vlgmr.msra.gmra.mrb[66].mxu1 %vm1118_vm2, %v9390_v18  ;;  %v18050_v28 = vpop.f32.mrb[102].mxu0  ;;  %v944_v18 = vld [vmem:[%s18548_s9 + $0x10] sm:$0xff] }
0x4439   :  { %14503 = vmatpush3.xpose.msk.msra.mxu1 %vm1118_vm2, %v9548_v27  ;;  %v14501_v29 = vpop.f32.mrb[103].mxu0  ;;  %14504 = vmatprep.mubr.msk.f32.mxu1 %vm16564_vm3, %v16563_v19 }
0x443a   :  { %14512 = vmatprep.subr.mxu1 %v16563_v19 }
0x443c   :  { %14505 = vmatmul.mubr.msk.f32.vlgmr.msra.gmra.mrb[68].mxu1 %vm1118_vm2, %v9546_v30  ;;  %v9697_v56 = vpop.f32.mrb[104].mxu0 }
0x443d   :  { %v14511_v13 = vpop.f32.mrb[105].mxu0  ;;  %v9704_v22 = vsel %vm1118_vm2, %v9697_v56, -inf  ;;  %14514 = vmatprep.mubr.msk.f32.mxu1 %vm16564_vm3, %v16563_v19 }
0x443e   :  { %9705 = vmax.xlane.f32.xlu1 %v9704_v22 }
0x444f   :  { %10039 = vrot.lane.b32.xlu1 %v18005_v61, %s16569_s12 }
0x4453   :  { %10037 = vrot.lane.b32.xlu1 %v18005_v61, %s16571_s0 }
0x4457   :  { %10115 = vrot.lane.b32.xlu1 %v18003_v54, %s16571_s0 }
0x44cb   :  { %v9706_v23 = vpop.xlane.xlu1 %9705 }
0x44cc   :  { %v9708_v36 = vsub.f32 %v9697_v56, %v9706_v23 }
0x44ce   :  { %v9711_v21 = vmul.f32 1.442695, %v9708_v36 }
0x44cf   :  { %v10040_v43 = vpop.permute.xlu1 %10039 }
0x44d0   :  { %15260 = vpow2.f32 %v9711_v21 }
0x44d3   :  { %v10038_v46 = vpop.permute.xlu1 %10037 }
0x44d7   :  { %v10116_v50 = vpop.permute.xlu1 %10115 }
0x44da   :  { %v15261_v26 = vpop.eup %15260 }
0x44db   :  { %v9716_v39 = vsel %vm1118_vm2, %v15261_v26, 0.0 }
0x44dc   :  { %9717 = vadd.xlane.f32.xlu0 %v9716_v39 }
0x44f2   :  { %9799 = vrot.lane.b32.xlu0 %v18003_v54, %s16570_s6 }
0x44f6   :  { %10117 = vrot.lane.b32.xlu0 %v18003_v54, %s16569_s12 }
0x450b   :  { %v18071_v31 = vpop.f32.mrb[66].mxu1 }
0x450c   :  { %v14496_v40 = vpop.f32.mrb[67].mxu1 }
0x450f   :  { %v9619_v20 = vpop.f32.mrb[68].mxu1 }
0x4510   :  { %v14506_v41 = vpop.f32.mrb[69].mxu1  ;;  %v9701_v24 = vsel %vm1118_vm2, %v9619_v20, -inf }
0x4515   :  { %9702 = vmax.xlane.f32.xlu0 %v9701_v24 }
0x452b   :  { %9723 = vrot.lane.b32.xlu0 %v18005_v61, %s16570_s6  ;;  %s18549_s6 = sld [smem:[#allocation117_spill]] }
0x452f   :  { %10215 = vrot.lane.b32.xlu0 %v18005_v61, %s16572_s25 }
0x4533   :  { %10452 = vrot.lane.b32.xlu0 %v18005_v61, %s16573_s28 }
0x4537   :  { %10530 = vrot.lane.b32.xlu0 %v18003_v54, %s16573_s28 }
0x453b   :  { %10450 = vrot.lane.b32.xlu0 %v18005_v61, %s16574_s30 }
0x453f   :  { %10528 = vrot.lane.b32.xlu0 %v18003_v54, %s16574_s30 }
0x4569   :  { %v9718_v25 = vpop.xlane.xlu0 %9717 }
0x456a   :  { %15262 = vrcp.f32 %v9718_v25 }
0x456d   :  { %v9800_v42 = vpop.permute.xlu0 %9799 }
0x456e   :  { %14518 = vmatpush3.msra.mxu0 %v9800_v42 }
0x456f   :  { %14532 = vmatprep.subr.mxu0 %v16563_v19 }
0x4571   :  { %v10118_v48 = vpop.permute.xlu0 %10117 }
0x4574   :  { %v15263_v44 = vpop.eup %15262 }
0x4575   :  { %v9722_v45 = vmul.f32 %v15263_v44, %v15261_v26 }
0x4577   :  { %14520 = vmatmul.mubr.msk.f32.vlgmr.msra.gmra.mrb[106].mxu0 %vm1118_vm2, %v9722_v45 }
0x4578   :  { %14533 = vmatpush3.xpose.msk.msra.mxu0 %vm1118_vm2, %v10040_v43  ;;  %14534 = vmatprep.mubr.msk.f32.mxu0 %vm16564_vm3, %v16563_v19 }
0x4579   :  { %14537 = vmatprep.subr.mxu0 %v16563_v19 }
0x457b   :  { %14535 = vmatmul.mubr.msk.f32.vlgmr.msra.gmra.mrb[108].mxu0 %vm1118_vm2, %v10038_v46 }
0x457c   :  { %14538 = vmatpush3.xpose.msk.msra.mxu0 %vm1118_vm2, %v10118_v48  ;;  %14539 = vmatprep.mubr.msk.f32.mxu0 %vm16564_vm3, %v16563_v19 }
0x457d   :  { %14547 = vmatprep.subr.mxu0 %v16563_v19 }
0x457f   :  { %14540 = vmatmul.mubr.msk.f32.vlgmr.msra.gmra.mrb[110].mxu0 %vm1118_vm2, %v10116_v50 }
0x4580   :  { %14549 = vmatprep.mubr.msk.f32.mxu0 %vm16564_vm3, %v16563_v19 }
0x45a2   :  { %v9703_v51 = vpop.xlane.xlu0 %9702 }
0x45a3   :  { %v9707_v14 = vsub.f32 %v9619_v20, %v9703_v51 }
0x45a5   :  { %v9709_v58 = vmul.f32 1.442695, %v9707_v14 }
0x45a6   :  { %v9724_v60 = vpop.permute.xlu0 %9723 }
0x45a7   :  { %15264 = vpow2.f32 %v9709_v58  ;;  %14513 = vmatpush3.msra.mxu1 %v9724_v60 }
0x45a8   :  { %14522 = vmatprep.subr.mxu1 %v943_v4 }
0x45aa   :  { %v10216_v27 = vpop.permute.xlu0 %10215 }
0x45ae   :  { %v10453_v13 = vpop.permute.xlu0 %10452 }
0x45b1   :  { %v15265_v62 = vpop.eup %15264 }
0x45b2   :  { %v9713_v63 = vsel %vm1118_vm2, %v15265_v62, 0.0 }
0x45b3   :  { %9714 = vadd.xlane.f32.xlu1 %v9713_v63 }
0x4640   :  { %v9715_v49 = vpop.xlane.xlu1 %9714 }
0x4641   :  { %15266 = vrcp.f32 %v9715_v49 }
0x464a   :  { %v9871_v38 = vpop.f32.mrb[106].mxu0 }
0x464b   :  { %v15267_v0 = vpop.eup %15266  ;;  %v14521_v35 = vpop.f32.mrb[107].mxu0 }
0x464c   :  { %v9720_v37 = vmul.f32 %v15267_v0, %v15265_v62 }
0x464e   :  { %14515 = vmatmul.mubr.msk.f32.vlgmr.msra.gmra.mrb[70].mxu1 %vm1118_vm2, %v9720_v37  ;;  %v10111_v59 = vpop.f32.mrb[108].mxu0 }
0x464f   :  { %v14536_v52 = vpop.f32.mrb[109].mxu0  ;;  %v10193_v53 = vsel %vm1118_vm2, %v10111_v59, -inf  ;;  %14523 = vmatpush3.msra.mxu1 %v943_v4  ;;  %v908_v4 = vld [vmem:[%s18549_s6] sm:$0xff] }
0x4650   :  { %10194 = vmax.xlane.f32.xlu1 %v10193_v53  ;;  %14527 = vmatprep.subr.mxu1 %v942_v5 }
0x4652   :  { %v10189_v1 = vpop.f32.mrb[110].mxu0 }
0x4653   :  { %v14541_v2 = vpop.f32.mrb[111].mxu0  ;;  %v10196_v3 = vsel %vm1118_vm2, %v10189_v1, -inf }
0x4654   :  { %10197 = vmax.xlane.f32.xlu1 %v10196_v3 }
0x46dd   :  { %v10195_v6 = vpop.xlane.xlu1 %10194 }
0x46de   :  { %v10199_v57 = vsub.f32 %v10111_v59, %v10195_v6  ;;  %v945_v59 = vld [vmem:[%s18548_s9 + $0x18] sm:$0xff]  ;;  %v910_v6 = vld [vmem:[%s18549_s6 + $0x10] sm:$0xff] }
0x46e0   :  { %v10201_v7 = vmul.f32 1.442695, %v10199_v57  ;;  %v911_v57 = vld [vmem:[%s18549_s6 + $0x18] sm:$0xff] }
0x46e1   :  { %v10198_v47 = vpop.xlane.xlu1 %10197 }
0x46e2   :  { %15268 = vpow2.f32 %v10201_v7  ;;  %v10200_v8 = vsub.f32 %v10189_v1, %v10198_v47  ;;  %v14881_v7 = vpack.c.bf16 %v911_v57, %v910_v6 }
0x46e4   :  { %v10203_v34 = vmul.f32 1.442695, %v10200_v8 }
0x46e6   :  { %15270 = vpow2.f32 %v10203_v34  ;;  %v13468_v34 = vld [vmem:[#allocation41] ss:$0 sm:$0xff] }
0x46ec   :  { %v15269_v16 = vpop.eup %15268 }
0x46ed   :  { %v10205_v9 = vsel %vm1118_vm2, %v15269_v16, 0.0 }
0x46ee   :  { %10206 = vadd.xlane.f32.xlu1 %v10205_v9 }
0x46f0   :  { %v15271_v10 = vpop.eup %15270 }
0x46f1   :  { %v10208_v11 = vsel %vm1118_vm2, %v15271_v10, 0.0 }
0x46f2   :  { %10209 = vadd.xlane.f32.xlu1 %v10208_v11 }
0x4703   :  { %10291 = vrot.lane.b32.xlu1 %v18003_v54, %s16572_s25  ;;  %s18550_s25 = sld [smem:[#allocation119_spill]] }
0x4721   :  { %v9795_v12 = vpop.f32.mrb[70].mxu1 }
0x4722   :  { %v14516_v17 = vpop.f32.mrb[71].mxu1  ;;  %14524 = vmatprep.mubr.msk.f32.mxu1 %vm1118_vm2, %v9795_v12 }
0x4723   :  { %14525 = vmatmul.mubr.msk.f32.vlgmr.msra.gmra.mrb[72].mxu1 %vm1118_vm2, %v9871_v38 }
0x4724   :  { %14529 = vmatprep.mubr.msk.f32.mxu1 %vm1118_vm2, %v18071_v31  ;;  %14528 = vmatpush3.msra.mxu1 %v942_v5  ;;  %v909_v5 = vld [vmem:[%s18549_s6 + $0x8] sm:$0xff] }
0x4725   :  { %14542 = vmatprep.subr.mxu1 %v16563_v19 }
0x472b   :  { %14530 = vmatmul.mubr.msk.f32.vlgmr.msra.gmra.mrb[72].mxu1 %vm1118_vm2, %v18050_v28  ;;  %v10531_v28 = vpop.permute.xlu0 %10530 }
0x472c   :  { %14543 = vmatpush3.msra.mxu1 %v10216_v27  ;;  %14544 = vmatprep.mubr.msk.f32.mxu1 %vm16564_vm3, %v16563_v19  ;;  %v13474_v27 = vld [vmem:[#allocation25] ss:$0 sm:$0xff] }
0x472d   :  { %14552 = vmatprep.subr.mxu1 %v944_v18 }
0x472f   :  { %v10451_v26 = vpop.permute.xlu0 %10450 }
0x4733   :  { %v10529_v41 = vpop.permute.xlu0 %10528 }
0x477b   :  { %v10207_v29 = vpop.xlane.xlu1 %10206 }
0x477c   :  { %15272 = vrcp.f32 %v10207_v29 }
0x477f   :  { %v10210_v30 = vpop.xlane.xlu1 %10209 }
0x4780   :  { %15274 = vrcp.f32 %v10210_v30 }
0x4783   :  { %v10292_v56 = vpop.permute.xlu1 %10291 }
0x4784   :  { %14548 = vmatpush3.msra.mxu0 %v10292_v56 }
0x4785   :  { %14557 = vmatprep.subr.mxu0 %v16563_v19 }
0x4786   :  { %v15273_v22 = vpop.eup %15272 }
0x4787   :  { %v10212_v23 = vmul.f32 %v15273_v22, %v15269_v16 }
0x4789   :  { %14545 = vmatmul.mubr.msk.f32.vlgmr.msra.gmra.mrb[74].mxu1 %vm1118_vm2, %v10212_v23 }
0x478a   :  { %v15275_v36 = vpop.eup %15274  ;;  %14553 = vmatpush3.msra.mxu1 %v944_v18 }
0x478b   :  { %v10214_v21 = vmul.f32 %v15275_v36, %v15271_v10  ;;  %14562 = vmatprep.subr.mxu1 %v16563_v19 }
0x478d   :  { %14550 = vmatmul.mubr.msk.f32.vlgmr.msra.gmra.mrb[112].mxu0 %vm1118_vm2, %v10214_v21 }
0x478e   :  { %14558 = vmatpush3.xpose.msk.msra.mxu0 %vm1118_vm2, %v10453_v13  ;;  %14559 = vmatprep.mubr.msk.f32.mxu0 %vm16564_vm3, %v16563_v19 }
0x478f   :  { %14567 = vmatprep.subr.mxu0 %v16563_v19 }
0x4791   :  { %14560 = vmatmul.mubr.msk.f32.vlgmr.msra.gmra.mrb[114].mxu0 %vm1118_vm2, %v10451_v26 }
0x4792   :  { %14569 = vmatprep.mubr.msk.f32.mxu0 %vm16564_vm3, %v16563_v19 }
0x485c   :  { %v10287_v39 = vpop.f32.mrb[74].mxu1 }
0x485d   :  { %v14546_v31 = vpop.f32.mrb[75].mxu1  ;;  %14554 = vmatprep.mubr.msk.f32.mxu1 %vm1118_vm2, %v10287_v39 }
0x485e   :  { %v916_v31 = vld [vmem:[%s18550_s25] sm:$0xff] }
0x4860   :  { %v10363_v40 = vpop.f32.mrb[112].mxu0 }
0x4861   :  { %v14551_v20 = vpop.f32.mrb[113].mxu0  ;;  %14555 = vmatmul.mubr.msk.f32.vlgmr.msra.gmra.mrb[72].mxu1 %vm1118_vm2, %v10363_v40  ;;  %v917_v40 = vld [vmem:[%s18550_s25 + $0x8] sm:$0xff] }
0x4862   :  { %14563 = vmatpush3.xpose.msk.msra.mxu1 %vm1118_vm2, %v10531_v28  ;;  %14564 = vmatprep.mubr.msk.f32.mxu1 %vm16564_vm3, %v16563_v19  ;;  %v14869_v20 = vpack.c.bf16 %v917_v40, %v916_v31 }
0x4863   :  { %14572 = vmatprep.subr.mxu1 %v16563_v19 }
0x4864   :  { %v10524_v24 = vpop.f32.mrb[114].mxu0 }
0x4865   :  { %v14561_v25 = vpop.f32.mrb[115].mxu0  ;;  %14565 = vmatmul.mubr.msk.f32.vlgmr.msra.gmra.mrb[76].mxu1 %vm1118_vm2, %v10529_v41  ;;  %v10606_v42 = vsel %vm1118_vm2, %v10524_v24, -inf  ;;  %v918_v41 = vld [vmem:[%s18550_s25 + $0x10] sm:$0xff] }
0x4866   :  { %10607 = vmax.xlane.f32.xlu1 %v10606_v42  ;;  %14574 = vmatprep.mubr.msk.f32.mxu1 %vm16564_vm3, %v16563_v19 }
0x48f3   :  { %v10608_v43 = vpop.xlane.xlu1 %10607 }
0x48f4   :  { %v10612_v44 = vsub.f32 %v10524_v24, %v10608_v43  ;;  %v919_v24 = vld [vmem:[%s18550_s25 + $0x18] sm:$0xff] }
0x48f5   :  { %v14873_v25 = vpack.c.bf16 %v919_v24, %v918_v41 }
0x48f6   :  { %v10614_v45 = vmul.f32 1.442695, %v10612_v44 }
0x48f8   :  { %15276 = vpow2.f32 %v10614_v45 }
0x4902   :  { %v15277_v51 = vpop.eup %15276 }
0x4903   :  { %v10618_v14 = vsel %vm1118_vm2, %v15277_v51, 0.0 }
0x4938   :  { %v10602_v46 = vpop.f32.mrb[76].mxu1 }
0x4939   :  { %v14566_v48 = vpop.f32.mrb[77].mxu1  ;;  %v10609_v50 = vsel %vm1118_vm2, %v10602_v46, -inf }
0x493a   :  { %10610 = vmax.xlane.f32.xlu0 %v10609_v50 }
0x493e   :  { %10619 = vadd.xlane.f32.xlu0 %v10618_v14 }
0x4954   :  { %10628 = vrot.lane.b32.xlu0 %v18005_v61, %s16575_s20 }
0x49c7   :  { %v10611_v58 = vpop.xlane.xlu0 %10610 }
0x49c8   :  { %v10613_v60 = vsub.f32 %v10602_v46, %v10611_v58 }
0x49ca   :  { %v10616_v62 = vmul.f32 1.442695, %v10613_v60 }
0x49cb   :  { %v10620_v63 = vpop.xlane.xlu0 %10619 }
0x49cc   :  { %15278 = vpow2.f32 %v10616_v62  ;;  %v13470_v62 = vld [vmem:[#allocation34] ss:$0 sm:$0xff] }
0x49cd   :  { %15280 = vrcp.f32 %v10620_v63 }
0x49cf   :  { %v10629_v49 = vpop.permute.xlu0 %10628 }
0x49d0   :  { %14568 = vmatpush3.msra.mxu0 %v10629_v49 }
0x49d1   :  { %14870 = vmatprep.subr.bf16.mxu0 %v14869_v20 }
0x49d6   :  { %v15279_v38 = vpop.eup %15278 }
0x49d7   :  { %v15281_v0 = vpop.eup %15280  ;;  %v10621_v35 = vsel %vm1118_vm2, %v15279_v38, 0.0 }
0x49d8   :  { %v10625_v37 = vmul.f32 %v15281_v0, %v15277_v51  ;;  %10622 = vadd.xlane.f32.xlu1 %v10621_v35  ;;  %v13469_v51 = vld [vmem:[#allocation32] ss:$0 sm:$0xff]  ;;  %v13471_v35 = vld [vmem:[#allocation28] ss:$0 sm:$0xff] }
0x49da   :  { %14570 = vmatmul.mubr.msk.f32.vlgmr.msra.gmra.mrb[116].mxu0 %vm1118_vm2, %v10625_v37 }
0x49db   :  { %14872 = vmatpush3.bf16.msra.mxu0 %v14869_v20 }
0x49dc   :  { %14874 = vmatprep.subr.bf16.mxu0 %v14873_v25 }
0x49df   :  { %14876 = vmatpush3.bf16.msra.mxu0 %v14873_v25 }
0x49e0   :  { %14604 = vmatprep.subr.mxu0 %v16563_v19 }
0x49e9   :  { %10704 = vrot.lane.b32.xlu1 %v18003_v54, %s16575_s20  ;;  %v14877_v54 = vpack.c.bf16 %v909_v5, %v908_v4 }
0x4a65   :  { %v10623_v61 = vpop.xlane.xlu1 %10622 }
0x4a66   :  { %15282 = vrcp.f32 %v10623_v61 }
0x4a69   :  { %v10705_v52 = vpop.permute.xlu1 %10704 }
0x4a6a   :  { %14573 = vmatpush3.msra.mxu1 %v10705_v52 }
0x4a6b   :  { %14577 = vmatprep.subr.mxu1 %v945_v59 }
0x4a70   :  { %v15283_v53 = vpop.eup %15282 }
0x4a71   :  { %v10627_v1 = vmul.f32 %v15283_v53, %v15279_v38 }
0x4a73   :  { %14575 = vmatmul.mubr.msk.f32.vlgmr.msra.gmra.mrb[78].mxu1 %vm1118_vm2, %v10627_v1 }
0x4a74   :  { %14578 = vmatpush3.msra.mxu1 %v945_v59 }
0x4a75   :  { %14878 = vmatprep.subr.bf16.mxu1 %v14877_v54 }
0x4aad   :  { %v10700_v2 = vpop.f32.mrb[116].mxu0 }
0x4aae   :  { %v14571_v3 = vpop.f32.mrb[117].mxu0  ;;  %14579 = vmatprep.mubr.msk.f32.mxu1 %vm1118_vm2, %v10700_v2 }
0x4b46   :  { %v10776_v47 = vpop.f32.mrb[78].mxu1 }
0x4b47   :  { %v14576_v8 = vpop.f32.mrb[79].mxu1  ;;  %14580 = vmatmul.mubr.msk.f32.vlgmr.msra.gmra.mrb[72].mxu1 %vm1118_vm2, %v10776_v47 }
0x4b48   :  { %14880 = vmatpush3.bf16.msra.mxu1 %v14877_v54  ;;  %14601 = vmatprep.mubr.msk.f32.mxu1 %vm1206_vm1, %v17781_v32 }
0x4b49   :  { %14882 = vmatprep.subr.bf16.mxu1 %v14881_v7 }
0x4b4c   :  { %14884 = vmatpush3.bf16.msra.mxu1 %v14881_v7 }
0x4b4d   :  { %14614 = vmatprep.subr.mxu1 %v16563_v19 }
0x4b4f   :  { %14602 = vmatmul.mubr.msk.f32.vlgmr.msra.gmra.mrb[80].mxu1 %vm1206_vm1, %v17783_v33 }
0x4b50   :  { %14616 = vmatprep.mubr.msk.f32.mxu1 %vm16564_vm3, %v16563_v19 }
0x4c1a   :  { %v14581_v16 = vpop.f32.mrb[72].mxu1 }
0x4c1b   :  { %v10870_v9 = vadd.f32 %v14581_v16, %v13468_v34  ;;  %v10852_v10 = vpop.f32.mrb[73].mxu1 }
0x4c1c   :  { %v10869_v11 = vadd.f32 %v13468_v34, %v10852_v10 }
0x4c1d   :  { %v10872_v12 = vadd.f32 %v10870_v9, %v17995_v15 }
0x4c1e   :  { %v10871_v17 = vadd.f32 %v10869_v11, %v17993_v55 }
0x4c1f   :  { %v10876_v32 = vsel %vm1206_vm1, %v10872_v12, 0.0 }
0x4c20   :  { %10877 = vadd.xlane.f32.xlu0 %v10876_v32  ;;  %v10873_v18 = vsel %vm1206_vm1, %v10871_v17, 0.0 }
0x4c21   :  { %10874 = vadd.xlane.f32.xlu1 %v10873_v18 }
0x4c22   :  { %v14603_v33 = vpop.f32.mrb[80].mxu1 }
0x4c23   :  { %v11074_v29 = vpop.f32.mrb[81].mxu1  ;;  %v18172_v39 = vadd.f32 %v14603_v33, %v13474_v27 }
0x4c24   :  { %v18168_v30 = vadd.f32 %v13474_v27, %v11074_v29 }
0x4cad   :  { %v10878_v56 = vpop.xlane.xlu0 %10877 }
0x4cae   :  { %v10880_v13 = vmul.f32 0.03125, %v10878_v56  ;;  %v10875_v22 = vpop.xlane.xlu1 %10874 }
0x4caf   :  { %v10879_v23 = vmul.f32 0.03125, %v10875_v22 }
0x4cb0   :  { %v10882_v15 = vsub.f32 %v10872_v12, %v10880_v13 }
0x4cb1   :  { %v10881_v55 = vsub.f32 %v10871_v17, %v10879_v23 }
0x4cb2   :  { %v10884_v36 = vmul.f32 %v10882_v15, %v10882_v15 }
0x4cb3   :  { %v10883_v28 = vmul.f32 %v10881_v55, %v10881_v55 }
0x4cb4   :  { %v10888_v21 = vsel %vm1206_vm1, %v10884_v36, 0.0 }
0x4cb5   :  { %10889 = vadd.xlane.f32.xlu1 %v10888_v21  ;;  %v10885_v26 = vsel %vm1206_vm1, %v10883_v28, 0.0 }
0x4cb6   :  { %10886 = vadd.xlane.f32.xlu0 %v10885_v26 }
0x4cc6   :  { %11489 = vrot.lane.b32.xlu1 %v18172_v39, %s16567_s23 }
0x4d42   :  { %v10890_v42 = vpop.xlane.xlu1 %10889 }
0x4d43   :  { %v10892_v43 = vmul.f32 0.03125, %v10890_v42  ;;  %v10887_v44 = vpop.xlane.xlu0 %10886 }
0x4d44   :  { %v10891_v45 = vmul.f32 0.03125, %v10887_v44 }
0x4d45   :  { %v10894_v46 = vadd.f32 1e-05, %v10892_v43 }
0x4d46   :  { %v10893_v48 = vadd.f32 1e-05, %v10891_v45  ;;  %v11490_v17 = vpop.permute.xlu1 %11489 }
0x4d47   :  { %15284 = vrsqrt.f32 %v10894_v46 }
0x4d48   :  { %15286 = vrsqrt.f32 %v10893_v48 }
0x4d51   :  { %v15285_v50 = vpop.eup %15284 }
0x4d52   :  { %v15287_v14 = vpop.eup %15286  ;;  %v10898_v58 = vmul.f32 %v15285_v50, %v10882_v15 }
0x4d53   :  { %v10897_v60 = vmul.f32 %v15287_v14, %v10881_v55 }
0x4d54   :  { %v10906_v63 = vmul.f32 %v13469_v51, %v10898_v58 }
0x4d55   :  { %v10905_v49 = vmul.f32 %v13469_v51, %v10897_v60 }
0x4d56   :  { %v18183_v0 = vadd.f32 %v13470_v62, %v10906_v63 }
0x4d57   :  { %v18181_v38 = vadd.f32 %v13470_v62, %v10905_v49 }
0x4d59   :  { %14590 = vmatprep.mubr.msk.f32.mxu0 %vm1206_vm1, %v18181_v38 }
0x4d5a   :  { %14591 = vmatmul.mubr.msk.f32.vlgmr.msra.gmra.mrb[118].mxu0 %vm1206_vm1, %v18183_v0 }
0x4d5b   :  { %14605 = vmatpush3.xpose.msk.msra.mxu0 %vm1118_vm2, %v18168_v30  ;;  %14606 = vmatprep.mubr.msk.f32.mxu0 %vm16564_vm3, %v16563_v19 }
0x4d5c   :  { %14609 = vmatprep.subr.mxu0 %v16563_v19 }
0x4e2d   :  { %v14592_v37 = vpop.f32.mrb[118].mxu0 }
0x4e2e   :  { %v10993_v61 = vpop.f32.mrb[119].mxu0  ;;  %v18202_v52 = vadd.f32 %v14592_v37, %v13471_v35 }
0x4e2f   :  { %v18194_v59 = vadd.f32 %v13471_v35, %v10993_v61 }
0x4e31   :  { %14607 = vmatmul.mubr.msk.f32.vlgmr.msra.gmra.mrb[120].mxu0 %vm1118_vm2, %v18194_v59 }
0x4e32   :  { %14610 = vmatpush3.xpose.msk.msra.mxu0 %vm1118_vm2, %v18172_v39  ;;  %14611 = vmatprep.mubr.msk.f32.mxu0 %vm16564_vm3, %v16563_v19 }
0x4e33   :  { %14619 = vmatprep.subr.mxu0 %v16563_v19 }
0x4e35   :  { %14612 = vmatmul.mubr.msk.f32.vlgmr.msra.gmra.mrb[122].mxu0 %vm1118_vm2, %v18202_v52 }
0x4e36   :  { %14621 = vmatprep.mubr.msk.f32.mxu0 %vm16564_vm3, %v16563_v19 }
0x4f04   :  { %v11155_v53 = vpop.f32.mrb[120].mxu0 }
0x4f05   :  { %v14608_v1 = vpop.f32.mrb[121].mxu0  ;;  %v11235_v5 = vsel %vm1118_vm2, %v11155_v53, -inf }
0x4f08   :  { %v11231_v2 = vpop.f32.mrb[122].mxu0 }
0x4f09   :  { %v14613_v3 = vpop.f32.mrb[123].mxu0  ;;  %v11238_v4 = vsel %vm1118_vm2, %v11231_v2, -inf }
0x4f0a   :  { %11239 = vmax.xlane.f32.xlu0 %v11238_v4 }
0x4f20   :  { %11333 = vrot.lane.b32.xlu0 %v18172_v39, %s16565_s8 }
0x4f3f   :  { %11236 = vmax.xlane.f32.xlu0 %v11235_v5 }
0x4f55   :  { %11257 = vrot.lane.b32.xlu0 %v18168_v30, %s16565_s8  ;;  %s18551_s8 = sld [smem:[#allocation118_spill]] }
0x4f59   :  { %11409 = vrot.lane.b32.xlu0 %v18194_v59, %s16567_s23 }
0x4f97   :  { %v11240_v54 = vpop.xlane.xlu0 %11239 }
0x4f98   :  { %v11242_v6 = vsub.f32 %v11231_v2, %v11240_v54 }
0x4f9a   :  { %v11245_v57 = vmul.f32 1.442695, %v11242_v6 }
0x4f9b   :  { %v11334_v7 = vpop.permute.xlu0 %11333 }
0x4f9c   :  { %15288 = vpow2.f32 %v11245_v57  ;;  %14620 = vmatpush3.msra.mxu0 %v11334_v7  ;;  %v913_v7 = vld [vmem:[%s18551_s8 + $0x8] sm:$0xff] }
0x4f9d   :  { %14629 = vmatprep.subr.mxu0 %v16563_v19 }
0x4fa6   :  { %v15289_v47 = vpop.eup %15288 }
0x4fa7   :  { %v11250_v8 = vsel %vm1118_vm2, %v15289_v47, 0.0 }
0x4fa8   :  { %11251 = vadd.xlane.f32.xlu1 %v11250_v8 }
0x4fb9   :  { %11487 = vrot.lane.b32.xlu1 %v18202_v52, %s16567_s23 }
0x4fcc   :  { %v11237_v34 = vpop.xlane.xlu0 %11236 }
0x4fcd   :  { %v11241_v16 = vsub.f32 %v11155_v53, %v11237_v34 }
0x4fcf   :  { %v11243_v9 = vmul.f32 1.442695, %v11241_v16 }
0x4fd0   :  { %v11258_v10 = vpop.permute.xlu0 %11257 }
0x4fd1   :  { %15290 = vpow2.f32 %v11243_v9  ;;  %14615 = vmatpush3.msra.mxu1 %v11258_v10 }
0x4fd2   :  { %14624 = vmatprep.subr.mxu1 %v16563_v19 }
0x4fd4   :  { %v11410_v23 = vpop.permute.xlu0 %11409 }
0x4fdb   :  { %v15291_v11 = vpop.eup %15290 }
0x4fdc   :  { %v11247_v12 = vsel %vm1118_vm2, %v15291_v11, 0.0 }
0x4fdd   :  { %11248 = vadd.xlane.f32.xlu1 %v11247_v12 }
0x4fee   :  { %11411 = vrot.lane.b32.xlu1 %v18168_v30, %s16567_s23  ;;  %s18552_s23 = sld [smem:[#allocation120_spill]] }
0x5035   :  { %v11252_v32 = vpop.xlane.xlu1 %11251 }
0x5036   :  { %15292 = vrcp.f32 %v11252_v32 }
0x5039   :  { %v11488_v33 = vpop.permute.xlu1 %11487 }
0x5040   :  { %v15293_v18 = vpop.eup %15292 }
0x5041   :  { %v11256_v27 = vmul.f32 %v15293_v18, %v15289_v47  ;;  %v912_v47 = vld [vmem:[%s18551_s8] sm:$0xff] }
0x5043   :  { %14622 = vmatmul.mubr.msk.f32.vlgmr.msra.gmra.mrb[124].mxu0 %vm1118_vm2, %v11256_v27 }
0x5044   :  { %14630 = vmatpush3.xpose.msk.msra.mxu0 %vm1118_vm2, %v11490_v17  ;;  %14631 = vmatprep.mubr.msk.f32.mxu0 %vm16564_vm3, %v16563_v19 }
0x5045   :  { %14639 = vmatprep.subr.mxu0 %v16563_v19 }
0x5047   :  { %14632 = vmatmul.mubr.msk.f32.vlgmr.msra.gmra.mrb[126].mxu0 %vm1118_vm2, %v11488_v33 }
0x5048   :  { %14641 = vmatprep.mubr.msk.f32.mxu0 %vm16564_vm3, %v16563_v19 }
0x506a   :  { %v11249_v29 = vpop.xlane.xlu1 %11248 }
0x506b   :  { %15294 = vrcp.f32 %v11249_v29  ;;  %v914_v29 = vld [vmem:[%s18551_s8 + $0x10] sm:$0xff] }
0x506e   :  { %v11412_v22 = vpop.permute.xlu1 %11411 }
0x5075   :  { %v15295_v56 = vpop.eup %15294 }
0x5076   :  { %v11254_v13 = vmul.f32 %v15295_v56, %v15291_v11 }
0x5078   :  { %14617 = vmatmul.mubr.msk.f32.vlgmr.msra.gmra.mrb[82].mxu1 %vm1118_vm2, %v11254_v13 }
0x5079   :  { %14625 = vmatpush3.xpose.msk.msra.mxu1 %vm1118_vm2, %v11412_v22  ;;  %14626 = vmatprep.mubr.msk.f32.mxu1 %vm16564_vm3, %v16563_v19 }
0x507a   :  { %14634 = vmatprep.subr.mxu1 %v16563_v19 }
0x507c   :  { %14627 = vmatmul.mubr.msk.f32.vlgmr.msra.gmra.mrb[84].mxu1 %vm1118_vm2, %v11410_v23 }
0x507d   :  { %14636 = vmatprep.mubr.msk.f32.mxu1 %vm16564_vm3, %v16563_v19 }
0x5116   :  { %v18241_v15 = vpop.f32.mrb[124].mxu0 }
0x5117   :  { %v14623_v55 = vpop.f32.mrb[125].mxu0 }
0x511a   :  { %v11561_v36 = vpop.f32.mrb[126].mxu0 }
0x511b   :  { %v14633_v28 = vpop.f32.mrb[127].mxu0  ;;  %v11568_v21 = vsel %vm1118_vm2, %v11561_v36, -inf }
0x511c   :  { %11569 = vmax.xlane.f32.xlu1 %v11568_v21 }
0x512d   :  { %11903 = vrot.lane.b32.xlu1 %v18168_v30, %s16571_s0 }
0x5131   :  { %11901 = vrot.lane.b32.xlu1 %v18194_v59, %s16571_s0 }
0x5135   :  { %11979 = vrot.lane.b32.xlu1 %v18202_v52, %s16571_s0 }
0x514b   :  { %v18250_v26 = vpop.f32.mrb[82].mxu1 }
0x514c   :  { %v14618_v31 = vpop.f32.mrb[83].mxu1 }
0x514f   :  { %v11483_v40 = vpop.f32.mrb[84].mxu1 }
0x5150   :  { %v14628_v20 = vpop.f32.mrb[85].mxu1  ;;  %v11565_v44 = vsel %vm1118_vm2, %v11483_v40, -inf }
0x51a9   :  { %v11570_v41 = vpop.xlane.xlu1 %11569 }
0x51aa   :  { %v11572_v24 = vsub.f32 %v11561_v36, %v11570_v41 }
0x51ac   :  { %v11575_v25 = vmul.f32 1.442695, %v11572_v24 }
0x51ad   :  { %v11904_v48 = vpop.permute.xlu1 %11903 }
0x51ae   :  { %15296 = vpow2.f32 %v11575_v25 }
0x51b1   :  { %v11902_v14 = vpop.permute.xlu1 %11901 }
0x51b5   :  { %v11980_v60 = vpop.permute.xlu1 %11979 }
0x51b8   :  { %v15297_v42 = vpop.eup %15296 }
0x51b9   :  { %v11580_v43 = vsel %vm1118_vm2, %v15297_v42, 0.0 }
0x51ba   :  { %11581 = vadd.xlane.f32.xlu0 %v11580_v43 }
0x51d0   :  { %11663 = vrot.lane.b32.xlu0 %v18172_v39, %s16568_s26 }
0x51d4   :  { %11981 = vrot.lane.b32.xlu0 %v18172_v39, %s16571_s0  ;;  %s16576_s0 = smov [#allocation74]  }
0x51f3   :  { %11566 = vmax.xlane.f32.xlu0 %v11565_v44 }
0x5209   :  { %11587 = vrot.lane.b32.xlu0 %v18168_v30, %s16568_s26  ;;  %s18553_s26 = sld [smem:[#allocation121_spill]] }
0x520d   :  { %12079 = vrot.lane.b32.xlu0 %v18168_v30, %s16569_s12 }
0x5211   :  { %12316 = vrot.lane.b32.xlu0 %v18168_v30, %s16574_s30 }
0x5215   :  { %12394 = vrot.lane.b32.xlu0 %v18172_v39, %s16574_s30 }
0x5219   :  { %12314 = vrot.lane.b32.xlu0 %v18194_v59, %s16574_s30 }
0x521d   :  { %12392 = vrot.lane.b32.xlu0 %v18202_v52, %s16574_s30 }
0x5247   :  { %v11582_v45 = vpop.xlane.xlu0 %11581 }
0x5248   :  { %15298 = vrcp.f32 %v11582_v45 }
0x524b   :  { %v11664_v46 = vpop.permute.xlu0 %11663 }
0x524c   :  { %14640 = vmatpush3.msra.mxu0 %v11664_v46 }
0x524d   :  { %14654 = vmatprep.subr.mxu0 %v16563_v19 }
0x524f   :  { %v11982_v58 = vpop.permute.xlu0 %11981 }
0x5252   :  { %v15299_v50 = vpop.eup %15298 }
0x5253   :  { %v11586_v51 = vmul.f32 %v15299_v50, %v15297_v42 }
0x5255   :  { %14642 = vmatmul.mubr.msk.f32.vlgmr.msra.gmra.mrb[128].mxu0 %vm1118_vm2, %v11586_v51 }
0x5256   :  { %14655 = vmatpush3.xpose.msk.msra.mxu0 %vm1118_vm2, %v11904_v48  ;;  %14656 = vmatprep.mubr.msk.f32.mxu0 %vm16564_vm3, %v16563_v19 }
0x5257   :  { %14659 = vmatprep.subr.mxu0 %v16563_v19 }
0x5259   :  { %14657 = vmatmul.mubr.msk.f32.vlgmr.msra.gmra.mrb[130].mxu0 %vm1118_vm2, %v11902_v14 }
0x525a   :  { %14660 = vmatpush3.xpose.msk.msra.mxu0 %vm1118_vm2, %v11982_v58  ;;  %14661 = vmatprep.mubr.msk.f32.mxu0 %vm16564_vm3, %v16563_v19 }
0x525b   :  { %14669 = vmatprep.subr.mxu0 %v16563_v19 }
0x525d   :  { %14662 = vmatmul.mubr.msk.f32.vlgmr.msra.gmra.mrb[132].mxu0 %vm1118_vm2, %v11980_v60 }
0x525e   :  { %14671 = vmatprep.mubr.msk.f32.mxu0 %vm16564_vm3, %v16563_v19 }
0x5280   :  { %v11567_v62 = vpop.xlane.xlu0 %11566 }
0x5281   :  { %v11571_v63 = vsub.f32 %v11483_v40, %v11567_v62 }
0x5283   :  { %v11573_v49 = vmul.f32 1.442695, %v11571_v63 }
0x5284   :  { %v11588_v35 = vpop.permute.xlu0 %11587 }
0x5285   :  { %15300 = vpow2.f32 %v11573_v49  ;;  %14635 = vmatpush3.msra.mxu1 %v11588_v35 }
0x5286   :  { %14644 = vmatprep.subr.mxu1 %v913_v7 }
0x5288   :  { %v12080_v56 = vpop.permute.xlu0 %12079 }
0x528c   :  { %v12317_v55 = vpop.permute.xlu0 %12316 }
0x528f   :  { %v15301_v37 = vpop.eup %15300 }
0x5290   :  { %v11577_v61 = vsel %vm1118_vm2, %v15301_v37, 0.0 }
0x5291   :  { %11578 = vadd.xlane.f32.xlu1 %v11577_v61 }
0x531e   :  { %v11579_v59 = vpop.xlane.xlu1 %11578 }
0x531f   :  { %15302 = vrcp.f32 %v11579_v59 }
0x5328   :  { %v11735_v52 = vpop.f32.mrb[128].mxu0 }
0x5329   :  { %v15303_v53 = vpop.eup %15302  ;;  %v14643_v1 = vpop.f32.mrb[129].mxu0 }
0x532a   :  { %v11584_v2 = vmul.f32 %v15303_v53, %v15301_v37  ;;  %v915_v53 = vld [vmem:[%s18551_s8 + $0x18] sm:$0xff] }
0x532c   :  { %14637 = vmatmul.mubr.msk.f32.vlgmr.msra.gmra.mrb[86].mxu1 %vm1118_vm2, %v11584_v2  ;;  %v11975_v3 = vpop.f32.mrb[130].mxu0 }
0x532d   :  { %v14658_v4 = vpop.f32.mrb[131].mxu0  ;;  %v12057_v5 = vsel %vm1118_vm2, %v11975_v3, -inf  ;;  %14645 = vmatpush3.msra.mxu1 %v913_v7 }
0x532e   :  { %12058 = vmax.xlane.f32.xlu1 %v12057_v5  ;;  %14649 = vmatprep.subr.mxu1 %v912_v47 }
0x5330   :  { %v12053_v54 = vpop.f32.mrb[132].mxu0 }
0x5331   :  { %v14663_v6 = vpop.f32.mrb[133].mxu0  ;;  %v12060_v57 = vsel %vm1118_vm2, %v12053_v54, -inf }
0x5332   :  { %12061 = vmax.xlane.f32.xlu1 %v12060_v57 }
0x53bb   :  { %v12059_v8 = vpop.xlane.xlu1 %12058 }
0x53bc   :  { %v12063_v34 = vsub.f32 %v11975_v3, %v12059_v8 }
0x53be   :  { %v12065_v16 = vmul.f32 1.442695, %v12063_v34 }
0x53bf   :  { %v12062_v9 = vpop.xlane.xlu1 %12061 }
0x53c0   :  { %15304 = vpow2.f32 %v12065_v16  ;;  %v12064_v10 = vsub.f32 %v12053_v54, %v12062_v9 }
0x53c2   :  { %v12067_v11 = vmul.f32 1.442695, %v12064_v10 }
0x53c4   :  { %15306 = vpow2.f32 %v12067_v11 }
0x53ca   :  { %v15305_v12 = vpop.eup %15304 }
0x53cb   :  { %v12069_v17 = vsel %vm1118_vm2, %v15305_v12, 0.0 }
0x53cc   :  { %12070 = vadd.xlane.f32.xlu1 %v12069_v17 }
0x53ce   :  { %v15307_v32 = vpop.eup %15306 }
0x53cf   :  { %v12072_v18 = vsel %vm1118_vm2, %v15307_v32, 0.0 }
0x53d0   :  { %12073 = vadd.xlane.f32.xlu1 %v12072_v18 }
0x53e1   :  { %12155 = vrot.lane.b32.xlu1 %v18172_v39, %s16569_s12  ;;  %s18554_s12 = sld [smem:[#allocation132_spill]] }
0x53ff   :  { %v11659_v27 = vpop.f32.mrb[86].mxu1 }
0x5400   :  { %v14638_v33 = vpop.f32.mrb[87].mxu1  ;;  %14646 = vmatprep.mubr.msk.f32.mxu1 %vm1118_vm2, %v11659_v27 }
0x5401   :  { %14647 = vmatmul.mubr.msk.f32.vlgmr.msra.gmra.mrb[88].mxu1 %vm1118_vm2, %v11735_v52 }
0x5402   :  { %14651 = vmatprep.mubr.msk.f32.mxu1 %vm1118_vm2, %v18250_v26  ;;  %14650 = vmatpush3.msra.mxu1 %v912_v47 }
0x5403   :  { %14664 = vmatprep.subr.mxu1 %v16563_v19 }
0x5409   :  { %14652 = vmatmul.mubr.msk.f32.vlgmr.msra.gmra.mrb[88].mxu1 %vm1118_vm2, %v18241_v15  ;;  %v12395_v15 = vpop.permute.xlu0 %12394 }
0x540a   :  { %14665 = vmatpush3.msra.mxu1 %v12080_v56  ;;  %14666 = vmatprep.mubr.msk.f32.mxu1 %vm16564_vm3, %v16563_v19  ;;  %v920_v56 = vld [vmem:[%s18552_s23] sm:$0xff] }
0x540b   :  { %14674 = vmatprep.subr.mxu1 %v914_v29 }
0x540d   :  { %v12315_v31 = vpop.permute.xlu0 %12314 }
0x5411   :  { %v12393_v25 = vpop.permute.xlu0 %12392 }
0x5459   :  { %v12071_v13 = vpop.xlane.xlu1 %12070 }
0x545a   :  { %15308 = vrcp.f32 %v12071_v13  ;;  %v921_v13 = vld [vmem:[%s18552_s23 + $0x8] sm:$0xff] }
0x545d   :  { %v12074_v22 = vpop.xlane.xlu1 %12073 }
0x545e   :  { %15310 = vrcp.f32 %v12074_v22  ;;  %v14885_v22 = vpack.c.bf16 %v921_v13, %v920_v56 }
0x5461   :  { %v12156_v23 = vpop.permute.xlu1 %12155 }
0x5462   :  { %14670 = vmatpush3.msra.mxu0 %v12156_v23  ;;  %v922_v23 = vld [vmem:[%s18552_s23 + $0x10] sm:$0xff] }
0x5463   :  { %14679 = vmatprep.subr.mxu0 %v16563_v19 }
0x5464   :  { %v15309_v36 = vpop.eup %15308 }
0x5465   :  { %v12076_v28 = vmul.f32 %v15309_v36, %v15305_v12 }
0x5467   :  { %14667 = vmatmul.mubr.msk.f32.vlgmr.msra.gmra.mrb[90].mxu1 %vm1118_vm2, %v12076_v28  ;;  %v925_v28 = vld [vmem:[%s18553_s26] sm:$0xff] }
0x5468   :  { %v15311_v21 = vpop.eup %15310  ;;  %14675 = vmatpush3.msra.mxu1 %v914_v29 }
0x5469   :  { %v12078_v26 = vmul.f32 %v15311_v21, %v15307_v32  ;;  %14684 = vmatprep.subr.mxu1 %v16563_v19  ;;  %v926_v21 = vld [vmem:[%s18553_s26 + $0x8] sm:$0xff] }
0x546b   :  { %14672 = vmatmul.mubr.msk.f32.vlgmr.msra.gmra.mrb[134].mxu0 %vm1118_vm2, %v12078_v26  ;;  %v14893_v26 = vpack.c.bf16 %v926_v21, %v925_v28  ;;  %v13519_v28 = vld [vmem:[#allocation40] ss:$0 sm:$0xff] }
0x546c   :  { %14680 = vmatpush3.xpose.msk.msra.mxu0 %vm1118_vm2, %v12317_v55  ;;  %14681 = vmatprep.mubr.msk.f32.mxu0 %vm16564_vm3, %v16563_v19  ;;  %v923_v55 = vld [vmem:[%s18552_s23 + $0x18] sm:$0xff] }
0x546d   :  { %14689 = vmatprep.subr.mxu0 %v16563_v19  ;;  %v14889_v36 = vpack.c.bf16 %v923_v55, %v922_v23  ;;  %v13518_v23 = vld [vmem:[#allocation38] ss:$0 sm:$0xff] }
0x546f   :  { %14682 = vmatmul.mubr.msk.f32.vlgmr.msra.gmra.mrb[136].mxu0 %vm1118_vm2, %v12315_v31  ;;  %v928_v31 = vld [vmem:[%s18553_s26 + $0x18] sm:$0xff] }
0x5470   :  { %14691 = vmatprep.mubr.msk.f32.mxu0 %vm16564_vm3, %v16563_v19 }
0x553a   :  { %v12151_v40 = vpop.f32.mrb[90].mxu1 }
0x553b   :  { %v14668_v20 = vpop.f32.mrb[91].mxu1  ;;  %14676 = vmatprep.mubr.msk.f32.mxu1 %vm1118_vm2, %v12151_v40 }
0x553c   :  { %v929_v20 = vld [vmem:[%s18553_s26 + $0x20] sm:$0xff] }
0x553e   :  { %v12227_v41 = vpop.f32.mrb[134].mxu0 }
0x553f   :  { %v14673_v24 = vpop.f32.mrb[135].mxu0  ;;  %14677 = vmatmul.mubr.msk.f32.vlgmr.msra.gmra.mrb[88].mxu1 %vm1118_vm2, %v12227_v41  ;;  %v930_v41 = vld [vmem:[%s18553_s26 + $0x28] sm:$0xff] }
0x5540   :  { %14685 = vmatpush3.xpose.msk.msra.mxu1 %vm1118_vm2, %v12395_v15  ;;  %14686 = vmatprep.mubr.msk.f32.mxu1 %vm16564_vm3, %v16563_v19  ;;  %v927_v15 = vld [vmem:[%s18553_s26 + $0x10] sm:$0xff]  ;;  %v14901_v24 = vpack.c.bf16 %v930_v41, %v929_v20 }
0x5541   :  { %14694 = vmatprep.subr.mxu1 %v16563_v19  ;;  %v14897_v40 = vpack.c.bf16 %v928_v31, %v927_v15 }
0x5542   :  { %v12388_v42 = vpop.f32.mrb[136].mxu0 }
0x5543   :  { %v14683_v43 = vpop.f32.mrb[137].mxu0  ;;  %14687 = vmatmul.mubr.msk.f32.vlgmr.msra.gmra.mrb[92].mxu1 %vm1118_vm2, %v12393_v25  ;;  %v12470_v44 = vsel %vm1118_vm2, %v12388_v42, -inf }
0x5544   :  { %12471 = vmax.xlane.f32.xlu1 %v12470_v44  ;;  %14696 = vmatprep.mubr.msk.f32.mxu1 %vm16564_vm3, %v16563_v19 }
0x55d1   :  { %v12472_v45 = vpop.xlane.xlu1 %12471 }
0x55d2   :  { %v12476_v46 = vsub.f32 %v12388_v42, %v12472_v45 }
0x55d4   :  { %v12478_v48 = vmul.f32 1.442695, %v12476_v46 }
0x55d6   :  { %15312 = vpow2.f32 %v12478_v48 }
0x55e0   :  { %v15313_v58 = vpop.eup %15312 }
0x55e1   :  { %v12482_v60 = vsel %vm1118_vm2, %v15313_v58, 0.0 }
0x5616   :  { %v12466_v50 = vpop.f32.mrb[92].mxu1 }
0x5617   :  { %v14688_v51 = vpop.f32.mrb[93].mxu1  ;;  %v12473_v14 = vsel %vm1118_vm2, %v12466_v50, -inf }
0x5618   :  { %12474 = vmax.xlane.f32.xlu0 %v12473_v14 }
0x561c   :  { %12483 = vadd.xlane.f32.xlu0 %v12482_v60  ;;  %v13511_v60 = vld [vmem:[#allocation37] ss:$0 sm:$0xff] }
0x5632   :  { %12492 = vrot.lane.b32.xlu0 %v18168_v30, %s16573_s28 }
0x56a5   :  { %v12475_v62 = vpop.xlane.xlu0 %12474 }
0x56a6   :  { %v12477_v63 = vsub.f32 %v12466_v50, %v12475_v62  ;;  %v13510_v50 = vld [vmem:[#allocation35] ss:$0 sm:$0xff] }
0x56a8   :  { %v12480_v19 = vmul.f32 1.442695, %v12477_v63 }
0x56a9   :  { %v12484_v49 = vpop.xlane.xlu0 %12483 }
0x56aa   :  { %15314 = vpow2.f32 %v12480_v19 }
0x56ab   :  { %15316 = vrcp.f32 %v12484_v49 }
0x56ad   :  { %v12493_v35 = vpop.permute.xlu0 %12492 }
0x56ae   :  { %14690 = vmatpush3.msra.mxu0 %v12493_v35  ;;  %v931_v35 = vld [vmem:[%s18553_s26 + $0x30] sm:$0xff] }
0x56af   :  { %14886 = vmatprep.subr.bf16.mxu0 %v14885_v22 }
0x56b4   :  { %v15315_v37 = vpop.eup %15314 }
0x56b5   :  { %v15317_v61 = vpop.eup %15316  ;;  %v12485_v59 = vsel %vm1118_vm2, %v15315_v37, 0.0 }
0x56b6   :  { %v12489_v52 = vmul.f32 %v15317_v61, %v15313_v58  ;;  %12486 = vadd.xlane.f32.xlu1 %v12485_v59  ;;  %v13512_v59 = vld [vmem:[#allocation29] ss:$0 sm:$0xff] }
0x56b8   :  { %14692 = vmatmul.mubr.msk.f32.vlgmr.msra.gmra.mrb[138].mxu0 %vm1118_vm2, %v12489_v52 }
0x56b9   :  { %14888 = vmatpush3.bf16.msra.mxu0 %v14885_v22 }
0x56ba   :  { %14890 = vmatprep.subr.bf16.mxu0 %v14889_v36 }
0x56bd   :  { %14892 = vmatpush3.bf16.msra.mxu0 %v14889_v36 }
0x56c7   :  { %12568 = vrot.lane.b32.xlu1 %v18172_v39, %s16573_s28  ;;  %v13509_v39 = vld [vmem:[#allocation26] ss:$0 sm:$0xff]  ;;  %s13135_s28 = sshll.u32 %s16576_s0, 4  ;;  %s13136_s28 = int_to_ptr.vmem [resolvable:$true] %s13135_s28 }
0x56c8   :  { %s16366_s30 = scalar_lea.vmem %s13136_s28, 256  ;;  %p16371_p13 = scmp.lt.s32.totalorder %s13136_s28, %s13136_s28 }
0x56c9   :  { %p16367_p12 = scmp.ne.s32.totalorder %s13136_s28, %s16366_s30  ;;  %p16372_p0 = scmp.lt.s32.totalorder %s16366_s30, %s16366_s30 }
0x56cb   :  { %p16373_p1 = por %p16372_p0, %p16371_p13 }
0x56cd   :  { %p16374_p2 = pnand %p16373_p1, %p16367_p12 }
0x5743   :  { %v12487_v30 = vpop.xlane.xlu1 %12486 }
0x5744   :  { %15318 = vrcp.f32 %v12487_v30 }
0x5747   :  { %v12569_v1 = vpop.permute.xlu1 %12568 }
0x5748   :  { %14695 = vmatpush3.msra.mxu1 %v12569_v1 }
0x5749   :  { %14699 = vmatprep.subr.mxu1 %v915_v53 }
0x574e   :  { %v15319_v2 = vpop.eup %15318 }
0x574f   :  { %v12491_v3 = vmul.f32 %v15319_v2, %v15315_v37  ;;  %v932_v37 = vld [vmem:[%s18553_s26 + $0x38] sm:$0xff] }
0x5750   :  { %v14905_v61 = vpack.c.bf16 %v932_v37, %v931_v35 }
0x5751   :  { %14697 = vmatmul.mubr.msk.f32.vlgmr.msra.gmra.mrb[94].mxu1 %vm1118_vm2, %v12491_v3 }
0x5752   :  { %14700 = vmatpush3.msra.mxu1 %v915_v53 }
0x5753   :  { %14894 = vmatprep.subr.bf16.mxu1 %v14893_v26 }
0x578b   :  { %v12564_v4 = vpop.f32.mrb[138].mxu0 }
0x578c   :  { %v14693_v5 = vpop.f32.mrb[139].mxu0  ;;  %14701 = vmatprep.mubr.msk.f32.mxu1 %vm1118_vm2, %v12564_v4  ;;  %v13515_v4 = vld [vmem:[#allocation31] ss:$0 sm:$0xff] }
0x5824   :  { %v12640_v54 = vpop.f32.mrb[94].mxu1 }
0x5825   :  { %v14698_v6 = vpop.f32.mrb[95].mxu1  ;;  %14702 = vmatmul.mubr.msk.f32.vlgmr.msra.gmra.mrb[88].mxu1 %vm1118_vm2, %v12640_v54 }
0x5826   :  { %14896 = vmatpush3.bf16.msra.mxu1 %v14893_v26 }
0x5827   :  { %14898 = vmatprep.subr.bf16.mxu1 %v14897_v40 }
0x582a   :  { %14900 = vmatpush3.bf16.msra.mxu1 %v14897_v40 }
0x582b   :  { %14902 = vmatprep.subr.bf16.mxu1 %v14901_v24 }
0x582e   :  { %14904 = vmatpush3.bf16.msra.mxu1 %v14901_v24 }
0x582f   :  { %14906 = vmatprep.subr.bf16.mxu1 %v14905_v61 }
0x5832   :  { %14908 = vmatpush3.bf16.msra.mxu1 %v14905_v61 }
0x58f8   :  { %v14703_v57 = vpop.f32.mrb[88].mxu1 }
0x58f9   :  { %v12734_v7 = vadd.f32 %v14703_v57, %v13509_v39  ;;  %v12716_v47 = vpop.f32.mrb[89].mxu1 }
0x58fa   :  { %v12733_v8 = vadd.f32 %v13509_v39, %v12716_v47 }
0x58fb   :  { %v12736_v34 = vadd.f32 %v12734_v7, %v18183_v0 }
0x58fc   :  { %v12735_v16 = vadd.f32 %v12733_v8, %v18181_v38 }
0x58fd   :  { %v12740_v9 = vsel %vm1206_vm1, %v12736_v34, 0.0 }
0x58fe   :  { %12741 = vadd.xlane.f32.xlu0 %v12740_v9  ;;  %v12737_v10 = vsel %vm1206_vm1, %v12735_v16, 0.0 }
0x58ff   :  { %12738 = vadd.xlane.f32.xlu1 %v12737_v10 }
0x598b   :  { %v12742_v11 = vpop.xlane.xlu0 %12741 }
0x598c   :  { %v12744_v12 = vmul.f32 0.03125, %v12742_v11  ;;  %v12739_v17 = vpop.xlane.xlu1 %12738 }
0x598d   :  { %v12743_v32 = vmul.f32 0.03125, %v12739_v17 }
0x598e   :  { %v12746_v18 = vsub.f32 %v12736_v34, %v12744_v12 }
0x598f   :  { %v12745_v27 = vsub.f32 %v12735_v16, %v12743_v32 }
0x5990   :  { %v12748_v33 = vmul.f32 %v12746_v18, %v12746_v18 }
0x5991   :  { %v12747_v0 = vmul.f32 %v12745_v27, %v12745_v27 }
0x5992   :  { %v12752_v38 = vsel %vm1206_vm1, %v12748_v33, 0.0 }
0x5993   :  { %12753 = vadd.xlane.f32.xlu1 %v12752_v38  ;;  %v12749_v29 = vsel %vm1206_vm1, %v12747_v0, 0.0 }
0x5994   :  { %12750 = vadd.xlane.f32.xlu0 %v12749_v29 }
0x5a20   :  { %v12754_v25 = vpop.xlane.xlu1 %12753 }
0x5a21   :  { %v12756_v42 = vmul.f32 0.03125, %v12754_v25  ;;  %v12751_v43 = vpop.xlane.xlu0 %12750 }
0x5a22   :  { %v12755_v44 = vmul.f32 0.03125, %v12751_v43 }
0x5a23   :  { %v12758_v45 = vadd.f32 1e-05, %v12756_v42 }
0x5a24   :  { %v12757_v46 = vadd.f32 1e-05, %v12755_v44 }
0x5a25   :  { %15320 = vrsqrt.f32 %v12758_v45 }
0x5a26   :  { %15322 = vrsqrt.f32 %v12757_v46 }
0x5a2f   :  { %v15321_v48 = vpop.eup %15320 }
0x5a30   :  { %v15323_v51 = vpop.eup %15322  ;;  %v12762_v14 = vmul.f32 %v15321_v48, %v12746_v18 }
0x5a31   :  { %v12761_v58 = vmul.f32 %v15323_v51, %v12745_v27 }
0x5a32   :  { %v12770_v62 = vmul.f32 %v13510_v50, %v12762_v14  ;;  %v955_v14 = vld [vmem:[%s18554_s12] sm:$0xff] }
0x5a33   :  { %v12769_v63 = vmul.f32 %v13510_v50, %v12761_v58  ;;  %v956_v58 = vld [vmem:[%s18554_s12 + $0x8] sm:$0xff] }
0x5a34   :  { %v12778_v49 = vadd.f32 %v13511_v60, %v12770_v62  ;;  %v957_v62 = vld [vmem:[%s18554_s12 + $0x10] sm:$0xff] }
0x5a35   :  { %v12777_v19 = vadd.f32 %v13511_v60, %v12769_v63  ;;  %v14909_v60 = vpack.c.bf16 %v956_v58, %v955_v14  ;;  %v958_v63 = vld [vmem:[%s18554_s12 + $0x18] sm:$0xff] }
0x5a37   :  { %14712 = vmatprep.mubr.msk.f32.mxu0 %vm1206_vm1, %v12777_v19  ;;  %14910 = vmatprep.subr.bf16.mxu0 %v14909_v60 }
0x5a38   :  { %14713 = vmatmul.mubr.msk.f32.vlgmr.msra.gmra.mrb[140].mxu0 %vm1206_vm1, %v12778_v49 }
0x5a39   :  { %14912 = vmatpush3.bf16.msra.mxu0 %v14909_v60 }
0x5b0b   :  { %v14714_v52 = vpop.f32.mrb[140].mxu0 }
0x5b0c   :  { %v12863_v30 = vadd.f32 %v14714_v52, %v13512_v59  ;;  %v12857_v53 = vpop.f32.mrb[141].mxu0 }
0x5b0d   :  { %v12858_v1 = vadd.f32 %v13512_v59, %v12857_v53  ;;  %v13520_v53 = vld [vmem:[#allocation44] ss:$0 sm:$0xff] }
0x5b0e   :  { %v12867_v3 = vmax.f32 %v12863_v30, 0.0 }
0x5b0f   :  { %v12866_v2 = vmax.f32 %v12858_v1, 0.0 }
0x5b11   :  { %14731 = vmatprep.mubr.msk.f32.mxu1 %vm3082_vm4, %v12866_v2 }
0x5b12   :  { %14732 = vmatmul.mubr.msk.f32.vlgmr.msra.gmra.mrb[96].mxu1 %vm3082_vm4, %v12867_v3 }
0x5be5   :  { %v14733_v5 = vpop.f32.mrb[96].mxu1 }
0x5be6   :  { %v12952_v54 = vadd.f32 %v14733_v5, %v13515_v4  ;;  %v12946_v6 = vpop.f32.mrb[97].mxu1 }
0x5be7   :  { %v12947_v39 = vadd.f32 %v13515_v4, %v12946_v6  ;;  %v13521_v4 = vld [vmem:[#allocation46] ss:$0 sm:$0xff] }
0x5be8   :  { %v12956_v57 = vadd.f32 %v12952_v54, %v12778_v49 }
0x5be9   :  { %v12955_v7 = vadd.f32 %v12947_v39, %v12777_v19  ;;  %v14913_v19 = vpack.c.bf16 %v958_v63, %v957_v62 }
0x5bea   :  { %v12960_v47 = vsel %vm1206_vm1, %v12956_v57, 0.0 }
0x5beb   :  { %12961 = vadd.xlane.f32.xlu1 %v12960_v47  ;;  %v12957_v8 = vsel %vm1206_vm1, %v12955_v7, 0.0  ;;  %14914 = vmatprep.subr.bf16.mxu0 %v14913_v19 }
0x5bec   :  { %12958 = vadd.xlane.f32.xlu0 %v12957_v8  ;;  %14916 = vmatpush3.bf16.msra.mxu0 %v14913_v19 }
0x5c78   :  { %v12962_v34 = vpop.xlane.xlu1 %12961 }
0x5c79   :  { %v12964_v16 = vmul.f32 0.03125, %v12962_v34  ;;  %v12959_v9 = vpop.xlane.xlu0 %12958 }
0x5c7a   :  { %v12963_v10 = vmul.f32 0.03125, %v12959_v9 }
0x5c7b   :  { %v12966_v11 = vsub.f32 %v12956_v57, %v12964_v16  ;;  %v13522_v57 = vld [vmem:[#allocation50] ss:$0 sm:$0xff] }
0x5c7c   :  { %v12965_v12 = vsub.f32 %v12955_v7, %v12963_v10 }
0x5c7d   :  { %v12968_v17 = vmul.f32 %v12966_v11, %v12966_v11 }
0x5c7e   :  { %v12967_v32 = vmul.f32 %v12965_v12, %v12965_v12 }
0x5c7f   :  { %v12972_v18 = vsel %vm1206_vm1, %v12968_v17, 0.0 }
0x5c80   :  { %12973 = vadd.xlane.f32.xlu1 %v12972_v18  ;;  %v12969_v27 = vsel %vm1206_vm1, %v12967_v32, 0.0 }
0x5c81   :  { %12970 = vadd.xlane.f32.xlu0 %v12969_v27 }
0x5d0d   :  { %v12974_v33 = vpop.xlane.xlu1 %12973 }
0x5d0e   :  { %v12976_v0 = vmul.f32 0.03125, %v12974_v33  ;;  %v12971_v38 = vpop.xlane.xlu0 %12970 }
0x5d0f   :  { %v12975_v29 = vmul.f32 0.03125, %v12971_v38 }
0x5d10   :  { %v12978_v56 = vadd.f32 1e-05, %v12976_v0 }
0x5d11   :  { %v12977_v13 = vadd.f32 1e-05, %v12975_v29 }
0x5d12   :  { %15324 = vrsqrt.f32 %v12978_v56 }
0x5d13   :  { %15326 = vrsqrt.f32 %v12977_v13 }
0x5d1c   :  { %v15325_v22 = vpop.eup %15324 }
0x5d1d   :  { %v15327_v55 = vpop.eup %15326  ;;  %v12982_v36 = vmul.f32 %v15325_v22, %v12966_v11 }
0x5d1e   :  { %v12981_v21 = vmul.f32 %v15327_v55, %v12965_v12 }
0x5d1f   :  { %v12990_v15 = vmul.f32 %v13518_v23, %v12982_v36 }
0x5d20   :  { %v12989_v26 = vmul.f32 %v13518_v23, %v12981_v21 }
0x5d21   :  { %v12998_v31 = vadd.f32 %v13519_v28, %v12990_v15 }
0x5d22   :  { %v12997_v40 = vadd.f32 %v13519_v28, %v12989_v26 }
0x5d23   :  { %v13002_v20 = vsel %vm1206_vm1, %v12998_v31, 0.0 }
0x5d24   :  { %13003 = vadd.xlane.f32.xlu1 %v13002_v20  ;;  %v12999_v41 = vsel %vm1206_vm1, %v12997_v40, 0.0 }
0x5d25   :  { %13000 = vadd.xlane.f32.xlu0 %v12999_v41 }
0x5db1   :  { %v13004_v24 = vpop.xlane.xlu1 %13003 }
0x5db2   :  { %v13006_v25 = vmul.f32 0.03125, %v13004_v24  ;;  %v13001_v42 = vpop.xlane.xlu0 %13000 }
0x5db3   :  { %v13005_v43 = vmul.f32 0.03125, %v13001_v42 }
0x5db4   :  { %v13008_v44 = vsub.f32 %v12998_v31, %v13006_v25 }
0x5db5   :  { %v13007_v45 = vsub.f32 %v12997_v40, %v13005_v43 }
0x5db6   :  { %v13010_v46 = vmul.f32 %v13008_v44, %v13008_v44 }
0x5db7   :  { %v13009_v48 = vmul.f32 %v13007_v45, %v13007_v45 }
0x5db8   :  { %v13014_v50 = vsel %vm1206_vm1, %v13010_v46, 0.0 }
0x5db9   :  { %13015 = vadd.xlane.f32.xlu1 %v13014_v50  ;;  %v13011_v51 = vsel %vm1206_vm1, %v13009_v48, 0.0 }
0x5dba   :  { %13012 = vadd.xlane.f32.xlu0 %v13011_v51 }
0x5e46   :  { %v13016_v49 = vpop.xlane.xlu1 %13015 }
0x5e47   :  { %v13018_v35 = vmul.f32 0.03125, %v13016_v49  ;;  %v13013_v37 = vpop.xlane.xlu0 %13012 }
0x5e48   :  { %v13017_v61 = vmul.f32 0.03125, %v13013_v37 }
0x5e49   :  { %v13020_v59 = vadd.f32 1e-05, %v13018_v35 }
0x5e4a   :  { %v13019_v52 = vadd.f32 1e-05, %v13017_v61 }
0x5e4b   :  { %15328 = vrsqrt.f32 %v13020_v59 }
0x5e4c   :  { %15330 = vrsqrt.f32 %v13019_v52 }
0x5e55   :  { %v15329_v30 = vpop.eup %15328 }
0x5e56   :  { %v15331_v1 = vpop.eup %15330  ;;  %v13024_v2 = vmul.f32 %v15329_v30, %v13008_v44 }
0x5e57   :  { %v13023_v3 = vmul.f32 %v15331_v1, %v13007_v45 }
0x5e58   :  { %v13032_v5 = vmul.f32 %v13520_v53, %v13024_v2 }
0x5e59   :  { %v13031_v54 = vmul.f32 %v13520_v53, %v13023_v3 }
0x5e5a   :  { %v13040_v39 = vadd.f32 %v13521_v4, %v13032_v5 }
0x5e5b   :  { %v13039_v6 = vadd.f32 %v13521_v4, %v13031_v54 }
0x5e5d   :  { %14742 = vmatprep.mubr.msk.f32.mxu0 %vm1206_vm1, %v13039_v6 }
0x5e5e   :  { %14743 = vmatmul.mubr.msk.f32.vlgmr.msra.gmra.mrb[142].mxu0 %vm1206_vm1, %v13040_v39 }
0x5f31   :  { %v14744_v7 = vpop.f32.mrb[142].mxu0 }
0x5f32   :  { %v13125_v47 = vadd.f32 %v14744_v7, %v13522_v57  ;;  %v13119_v8 = vpop.f32.mrb[143].mxu0 }
0x5f33   :  { %v13120_v34 = vadd.f32 %v13522_v57, %v13119_v8 }
0x5f34   :  { %13129 = vst.msk [vmem:[#allocation74 + $0x8] sm:$0xff] %vm1118_vm2, %v13125_v47 }
0x5f35   :  { %13128 = vst.msk [vmem:[#allocation74] sm:$0xff] %vm1118_vm2, %v13120_v34 }
0x5f36   :  { %16377 = shalt.err (!%p16374_p2)
}
0x5f37   :  { %s16378_s20 = scalar_lea.hbm %s16965_s14, 256 }
0x5f38   :  { %p16379_p3 = scmp.ne.s32.totalorder %s16965_s14, %s16378_s20  ;;  %p16382_p4 = scmp.lt.u32.totalorder %s16378_s20, %s16965_s14 }
0x5f3a   :  { %p16384_p5 = pnand %p16382_p4, %p16379_p3 }
0x5f3c   :  { %16387 = shalt.err (!%p16384_p5)
}
0x5f3d   :  { %13141 = dma.vmem_to_hbm [thread:$0]  %s13136_s28, 256, %s16965_s14, [#allocation4], %s16516_s11, %s16516_s11, %s16517_s15  }
0x5f3e   :  { %16436 = dma.done.wait [#allocation4], 256  }
0x5f3f   :  { %16437 = vsyncadd [#allocation4], 4294967040 }
0x5f40   :  { %13145 = vsyncpa [#allocation3], 1 }
0x5f41   :  { %13146 = vsyncpa [#allocation6], 1 }
0x5f42   :  { %13147 = vsyncpa [#allocation9], 1 }
0x5f43   :  { %13148 = vsyncpa [#allocation12], 1 }
0x5f44   :  { %13149 = vsyncpa [#allocation15], 1 }
0x5f45   :  { %13150 = vsyncpa [#allocation18], 1 }
0x5f46   :  { %13151 = vsyncpa [#allocation21], 1 }
0x5f47   :  { %13152 = vsyncpa [#allocation24], 1 }
0x5f48   :  { %13153 = vsyncpa [#allocation27], 1 }
0x5f49   :  { %13154 = vsyncpa [#allocation30], 1 }
0x5f4a   :  { %13155 = vsyncpa [#allocation33], 1 }
0x5f4b   :  { %13156 = vsyncpa [#allocation36], 1 }
0x5f4c   :  { %13157 = vsyncpa [#allocation39], 1 }
0x5f4d   :  { %13158 = vsyncpa [#allocation42], 1 }
0x5f4e   :  { %13159 = vsyncpa [#allocation45], 1 }
0x5f4f   :  { %13160 = vsyncpa [#allocation48], 1 }
0x5f50   :  { %13161 = vsyncpa [#allocation51], 1 }
0x5f51   :  { %13162 = vsyncpa [#allocation54], 1 }
0x5f52   :  { %13163 = vsyncpa [#allocation57], 1 }
0x5f53   :  { %13164 = vsyncpa [#allocation60], 1 }
0x5f54   :  { %13165 = vsyncpa [#allocation63], 1 }
0x5f55   :  { %13166 = vsyncpa [#allocation66], 1 }
0x5f56   :  { %13167 = vsyncpa [#allocation69], 1 }
0x5f57   :  { %13168 = vsyncpa [#allocation72], 1 }
0x5f58   :  { %13169 = vsyncpa [#allocation4], 1 }

</bundles_post_ra>
